<compile_context>
chip_gen: v7x
topology: tpu7x:2x2x1
jax: 0.10.0
libtpu: 0.0.40
codegen_flags: <defaults>
</compile_context>

<pallas_src>
import math

import numpy as np
import jax
import jax.numpy as jnp
from jax import lax
from jax.experimental import pallas as pl
from jax.experimental.pallas import tpu as pltpu

# ---- module hyper-parameters (small but consistent with the nn.Module) -------
DIM_STATE = 12
DIM_ACTION = 4
INPUT_SIZE = DIM_STATE + DIM_ACTION          # state+action concat
HIDDEN_SIZES = (32, 32)                      # hidden_sizes
H0, H1 = HIDDEN_SIZES
EMB = 64                                     # embedding_size
NUM_QUANTILES = 32                           # num_quantiles (K=None path -> T = Q)
BASELINE_HIDDEN = 256                        # baseline_net hidden width


def _ln(x, g, b, eps=1e-5):
    """LayerNorm over last dim (matches nn.LayerNorm: biased var, eps=1e-5)."""
    mu = jnp.mean(x, axis=-1, keepdims=True)
    var = jnp.mean(jnp.square(x - mu), axis=-1, keepdims=True)
    return (x - mu) * lax.rsqrt(var + eps) * g + b


def _sigmoid_kernel(x):
    # EUP exp + EUP approx reciprocal; avoids the f32 VALU divide.
    return pl.reciprocal(1.0 + jnp.exp(-x), approx=True)


def _quantile_dueling_kernel(
    sa_ref, tau_ref, kpi_ref, tri_ref,
    w0_ref, b0_ref, g0_ref, be0_ref,          # base_fc: Linear + LN (+ReLU)
    wt_ref, bt_ref, gt_ref, bet_ref,          # tau_fc : Linear + LN (+Sigmoid)
    wm_ref, bm_ref, gm_ref, bem_ref,          # merge_fc: Linear + LN (+ReLU)
    wl_ref, bl_ref,                           # last_fc: Linear (+ReLU), weight as (1, H1) row
    wb1_ref, bb1_ref, gb1_ref, beb1_ref,      # baseline_net layer 1 + LN (+ReLU)
    wb2_ref, bb2_ref,                         # baseline_net layer 2, weight as (1, 256) row
    out_ref,
):
    N, Q = out_ref.shape
    NQ = N * Q
    H0_ = w0_ref.shape[1]
    H1_ = wm_ref.shape[1]

    sa = sa_ref[...]                                            # (N, IN)

    # ---- base_fc: Linear -> LayerNorm -> ReLU ------------------------------
    hs = jnp.dot(sa, w0_ref[...], preferred_element_type=jnp.float32) + b0_ref[...]
    hs = jnp.maximum(_ln(hs, g0_ref[...], be0_ref[...]), 0.0)   # (N, H0)

    # ---- cosine quantile embedding: cos(tau * k * pi), k*pi precomputed ----
    x = jnp.cos(tau_ref[...] * kpi_ref[...])                    # (NQ,1)*(1,E) -> (NQ, E)

    # ---- tau_fc: Linear -> LayerNorm -> Sigmoid ----------------------------
    xt = jnp.dot(x, wt_ref[...], preferred_element_type=jnp.float32) + bt_ref[...]
    xt = _sigmoid_kernel(_ln(xt, gt_ref[...], bet_ref[...]))    # (NQ, H0)

    # ---- broadcast hs over quantiles (sublane broadcast, no MXU pass) ------
    h = (xt.reshape(N, Q, H0_) * hs[:, None, :]).reshape(NQ, H0_)   # torch.mul(x, hs.unsqueeze(-2))

    # ---- merge_fc: Linear -> LayerNorm -> ReLU -----------------------------
    h = jnp.dot(h, wm_ref[...], preferred_element_type=jnp.float32) + bm_ref[...]
    h = jnp.maximum(_ln(h, gm_ref[...], bem_ref[...]), 0.0)     # (NQ, H1)

    # ---- last_fc: Linear -> ReLU, as broadcast-mul + lane reduce -> (N, Q) --
    z = jnp.sum((h * wl_ref[...]).reshape(N, Q, H1_), axis=-1)  # (N, Q), quantiles on lanes
    out2 = jnp.maximum(z + bl_ref[...], 0.0)                    # (N, Q)

    # ---- non-crossing cumulative sum: (N,Q) @ (Q,Q) upper-triangular -------
    # tri already includes the 1/(num_quantiles*10) scale (fixed NUM_QUANTILES).
    noncross = jnp.dot(out2, tri_ref[...], preferred_element_type=jnp.float32)

    # ---- baseline_net: Linear -> LN -> ReLU -> Linear ----------------------
    vb = jnp.dot(sa, wb1_ref[...], preferred_element_type=jnp.float32) + bb1_ref[...]
    vb = jnp.maximum(_ln(vb, gb1_ref[...], beb1_ref[...]), 0.0)             # (N, 256)
    vb = jnp.sum(vb * wb2_ref[...], axis=-1, keepdims=True) + bb2_ref[...]  # (N, 1)

    # ---- dueling add: (N,1) broadcasts over lanes for free -----------------
    out_ref[...] = noncross + vb


def init_params(key):
    """Deterministic PyTorch-style init: Linear ~ U(-1/sqrt(fan_in), ..), LN = (1, 0)."""
    ks = jax.random.split(key, 6)

    def linear(k, fan_in, fan_out):
        k1, k2 = jax.random.split(k)
        bnd = 1.0 / math.sqrt(fan_in)
        w = jax.random.uniform(k1, (fan_in, fan_out), jnp.float32, -bnd, bnd)
        b = jax.random.uniform(k2, (1, fan_out), jnp.float32, -bnd, bnd)
        return w, b

    def linear_row(k, fan_in):
        # Linear(fan_in -> 1): weight stored as a (1, fan_in) row, bias (1, 1).
        k1, k2 = jax.random.split(k)
        bnd = 1.0 / math.sqrt(fan_in)
        w = jax.random.uniform(k1, (1, fan_in), jnp.float32, -bnd, bnd)
        b = jax.random.uniform(k2, (1, 1), jnp.float32, -bnd, bnd)
        return w, b

    def ln_params(width):
        return jnp.ones((1, width), jnp.float32), jnp.zeros((1, width), jnp.float32)

    w0, b0 = linear(ks[0], INPUT_SIZE, H0)
    g0, be0 = ln_params(H0)
    wt, bt = linear(ks[1], EMB, H0)
    gt, bet = ln_params(H0)
    wm, bm = linear(ks[2], H0, H1)
    gm, bem = ln_params(H1)
    wl, bl = linear_row(ks[3], H1)
    wb1, bb1 = linear(ks[4], INPUT_SIZE, BASELINE_HIDDEN)
    gb1, beb1 = ln_params(BASELINE_HIDDEN)
    wb2, bb2 = linear_row(ks[5], BASELINE_HIDDEN)

    return (w0, b0, g0, be0, wt, bt, gt, bet, wm, bm, gm, bem,
            wl, bl, wb1, bb1, gb1, beb1, wb2, bb2)


@jax.jit
def quantile_dueling_forward(state, action, tau, params):
    N, Q = tau.shape
    sa = jnp.concatenate([state, action], axis=1)               # (N, INPUT_SIZE)
    tau_flat = tau.reshape(N * Q, 1)                            # batch-major flatten

    # Host/trace-time constants (become literals in the compiled program).
    kpi = jnp.asarray(np.arange(1, EMB + 1, dtype=np.float32)[None, :] * np.pi)   # (1, E)
    tri = jnp.asarray(np.triu(np.ones((Q, Q), dtype=np.float32))
                      / (NUM_QUANTILES * 10.0))                                   # (Q, Q)

    n_inputs = 4 + len(params)
    out = pl.pallas_call(
        _quantile_dueling_kernel,
        out_shape=jax.ShapeDtypeStruct((N, Q), jnp.float32),
        in_specs=[pl.BlockSpec(memory_space=pltpu.MemorySpace.VMEM)] * n_inputs,
        out_specs=pl.BlockSpec(memory_space=pltpu.MemorySpace.VMEM),
    )(sa, tau_flat, kpi, tri, *params)
    return out                                                  # (N, Q)


def reference_forward(state, action, tau, params):
    """Pure-JAX reference mirroring the PyTorch forward (3D, un-flattened)."""
    (w0, b0, g0, be0, wt, bt, gt, bet, wm, bm, gm, bem,
     wl, bl, wb1, bb1, gb1, beb1, wb2, bb2) = params
    N, Q = tau.shape
    sa = jnp.concatenate([state, action], axis=1)
    hs = jnp.maximum(_ln(sa @ w0 + b0, g0, be0), 0.0)           # (N, H0)
    const = jnp.arange(1, EMB + 1, dtype=jnp.float32)
    x = jnp.cos(tau[:, :, None] * const * jnp.float32(math.pi)) # (N, Q, E)
    xt = jax.nn.sigmoid(_ln(x @ wt + bt, gt, bet))              # (N, Q, H0)
    h = xt * hs[:, None, :]
    h = jnp.maximum(_ln(h @ wm + bm, gm, bem), 0.0)             # (N, Q, H1)
    out = jnp.maximum(h @ wl[0] + bl[0, 0], 0.0)                # (N, Q)
    noncross = jnp.cumsum(out, axis=1) / NUM_QUANTILES / 10.0
    vb = (jnp.maximum(_ln(sa @ wb1 + bb1, gb1, beb1), 0.0) @ wb2[0] + bb2[0, 0])[:, None]  # (N, 1)
    return noncross + vb


if __name__ == "__main__":
    key = jax.random.PRNGKey(0)
    k_state, k_action, k_tau, k_params = jax.random.split(key, 4)

    N = 8
    state = jax.random.normal(k_state, (N, DIM_STATE), jnp.float32)
    action = jax.random.normal(k_action, (N, DIM_ACTION), jnp.float32)
    tau = jax.random.uniform(k_tau, (N, NUM_QUANTILES), jnp.float32)
    params = init_params(k_params)

    out = quantile_dueling_forward(state, action, tau, params)
    out = jax.block_until_ready(out)

    ref = reference_forward(state, action, tau, params)
    assert out.shape == (N, NUM_QUANTILES)
    assert out.dtype == jnp.float32
    assert float(jnp.max(jnp.abs(out - ref))) < 1e-2

    print("KERNEL_OK")
</pallas_src>

<mosaic_0001>
module attributes {stable_mosaic.version = 11 : i64} {
  func.func @_quantile_dueling_kernel(%arg0: memref<8x16xf32, #tpu.memory_space<vmem>>, %arg1: memref<256x1xf32, #tpu.memory_space<vmem>>, %arg2: memref<1x64xf32, #tpu.memory_space<vmem>>, %arg3: memref<32x32xf32, #tpu.memory_space<vmem>>, %arg4: memref<16x32xf32, #tpu.memory_space<vmem>>, %arg5: memref<1x32xf32, #tpu.memory_space<vmem>>, %arg6: memref<1x32xf32, #tpu.memory_space<vmem>>, %arg7: memref<1x32xf32, #tpu.memory_space<vmem>>, %arg8: memref<64x32xf32, #tpu.memory_space<vmem>>, %arg9: memref<1x32xf32, #tpu.memory_space<vmem>>, %arg10: memref<1x32xf32, #tpu.memory_space<vmem>>, %arg11: memref<1x32xf32, #tpu.memory_space<vmem>>, %arg12: memref<32x32xf32, #tpu.memory_space<vmem>>, %arg13: memref<1x32xf32, #tpu.memory_space<vmem>>, %arg14: memref<1x32xf32, #tpu.memory_space<vmem>>, %arg15: memref<1x32xf32, #tpu.memory_space<vmem>>, %arg16: memref<1x32xf32, #tpu.memory_space<vmem>>, %arg17: memref<1x1xf32, #tpu.memory_space<vmem>>, %arg18: memref<16x256xf32, #tpu.memory_space<vmem>>, %arg19: memref<1x256xf32, #tpu.memory_space<vmem>>, %arg20: memref<1x256xf32, #tpu.memory_space<vmem>>, %arg21: memref<1x256xf32, #tpu.memory_space<vmem>>, %arg22: memref<1x256xf32, #tpu.memory_space<vmem>>, %arg23: memref<1x1xf32, #tpu.memory_space<vmem>>, %arg24: memref<8x32xf32, #tpu.memory_space<vmem>>) attributes {dimension_semantics = [], scalar_prefetch = 0 : i64, scratch_operands = 0 : i64, tpu.core_type = #tpu.core_type<tc>} {
    %c0 = arith.constant 0 : index
    %c0_0 = arith.constant 0 : index
    %0 = vector.load %arg0[%c0, %c0_0] : memref<8x16xf32, #tpu.memory_space<vmem>>, vector<8x16xf32>
    %c0_1 = arith.constant 0 : index
    %c0_2 = arith.constant 0 : index
    %1 = vector.load %arg4[%c0_1, %c0_2] : memref<16x32xf32, #tpu.memory_space<vmem>>, vector<16x32xf32>
    %cst = arith.constant dense<0.000000e+00> : vector<8x32xf32>
    %2 = tpu.matmul %0, %1, %cst {dimension_numbers = #tpu.dot_dimension_numbers<[1], [0], [0], [1], [0, 0, 1, 1], [], []>} : vector<8x16xf32>, vector<16x32xf32>, vector<8x32xf32> -> vector<8x32xf32>
    %c0_3 = arith.constant 0 : index
    %c0_4 = arith.constant 0 : index
    %3 = vector.load %arg5[%c0_3, %c0_4] : memref<1x32xf32, #tpu.memory_space<vmem>>, vector<1x32xf32>
    %4 = vector.broadcast %3 : vector<1x32xf32> to vector<8x32xf32>
    %5 = arith.addf %2, %4 : vector<8x32xf32>
    %c0_5 = arith.constant 0 : index
    %c0_6 = arith.constant 0 : index
    %6 = vector.load %arg6[%c0_5, %c0_6] : memref<1x32xf32, #tpu.memory_space<vmem>>, vector<1x32xf32>
    %c0_7 = arith.constant 0 : index
    %c0_8 = arith.constant 0 : index
    %7 = vector.load %arg7[%c0_7, %c0_8] : memref<1x32xf32, #tpu.memory_space<vmem>>, vector<1x32xf32>
    %cst_9 = arith.constant dense<0.000000e+00> : vector<8xf32>
    %8 = vector.multi_reduction <add>, %5, %cst_9 [1] : vector<8x32xf32> to vector<8xf32>
    %9 = vector.shape_cast %8 : vector<8xf32> to vector<8x1xf32>
    %cst_10 = arith.constant 3.200000e+01 : f32
    %10 = vector.broadcast %cst_10 : f32 to vector<8x1xf32>
    %11 = arith.divf %9, %10 : vector<8x1xf32>
    %12 = vector.broadcast %11 : vector<8x1xf32> to vector<8x32xf32>
    %13 = arith.subf %5, %12 : vector<8x32xf32>
    %14 = arith.mulf %13, %13 : vector<8x32xf32>
    %cst_11 = arith.constant dense<0.000000e+00> : vector<8xf32>
    %15 = vector.multi_reduction <add>, %14, %cst_11 [1] : vector<8x32xf32> to vector<8xf32>
    %16 = vector.shape_cast %15 : vector<8xf32> to vector<8x1xf32>
    %cst_12 = arith.constant 3.200000e+01 : f32
    %17 = vector.broadcast %cst_12 : f32 to vector<8x1xf32>
    %18 = arith.divf %16, %17 : vector<8x1xf32>
    %19 = vector.broadcast %11 : vector<8x1xf32> to vector<8x32xf32>
    %20 = arith.subf %5, %19 : vector<8x32xf32>
    %cst_13 = arith.constant 9.99999974E-6 : f32
    %21 = vector.broadcast %cst_13 : f32 to vector<8x1xf32>
    %22 = arith.addf %18, %21 : vector<8x1xf32>
    %23 = math.rsqrt %22 : vector<8x1xf32>
    %24 = vector.broadcast %23 : vector<8x1xf32> to vector<8x32xf32>
    %25 = arith.mulf %20, %24 : vector<8x32xf32>
    %26 = vector.broadcast %6 : vector<1x32xf32> to vector<8x32xf32>
    %27 = arith.mulf %25, %26 : vector<8x32xf32>
    %28 = vector.broadcast %7 : vector<1x32xf32> to vector<8x32xf32>
    %29 = arith.addf %27, %28 : vector<8x32xf32>
    %cst_14 = arith.constant 0.000000e+00 : f32
    %30 = vector.broadcast %cst_14 : f32 to vector<8x32xf32>
    %31 = arith.maximumf %29, %30 : vector<8x32xf32>
    %c0_15 = arith.constant 0 : index
    %c0_16 = arith.constant 0 : index
    %32 = vector.load %arg1[%c0_15, %c0_16] : memref<256x1xf32, #tpu.memory_space<vmem>>, vector<256x1xf32>
    %c0_17 = arith.constant 0 : index
    %c0_18 = arith.constant 0 : index
    %33 = vector.load %arg2[%c0_17, %c0_18] : memref<1x64xf32, #tpu.memory_space<vmem>>, vector<1x64xf32>
    %34 = vector.broadcast %32 : vector<256x1xf32> to vector<256x64xf32>
    %35 = vector.broadcast %33 : vector<1x64xf32> to vector<256x64xf32>
    %36 = arith.mulf %34, %35 : vector<256x64xf32>
    %37 = math.cos %36 : vector<256x64xf32>
    %c0_19 = arith.constant 0 : index
    %c0_20 = arith.constant 0 : index
    %38 = vector.load %arg8[%c0_19, %c0_20] : memref<64x32xf32, #tpu.memory_space<vmem>>, vector<64x32xf32>
    %cst_21 = arith.constant dense<0.000000e+00> : vector<256x32xf32>
    %39 = tpu.matmul %37, %38, %cst_21 {dimension_numbers = #tpu.dot_dimension_numbers<[1], [0], [0], [1], [0, 0, 1, 1], [], []>} : vector<256x64xf32>, vector<64x32xf32>, vector<256x32xf32> -> vector<256x32xf32>
    %c0_22 = arith.constant 0 : index
    %c0_23 = arith.constant 0 : index
    %40 = vector.load %arg9[%c0_22, %c0_23] : memref<1x32xf32, #tpu.memory_space<vmem>>, vector<1x32xf32>
    %41 = vector.broadcast %40 : vector<1x32xf32> to vector<256x32xf32>
    %42 = arith.addf %39, %41 : vector<256x32xf32>
    %c0_24 = arith.constant 0 : index
    %c0_25 = arith.constant 0 : index
    %43 = vector.load %arg10[%c0_24, %c0_25] : memref<1x32xf32, #tpu.memory_space<vmem>>, vector<1x32xf32>
    %c0_26 = arith.constant 0 : index
    %c0_27 = arith.constant 0 : index
    %44 = vector.load %arg11[%c0_26, %c0_27] : memref<1x32xf32, #tpu.memory_space<vmem>>, vector<1x32xf32>
    %cst_28 = arith.constant dense<0.000000e+00> : vector<256xf32>
    %45 = vector.multi_reduction <add>, %42, %cst_28 [1] : vector<256x32xf32> to vector<256xf32>
    %46 = vector.shape_cast %45 : vector<256xf32> to vector<256x1xf32>
    %cst_29 = arith.constant 3.200000e+01 : f32
    %47 = vector.broadcast %cst_29 : f32 to vector<256x1xf32>
    %48 = arith.divf %46, %47 : vector<256x1xf32>
    %49 = vector.broadcast %48 : vector<256x1xf32> to vector<256x32xf32>
    %50 = arith.subf %42, %49 : vector<256x32xf32>
    %51 = arith.mulf %50, %50 : vector<256x32xf32>
    %cst_30 = arith.constant dense<0.000000e+00> : vector<256xf32>
    %52 = vector.multi_reduction <add>, %51, %cst_30 [1] : vector<256x32xf32> to vector<256xf32>
    %53 = vector.shape_cast %52 : vector<256xf32> to vector<256x1xf32>
    %cst_31 = arith.constant 3.200000e+01 : f32
    %54 = vector.broadcast %cst_31 : f32 to vector<256x1xf32>
    %55 = arith.divf %53, %54 : vector<256x1xf32>
    %56 = vector.broadcast %48 : vector<256x1xf32> to vector<256x32xf32>
    %57 = arith.subf %42, %56 : vector<256x32xf32>
    %cst_32 = arith.constant 9.99999974E-6 : f32
    %58 = vector.broadcast %cst_32 : f32 to vector<256x1xf32>
    %59 = arith.addf %55, %58 : vector<256x1xf32>
    %60 = math.rsqrt %59 : vector<256x1xf32>
    %61 = vector.broadcast %60 : vector<256x1xf32> to vector<256x32xf32>
    %62 = arith.mulf %57, %61 : vector<256x32xf32>
    %63 = vector.broadcast %43 : vector<1x32xf32> to vector<256x32xf32>
    %64 = arith.mulf %62, %63 : vector<256x32xf32>
    %65 = vector.broadcast %44 : vector<1x32xf32> to vector<256x32xf32>
    %66 = arith.addf %64, %65 : vector<256x32xf32>
    %cst_33 = arith.constant 0.000000e+00 : f32
    %67 = vector.broadcast %cst_33 : f32 to vector<256x32xf32>
    %68 = arith.subf %67, %66 : vector<256x32xf32>
    %69 = math.exp %68 : vector<256x32xf32>
    %cst_34 = arith.constant 1.000000e+00 : f32
    %70 = vector.broadcast %cst_34 : f32 to vector<256x32xf32>
    %71 = arith.addf %70, %69 : vector<256x32xf32>
    %72 = tpu.reciprocal %71 {approx = true} : vector<256x32xf32> -> vector<256x32xf32>
    %73 = vector.shape_cast %72 : vector<256x32xf32> to vector<8x32x32xf32>
    %74 = vector.shape_cast %31 : vector<8x32xf32> to vector<8x1x32xf32>
    %75 = vector.broadcast %74 : vector<8x1x32xf32> to vector<8x32x32xf32>
    %76 = arith.mulf %73, %75 : vector<8x32x32xf32>
    %77 = vector.shape_cast %76 : vector<8x32x32xf32> to vector<256x32xf32>
    %c0_35 = arith.constant 0 : index
    %c0_36 = arith.constant 0 : index
    %78 = vector.load %arg12[%c0_35, %c0_36] : memref<32x32xf32, #tpu.memory_space<vmem>>, vector<32x32xf32>
    %cst_37 = arith.constant dense<0.000000e+00> : vector<256x32xf32>
    %79 = tpu.matmul %77, %78, %cst_37 {dimension_numbers = #tpu.dot_dimension_numbers<[1], [0], [0], [1], [0, 0, 1, 1], [], []>} : vector<256x32xf32>, vector<32x32xf32>, vector<256x32xf32> -> vector<256x32xf32>
    %c0_38 = arith.constant 0 : index
    %c0_39 = arith.constant 0 : index
    %80 = vector.load %arg13[%c0_38, %c0_39] : memref<1x32xf32, #tpu.memory_space<vmem>>, vector<1x32xf32>
    %81 = vector.broadcast %80 : vector<1x32xf32> to vector<256x32xf32>
    %82 = arith.addf %79, %81 : vector<256x32xf32>
    %c0_40 = arith.constant 0 : index
    %c0_41 = arith.constant 0 : index
    %83 = vector.load %arg14[%c0_40, %c0_41] : memref<1x32xf32, #tpu.memory_space<vmem>>, vector<1x32xf32>
    %c0_42 = arith.constant 0 : index
    %c0_43 = arith.constant 0 : index
    %84 = vector.load %arg15[%c0_42, %c0_43] : memref<1x32xf32, #tpu.memory_space<vmem>>, vector<1x32xf32>
    %cst_44 = arith.constant dense<0.000000e+00> : vector<256xf32>
    %85 = vector.multi_reduction <add>, %82, %cst_44 [1] : vector<256x32xf32> to vector<256xf32>
    %86 = vector.shape_cast %85 : vector<256xf32> to vector<256x1xf32>
    %cst_45 = arith.constant 3.200000e+01 : f32
    %87 = vector.broadcast %cst_45 : f32 to vector<256x1xf32>
    %88 = arith.divf %86, %87 : vector<256x1xf32>
    %89 = vector.broadcast %88 : vector<256x1xf32> to vector<256x32xf32>
    %90 = arith.subf %82, %89 : vector<256x32xf32>
    %91 = arith.mulf %90, %90 : vector<256x32xf32>
    %cst_46 = arith.constant dense<0.000000e+00> : vector<256xf32>
    %92 = vector.multi_reduction <add>, %91, %cst_46 [1] : vector<256x32xf32> to vector<256xf32>
    %93 = vector.shape_cast %92 : vector<256xf32> to vector<256x1xf32>
    %cst_47 = arith.constant 3.200000e+01 : f32
    %94 = vector.broadcast %cst_47 : f32 to vector<256x1xf32>
    %95 = arith.divf %93, %94 : vector<256x1xf32>
    %96 = vector.broadcast %88 : vector<256x1xf32> to vector<256x32xf32>
    %97 = arith.subf %82, %96 : vector<256x32xf32>
    %cst_48 = arith.constant 9.99999974E-6 : f32
    %98 = vector.broadcast %cst_48 : f32 to vector<256x1xf32>
    %99 = arith.addf %95, %98 : vector<256x1xf32>
    %100 = math.rsqrt %99 : vector<256x1xf32>
    %101 = vector.broadcast %100 : vector<256x1xf32> to vector<256x32xf32>
    %102 = arith.mulf %97, %101 : vector<256x32xf32>
    %103 = vector.broadcast %83 : vector<1x32xf32> to vector<256x32xf32>
    %104 = arith.mulf %102, %103 : vector<256x32xf32>
    %105 = vector.broadcast %84 : vector<1x32xf32> to vector<256x32xf32>
    %106 = arith.addf %104, %105 : vector<256x32xf32>
    %cst_49 = arith.constant 0.000000e+00 : f32
    %107 = vector.broadcast %cst_49 : f32 to vector<256x32xf32>
    %108 = arith.maximumf %106, %107 : vector<256x32xf32>
    %c0_50 = arith.constant 0 : index
    %c0_51 = arith.constant 0 : index
    %109 = vector.load %arg16[%c0_50, %c0_51] : memref<1x32xf32, #tpu.memory_space<vmem>>, vector<1x32xf32>
    %110 = vector.broadcast %109 : vector<1x32xf32> to vector<256x32xf32>
    %111 = arith.mulf %108, %110 : vector<256x32xf32>
    %112 = vector.shape_cast %111 : vector<256x32xf32> to vector<8x32x32xf32>
    %cst_52 = arith.constant dense<0.000000e+00> : vector<8x32xf32>
    %113 = vector.multi_reduction <add>, %112, %cst_52 [2] : vector<8x32x32xf32> to vector<8x32xf32>
    %c0_53 = arith.constant 0 : index
    %c0_54 = arith.constant 0 : index
    %114 = vector.load %arg17[%c0_53, %c0_54] : memref<1x1xf32, #tpu.memory_space<vmem>>, vector<1x1xf32>
    %115 = vector.broadcast %114 : vector<1x1xf32> to vector<8x32xf32>
    %116 = arith.addf %113, %115 : vector<8x32xf32>
    %cst_55 = arith.constant 0.000000e+00 : f32
    %117 = vector.broadcast %cst_55 : f32 to vector<8x32xf32>
    %118 = arith.maximumf %116, %117 : vector<8x32xf32>
    %c0_56 = arith.constant 0 : index
    %c0_57 = arith.constant 0 : index
    %119 = vector.load %arg3[%c0_56, %c0_57] : memref<32x32xf32, #tpu.memory_space<vmem>>, vector<32x32xf32>
    %cst_58 = arith.constant dense<0.000000e+00> : vector<8x32xf32>
    %120 = tpu.matmul %118, %119, %cst_58 {dimension_numbers = #tpu.dot_dimension_numbers<[1], [0], [0], [1], [0, 0, 1, 1], [], []>} : vector<8x32xf32>, vector<32x32xf32>, vector<8x32xf32> -> vector<8x32xf32>
    %c0_59 = arith.constant 0 : index
    %c0_60 = arith.constant 0 : index
    %121 = vector.load %arg18[%c0_59, %c0_60] : memref<16x256xf32, #tpu.memory_space<vmem>>, vector<16x256xf32>
    %cst_61 = arith.constant dense<0.000000e+00> : vector<8x256xf32>
    %122 = tpu.matmul %0, %121, %cst_61 {dimension_numbers = #tpu.dot_dimension_numbers<[1], [0], [0], [1], [0, 0, 1, 1], [], []>} : vector<8x16xf32>, vector<16x256xf32>, vector<8x256xf32> -> vector<8x256xf32>
    %c0_62 = arith.constant 0 : index
    %c0_63 = arith.constant 0 : index
    %123 = vector.load %arg19[%c0_62, %c0_63] : memref<1x256xf32, #tpu.memory_space<vmem>>, vector<1x256xf32>
    %124 = vector.broadcast %123 : vector<1x256xf32> to vector<8x256xf32>
    %125 = arith.addf %122, %124 : vector<8x256xf32>
    %c0_64 = arith.constant 0 : index
    %c0_65 = arith.constant 0 : index
    %126 = vector.load %arg20[%c0_64, %c0_65] : memref<1x256xf32, #tpu.memory_space<vmem>>, vector<1x256xf32>
    %c0_66 = arith.constant 0 : index
    %c0_67 = arith.constant 0 : index
    %127 = vector.load %arg21[%c0_66, %c0_67] : memref<1x256xf32, #tpu.memory_space<vmem>>, vector<1x256xf32>
    %cst_68 = arith.constant dense<0.000000e+00> : vector<8xf32>
    %128 = vector.multi_reduction <add>, %125, %cst_68 [1] : vector<8x256xf32> to vector<8xf32>
    %129 = vector.shape_cast %128 : vector<8xf32> to vector<8x1xf32>
    %cst_69 = arith.constant 2.560000e+02 : f32
    %130 = vector.broadcast %cst_69 : f32 to vector<8x1xf32>
    %131 = arith.divf %129, %130 : vector<8x1xf32>
    %132 = vector.broadcast %131 : vector<8x1xf32> to vector<8x256xf32>
    %133 = arith.subf %125, %132 : vector<8x256xf32>
    %134 = arith.mulf %133, %133 : vector<8x256xf32>
    %cst_70 = arith.constant dense<0.000000e+00> : vector<8xf32>
    %135 = vector.multi_reduction <add>, %134, %cst_70 [1] : vector<8x256xf32> to vector<8xf32>
    %136 = vector.shape_cast %135 : vector<8xf32> to vector<8x1xf32>
    %cst_71 = arith.constant 2.560000e+02 : f32
    %137 = vector.broadcast %cst_71 : f32 to vector<8x1xf32>
    %138 = arith.divf %136, %137 : vector<8x1xf32>
    %139 = vector.broadcast %131 : vector<8x1xf32> to vector<8x256xf32>
    %140 = arith.subf %125, %139 : vector<8x256xf32>
    %cst_72 = arith.constant 9.99999974E-6 : f32
    %141 = vector.broadcast %cst_72 : f32 to vector<8x1xf32>
    %142 = arith.addf %138, %141 : vector<8x1xf32>
    %143 = math.rsqrt %142 : vector<8x1xf32>
    %144 = vector.broadcast %143 : vector<8x1xf32> to vector<8x256xf32>
    %145 = arith.mulf %140, %144 : vector<8x256xf32>
    %146 = vector.broadcast %126 : vector<1x256xf32> to vector<8x256xf32>
    %147 = arith.mulf %145, %146 : vector<8x256xf32>
    %148 = vector.broadcast %127 : vector<1x256xf32> to vector<8x256xf32>
    %149 = arith.addf %147, %148 : vector<8x256xf32>
    %cst_73 = arith.constant 0.000000e+00 : f32
    %150 = vector.broadcast %cst_73 : f32 to vector<8x256xf32>
    %151 = arith.maximumf %149, %150 : vector<8x256xf32>
    %c0_74 = arith.constant 0 : index
    %c0_75 = arith.constant 0 : index
    %152 = vector.load %arg22[%c0_74, %c0_75] : memref<1x256xf32, #tpu.memory_space<vmem>>, vector<1x256xf32>
    %153 = vector.broadcast %152 : vector<1x256xf32> to vector<8x256xf32>
    %154 = arith.mulf %151, %153 : vector<8x256xf32>
    %cst_76 = arith.constant dense<0.000000e+00> : vector<8xf32>
    %155 = vector.multi_reduction <add>, %154, %cst_76 [1] : vector<8x256xf32> to vector<8xf32>
    %156 = vector.shape_cast %155 : vector<8xf32> to vector<8x1xf32>
    %c0_77 = arith.constant 0 : index
    %c0_78 = arith.constant 0 : index
    %157 = vector.load %arg23[%c0_77, %c0_78] : memref<1x1xf32, #tpu.memory_space<vmem>>, vector<1x1xf32>
    %158 = vector.broadcast %157 : vector<1x1xf32> to vector<8x1xf32>
    %159 = arith.addf %156, %158 : vector<8x1xf32>
    %160 = vector.broadcast %159 : vector<8x1xf32> to vector<8x32xf32>
    %161 = arith.addf %120, %160 : vector<8x32xf32>
    %c0_79 = arith.constant 0 : index
    %c0_80 = arith.constant 0 : index
    %162 = vector.load %arg24[%c0_79, %c0_80] : memref<8x32xf32, #tpu.memory_space<vmem>>, vector<8x32xf32>
    tpu.vector_store %arg24[%c0_79, %c0_80], %161 {strides = array<i32>} : memref<8x32xf32, #tpu.memory_space<vmem>>, vector<8x32xf32>,
    return
  }
}

</mosaic_0001>

<bundles_post_ra>
// kernel: quantile_dueling_forward.1
= control target key start
LH: loop header
LB: loop body
LE: loop exit
PB: predicated region body
PF: predicated region fallthrough
CT: control target
= control target key end

     0   :  { %s12072_s0 = inlined_call_operand.vmem [shape: f32[8,16], index: 0, kind: input, shape index: {}]   ;;  %s12073_s1 = inlined_call_operand.vmem [shape: f32[256,1], index: 1, kind: input, shape index: {}]   ;;  %s12074_s2 = inlined_call_operand.vmem [shape: f32[1,64], index: 2, kind: input, shape index: {}]   ;;  %s12075_s3 = inlined_call_operand.vmem [shape: f32[32,32], index: 3, kind: input, shape index: {}]   ;;  %s12076_s4 = inlined_call_operand.vmem [shape: f32[16,32], index: 4, kind: input, shape index: {}]   ;;  %s12077_s5 = inlined_call_operand.vmem [shape: f32[1,32], index: 5, kind: input, shape index: {}]   ;;  %s12078_s6 = inlined_call_operand.vmem [shape: f32[1,32], index: 6, kind: input, shape index: {}]   ;;  %s12079_s7 = inlined_call_operand.vmem [shape: f32[1,32], index: 7, kind: input, shape index: {}]   ;;  %s12080_s8 = inlined_call_operand.vmem [shape: f32[64,32], index: 8, kind: input, shape index: {}]   ;;  %s12081_s9 = inlined_call_operand.vmem [shape: f32[1,32], index: 9, kind: input, shape index: {}]   ;;  %s12082_s10 = inlined_call_operand.vmem [shape: f32[1,32], index: 10, kind: input, shape index: {}]   ;;  %s12083_s11 = inlined_call_operand.vmem [shape: f32[1,32], index: 11, kind: input, shape index: {}]   ;;  %s12084_s12 = inlined_call_operand.vmem [shape: f32[32,32], index: 12, kind: input, shape index: {}]   ;;  %s12085_s13 = inlined_call_operand.vmem [shape: f32[1,32], index: 13, kind: input, shape index: {}]   ;;  %s12086_s14 = inlined_call_operand.vmem [shape: f32[1,32], index: 14, kind: input, shape index: {}]   ;;  %s12087_s15 = inlined_call_operand.vmem [shape: f32[1,32], index: 15, kind: input, shape index: {}]   ;;  %s12088_s16 = inlined_call_operand.vmem [shape: f32[1,32], index: 16, kind: input, shape index: {}]   ;;  %s12089_s17 = inlined_call_operand.<no memory space> [shape: f32[1,1], index: 17, kind: input, shape index: {}]   ;;  %s12090_s18 = inlined_call_operand.vmem [shape: f32[16,256], index: 18, kind: input, shape index: {}]   ;;  %s12091_s19 = inlined_call_operand.vmem [shape: f32[1,256], index: 19, kind: input, shape index: {}]   ;;  %s12092_s20 = inlined_call_operand.vmem [shape: f32[1,256], index: 20, kind: input, shape index: {}]   ;;  %s12093_s21 = inlined_call_operand.vmem [shape: f32[1,256], index: 21, kind: input, shape index: {}]   ;;  %s12094_s22 = inlined_call_operand.vmem [shape: f32[1,256], index: 22, kind: input, shape index: {}]   ;;  %s12095_s24 = inlined_call_operand.hbm [shape: f32[8,32], index: 24, kind: output, shape index: {}]   ;;  %s12096_s23 = inlined_call_operand.<no memory space> [shape: f32[1,1], index: 23, kind: input, shape index: {}]  }
   0x1   :  { %12263 = sst [smem:[#allocation79_spill]] %s12072_s0  ;;  %v29_v0 = vstv %s12089_s17  ;;  %v31_v1 = vstv %s12096_s23 }
   0x2   :  { %12264 = sst [smem:[#allocation80_spill]] %s12073_s1  ;;  %30 = vst [vmem:[#allocation2] sm:$0x1] %v29_v0  ;;  %32 = vst [vmem:[#allocation3] sm:$0x1] %v31_v1 }
   0x3   :  { %12265 = sst [smem:[#allocation81_spill]] %s12074_s2 }
   0x4   :  { %12266 = sst [smem:[#allocation82_spill]] %s12075_s3 }
   0x5   :  { %12267 = sst [smem:[#allocation83_spill]] %s12076_s4 }
   0x6   :  { %12268 = sst [smem:[#allocation84_spill]] %s12077_s5 }
   0x7   :  { %12269 = sst [smem:[#allocation85_spill]] %s12078_s6 }
   0x8   :  { %12270 = sst [smem:[#allocation86_spill]] %s12079_s7 }
   0x9   :  { %12271 = sst [smem:[#allocation87_spill]] %s12080_s8 }
   0xa   :  { %s12272_s29 = sld [smem:[#allocation80_spill]]  ;;  %v7393_v4 = vmov 0  }
   0xb   :  { %6974 = vset.pattern.permute.xlu1 %v7393_v4  ;;  %6973 = vset.pattern.permute.xlu0 %v7393_v4 }
  0x10   :  { %v200_v2 = vld [vmem:[%s12272_s29 + $0x10] sm:$0xff]  ;;  %v198_v3 = vld [vmem:[%s12272_s29] sm:$0xff]  ;;  %v201_v5 = vld [vmem:[%s12272_s29 + $0x18] sm:$0xff] }
  0x11   :  { %243 = vperm.xlu1 %6974, %v200_v2   ;;  %233 = vperm.xlu0 %6973, %v198_v3   ;;  %v199_v6 = vld [vmem:[%s12272_s29 + $0x8] sm:$0xff]  ;;  %v202_v8 = vld [vmem:[%s12272_s29 + $0x20] sm:$0xff]  ;;  %v205_v9 = vld [vmem:[%s12272_s29 + $0x38] sm:$0xff] }
  0x12   :  { %v203_v7 = vld [vmem:[%s12272_s29 + $0x28] sm:$0xff]  ;;  %v204_v10 = vld [vmem:[%s12272_s29 + $0x30] sm:$0xff] }
  0x15   :  { %248 = vperm.xlu1 %6974, %v201_v5   ;;  %238 = vperm.xlu0 %6973, %v199_v6  }
  0x19   :  { %258 = vperm.xlu1 %6974, %v203_v7   ;;  %253 = vperm.xlu0 %6973, %v202_v8  }
  0x1a   :  { %33 = vsyncpa [#allocation5], 0  ;;  %v207_v11 = vld [vmem:[%s12272_s29 + $0x48] sm:$0xff]  ;;  %v206_v12 = vld [vmem:[%s12272_s29 + $0x40] sm:$0xff]  ;;  %s12273_s0 = sld [smem:[#allocation81_spill]]  ;;  %s12384_s4 = sld [smem:[#allocation87_spill]] }
  0x1b   :  { %v209_v13 = vld [vmem:[%s12272_s29 + $0x58] sm:$0xff]  ;;  %v208_v14 = vld [vmem:[%s12272_s29 + $0x50] sm:$0xff]  ;;  %v211_v15 = vld [vmem:[%s12272_s29 + $0x68] sm:$0xff]  ;;  %v12117_v59 = vmov 683565275   ;;  %s12463_s28 = sld [smem:[#allocation79_spill]] }
  0x1c   :  { %v210_v16 = vld [vmem:[%s12272_s29 + $0x60] sm:$0xff]  ;;  %v213_v17 = vld [vmem:[%s12272_s29 + $0x78] sm:$0xff]  ;;  %v212_v18 = vld [vmem:[%s12272_s29 + $0x70] sm:$0xff]  ;;  %v12114_v61 = vmov 2475754826   ;;  %s12582_s7 = sld [smem:[#allocation85_spill]] }
  0x1d   :  { %268 = vperm.xlu1 %6974, %v205_v9   ;;  %263 = vperm.xlu0 %6973, %v204_v10   ;;  %v215_v19 = vld [vmem:[%s12272_s29 + $0x88] sm:$0xff]  ;;  %v214_v20 = vld [vmem:[%s12272_s29 + $0x80] sm:$0xff]  ;;  %v217_v21 = vld [vmem:[%s12272_s29 + $0x98] sm:$0xff]  ;;  %v12110_v63 = vmov 2131351028   ;;  %s12583_s23 = sld [smem:[#allocation86_spill]] }
  0x1e   :  { %v216_v22 = vld [vmem:[%s12272_s29 + $0x90] sm:$0xff]  ;;  %v219_v23 = vld [vmem:[%s12272_s29 + $0xa8] sm:$0xff]  ;;  %v218_v24 = vld [vmem:[%s12272_s29 + $0xa0] sm:$0xff]  ;;  %v12112_v1 = vmov 2102212464  }
  0x1f   :  { %v221_v25 = vld [vmem:[%s12272_s29 + $0xb8] sm:$0xff]  ;;  %v220_v26 = vld [vmem:[%s12272_s29 + $0xb0] sm:$0xff]  ;;  %v223_v27 = vld [vmem:[%s12272_s29 + $0xc8] sm:$0xff]  ;;  %v12129_v3 = vmov 920167782  }
  0x20   :  { %v222_v28 = vld [vmem:[%s12272_s29 + $0xc0] sm:$0xff]  ;;  %v225_v29 = vld [vmem:[%s12272_s29 + $0xd8] sm:$0xff]  ;;  %v224_v30 = vld [vmem:[%s12272_s29 + $0xd0] sm:$0xff] }
  0x21   :  { %278 = vperm.xlu1 %6974, %v207_v11   ;;  %273 = vperm.xlu0 %6973, %v206_v12   ;;  %v227_v31 = vld [vmem:[%s12272_s29 + $0xe8] sm:$0xff]  ;;  %v226_v32 = vld [vmem:[%s12272_s29 + $0xe0] sm:$0xff]  ;;  %v229_v33 = vld [vmem:[%s12272_s29 + $0xf8] sm:$0xff]  ;;  %v12127_v12 = vmov 1326507024  }
  0x22   :  { %v228_v34 = vld [vmem:[%s12272_s29 + $0xf0] sm:$0xff]  ;;  %v7635_v35 = vld [vmem:[%s12273_s0] ss:$0 sm:$0xff]  ;;  %s12581_s29 = sld [smem:[#allocation84_spill]] }
  0x25   :  { %288 = vperm.xlu1 %6974, %v209_v13   ;;  %283 = vperm.xlu0 %6973, %v208_v14  }
  0x29   :  { %298 = vperm.xlu1 %6974, %v211_v15   ;;  %293 = vperm.xlu0 %6973, %v210_v16  }
  0x2d   :  { %308 = vperm.xlu1 %6974, %v213_v17   ;;  %303 = vperm.xlu0 %6973, %v212_v18  }
  0x31   :  { %318 = vperm.xlu1 %6974, %v215_v19   ;;  %313 = vperm.xlu0 %6973, %v214_v20  }
  0x35   :  { %328 = vperm.xlu1 %6974, %v217_v21   ;;  %323 = vperm.xlu0 %6973, %v216_v22  }
  0x39   :  { %338 = vperm.xlu1 %6974, %v219_v23   ;;  %333 = vperm.xlu0 %6973, %v218_v24  }
  0x3d   :  { %348 = vperm.xlu1 %6974, %v221_v25   ;;  %343 = vperm.xlu0 %6973, %v220_v26  }
  0x41   :  { %358 = vperm.xlu1 %6974, %v223_v27   ;;  %353 = vperm.xlu0 %6973, %v222_v28  }
  0x45   :  { %368 = vperm.xlu1 %6974, %v225_v29   ;;  %363 = vperm.xlu0 %6973, %v224_v30  }
  0x49   :  { %378 = vperm.xlu1 %6974, %v227_v31   ;;  %373 = vperm.xlu0 %6973, %v226_v32  }
  0x4d   :  { %388 = vperm.xlu1 %6974, %v229_v33   ;;  %383 = vperm.xlu0 %6973, %v228_v34  }
  0x90   :  { %v244_v36 = vpop.permute.xlu1 %243  ;;  %v7640_v38 = vpop.permute.xlu0 %233 }
  0x91   :  { %v7638_v37 = vmul.f32 %v7635_v35, %v244_v36 }
  0x93   :  { %12274 = vst [vmem:[#allocation7_spill] sm:$0xff] %v7638_v37  ;;  %v638_v39 = vand.u32 2139095040, %v7638_v37  ;;  %v12107_v43 = vand.u32 2147483647, %v7638_v37 }
  0x94   :  { %v249_v40 = vpop.permute.xlu1 %248  ;;  %v239_v45 = vpop.permute.xlu0 %238 }
  0x95   :  { %v639_v41 = vshrl.u32 %v638_v39, 23  ;;  %v7644_v42 = vmul.f32 %v7635_v35, %v249_v40  ;;  %v642_v48 = vand.u32 8388607, %v12107_v43  ;;  %v7651_v50 = vmul.f32 %v7635_v35, %v239_v45 }
  0x97   :  { %12275 = vst [vmem:[#allocation8_spill] sm:$0xff] %v7644_v42  ;;  %v6379_v44 = vadd.s32 4294967169, %v639_v41  ;;  %v741_v46 = vand.u32 2139095040, %v7644_v42  ;;  %12276 = vst [vmem:[#allocation9_spill] sm:$0xff] %v7651_v50  ;;  %v12106_v52 = vand.u32 2147483647, %v7644_v42 }
  0x98   :  { %v643_v55 = vor.u32 8388608, %v642_v48  ;;  %v535_v57 = vand.u32 2139095040, %v7651_v50 }
  0x99   :  { %v645_v47 = vadd.s32 1, %v6379_v44  ;;  %v742_v49 = vshrl.u32 %v741_v46, 23  ;;  %v745_v5 = vand.u32 8388607, %v12106_v52 }
  0x9a   :  { %v536_v17 = vshrl.u32 %v535_v57, 23  ;;  %v683_v30 = vshll.u32 %v643_v55, 8 }
  0x9b   :  { %vm646_vm0 = vcmp.gt.s32.totalorder %v645_v47, 0  ;;  %v6383_v53 = vadd.s32 4294967169, %v742_v49  ;;  %v746_v44 = vor.u32 8388608, %v745_v5 }
  0x9c   :  { %v647_v51 = vsel %vm646_vm0, %v645_v47, 0  ;;  %v6375_v47 = vadd.s32 4294967169, %v536_v17 }
  0x9d   :  { %v649_v54 = vand.u32 31, %v647_v51  ;;  %v648_v56 = vshrl.u32 %v647_v51, 5  ;;  %v748_v6 = vadd.s32 1, %v6383_v53 }
  0x9f   :  { %v650_v58 = vsub.s32 32, %v649_v54  ;;  %v652_v60 = vshll.u32 %v12117_v59, %v649_v54  ;;  %v655_v62 = vshll.u32 %v12114_v61, %v649_v54  ;;  %v658_v0 = vshll.u32 %v12110_v63, %v649_v54 }
  0xa0   :  { %v661_v2 = vshll.u32 %v12112_v1, %v649_v54  ;;  %v664_v4 = vshll.u32 %v12129_v3, %v649_v54  ;;  %vm667_vm1 = vcmp.lt.s32.totalorder %v648_v56, 1  ;;  %vm670_vm2 = vcmp.lt.s32.totalorder %v648_v56, 4 }
  0xa1   :  { %v651_v7 = vshrl.u32 %v12117_v59, %v650_v58  ;;  %v653_v8 = vshrl.u32 %v12114_v61, %v650_v58  ;;  %v656_v9 = vshrl.u32 %v12110_v63, %v650_v58  ;;  %v659_v10 = vshrl.u32 %v12112_v1, %v650_v58 }
  0xa2   :  { %v662_v11 = vshrl.u32 %v12129_v3, %v650_v58  ;;  %v665_v13 = vshrl.u32 %v12127_v12, %v650_v58  ;;  %vm669_vm3 = vcmp.lt.s32.totalorder %v648_v56, 3  ;;  %vm749_vm4 = vcmp.gt.s32.totalorder %v748_v6, 0 }
  0xa3   :  { %v654_v14 = vor.u32 %v653_v8, %v652_v60  ;;  %v657_v15 = vor.u32 %v656_v9, %v655_v62  ;;  %v660_v16 = vor.u32 %v659_v10, %v658_v0  ;;  %v750_v27 = vsel %vm749_vm4, %v748_v6, 0 }
  0xa4   :  { %v663_v18 = vor.u32 %v662_v11, %v661_v2  ;;  %v666_v19 = vor.u32 %v665_v13, %v664_v4  ;;  %vm668_vm5 = vcmp.lt.s32.totalorder %v648_v56, 2  ;;  %v752_v34 = vand.u32 31, %v750_v27 }
  0xa5   :  { %v671_v20 = vsel %vm667_vm1, %v651_v7, %v654_v14  ;;  %v672_v21 = vsel %vm670_vm2, %v660_v16, 2102212464  ;;  %v675_v22 = vsel %vm667_vm1, %v654_v14, %v657_v15  ;;  %v679_v23 = vsel %vm667_vm1, %v657_v15, %v660_v16 }
  0xa6   :  { %v673_v24 = vsel %vm669_vm3, %v657_v15, %v672_v21  ;;  %v676_v25 = vsel %vm670_vm2, %v663_v18, 920167782  ;;  %v680_v26 = vsel %vm670_vm2, %v666_v19, 1326507024  ;;  %v751_v45 = vshrl.u32 %v750_v27, 5 }
  0xa7   :  { %v677_v28 = vsel %vm669_vm3, %v660_v16, %v676_v25  ;;  %v681_v29 = vsel %vm669_vm3, %v663_v18, %v680_v26  ;;  %v674_v31 = vsel %vm668_vm5, %v671_v20, %v673_v24  ;;  %v753_v46 = vsub.s32 32, %v752_v34 }
  0xa8   :  { %v678_v32 = vsel %vm668_vm5, %v675_v22, %v677_v28  ;;  %v682_v33 = vsel %vm668_vm5, %v679_v23, %v681_v29  ;;  %v690_v48 = vmul.u32 %v683_v30, %v674_v31  ;;  %v755_v49 = vshll.u32 %v12117_v59, %v752_v34 }
  0xa9   :  { %v7668_v36 = vmul.u32.u64.low %v683_v30, %v682_v33  ;;  %v7669_v39 = vmul.u32.u64.high %v683_v30, %v682_v33, %v7668_v36  ;;  %v7671_v40 = vmul.u32.u64.low %v683_v30, %v678_v32  ;;  %v7672_v41 = vmul.u32.u64.high %v683_v30, %v678_v32, %v7671_v40 }
  0xaa   :  { %v758_v51 = vshll.u32 %v12114_v61, %v752_v34  ;;  %v761_v53 = vshll.u32 %v12110_v63, %v752_v34  ;;  %v756_v54 = vshrl.u32 %v12114_v61, %v753_v46  ;;  %v759_v55 = vshrl.u32 %v12110_v63, %v753_v46 }
  0xab   :  { %v762_v56 = vshrl.u32 %v12112_v1, %v753_v46  ;;  %v764_v57 = vshll.u32 %v12112_v1, %v752_v34  ;;  %vm692_vm6 = vc.u32 %v7669_v39, %v7671_v40  ;;  %v693_v58 = vadd.s32 1, %v7672_v41 }
  0xac   :  { %v765_v60 = vshrl.u32 %v12129_v3, %v753_v46  ;;  %v767_v62 = vshll.u32 %v12129_v3, %v752_v34  ;;  %v757_v0 = vor.u32 %v756_v54, %v755_v49  ;;  %v760_v2 = vor.u32 %v759_v55, %v758_v51 }
  0xad   :  { %v763_v4 = vor.u32 %v762_v56, %v761_v53  ;;  %v768_v5 = vshrl.u32 %v12127_v12, %v753_v46  ;;  %v694_v6 = vsel %vm692_vm6, %v693_v58, %v7672_v41  ;;  %v786_v8 = vshll.u32 %v746_v44, 8 }
  0xae   :  { %v766_v7 = vor.u32 %v765_v60, %v764_v57  ;;  %v542_v9 = vadd.s32 1, %v6375_v47  ;;  %v695_v10 = vadd.s32 %v694_v6, %v690_v48  ;;  %vm770_vm7 = vcmp.lt.s32.totalorder %v751_v45, 1  ;;  %v259_v48 = vpop.permute.xlu1 %258 }
  0xaf   :  { %v769_v11 = vor.u32 %v768_v5, %v767_v62  ;;  %vm773_vm8 = vcmp.lt.s32.totalorder %v751_v45, 4  ;;  %vm772_vm9 = vcmp.lt.s32.totalorder %v751_v45, 3  ;;  %v778_v13 = vsel %vm770_vm7, %v757_v0, %v760_v2 }
  0xb0   :  { %v779_v14 = vsel %vm773_vm8, %v766_v7, 920167782  ;;  %v782_v15 = vsel %vm770_vm7, %v760_v2, %v763_v4  ;;  %v696_v16 = vadd.s32 536870912, %v695_v10  ;;  %vm771_vm10 = vcmp.lt.s32.totalorder %v751_v45, 2 }
  0xb1   :  { %v780_v17 = vsel %vm772_vm9, %v763_v4, %v779_v14  ;;  %v783_v18 = vsel %vm773_vm8, %v769_v11, 1326507024  ;;  %vm543_vm11 = vcmp.gt.s32.totalorder %v542_v9, 0  ;;  %v775_v25 = vsel %vm773_vm8, %v763_v4, 2102212464 }
  0xb2   :  { %v781_v19 = vsel %vm771_vm10, %v778_v13, %v780_v17  ;;  %v784_v20 = vsel %vm772_vm9, %v766_v7, %v783_v18  ;;  %v7694_v21 = vshrl.u32 %v696_v16, 30  ;;  %v544_v28 = vsel %vm543_vm11, %v542_v9, 0 }
  0xb3   :  { %v785_v22 = vsel %vm771_vm10, %v782_v15, %v784_v20  ;;  %v7697_v23 = vmul.u32.u64.low %v786_v8, %v781_v19  ;;  %v7698_v24 = vmul.u32.u64.high %v786_v8, %v781_v19, %v7697_v23  ;;  %v754_v30 = vshrl.u32 %v12117_v59, %v753_v46 }
  0xb4   :  { %12277 = vst [vmem:[#allocation10_spill] sm:$0xff] %v7694_v21  ;;  %v7701_v26 = vmul.u32.u64.low %v786_v8, %v785_v22  ;;  %v7702_v27 = vmul.u32.u64.high %v786_v8, %v785_v22, %v7701_v26  ;;  %v698_v29 = vshll.u32 %v7694_v21, 30  ;;  %v546_v31 = vand.u32 31, %v544_v28 }
  0xb5   :  { %v774_v32 = vsel %vm770_vm7, %v754_v30, %v757_v0  ;;  %v776_v33 = vsel %vm772_vm9, %v760_v2, %v775_v25  ;;  %v796_v44 = vadd.s32 1, %v7698_v24  ;;  %v12109_v47 = vand.u32 2147483647, %v7651_v50 }
  0xb6   :  { %v547_v34 = vsub.s32 32, %v546_v31  ;;  %v7708_v36 = vsub.s32 %v695_v10, %v698_v29  ;;  %v777_v41 = vsel %vm771_vm10, %v774_v32, %v776_v33  ;;  %vm795_vm12 = vc.u32 %v7702_v27, %v7697_v23 }
  0xb7   :  { %v7715_v49 = vshrl.u32 %v544_v28, 5  ;;  %v558_v46 = vshll.u32 %v12112_v1, %v546_v31  ;;  %v561_v58 = vshll.u32 %v12129_v3, %v546_v31  ;;  %v7726_v60 = vmul.f32 %v7635_v35, %v259_v48 }
  0xb8   :  { %v559_v51 = vshrl.u32 %v12129_v3, %v547_v34  ;;  %v550_v53 = vshrl.u32 %v12114_v61, %v547_v34  ;;  %v553_v54 = vshrl.u32 %v12110_v63, %v547_v34  ;;  %v556_v45 = vshrl.u32 %v12112_v1, %v547_v34 }
  0xb9   :  { %v562_v55 = vshrl.u32 %v12127_v12, %v547_v34  ;;  %v701_v56 = vsub.s32 0, %v7708_v36  ;;  %12278 = vst [vmem:[#allocation11_spill] sm:$0xff] %v7726_v60  ;;  %v797_v62 = vsel %vm795_vm12, %v796_v44, %v7698_v24  ;;  %v549_v0 = vshll.u32 %v12117_v59, %v546_v31  ;;  %v254_v24 = vpop.permute.xlu0 %253 }
  0xba   :  { %v560_v57 = vor.u32 %v559_v51, %v558_v46  ;;  %v552_v2 = vshll.u32 %v12114_v61, %v546_v31  ;;  %v555_v4 = vshll.u32 %v12110_v63, %v546_v31  ;;  %v793_v5 = vmul.u32 %v786_v8, %v777_v41 }
  0xbb   :  { %v539_v6 = vand.u32 8388607, %v12109_v47  ;;  %v563_v7 = vor.u32 %v562_v55, %v561_v58  ;;  %v551_v9 = vor.u32 %v550_v53, %v549_v0  ;;  %vm567_vm13 = vcmp.lt.s32.totalorder %v7715_v49, 4 }
  0xbc   :  { %v554_v10 = vor.u32 %v553_v54, %v552_v2  ;;  %v557_v11 = vor.u32 %v556_v45, %v555_v4  ;;  %v6380_v13 = vmin.u32 %v701_v56, %v7708_v36  ;;  %v798_v14 = vadd.s32 %v797_v62, %v793_v5 }
  0xbd   :  { %v573_v15 = vsel %vm567_vm13, %v560_v57, 920167782  ;;  %v947_v16 = vand.u32 2139095040, %v7726_v60  ;;  %vm564_vm14 = vcmp.lt.s32.totalorder %v7715_v49, 1  ;;  %vm566_vm15 = vcmp.lt.s32.totalorder %v7715_v49, 3 }
  0xbe   :  { %v577_v8 = vsel %vm567_vm13, %v563_v7, 1326507024  ;;  %v540_v17 = vor.u32 8388608, %v539_v6  ;;  %v572_v18 = vsel %vm564_vm14, %v551_v9, %v554_v10  ;;  %v574_v19 = vsel %vm566_vm15, %v557_v11, %v573_v15 }
  0xbf   :  { %v703_v20 = vclz %v6380_v13  ;;  %v799_v22 = vadd.s32 536870912, %v798_v14  ;;  %vm565_vm0 = vcmp.lt.s32.totalorder %v7715_v49, 2  ;;  %v576_v25 = vsel %vm564_vm14, %v554_v10, %v557_v11 }
  0xc0   :  { %v578_v26 = vsel %vm566_vm15, %v560_v57, %v577_v8  ;;  %v948_v28 = vshrl.u32 %v947_v16, 23  ;;  %v7754_v29 = vmul.f32 %v7635_v35, %v7640_v38  ;;  %v575_v30 = vsel %vm565_vm0, %v572_v18, %v574_v19 }
  0xc1   :  { %v7758_v31 = vshll.u32 %v540_v17, 8  ;;  %v7761_v33 = vmul.f32 %v7635_v35, %v254_v24  ;;  %v7763_v41 = vshrl.u32 %v799_v22, 30  ;;  %v579_v44 = vsel %vm565_vm0, %v576_v25, %v578_v26 }
  0xc2   :  { %v6391_v32 = vadd.s32 4294967169, %v948_v28  ;;  %v6381_v48 = vadd.s32 4294967294, %v703_v20  ;;  %v432_v53 = vand.u32 2139095040, %v7754_v29  ;;  %v548_v54 = vshrl.u32 %v12117_v59, %v547_v34 }
  0xc3   :  { %12279 = vst [vmem:[#allocation12_spill] sm:$0xff] %v7761_v33  ;;  %12280 = vst [vmem:[#allocation13_spill] sm:$0xff] %v7763_v41  ;;  %v7768_v46 = vmul.u32.u64.low %v7758_v31, %v575_v30  ;;  %v7769_v51 = vmul.u32.u64.high %v7758_v31, %v575_v30, %v7768_v46  ;;  %v569_v45 = vsel %vm567_vm13, %v557_v11, 2102212464  ;;  %v844_v57 = vand.u32 2139095040, %v7761_v33 }
  0xc4   :  { %v954_v38 = vadd.s32 1, %v6391_v32  ;;  %v7777_v55 = vmul.u32.u64.low %v7758_v31, %v579_v44  ;;  %v7778_v56 = vmul.u32.u64.high %v7758_v31, %v579_v44, %v7777_v55  ;;  %v801_v58 = vshll.u32 %v7763_v41, 30 }
  0xc5   :  { %vm6382_vm2 = vcmp.lt.s32.totalorder %v6381_v48, 0  ;;  %v568_v0 = vsel %vm564_vm14, %v548_v54, %v551_v9  ;;  %v570_v34 = vsel %vm566_vm15, %v554_v10, %v569_v45  ;;  %v12104_v2 = vand.u32 2147483647, %v7726_v60 }
  0xc6   :  { %vm955_vm1 = vcmp.gt.s32.totalorder %v954_v38, 0  ;;  %v433_v5 = vshrl.u32 %v432_v53, 23  ;;  %v845_v6 = vshrl.u32 %v844_v57, 23  ;;  %v7787_v7 = vsel %vm6382_vm2, 0, %v6381_v48 }
  0xc7   :  { %v956_v62 = vsel %vm955_vm1, %v954_v38, 0  ;;  %v7789_v11 = vsub.s32 %v798_v14, %v801_v58  ;;  %v571_v13 = vsel %vm565_vm0, %v568_v0, %v570_v34  ;;  %v590_v16 = vadd.s32 1, %v7769_v51 }
  0xc8   :  { %v958_v4 = vand.u32 31, %v956_v62  ;;  %v951_v9 = vand.u32 8388607, %v12104_v2  ;;  %vm589_vm3 = vc.u32 %v7778_v56, %v7768_v46  ;;  %v957_v49 = vshrl.u32 %v956_v62, 5 }
  0xc9   :  { %v6387_v22 = vadd.s32 4294967169, %v845_v6  ;;  %v711_v30 = vsub.s32 4294967266, %v7787_v7  ;;  %v804_v32 = vsub.s32 0, %v7789_v11  ;;  %v587_v38 = vmul.u32 %v7758_v31, %v571_v13 }
  0xca   :  { %v959_v15 = vsub.s32 32, %v958_v4  ;;  %v961_v10 = vshll.u32 %v12117_v59, %v958_v4  ;;  %v964_v8 = vshll.u32 %v12114_v61, %v958_v4  ;;  %v967_v14 = vshll.u32 %v12110_v63, %v958_v4 }
  0xcb   :  { %v970_v20 = vshll.u32 %v12112_v1, %v958_v4  ;;  %v973_v44 = vshll.u32 %v12129_v3, %v958_v4  ;;  %v591_v53 = vsel %vm589_vm3, %v590_v16, %v7769_v51  ;;  %v952_v54 = vor.u32 8388608, %v951_v9 }
  0xcc   :  { %v962_v17 = vshrl.u32 %v12114_v61, %v959_v15  ;;  %v965_v18 = vshrl.u32 %v12110_v63, %v959_v15  ;;  %v968_v19 = vshrl.u32 %v12112_v1, %v959_v15  ;;  %v971_v28 = vshrl.u32 %v12129_v3, %v959_v15 }
  0xcd   :  { %v974_v48 = vshrl.u32 %v12127_v12, %v959_v15  ;;  %vm976_vm4 = vcmp.lt.s32.totalorder %v957_v49, 1  ;;  %vm979_vm5 = vcmp.lt.s32.totalorder %v957_v49, 4  ;;  %v851_v57 = vadd.s32 1, %v6387_v22 }
  0xce   :  { %v963_v24 = vor.u32 %v962_v17, %v961_v10  ;;  %v966_v25 = vor.u32 %v965_v18, %v964_v8  ;;  %v969_v26 = vor.u32 %v968_v19, %v967_v14  ;;  %v972_v45 = vor.u32 %v971_v28, %v970_v20 }
  0xcf   :  { %v975_v55 = vor.u32 %v974_v48, %v973_v44  ;;  %vm978_vm6 = vcmp.lt.s32.totalorder %v957_v49, 3  ;;  %v6384_v34 = vmin.u32 %v804_v32, %v7789_v11  ;;  %v960_v4 = vshrl.u32 %v12117_v59, %v959_v15  ;;  %v269_v44 = vpop.permute.xlu1 %268 }
  0xd0   :  { %v981_v58 = vsel %vm979_vm5, %v969_v26, 2102212464  ;;  %v984_v62 = vsel %vm976_vm4, %v963_v24, %v966_v25  ;;  %v985_v0 = vsel %vm979_vm5, %v972_v45, 920167782  ;;  %vm977_vm7 = vcmp.lt.s32.totalorder %v957_v49, 2 }
  0xd1   :  { %v986_v6 = vsel %vm978_vm6, %v969_v26, %v985_v0  ;;  %v988_v51 = vsel %vm976_vm4, %v966_v25, %v969_v26  ;;  %v989_v13 = vsel %vm979_vm5, %v975_v55, 1326507024  ;;  %v992_v16 = vshll.u32 %v952_v54, 8 }
  0xd2   :  { %v987_v31 = vsel %vm977_vm7, %v984_v62, %v986_v6  ;;  %v7817_v9 = vadd.s32 %v591_v53, %v587_v38  ;;  %v980_v10 = vsel %vm976_vm4, %v960_v4, %v963_v24  ;;  %v982_v8 = vsel %vm978_vm6, %v966_v25, %v981_v58 }
  0xd3   :  { %v990_v17 = vsel %vm978_vm6, %v972_v45, %v989_v13  ;;  %v7821_v14 = vmul.u32.u64.low %v992_v16, %v987_v31  ;;  %v7822_v19 = vmul.u32.u64.high %v992_v16, %v987_v31, %v7821_v14  ;;  %vm852_vm8 = vcmp.gt.s32.totalorder %v851_v57, 0 }
  0xd4   :  { %v991_v18 = vsel %vm977_vm7, %v988_v51, %v990_v17  ;;  %v12105_v22 = vand.u32 2147483647, %v7761_v33  ;;  %v853_v26 = vsel %vm852_vm8, %v851_v57, 0  ;;  %v983_v28 = vsel %vm977_vm7, %v980_v10, %v982_v8 }
  0xd5   :  { %v7825_v15 = vmul.u32.u64.low %v992_v16, %v991_v18  ;;  %v7826_v20 = vmul.u32.u64.high %v992_v16, %v991_v18, %v7825_v15  ;;  %v855_v32 = vand.u32 31, %v853_v26  ;;  %v691_v24 = vadd.s32 %v7671_v40, %v7669_v39 }
  0xd6   :  { %v6371_v25 = vadd.s32 4294967169, %v433_v5  ;;  %v806_v48 = vclz %v6384_v34  ;;  %v593_v38 = vadd.s32 536870912, %v7817_v9  ;;  %v707_v53 = vsub.s32 32, %v7787_v7 }
  0xd7   :  { %v7834_v54 = vadd.s32 127, %v711_v30  ;;  %v1002_v45 = vadd.s32 1, %v7822_v19  ;;  %v856_v55 = vsub.s32 32, %v855_v32  ;;  %v999_v58 = vmul.u32 %v992_v16, %v983_v28 }
  0xd8   :  { %vm1001_vm9 = vc.u32 %v7826_v20, %v7821_v14  ;;  %v848_v49 = vand.u32 8388607, %v12105_v22  ;;  %v7842_v39 = vmul.f32 %v7635_v35, %v269_v44  ;;  %v858_v5 = vshll.u32 %v12117_v59, %v855_v32 }
  0xd9   :  { %v1003_v40 = vsel %vm1001_vm9, %v1002_v45, %v7822_v19  ;;  %v859_v30 = vshrl.u32 %v12114_v61, %v856_v55  ;;  %v862_v57 = vshrl.u32 %v12110_v63, %v856_v55  ;;  %v6385_v62 = vadd.s32 4294967294, %v806_v48 }
  0xda   :  { %12281 = vst [vmem:[#allocation14_spill] sm:$0xff] %v7842_v39  ;;  %v7848_v0 = vshrl.u32 %v593_v38, 30  ;;  %v1004_v34 = vadd.s32 %v1003_v40, %v999_v58  ;;  %v861_v4 = vshll.u32 %v12114_v61, %v855_v32  ;;  %v7851_v6 = vshrl.u32 %v853_v26, 5 }
  0xdb   :  { %v860_v31 = vor.u32 %v859_v30, %v858_v5  ;;  %v864_v51 = vshll.u32 %v12110_v63, %v855_v32  ;;  %v865_v13 = vshrl.u32 %v12112_v1, %v856_v55  ;;  %v867_v8 = vshll.u32 %v12112_v1, %v855_v32 }
  0xdc   :  { %12282 = vst [vmem:[#allocation15_spill] sm:$0xff] %v7848_v0  ;;  %v1005_v16 = vadd.s32 536870912, %v1004_v34  ;;  %v863_v10 = vor.u32 %v862_v57, %v861_v4  ;;  %v868_v17 = vshrl.u32 %v12129_v3, %v856_v55  ;;  %v439_v18 = vadd.s32 1, %v6371_v25 }
  0xdd   :  { %v866_v19 = vor.u32 %v865_v13, %v864_v51  ;;  %v870_v15 = vshll.u32 %v12129_v3, %v855_v32  ;;  %v871_v28 = vshrl.u32 %v12127_v12, %v856_v55  ;;  %v709_v44 = vshrl.u32 %v691_v24, %v707_v53 }
  0xde   :  { %vm6386_vm10 = vcmp.lt.s32.totalorder %v6385_v62, 0  ;;  %v849_v26 = vor.u32 8388608, %v848_v49  ;;  %v869_v48 = vor.u32 %v868_v17, %v867_v8  ;;  %v595_v38 = vshll.u32 %v7848_v0, 30 }
  0xdf   :  { %v872_v45 = vor.u32 %v871_v28, %v870_v15  ;;  %vm873_vm11 = vcmp.lt.s32.totalorder %v7851_v6, 1  ;;  %v1153_v58 = vand.u32 2139095040, %v7842_v39  ;;  %v713_v40 = vshll.u32 %v7834_v54, 23 }
  0xe0   :  { %v7863_v5 = vshrl.u32 %v1005_v16, 30  ;;  %vm876_vm12 = vcmp.lt.s32.totalorder %v7851_v6, 4  ;;  %v881_v32 = vsel %vm873_vm11, %v860_v31, %v863_v10  ;;  %vm875_vm13 = vcmp.lt.s32.totalorder %v7851_v6, 3 }
  0xe1   :  { %v882_v24 = vsel %vm876_vm12, %v869_v48, 920167782  ;;  %v885_v25 = vsel %vm873_vm11, %v863_v10, %v866_v19  ;;  %v886_v53 = vsel %vm876_vm12, %v872_v45, 1326507024  ;;  %v7875_v49 = vsel %vm6386_vm10, 0, %v6385_v62 }
  0xe2   :  { %12283 = vst [vmem:[#allocation16_spill] sm:$0xff] %v7863_v5  ;;  %vm874_vm14 = vcmp.lt.s32.totalorder %v7851_v6, 2  ;;  %v883_v54 = vsel %vm875_vm13, %v866_v19, %v882_v24  ;;  %v889_v30 = vshll.u32 %v849_v26, 8  ;;  %v7881_v57 = vsub.s32 %v7817_v9, %v595_v38  ;;  %v264_v38 = vpop.permute.xlu0 %263 }
  0xe3   :  { %v884_v4 = vsel %vm874_vm14, %v881_v32, %v883_v54  ;;  %v887_v51 = vsel %vm875_vm13, %v869_v48, %v886_v53  ;;  %v1154_v13 = vshrl.u32 %v1153_v58, 23  ;;  %v1007_v16 = vshll.u32 %v7863_v5, 30 }
  0xe4   :  { %v857_v62 = vshrl.u32 %v12117_v59, %v856_v55  ;;  %v878_v8 = vsel %vm876_vm12, %v866_v19, 2102212464  ;;  %v888_v17 = vsel %vm874_vm14, %v885_v25, %v887_v51  ;;  %vm440_vm15 = vcmp.gt.s32.totalorder %v439_v18, 0 }
  0xe5   :  { %v7893_v15 = vmul.u32.u64.low %v889_v30, %v888_v17  ;;  %v7894_v9 = vmul.u32.u64.high %v889_v30, %v888_v17, %v7893_v15  ;;  %v7896_v28 = vmul.u32.u64.low %v889_v30, %v884_v4  ;;  %v7897_v26 = vmul.u32.u64.high %v889_v30, %v884_v4, %v7896_v28 }
  0xe6   :  { %v6399_v48 = vadd.s32 4294967169, %v1154_v13  ;;  %v708_v45 = vshll.u32 %v7708_v36, %v7787_v7  ;;  %v814_v55 = vsub.s32 4294967266, %v7875_v49  ;;  %v598_v19 = vsub.s32 0, %v7881_v57 }
  0xe7   :  { %v877_v58 = vsel %vm873_vm11, %v857_v62, %v860_v31  ;;  %v7906_v32 = vsub.s32 %v1004_v34, %v1007_v16  ;;  %v879_v24 = vsel %vm875_vm13, %v863_v10, %v878_v8  ;;  %v7911_v53 = vmul.f32 %v7635_v35, %v264_v38 }
  0xe8   :  { %v1160_v25 = vadd.s32 1, %v6399_v48  ;;  %v710_v54 = vor.u32 %v709_v44, %v708_v45  ;;  %v714_v4 = vor.u32 4788187, %v713_v40  ;;  %v441_v51 = vsel %vm440_vm15, %v439_v18, 0 }
  0xe9   :  { %v899_v36 = vadd.s32 1, %v7897_v26  ;;  %v810_v7 = vsub.s32 32, %v7875_v49  ;;  %vm898_vm0 = vc.u32 %v7894_v9, %v7896_v28  ;;  %v12103_v34 = vand.u32 2147483647, %v7842_v39 }
  0xea   :  { %vm1161_vm1 = vcmp.gt.s32.totalorder %v1160_v25, 0  ;;  %v815_v31 = vadd.s32 127, %v814_v55  ;;  %v6376_v10 = vmin.u32 %v598_v19, %v7881_v57  ;;  %v880_v13 = vsel %vm874_vm14, %v877_v58, %v879_v24 }
  0xeb   :  { %v1162_v16 = vsel %vm1161_vm1, %v1160_v25, 0  ;;  %v794_v18 = vadd.s32 %v7697_v23, %v7702_v27  ;;  %v1010_v44 = vsub.s32 0, %v7906_v32  ;;  %v1050_v62 = vand.u32 2139095040, %v7911_v53 }
  0xec   :  { %v1164_v40 = vand.u32 31, %v1162_v16  ;;  %v717_v8 = vcvt.s32.f32 %v710_v54  ;;  %v7925_v17 = vshrl.u32 %v441_v51, 5  ;;  %v7927_v15 = vand.u32 31, %v441_v51 }
  0xed   :  { %v900_v38 = vsel %vm898_vm0, %v899_v36, %v7897_v26  ;;  %v715_v48 = vand.u32 2147483647, %v714_v4  ;;  %v811_v6 = vshll.u32 %v7789_v11, %v7875_v49  ;;  %v812_v45 = vshrl.u32 %v794_v18, %v810_v7 }
  0xee   :  { %12284 = vst [vmem:[#allocation17_spill] sm:$0xff] %v7925_v17  ;;  %12285 = vst [vmem:[#allocation18_spill] sm:$0xff] %v7927_v15  ;;  %v896_v55 = vmul.u32 %v889_v30, %v880_v13  ;;  %v816_v19 = vshll.u32 %v815_v31, 23  ;;  %v600_v23 = vclz %v6376_v10  ;;  %v1157_v27 = vand.u32 8388607, %v12103_v34 }
  0xef   :  { %v1165_v58 = vsub.s32 32, %v1164_v40  ;;  %v6392_v24 = vmin.u32 %v1010_v44, %v7906_v32  ;;  %v1167_v54 = vshll.u32 %v12117_v59, %v1164_v40  ;;  %v1051_v51 = vshrl.u32 %v1050_v62, 23 }
  0xf0   :  { %v7935_v25 = vadd.s32 %v900_v38, %v896_v55  ;;  %v1170_v4 = vshll.u32 %v12114_v61, %v1164_v40  ;;  %v7942_v30 = vshrl.u32 %v1162_v16, 5  ;;  %v1173_v36 = vshll.u32 %v12110_v63, %v1164_v40 }
  0xf1   :  { %v1168_v26 = vshrl.u32 %v12114_v61, %v1165_v58  ;;  %v1171_v11 = vshrl.u32 %v12110_v63, %v1165_v58  ;;  %v1174_v49 = vshrl.u32 %v12112_v1, %v1165_v58  ;;  %v1176_v7 = vshll.u32 %v12112_v1, %v1164_v40 }
  0xf2   :  { %v1177_v31 = vshrl.u32 %v12129_v3, %v1165_v58  ;;  %v7947_v10 = vmul.f32 %v717_v8, %v715_v48  ;;  %v813_v13 = vor.u32 %v812_v45, %v811_v6  ;;  %v6377_v62 = vadd.s32 4294967294, %v600_v23 }
  0xf3   :  { %v1169_v18 = vor.u32 %v1168_v26, %v1167_v54  ;;  %v1172_v44 = vor.u32 %v1171_v11, %v1170_v4  ;;  %v1158_v38 = vor.u32 8388608, %v1157_v27  ;;  %v1175_v55 = vor.u32 %v1174_v49, %v1173_v36 }
  0xf4   :  { %v1178_v34 = vor.u32 %v1177_v31, %v1176_v7  ;;  %v817_v2 = vor.u32 4788187, %v816_v19  ;;  %v1012_v22 = vclz %v6392_v24  ;;  %v1179_v16 = vshll.u32 %v12129_v3, %v1164_v40 }
  0xf5   :  { %v1180_v52 = vshrl.u32 %v12127_v12, %v1165_v58  ;;  %v902_v43 = vadd.s32 536870912, %v7935_v25  ;;  %vm1182_vm2 = vcmp.lt.s32.totalorder %v7942_v30, 1  ;;  %vm1185_vm3 = vcmp.lt.s32.totalorder %v7942_v30, 4 }
  0xf6   :  { %v6395_v8 = vadd.s32 4294967169, %v1051_v51  ;;  %vm1184_vm4 = vcmp.lt.s32.totalorder %v7942_v30, 3  ;;  %v1190_v6 = vsel %vm1182_vm2, %v1169_v18, %v1172_v44  ;;  %v1191_v45 = vsel %vm1185_vm3, %v1178_v34, 920167782 }
  0xf7   :  { %v1181_v48 = vor.u32 %v1180_v52, %v1179_v16  ;;  %vm6378_vm5 = vcmp.lt.s32.totalorder %v6377_v62, 0  ;;  %vm1183_vm6 = vcmp.lt.s32.totalorder %v7942_v30, 2  ;;  %v1192_v40 = vsel %vm1184_vm4, %v1175_v55, %v1191_v45 }
  0xf8   :  { %v1198_v19 = vshll.u32 %v1158_v38, 8  ;;  %v1193_v23 = vsel %vm1183_vm6, %v1190_v6, %v1192_v40  ;;  %v1194_v52 = vsel %vm1182_vm2, %v1172_v44, %v1175_v55  ;;  %v12108_v24 = vand.u32 2147483647, %v7911_v53  ;;  %v279_v40 = vpop.permute.xlu1 %278 }
  0xf9   :  { %v1195_v27 = vsel %vm1185_vm3, %v1181_v48, 1326507024  ;;  %v6393_v54 = vadd.s32 4294967294, %v1012_v22  ;;  %v7969_v51 = vshrl.u32 %v902_v43, 30  ;;  %v1187_v26 = vsel %vm1185_vm3, %v1175_v55, 2102212464 }
  0xfa   :  { %v1196_v4 = vsel %vm1184_vm4, %v1178_v34, %v1195_v27  ;;  %v7977_v49 = vmul.u32.u64.low %v1198_v19, %v1193_v23  ;;  %v7978_v36 = vmul.u32.u64.high %v1198_v19, %v1193_v23, %v7977_v49  ;;  %v1057_v7 = vadd.s32 1, %v6395_v8 }
  0xfb   :  { %12286 = vst [vmem:[#allocation19_spill] sm:$0xff] %v7969_v51  ;;  %v1197_v11 = vsel %vm1183_vm6, %v1194_v52, %v1196_v4  ;;  %v818_v31 = vand.u32 2147483647, %v817_v2  ;;  %v1166_v38 = vshrl.u32 %v12117_v59, %v1165_v58  ;;  %v7986_v16 = vsub.s32 32, %v7927_v15 }
  0xfc   :  { %v7982_v22 = vmul.u32.u64.low %v1198_v19, %v1197_v11  ;;  %v7983_v43 = vmul.u32.u64.high %v1198_v19, %v1197_v11, %v7982_v22  ;;  %v820_v55 = vcvt.s32.f32 %v813_v13  ;;  %v7989_v34 = vsel %vm6378_vm5, 0, %v6377_v62 }
  0xfd   :  { %12287 = vst [vmem:[#allocation20_spill] sm:$0xff] %v7986_v16  ;;  %vm1058_vm7 = vcmp.gt.s32.totalorder %v1057_v7, 0  ;;  %v1186_v48 = vsel %vm1182_vm2, %v1166_v38, %v1169_v18  ;;  %v1188_v8 = vsel %vm1184_vm4, %v1172_v44, %v1187_v26  ;;  %v1054_v2 = vand.u32 8388607, %v12108_v24 }
  0xfe   :  { %v1059_v58 = vsel %vm1058_vm7, %v1057_v7, 0  ;;  %vm6394_vm8 = vcmp.lt.s32.totalorder %v6393_v54, 0  ;;  %v904_v6 = vshll.u32 %v7969_v51, 30  ;;  %v1208_v45 = vadd.s32 1, %v7978_v36 }
  0xff   :  { %v1061_v13 = vand.u32 31, %v1059_v58  ;;  %v719_v62 = vxor.u32 2147483648, %v7947_v10  ;;  %v8000_v23 = vmul.f32 %v820_v55, %v818_v31  ;;  %v588_v18 = vadd.s32 %v7768_v46, %v7778_v56 }
 0x100   :  { %v604_v44 = vsub.s32 32, %v7989_v34  ;;  %v605_v52 = vshll.u32 %v7881_v57, %v7989_v34  ;;  %v1189_v27 = vsel %vm1183_vm6, %v1186_v48, %v1188_v8  ;;  %vm1207_vm9 = vc.u32 %v7983_v43, %v7977_v49 }
 0x101   :  { %v1062_v26 = vsub.s32 32, %v1061_v13  ;;  %v608_v4 = vsub.s32 4294967266, %v7989_v34  ;;  %v8012_v11 = vsel %vm6394_vm8, 0, %v6393_v54  ;;  %v1055_v7 = vor.u32 8388608, %v1054_v2 }
 0x102   :  { %v8015_v31 = vmul.f32 %v7635_v35, %v279_v40  ;;  %v8018_v46 = vsub.s32 %v7935_v25, %v904_v6  ;;  %v1209_v56 = vsel %vm1207_vm9, %v1208_v45, %v7978_v36  ;;  %v1205_v38 = vmul.u32 %v1198_v19, %v1189_v27 }
 0x103   :  { %v1065_v57 = vshrl.u32 %v12114_v61, %v1062_v26  ;;  %v1068_v30 = vshrl.u32 %v12110_v63, %v1062_v26  ;;  %v1064_v22 = vshll.u32 %v12117_v59, %v1061_v13  ;;  %v1067_v55 = vshll.u32 %v12114_v61, %v1061_v13 }
 0x104   :  { %12288 = vst [vmem:[#allocation21_spill] sm:$0xff] %v8015_v31  ;;  %v1071_v54 = vshrl.u32 %v12112_v1, %v1062_v26  ;;  %v8026_v34 = vshrl.u32 %v1059_v58, 5  ;;  %v1070_v48 = vshll.u32 %v12110_v63, %v1061_v13  ;;  %v1073_v25 = vshll.u32 %v12112_v1, %v1061_v13 }
 0x105   :  { %v1074_v8 = vshrl.u32 %v12129_v3, %v1062_v26  ;;  %v8031_v36 = vadd.s32 %v1209_v56, %v1205_v38  ;;  %v1066_v2 = vor.u32 %v1065_v57, %v1064_v22  ;;  %v1069_v6 = vor.u32 %v1068_v30, %v1067_v55 }
 0x106   :  { %v1359_v19 = vand.u32 2139095040, %v8015_v31  ;;  %v1072_v45 = vor.u32 %v1071_v54, %v1070_v48  ;;  %v1076_v27 = vshll.u32 %v12129_v3, %v1061_v13  ;;  %v1077_v24 = vshrl.u32 %v12127_v12, %v1062_v26 }
 0x107   :  { %v1075_v40 = vor.u32 %v1074_v8, %v1073_v25  ;;  %v606_v58 = vshrl.u32 %v588_v18, %v604_v44  ;;  %v609_v47 = vadd.s32 127, %v608_v4  ;;  %v1020_v63 = vsub.s32 4294967266, %v8012_v11  ;;  %v274_v8 = vpop.permute.xlu0 %273 }
 0x108   :  { %v907_v1 = vsub.s32 0, %v8018_v46  ;;  %v1078_v61 = vor.u32 %v1077_v24, %v1076_v27  ;;  %vm1079_vm10 = vcmp.lt.s32.totalorder %v8026_v34, 1  ;;  %vm1082_vm11 = vcmp.lt.s32.totalorder %v8026_v34, 4 }
 0x109   :  { %v8040_v56 = vshll.u32 %v1055_v7, 8  ;;  %vm1081_vm12 = vcmp.lt.s32.totalorder %v8026_v34, 3  ;;  %v1087_v13 = vsel %vm1079_vm10, %v1066_v2, %v1069_v6  ;;  %v1088_v18 = vsel %vm1082_vm11, %v1075_v40, 920167782 }
 0x10a   :  { %v1360_v44 = vshrl.u32 %v1359_v19, 23  ;;  %v1211_v4 = vadd.s32 536870912, %v8031_v36  ;;  %vm1080_vm13 = vcmp.lt.s32.totalorder %v8026_v34, 2  ;;  %v1089_v24 = vsel %vm1081_vm12, %v1072_v45, %v1088_v18 }
 0x10b   :  { %v1091_v7 = vsel %vm1079_vm10, %v1069_v6, %v1072_v45  ;;  %vm637_vm14 = vcmp.lt.s32.totalorder %v7638_v37, 0  ;;  %v610_v57 = vshll.u32 %v609_v47, 23  ;;  %v1016_v30 = vsub.s32 32, %v8012_v11 }
 0x10c   :  { %v1090_v38 = vsel %vm1080_vm13, %v1087_v13, %v1089_v24  ;;  %v1092_v22 = vsel %vm1082_vm11, %v1078_v61, 1326507024  ;;  %v1021_v55 = vadd.s32 127, %v1020_v63  ;;  %v6388_v47 = vmin.u32 %v907_v1, %v8018_v46 }
 0x10d   :  { %v1093_v54 = vsel %vm1081_vm12, %v1075_v40, %v1092_v22  ;;  %v8062_v48 = vmul.u32.u64.low %v8040_v56, %v1090_v38  ;;  %v8063_v25 = vmul.u32.u64.high %v8040_v56, %v1090_v38, %v8062_v48  ;;  %v1084_v19 = vsel %vm1082_vm11, %v1072_v45, 2102212464 }
 0x10e   :  { %v1094_v27 = vsel %vm1080_vm13, %v1091_v7, %v1093_v54  ;;  %v6407_v13 = vadd.s32 4294967169, %v1360_v44  ;;  %v8071_v61 = vshrl.u32 %v1211_v4, 30  ;;  %v1063_v63 = vshrl.u32 %v12117_v59, %v1062_v26 }
 0x10f   :  { %v8075_v40 = vmul.u32.u64.low %v8040_v56, %v1094_v27  ;;  %v8076_v18 = vmul.u32.u64.high %v8040_v56, %v1094_v27, %v8075_v40  ;;  %v8078_v24 = vor.u32 %v606_v58, %v605_v52  ;;  %v1000_v1 = vadd.s32 %v7821_v14, %v7826_v20  ;;  %v8117_v27 = vld [vmem:[%s12273_s0] ss:$0 sm:$0xff] }
 0x110   :  { %12289 = vst [vmem:[#allocation22_spill] sm:$0xff] %v8071_v61  ;;  %v1366_v38 = vadd.s32 1, %v6407_v13  ;;  %v8083_v45 = vmul.f32 %v7635_v35, %v274_v8  ;;  %v8085_v22 = vor.u32 4788187, %v610_v57  ;;  %v1083_v44 = vsel %vm1079_vm10, %v1063_v63, %v1066_v2  ;;  %v289_v57 = vpop.permute.xlu1 %288 }
 0x111   :  { %v1085_v26 = vsel %vm1081_vm12, %v1069_v6, %v1084_v19  ;;  %v12116_v4 = vand.u32 2147483647, %v8015_v31  ;;  %v1018_v7 = vshrl.u32 %v1000_v1, %v1016_v30  ;;  %v1022_v52 = vshll.u32 %v1021_v55, 23 }
 0x112   :  { %12290 = vst [vmem:[#allocation23_spill] sm:$0xff] %v8083_v45  ;;  %v1105_v58 = vadd.s32 1, %v8063_v25  ;;  %vm1367_vm15 = vcmp.gt.s32.totalorder %v1366_v38, 0  ;;  %v909_v14 = vclz %v6388_v47  ;;  %v1213_v20 = vshll.u32 %v8071_v61, 30 }
 0x113   :  { %vm1104_vm0 = vc.u32 %v8076_v18, %v8062_v48  ;;  %v1368_v35 = vsel %vm1367_vm15, %v1366_v38, 0  ;;  %v1017_v2 = vshll.u32 %v7906_v32, %v8012_v11  ;;  %v1086_v6 = vsel %vm1080_vm13, %v1083_v44, %v1085_v26 }
 0x114   :  { %v1370_v54 = vand.u32 31, %v1368_v35  ;;  %v1256_v30 = vand.u32 2139095040, %v8083_v45  ;;  %v8106_v55 = vsel %vm637_vm14, %v719_v62, %v7947_v10  ;;  %v1106_v11 = vsel %vm1104_vm0, %v1105_v58, %v8063_v25 }
 0x115   :  { %12291 = vst [vmem:[#allocation24_spill] sm:$0xff] %v8106_v55  ;;  %v8111_v32 = vor.u32 %v1018_v7, %v1017_v2  ;;  %v8120_v13 = vmul.f32 %v8117_v27, %v289_v57  ;;  %v8122_v10 = vor.u32 4788187, %v1022_v52  ;;  %v6389_v62 = vadd.s32 4294967294, %v909_v14 }
 0x116   :  { %v1371_v34 = vsub.s32 32, %v1370_v54  ;;  %v8125_v63 = vsub.s32 %v8031_v36, %v1213_v20  ;;  %v1102_v40 = vmul.u32 %v8040_v56, %v1086_v6  ;;  %v1363_v25 = vand.u32 8388607, %v12116_v4 }
 0x117   :  { %12292 = vst [vmem:[#allocation25_spill] sm:$0xff] %v8120_v13  ;;  %v12293_v1 = vmov 2475754826   ;;  %v12294_v44 = vmov 2131351028   ;;  %v1257_v7 = vshrl.u32 %v1256_v30, 23  ;;  %v1373_v57 = vshll.u32 %v12117_v59, %v1370_v54 }
 0x118   :  { %v1374_v38 = vshrl.u32 %v12293_v1, %v1371_v34  ;;  %v1377_v26 = vshrl.u32 %v12294_v44, %v1371_v34  ;;  %v8132_v58 = vadd.s32 %v1106_v11, %v1102_v40  ;;  %v1376_v52 = vshll.u32 %v12293_v1, %v1370_v54 }
 0x119   :  { %v12295_v14 = vmov 2102212464   ;;  %v1369_v36 = vshrl.u32 %v1368_v35, 5  ;;  %v1379_v20 = vshll.u32 %v12294_v44, %v1370_v54  ;;  %v1383_v6 = vshrl.u32 %v12129_v3, %v1371_v34 }
 0x11a   :  { %v1380_v2 = vshrl.u32 %v12295_v14, %v1371_v34  ;;  %v1382_v56 = vshll.u32 %v12295_v14, %v1370_v54  ;;  %vm6390_vm1 = vcmp.lt.s32.totalorder %v6389_v62, 0  ;;  %v1216_v4 = vsub.s32 0, %v8125_v63 }
 0x11b   :  { %v1375_v8 = vor.u32 %v1374_v38, %v1373_v57  ;;  %v1378_v30 = vor.u32 %v1377_v26, %v1376_v52  ;;  %v1385_v19 = vshll.u32 %v12129_v3, %v1370_v54  ;;  %v1386_v47 = vshrl.u32 %v12127_v12, %v1371_v34 }
 0x11c   :  { %v1381_v11 = vor.u32 %v1380_v2, %v1379_v20  ;;  %v1384_v40 = vor.u32 %v1383_v6, %v1382_v56  ;;  %v1024_v59 = vand.u32 2147483647, %v8122_v10  ;;  %v1026_v35 = vcvt.s32.f32 %v8111_v32 }
 0x11d   :  { %v1108_v61 = vadd.s32 536870912, %v8132_v58  ;;  %v1364_v5 = vor.u32 8388608, %v1363_v25  ;;  %v1387_v51 = vor.u32 %v1386_v47, %v1385_v19  ;;  %vm1388_vm2 = vcmp.lt.s32.totalorder %v1369_v36, 1 }
 0x11e   :  { %v12131_v41 = vand.u32 2147483647, %v8083_v45  ;;  %v6403_v55 = vadd.s32 4294967169, %v1257_v7  ;;  %v8148_v38 = vsel %vm6390_vm1, 0, %v6389_v62  ;;  %v6400_v26 = vmin.u32 %v1216_v4, %v8125_v63 }
 0x11f   :  { %vm1391_vm3 = vcmp.lt.s32.totalorder %v1369_v36, 4  ;;  %v1396_v54 = vsel %vm1388_vm2, %v1375_v8, %v1378_v30  ;;  %vm1390_vm4 = vcmp.lt.s32.totalorder %v1369_v36, 3  ;;  %v1400_v32 = vsel %vm1388_vm2, %v1378_v30, %v1381_v11 }
 0x120   :  { %v1397_v10 = vsel %vm1391_vm3, %v1384_v40, 920167782  ;;  %v1401_v57 = vsel %vm1391_vm3, %v1387_v51, 1326507024  ;;  %v8153_v52 = vshrl.u32 %v1108_v61, 30  ;;  %vm1389_vm5 = vcmp.lt.s32.totalorder %v1369_v36, 2 }
 0x121   :  { %v1398_v47 = vsel %vm1390_vm4, %v1381_v11, %v1397_v10  ;;  %v1404_v19 = vshll.u32 %v1364_v5, 8  ;;  %v1393_v25 = vsel %vm1391_vm3, %v1381_v11, 2102212464  ;;  %v1402_v7 = vsel %vm1390_vm4, %v1384_v40, %v1401_v57 }
 0x122   :  { %12296 = vst [vmem:[#allocation26_spill] sm:$0xff] %v8153_v52  ;;  %v1399_v62 = vsel %vm1389_vm5, %v1396_v54, %v1398_v47  ;;  %v1263_v4 = vadd.s32 1, %v6403_v55  ;;  %v913_v2 = vsub.s32 32, %v8148_v38  ;;  %v12297_v20 = vmov 683565275  }
 0x123   :  { %v1372_v56 = vshrl.u32 %v12297_v20, %v1371_v34  ;;  %v1403_v6 = vsel %vm1389_vm5, %v1400_v32, %v1402_v7  ;;  %v1565_v51 = vand.u32 2139095040, %v8120_v13  ;;  %v917_v5 = vsub.s32 4294967266, %v8148_v38 }
 0x124   :  { %v8162_v61 = vmul.u32.u64.low %v1404_v19, %v1403_v6  ;;  %v8163_v12 = vmul.u32.u64.high %v1404_v19, %v1403_v6, %v8162_v61  ;;  %v8165_v3 = vmul.u32.u64.low %v1404_v19, %v1399_v62  ;;  %v8166_v10 = vmul.u32.u64.high %v1404_v19, %v1399_v62, %v8165_v3 }
 0x125   :  { %v1392_v11 = vsel %vm1388_vm2, %v1372_v56, %v1375_v8  ;;  %v1394_v55 = vsel %vm1390_vm4, %v1378_v30, %v1393_v25  ;;  %vm1264_vm6 = vcmp.gt.s32.totalorder %v1263_v4, 0  ;;  %v1218_v40 = vclz %v6400_v26 }
 0x126   :  { %v1110_v34 = vshll.u32 %v8153_v52, 30  ;;  %v1260_v54 = vand.u32 8388607, %v12131_v41  ;;  %v1265_v32 = vsel %vm1264_vm6, %v1263_v4, 0  ;;  %v12298_v57 = vand.u32 2147483647, %v8085_v22 }
 0x127   :  { %v12299_v47 = vcvt.s32.f32 %v8078_v24  ;;  %v897_v7 = vadd.s32 %v7896_v28, %v7894_v9  ;;  %v1267_v8 = vand.u32 31, %v1265_v32  ;;  %v1566_v56 = vshrl.u32 %v1565_v51, 23 }
 0x128   :  { %v8183_v30 = vmul.f32 %v1026_v35, %v1024_v59  ;;  %v1395_v26 = vsel %vm1389_vm5, %v1392_v11, %v1394_v55  ;;  %vm1413_vm7 = vc.u32 %v8163_v12, %v8165_v3  ;;  %v1414_v25 = vadd.s32 1, %v8166_v10 }
 0x129   :  { %v8179_v62 = vmul.f32 %v12299_v47, %v12298_v57  ;;  %v914_v22 = vshll.u32 %v8018_v46, %v8148_v38  ;;  %v915_v24 = vshrl.u32 %v897_v7, %v913_v2  ;;  %v918_v4 = vadd.s32 127, %v917_v5 }
 0x12a   :  { %v1268_v6 = vsub.s32 32, %v1267_v8  ;;  %v6401_v61 = vadd.s32 4294967294, %v1218_v40  ;;  %v8192_v9 = vsub.s32 %v8132_v58, %v1110_v34  ;;  %v1415_v59 = vsel %vm1413_vm7, %v1414_v25, %v8166_v10 }
 0x12b   :  { %v1261_v28 = vor.u32 8388608, %v1260_v54  ;;  %v1411_v36 = vmul.u32 %v1404_v19, %v1395_v26  ;;  %v1270_v35 = vshll.u32 %v12297_v20, %v1267_v8  ;;  %v1273_v51 = vshll.u32 %v12293_v1, %v1267_v8 }
 0x12c   :  { %v6415_v11 = vadd.s32 4294967169, %v1566_v56  ;;  %v1271_v55 = vshrl.u32 %v12293_v1, %v1268_v6  ;;  %v1274_v46 = vshrl.u32 %v12294_v44, %v1268_v6  ;;  %v1276_v38 = vshll.u32 %v12294_v44, %v1267_v8 }
 0x12d   :  { %v1277_v2 = vshrl.u32 %v12295_v14, %v1268_v6  ;;  %v8201_v5 = vadd.s32 %v1415_v59, %v1411_v36  ;;  %v1266_v58 = vshrl.u32 %v1265_v32, 5  ;;  %v1279_v10 = vshll.u32 %v12295_v14, %v1267_v8 }
 0x12e   :  { %v12300_v40 = vmov 920167782   ;;  %vm740_vm8 = vcmp.lt.s32.totalorder %v7644_v42, 0  ;;  %v919_v34 = vshll.u32 %v918_v4, 23  ;;  %v1272_v54 = vor.u32 %v1271_v55, %v1270_v35 }
 0x12f   :  { %v1280_v19 = vshrl.u32 %v12300_v40, %v1268_v6  ;;  %v1275_v57 = vor.u32 %v1274_v46, %v1273_v51  ;;  %v1278_v47 = vor.u32 %v1277_v2, %v1276_v38  ;;  %vm6402_vm9 = vcmp.lt.s32.totalorder %v6401_v61, 0 }
 0x130   :  { %v1301_v56 = vshll.u32 %v1261_v28, 8  ;;  %v1113_v25 = vsub.s32 0, %v8192_v9  ;;  %v1282_v59 = vshll.u32 %v12300_v40, %v1267_v8  ;;  %v12301_v32 = vmov 1326507024  }
 0x131   :  { %v1281_v7 = vor.u32 %v1280_v19, %v1279_v10  ;;  %v1283_v36 = vshrl.u32 %v12301_v32, %v1268_v6  ;;  %v1572_v41 = vadd.s32 1, %v6415_v11  ;;  %v1417_v52 = vadd.s32 536870912, %v8201_v5 }
 0x132   :  { %vm1285_vm10 = vcmp.lt.s32.totalorder %v1266_v58, 1  ;;  %vm1287_vm11 = vcmp.lt.s32.totalorder %v1266_v58, 3  ;;  %vm1288_vm12 = vcmp.lt.s32.totalorder %v1266_v58, 4  ;;  %v8213_v28 = vsel %vm6402_vm9, 0, %v6401_v61 }
 0x133   :  { %v1284_v4 = vor.u32 %v1283_v36, %v1282_v59  ;;  %v1290_v35 = vsel %vm1288_vm12, %v1278_v47, 2102212464  ;;  %v1293_v51 = vsel %vm1285_vm10, %v1272_v54, %v1275_v57  ;;  %v1294_v55 = vsel %vm1288_vm12, %v1281_v7, 920167782 }
 0x134   :  { %v1269_v46 = vshrl.u32 %v12297_v20, %v1268_v6  ;;  %vm1286_vm13 = vcmp.lt.s32.totalorder %v1266_v58, 2  ;;  %v1295_v8 = vsel %vm1287_vm11, %v1278_v47, %v1294_v55  ;;  %v6396_v11 = vmin.u32 %v1113_v25, %v8192_v9  ;;  %v284_v25 = vpop.permute.xlu0 %283 }
 0x135   :  { %v1296_v38 = vsel %vm1286_vm13, %v1293_v51, %v1295_v8  ;;  %v1297_v2 = vsel %vm1285_vm10, %v1275_v57, %v1278_v47  ;;  %v1298_v10 = vsel %vm1288_vm12, %v1284_v4, 1326507024  ;;  %v8220_v19 = vshrl.u32 %v1417_v52, 30 }
 0x136   :  { %v1289_v59 = vsel %vm1285_vm10, %v1269_v46, %v1272_v54  ;;  %v1291_v36 = vsel %vm1287_vm11, %v1275_v57, %v1290_v35  ;;  %v1299_v61 = vsel %vm1287_vm11, %v1281_v7, %v1298_v10  ;;  %vm1573_vm15 = vcmp.gt.s32.totalorder %v1572_v41, 0 }
 0x137   :  { %12302 = vst [vmem:[#allocation27_spill] sm:$0xff] %v8220_v19  ;;  %v1300_v6 = vsel %vm1286_vm13, %v1297_v2, %v1299_v61  ;;  %v8226_v26 = vmul.u32.u64.low %v1301_v56, %v1296_v38  ;;  %v8227_v21 = vmul.u32.u64.high %v1301_v56, %v1296_v38, %v8226_v26  ;;  %v12303_v47 = vxor.u32 2147483648, %v8000_v23 }
 0x138   :  { %v8238_v57 = vmul.u32.u64.low %v1301_v56, %v1300_v6  ;;  %v8239_v4 = vmul.u32.u64.high %v1301_v56, %v1300_v6, %v8238_v57  ;;  %v8241_v7 = vor.u32 %v915_v24, %v914_v22  ;;  %v8243_v35 = vor.u32 4788187, %v919_v34 }
 0x139   :  { %v8235_v52 = vsel %vm740_vm8, %v12303_v47, %v8000_v23  ;;  %v1292_v51 = vsel %vm1286_vm13, %v1289_v59, %v1291_v36  ;;  %v1574_v55 = vsel %vm1573_vm15, %v1572_v41, 0  ;;  %v1226_v46 = vsub.s32 4294967266, %v8213_v28 }
 0x13a   :  { %12304 = vst [vmem:[#allocation28_spill] sm:$0xff] %v8235_v52  ;;  %v1115_v8 = vclz %v6396_v11  ;;  %v1576_v38 = vand.u32 31, %v1574_v55  ;;  %v8248_v2 = vmul.f32 %v8117_v27, %v284_v25  ;;  %v1419_v10 = vshll.u32 %v8220_v19, 30 }
 0x13b   :  { %v1311_v61 = vadd.s32 1, %v8227_v21  ;;  %v12306_v22 = vand.u32 2147483647, %v8120_v13  ;;  %v1206_v58 = vadd.s32 %v7977_v49, %v7983_v43  ;;  %v1308_v41 = vmul.u32 %v1301_v56, %v1292_v51 }
 0x13c   :  { %12305 = vst [vmem:[#allocation29_spill] sm:$0xff] %v8248_v2  ;;  %vm1310_vm0 = vc.u32 %v8239_v4, %v8226_v26  ;;  %v1577_v34 = vsub.s32 32, %v1576_v38  ;;  %v923_v59 = vcvt.s32.f32 %v8241_v7  ;;  %v1222_v36 = vsub.s32 32, %v8213_v28 }
 0x13d   :  { %v1569_v24 = vand.u32 8388607, %v12306_v22  ;;  %v1312_v6 = vsel %vm1310_vm0, %v1311_v61, %v8227_v21  ;;  %v1227_v25 = vadd.s32 127, %v1226_v46  ;;  %v6397_v47 = vadd.s32 4294967294, %v1115_v8 }
 0x13e   :  { %v1313_v57 = vadd.s32 %v1312_v6, %v1308_v41  ;;  %v1580_v22 = vshrl.u32 %v12293_v1, %v1577_v34  ;;  %v8265_v49 = vsub.s32 %v8201_v5, %v1419_v10  ;;  %v1583_v56 = vshrl.u32 %v12294_v44, %v1577_v34 }
 0x13f   :  { %v1570_v43 = vor.u32 8388608, %v1569_v24  ;;  %v1586_v51 = vshrl.u32 %v12295_v14, %v1577_v34  ;;  %v1579_v7 = vshll.u32 %v12297_v20, %v1576_v38  ;;  %v1582_v23 = vshll.u32 %v12293_v1, %v1576_v38 }
 0x140   :  { %v1314_v11 = vadd.s32 536870912, %v1313_v57  ;;  %v1462_v21 = vand.u32 2139095040, %v8248_v2  ;;  %v1575_v46 = vshrl.u32 %v1574_v55, 5  ;;  %v1585_v8 = vshll.u32 %v12294_v44, %v1576_v38 }
 0x141   :  { %v1588_v61 = vshll.u32 %v12295_v14, %v1576_v38  ;;  %v1589_v5 = vshrl.u32 %v12300_v40, %v1577_v34  ;;  %v1223_v10 = vshll.u32 %v8125_v63, %v8213_v28  ;;  %v1581_v41 = vor.u32 %v1580_v22, %v1579_v7 }
 0x142   :  { %v8277_v24 = vshrl.u32 %v1314_v11, 30  ;;  %v1584_v6 = vor.u32 %v1583_v56, %v1582_v23  ;;  %vm534_vm1 = vcmp.lt.s32.totalorder %v7651_v50, 0  ;;  %vm946_vm2 = vcmp.lt.s32.totalorder %v7726_v60, 0 }
 0x143   :  { %v1587_v54 = vor.u32 %v1586_v51, %v1585_v8  ;;  %v1590_v19 = vor.u32 %v1589_v5, %v1588_v61  ;;  %v1591_v55 = vshll.u32 %v12300_v40, %v1576_v38  ;;  %v1592_v52 = vshrl.u32 %v12301_v32, %v1577_v34 }
 0x144   :  { %12307 = vst [vmem:[#allocation30_spill] sm:$0xff] %v8277_v24  ;;  %v1224_v42 = vshrl.u32 %v1206_v58, %v1222_v36  ;;  %v1228_v37 = vshll.u32 %v1227_v25, 23  ;;  %vm6398_vm3 = vcmp.lt.s32.totalorder %v6397_v47, 0  ;;  %v1610_v0 = vshll.u32 %v1570_v43, 8 }
 0x145   :  { %v1422_v63 = vsub.s32 0, %v8265_v49  ;;  %v1593_v28 = vor.u32 %v1592_v52, %v1591_v55  ;;  %vm1594_vm4 = vcmp.lt.s32.totalorder %v1575_v46, 1  ;;  %v1463_v11 = vshrl.u32 %v1462_v21, 23 }
 0x146   :  { %v1316_v23 = vshll.u32 %v8277_v24, 30  ;;  %vm1596_vm5 = vcmp.lt.s32.totalorder %v1575_v46, 3  ;;  %vm1597_vm6 = vcmp.lt.s32.totalorder %v1575_v46, 4  ;;  %v1602_v22 = vsel %vm1594_vm4, %v1581_v41, %v1584_v6 }
 0x147   :  { %v1599_v56 = vsel %vm1597_vm6, %v1587_v54, 2102212464  ;;  %v1603_v51 = vsel %vm1597_vm6, %v1590_v19, 920167782  ;;  %v1606_v38 = vsel %vm1594_vm4, %v1584_v6, %v1587_v54  ;;  %v1607_v7 = vsel %vm1597_vm6, %v1593_v28, 1326507024 }
 0x148   :  { %v8287_v58 = vsel %vm6398_vm3, 0, %v6397_v47  ;;  %v1578_v36 = vshrl.u32 %v12297_v20, %v1577_v34  ;;  %vm1595_vm7 = vcmp.lt.s32.totalorder %v1575_v46, 2  ;;  %v1604_v52 = vsel %vm1596_vm5, %v1587_v54, %v1603_v51 }
 0x149   :  { %v6408_v25 = vmin.u32 %v1422_v63, %v8265_v49  ;;  %v1605_v43 = vsel %vm1595_vm7, %v1602_v22, %v1604_v52  ;;  %v1608_v21 = vsel %vm1596_vm5, %v1590_v19, %v1607_v7  ;;  %v6411_v8 = vadd.s32 4294967169, %v1463_v11 }
 0x14a   :  { %v8294_v61 = vsub.s32 %v1313_v57, %v1316_v23  ;;  %v1598_v5 = vsel %vm1594_vm4, %v1578_v36, %v1581_v41  ;;  %v1600_v55 = vsel %vm1596_vm5, %v1584_v6, %v1599_v56  ;;  %v1609_v47 = vsel %vm1595_vm7, %v1606_v38, %v1608_v21  ;;  %v299_v38 = vpop.permute.xlu1 %298 }
 0x14b   :  { %v8299_v28 = vmul.u32.u64.low %v1610_v0, %v1609_v47  ;;  %v8300_v34 = vmul.u32.u64.high %v1610_v0, %v1609_v47, %v8299_v28  ;;  %v8302_v24 = vmul.u32.u64.low %v1610_v0, %v1605_v43  ;;  %v8303_v54 = vmul.u32.u64.high %v1610_v0, %v1605_v43, %v8302_v24 }
 0x14c   :  { %v12308_v63 = vxor.u32 2147483648, %v8179_v62  ;;  %v12310_v57 = vxor.u32 2147483648, %v8183_v30  ;;  %v12312_v6 = vand.u32 2147483647, %v8243_v35  ;;  %v1469_v23 = vadd.s32 1, %v6411_v8 }
 0x14d   :  { %v8324_v22 = vor.u32 %v1224_v42, %v1223_v10  ;;  %v8326_v56 = vor.u32 4788187, %v1228_v37  ;;  %v1601_v51 = vsel %vm1595_vm7, %v1598_v5, %v1600_v55  ;;  %v1119_v7 = vsub.s32 32, %v8287_v58 }
 0x14e   :  { %v8311_v19 = vsel %vm534_vm1, %v12308_v63, %v8179_v62  ;;  %v8318_v41 = vsel %vm946_vm2, %v12310_v57, %v8183_v30  ;;  %v8322_v11 = vmul.f32 %v923_v59, %v12312_v6  ;;  %v12146_v62 = vand.u32 2147483647, %v8248_v2 }
 0x14f   :  { %12309 = vst [vmem:[#allocation31_spill] sm:$0xff] %v8311_v19  ;;  %12311 = vst [vmem:[#allocation32_spill] sm:$0xff] %v8318_v41  ;;  %v1123_v36 = vsub.s32 4294967266, %v8287_v58  ;;  %v1424_v30 = vclz %v6408_v25  ;;  %vm1470_vm9 = vcmp.gt.s32.totalorder %v1469_v23, 0  ;;  %v1319_v35 = vsub.s32 0, %v8294_v61 }
 0x150   :  { %vm1619_vm10 = vc.u32 %v8300_v34, %v8302_v24  ;;  %v1620_v42 = vadd.s32 1, %v8303_v54  ;;  %v1471_v37 = vsel %vm1470_vm9, %v1469_v23, 0  ;;  %v1103_v59 = vadd.s32 %v8062_v48, %v8076_v18 }
 0x151   :  { %v1617_v46 = vmul.u32 %v1610_v0, %v1601_v51  ;;  %v1473_v10 = vand.u32 31, %v1471_v37  ;;  %v8339_v52 = vmul.f32 %v8117_v27, %v299_v38  ;;  %v1120_v5 = vshll.u32 %v8192_v9, %v8287_v58 }
 0x152   :  { %v1621_v8 = vsel %vm1619_vm10, %v1620_v42, %v8303_v54  ;;  %v1121_v55 = vshrl.u32 %v1103_v59, %v1119_v7  ;;  %v8347_v47 = vadd.s32 127, %v1123_v36  ;;  %v6409_v0 = vadd.s32 4294967294, %v1424_v30  ;;  %v294_v7 = vpop.permute.xlu0 %293 }
 0x153   :  { %12313 = vst [vmem:[#allocation33_spill] sm:$0xff] %v8339_v52  ;;  %v1622_v48 = vadd.s32 %v1621_v8, %v1617_v46  ;;  %v6404_v18 = vmin.u32 %v1319_v35, %v8294_v61  ;;  %v1466_v28 = vand.u32 8388607, %v12146_v62  ;;  %v1474_v63 = vsub.s32 32, %v1473_v10 }
 0x154   :  { %v1476_v6 = vshll.u32 %v12297_v20, %v1473_v10  ;;  %v1479_v23 = vshll.u32 %v12293_v1, %v1473_v10  ;;  %v1771_v54 = vand.u32 2139095040, %v8339_v52  ;;  %v1482_v51 = vshll.u32 %v12294_v44, %v1473_v10 }
 0x155   :  { %v1623_v57 = vadd.s32 536870912, %v1622_v48  ;;  %v1477_v9 = vshrl.u32 %v12293_v1, %v1474_v63  ;;  %v1480_v58 = vshrl.u32 %v12294_v44, %v1474_v63  ;;  %v1483_v38 = vshrl.u32 %v12295_v14, %v1474_v63 }
 0x156   :  { %v1472_v30 = vshrl.u32 %v1471_v37, 5  ;;  %v1485_v35 = vshll.u32 %v12295_v14, %v1473_v10  ;;  %v1486_v42 = vshrl.u32 %v12300_v40, %v1474_v63  ;;  %v1125_v59 = vshll.u32 %v8347_v47, 23 }
 0x157   :  { %v8359_v36 = vshrl.u32 %v1623_v57, 30  ;;  %v1478_v46 = vor.u32 %v1477_v9, %v1476_v6  ;;  %v1481_v8 = vor.u32 %v1480_v58, %v1479_v23  ;;  %v1484_v62 = vor.u32 %v1483_v38, %v1482_v51 }
 0x158   :  { %vm843_vm11 = vcmp.lt.s32.totalorder %v7761_v33, 0  ;;  %v1467_v25 = vor.u32 8388608, %v1466_v28  ;;  %v1487_v43 = vor.u32 %v1486_v42, %v1485_v35  ;;  %v8367_v41 = vmul.f32 %v8117_v27, %v294_v7 }
 0x159   :  { %12314 = vst [vmem:[#allocation34_spill] sm:$0xff] %v8359_v36  ;;  %v1625_v21 = vshll.u32 %v8359_v36, 30  ;;  %vm6410_vm12 = vcmp.lt.s32.totalorder %v6409_v0, 0  ;;  %v1321_v37 = vclz %v6404_v18  ;;  %v1488_v57 = vshll.u32 %v12300_v40, %v1473_v10 }
 0x15a   :  { %v1489_v60 = vshrl.u32 %v12301_v32, %v1474_v63  ;;  %vm1491_vm13 = vcmp.lt.s32.totalorder %v1472_v30, 1  ;;  %vm1493_vm15 = vcmp.lt.s32.totalorder %v1472_v30, 3  ;;  %vm1494_vm0 = vcmp.lt.s32.totalorder %v1472_v30, 4 }
 0x15b   :  { %v1772_v47 = vshrl.u32 %v1771_v54, 23  ;;  %v1496_v23 = vsel %vm1494_vm0, %v1484_v62, 2102212464  ;;  %v1499_v9 = vsel %vm1491_vm13, %v1478_v46, %v1481_v8  ;;  %v1500_v58 = vsel %vm1494_vm0, %v1487_v43, 920167782 }
 0x15c   :  { %v1490_v6 = vor.u32 %v1489_v60, %v1488_v57  ;;  %v8372_v28 = vsub.s32 %v1622_v48, %v1625_v21  ;;  %v1475_v51 = vshrl.u32 %v12297_v20, %v1474_v63  ;;  %vm1492_vm3 = vcmp.lt.s32.totalorder %v1472_v30, 2 }
 0x15d   :  { %v1501_v18 = vsel %vm1493_vm15, %v1484_v62, %v1500_v58  ;;  %v1503_v38 = vsel %vm1491_vm13, %v1481_v8, %v1484_v62  ;;  %v1507_v35 = vshll.u32 %v1467_v25, 8  ;;  %v6405_v42 = vadd.s32 4294967294, %v1321_v37 }
 0x15e   :  { %v1502_v10 = vsel %vm1492_vm3, %v1499_v9, %v1501_v18  ;;  %v1504_v7 = vsel %vm1494_vm0, %v1490_v6, 1326507024  ;;  %v1495_v60 = vsel %vm1491_vm13, %v1475_v51, %v1478_v46  ;;  %v1497_v54 = vsel %vm1493_vm15, %v1481_v8, %v1496_v23 }
 0x15f   :  { %v1505_v57 = vsel %vm1493_vm15, %v1487_v43, %v1504_v7  ;;  %v8382_v48 = vmul.u32.u64.low %v1507_v35, %v1502_v10  ;;  %v8383_v63 = vmul.u32.u64.high %v1507_v35, %v1502_v10, %v8382_v48  ;;  %v6423_v58 = vadd.s32 4294967169, %v1772_v47 }
 0x160   :  { %v1506_v21 = vsel %vm1492_vm3, %v1503_v38, %v1505_v57  ;;  %v8387_v9 = vsel %vm6410_vm12, 0, %v6409_v0  ;;  %v1628_v62 = vsub.s32 0, %v8372_v28  ;;  %v12315_v46 = vxor.u32 2147483648, %v8322_v11 }
 0x161   :  { %v8390_v25 = vmul.u32.u64.low %v1507_v35, %v1506_v21  ;;  %v8391_v37 = vmul.u32.u64.high %v1507_v35, %v1506_v21, %v8390_v25  ;;  %v8400_v8 = vor.u32 %v1121_v55, %v1120_v5  ;;  %v1498_v6 = vsel %vm1492_vm3, %v1495_v60, %v1497_v54 }
 0x162   :  { %v8398_v43 = vsel %vm843_vm11, %v12315_v46, %v8322_v11  ;;  %v1778_v47 = vadd.s32 1, %v6423_v58  ;;  %v12317_v0 = vand.u32 2147483647, %v8326_v56  ;;  %v12318_v23 = vcvt.s32.f32 %v8324_v22 }
 0x163   :  { %12316 = vst [vmem:[#allocation35_spill] sm:$0xff] %v8398_v43  ;;  %v8409_v18 = vor.u32 4788187, %v1125_v59  ;;  %v12149_v10 = vand.u32 2147483647, %v8339_v52  ;;  %v1668_v38 = vand.u32 2139095040, %v8367_v41  ;;  %v6416_v55 = vmin.u32 %v1628_v62, %v8372_v28 }
 0x164   :  { %v8407_v51 = vmul.f32 %v12318_v23, %v12317_v0  ;;  %v1432_v11 = vsub.s32 4294967266, %v8387_v9  ;;  %vm6406_vm4 = vcmp.lt.s32.totalorder %v6405_v42, 0  ;;  %v1517_v5 = vadd.s32 1, %v8383_v63 }
 0x165   :  { %vm1779_vm5 = vcmp.gt.s32.totalorder %v1778_v47, 0  ;;  %v1514_v30 = vmul.u32 %v1507_v35, %v1498_v6  ;;  %vm1516_vm6 = vc.u32 %v8391_v37, %v8382_v48  ;;  %v1412_v59 = vadd.s32 %v8165_v3, %v8163_v12 }
 0x166   :  { %v1780_v22 = vsel %vm1779_vm5, %v1778_v47, 0  ;;  %v1518_v7 = vsel %vm1516_vm6, %v1517_v5, %v8383_v63  ;;  %v1309_v57 = vadd.s32 %v8226_v26, %v8239_v4  ;;  %v1669_v58 = vshrl.u32 %v1668_v38, 23 }
 0x167   :  { %v1782_v60 = vand.u32 31, %v1780_v22  ;;  %v1519_v21 = vadd.s32 %v1518_v7, %v1514_v30  ;;  %v1433_v35 = vadd.s32 127, %v1432_v11  ;;  %v8426_v62 = vsel %vm6406_vm4, 0, %v6405_v42 }
 0x168   :  { %v1775_v25 = vand.u32 8388607, %v12149_v10  ;;  %v1630_v6 = vclz %v6416_v55  ;;  %v1781_v42 = vshrl.u32 %v1780_v22, 5  ;;  %v6419_v11 = vadd.s32 4294967169, %v1669_v58 }
 0x169   :  { %v1783_v46 = vsub.s32 32, %v1782_v60  ;;  %v1520_v3 = vadd.s32 536870912, %v1519_v21  ;;  %v1785_v12 = vshll.u32 %v12297_v20, %v1782_v60  ;;  %v1788_v63 = vshll.u32 %v12293_v1, %v1782_v60 }
 0x16a   :  { %v1791_v4 = vshll.u32 %v12294_v44, %v1782_v60  ;;  %v1794_v23 = vshll.u32 %v12295_v14, %v1782_v60  ;;  %v1428_v5 = vsub.s32 32, %v8387_v9  ;;  %v1434_v10 = vshll.u32 %v1433_v35, 23 }
 0x16b   :  { %v1786_v47 = vshrl.u32 %v12293_v1, %v1783_v46  ;;  %v1789_v26 = vshrl.u32 %v12294_v44, %v1783_v46  ;;  %v1792_v0 = vshrl.u32 %v12295_v14, %v1783_v46  ;;  %v1795_v38 = vshrl.u32 %v12300_v40, %v1783_v46 }
 0x16c   :  { %v8439_v56 = vshrl.u32 %v1520_v3, 30  ;;  %v1776_v54 = vor.u32 8388608, %v1775_v25  ;;  %v1325_v43 = vsub.s32 32, %v8426_v62  ;;  %v6417_v33 = vadd.s32 4294967294, %v1630_v6 }
 0x16d   :  { %v1787_v55 = vor.u32 %v1786_v47, %v1785_v12  ;;  %v1790_v30 = vor.u32 %v1789_v26, %v1788_v63  ;;  %v1793_v7 = vor.u32 %v1792_v0, %v1791_v4  ;;  %v1796_v36 = vor.u32 %v1795_v38, %v1794_v23 }
 0x16e   :  { %12319 = vst [vmem:[#allocation36_spill] sm:$0xff] %v8439_v56  ;;  %v1797_v22 = vshll.u32 %v12300_v40, %v1782_v60  ;;  %v1798_v19 = vshrl.u32 %v12301_v32, %v1783_v46  ;;  %vm1800_vm7 = vcmp.lt.s32.totalorder %v1781_v42, 1  ;;  %vm1802_vm9 = vcmp.lt.s32.totalorder %v1781_v42, 3 }
 0x16f   :  { %vm1803_vm10 = vcmp.lt.s32.totalorder %v1781_v42, 4  ;;  %v1675_v58 = vadd.s32 1, %v6419_v11  ;;  %v1808_v63 = vsel %vm1800_vm7, %v1787_v55, %v1790_v30  ;;  %v1522_v3 = vshll.u32 %v8439_v56, 30 }
 0x170   :  { %v1799_v50 = vor.u32 %v1798_v19, %v1797_v22  ;;  %v1805_v12 = vsel %vm1803_vm10, %v1793_v7, 2102212464  ;;  %v1809_v35 = vsel %vm1803_vm10, %v1796_v36, 920167782  ;;  %v1784_v25 = vshrl.u32 %v12297_v20, %v1783_v46 }
 0x171   :  { %vm1801_vm12 = vcmp.lt.s32.totalorder %v1781_v42, 2  ;;  %v1810_v6 = vsel %vm1802_vm9, %v1793_v7, %v1809_v35  ;;  %v1812_v47 = vsel %vm1800_vm7, %v1790_v30, %v1793_v7  ;;  %v1816_v4 = vshll.u32 %v1776_v54, 8 }
 0x172   :  { %v1811_v60 = vsel %vm1801_vm12, %v1808_v63, %v1810_v6  ;;  %v1813_v26 = vsel %vm1803_vm10, %v1799_v50, 1326507024  ;;  %v1329_v0 = vsub.s32 4294967266, %v8426_v62  ;;  %v1804_v19 = vsel %vm1800_vm7, %v1784_v25, %v1787_v55 }
 0x173   :  { %v1806_v23 = vsel %vm1802_vm9, %v1790_v30, %v1805_v12  ;;  %v1814_v38 = vsel %vm1802_vm9, %v1796_v36, %v1813_v26  ;;  %v8455_v46 = vmul.u32.u64.low %v1816_v4, %v1811_v60  ;;  %v8456_v22 = vmul.u32.u64.high %v1816_v4, %v1811_v60, %v8455_v46 }
 0x174   :  { %v1815_v11 = vsel %vm1801_vm12, %v1812_v47, %v1814_v38  ;;  %vm1676_vm13 = vcmp.gt.s32.totalorder %v1675_v58, 0  ;;  %vm6418_vm15 = vcmp.lt.s32.totalorder %v6417_v33, 0  ;;  %v8459_v63 = vsub.s32 %v1519_v21, %v1522_v3 }
 0x175   :  { %v8461_v50 = vmul.u32.u64.low %v1816_v4, %v1815_v11  ;;  %v8462_v54 = vmul.u32.u64.high %v1816_v4, %v1815_v11, %v8461_v50  ;;  %v1430_v7 = vshrl.u32 %v1412_v59, %v1428_v5  ;;  %v8464_v35 = vor.u32 4788187, %v1434_v10 }
 0x176   :  { %v1807_v55 = vsel %vm1801_vm12, %v1804_v19, %v1806_v23  ;;  %v1677_v30 = vsel %vm1676_vm13, %v1675_v58, 0  ;;  %v1327_v36 = vshrl.u32 %v1309_v57, %v1325_v43  ;;  %v1330_v12 = vadd.s32 127, %v1329_v0  ;;  %v309_v57 = vpop.permute.xlu1 %308 }
 0x177   :  { %v12156_v25 = vand.u32 2147483647, %v8367_v41  ;;  %v1679_v6 = vand.u32 31, %v1677_v30  ;;  %v1429_v60 = vshll.u32 %v8265_v49, %v8387_v9  ;;  %v1326_v21 = vshll.u32 %v8294_v61, %v8426_v62 }
 0x178   :  { %v8472_v3 = vsel %vm6418_vm15, 0, %v6417_v33  ;;  %v1826_v59 = vadd.s32 1, %v8456_v22  ;;  %v1525_v10 = vsub.s32 0, %v8459_v63  ;;  %v1823_v42 = vmul.u32 %v1816_v4, %v1807_v55  ;;  %v304_v55 = vpop.permute.xlu0 %303 }
 0x179   :  { %vm1825_vm0 = vc.u32 %v8462_v54, %v8455_v46  ;;  %v1680_v43 = vsub.s32 32, %v1679_v6  ;;  %v8478_v5 = vor.u32 %v1430_v7, %v1429_v60  ;;  %v1618_v49 = vadd.s32 %v8302_v24, %v8300_v34 }
 0x17a   :  { %v1827_v33 = vsel %vm1825_vm0, %v1826_v59, %v8456_v22  ;;  %v8484_v61 = vor.u32 %v1327_v36, %v1326_v21  ;;  %v1331_v9 = vshll.u32 %v1330_v12, 23  ;;  %v1672_v47 = vand.u32 8388607, %v12156_v25 }
 0x17b   :  { %v8486_v62 = vadd.s32 %v1827_v33, %v1823_v42  ;;  %v1638_v26 = vsub.s32 4294967266, %v8472_v3  ;;  %v1683_v4 = vshrl.u32 %v12293_v1, %v1680_v43  ;;  %v1686_v0 = vshrl.u32 %v12294_v44, %v1680_v43 }
 0x17c   :  { %v8494_v19 = vmul.f32 %v8117_v27, %v309_v57  ;;  %v6412_v24 = vmin.u32 %v1525_v10, %v8459_v63  ;;  %v1682_v34 = vshll.u32 %v12297_v20, %v1679_v6  ;;  %v1685_v23 = vshll.u32 %v12293_v1, %v1679_v6 }
 0x17d   :  { %v1689_v38 = vshrl.u32 %v12295_v14, %v1680_v43  ;;  %v1678_v11 = vshrl.u32 %v1677_v30, 5  ;;  %v1688_v22 = vshll.u32 %v12294_v44, %v1679_v6  ;;  %v1691_v50 = vshll.u32 %v12295_v14, %v1679_v6 }
 0x17e   :  { %12320 = vst [vmem:[#allocation37_spill] sm:$0xff] %v8494_v19  ;;  %v1692_v7 = vshrl.u32 %v12300_v40, %v1680_v43  ;;  %v1332_v36 = vor.u32 4788187, %v1331_v9  ;;  %v1829_v12 = vadd.s32 536870912, %v8486_v62  ;;  %v1684_v60 = vor.u32 %v1683_v4, %v1682_v34 }
 0x17f   :  { %v1687_v21 = vor.u32 %v1686_v0, %v1685_v23  ;;  %v1690_v59 = vor.u32 %v1689_v38, %v1688_v22  ;;  %v1694_v42 = vshll.u32 %v12300_v40, %v1679_v6  ;;  %v1695_v57 = vshrl.u32 %v12301_v32, %v1680_v43 }
 0x180   :  { %v1693_v10 = vor.u32 %v1692_v7, %v1691_v50  ;;  %v1634_v30 = vsub.s32 32, %v8472_v3  ;;  %v1639_v33 = vadd.s32 127, %v1638_v26  ;;  %v1673_v25 = vor.u32 8388608, %v1672_v47 }
 0x181   :  { %v8508_v58 = vmul.f32 %v8117_v27, %v304_v55  ;;  %v1527_v56 = vclz %v6412_v24  ;;  %v1696_v17 = vor.u32 %v1695_v57, %v1694_v42  ;;  %vm1697_vm3 = vcmp.lt.s32.totalorder %v1678_v11, 1 }
 0x182   :  { %v1977_v9 = vand.u32 2139095040, %v8494_v19  ;;  %v8511_v4 = vshrl.u32 %v1829_v12, 30  ;;  %vm1699_vm4 = vcmp.lt.s32.totalorder %v1678_v11, 3  ;;  %vm1700_vm5 = vcmp.lt.s32.totalorder %v1678_v11, 4 }
 0x183   :  { %v1705_v6 = vsel %vm1697_vm3, %v1684_v60, %v1687_v21  ;;  %v1702_v0 = vsel %vm1700_vm5, %v1690_v59, 2102212464  ;;  %v1706_v34 = vsel %vm1700_vm5, %v1693_v10, 920167782  ;;  %v1709_v23 = vsel %vm1697_vm3, %v1687_v21, %v1690_v59 }
 0x184   :  { %12321 = vst [vmem:[#allocation38_spill] sm:$0xff] %v8511_v4  ;;  %v1710_v26 = vsel %vm1700_vm5, %v1696_v17, 1326507024  ;;  %v1681_v47 = vshrl.u32 %v12297_v20, %v1680_v43  ;;  %vm1698_vm6 = vcmp.lt.s32.totalorder %v1678_v11, 2  ;;  %v1707_v24 = vsel %vm1699_vm4, %v1690_v59, %v1706_v34 }
 0x185   :  { %v1713_v38 = vshll.u32 %v1673_v25, 8  ;;  %v6413_v22 = vadd.s32 4294967294, %v1527_v56  ;;  %v1708_v50 = vsel %vm1698_vm6, %v1705_v6, %v1707_v24  ;;  %v1711_v7 = vsel %vm1699_vm4, %v1693_v10, %v1710_v26 }
 0x186   :  { %v1978_v55 = vshrl.u32 %v1977_v9, 23  ;;  %v1831_v12 = vshll.u32 %v8511_v4, 30  ;;  %v1701_v42 = vsel %vm1697_vm3, %v1681_v47, %v1684_v60  ;;  %v1703_v57 = vsel %vm1699_vm4, %v1687_v21, %v1702_v0 }
 0x187   :  { %v1712_v17 = vsel %vm1698_vm6, %v1709_v23, %v1711_v7  ;;  %v8526_v16 = vmul.u32.u64.low %v1713_v38, %v1708_v50  ;;  %v8527_v59 = vmul.u32.u64.high %v1713_v38, %v1708_v50, %v8526_v16  ;;  %v12322_v56 = vand.u32 2147483647, %v8409_v18 }
 0x188   :  { %v8523_v15 = vmul.u32.u64.low %v1713_v38, %v1712_v17  ;;  %v8524_v43 = vmul.u32.u64.high %v1713_v38, %v1712_v17, %v8523_v15  ;;  %v12323_v25 = vcvt.s32.f32 %v8400_v8  ;;  %v1333_v9 = vand.u32 2147483647, %v1332_v36 }
 0x189   :  { %v1636_v6 = vshrl.u32 %v1618_v49, %v1634_v30  ;;  %v6431_v60 = vadd.s32 4294967169, %v1978_v55  ;;  %v1438_v21 = vcvt.s32.f32 %v8478_v5  ;;  %v1335_v0 = vcvt.s32.f32 %v8484_v61 }
 0x18a   :  { %v8534_v10 = vmul.f32 %v12323_v25, %v12322_v56  ;;  %v1640_v34 = vshll.u32 %v1639_v33, 23  ;;  %v1704_v15 = vsel %vm1698_vm6, %v1701_v42, %v1703_v57  ;;  %v1635_v23 = vshll.u32 %v8372_v28, %v8472_v3  ;;  %v319_v33 = vpop.permute.xlu1 %318 }
 0x18b   :  { %v8542_v26 = vsub.s32 %v8486_v62, %v1831_v12  ;;  %v1984_v18 = vadd.s32 1, %v6431_v60  ;;  %v1874_v8 = vand.u32 2139095040, %v8508_v58  ;;  %v12324_v36 = vand.u32 2147483647, %v8464_v35 }
 0x18c   :  { %vm6414_vm7 = vcmp.lt.s32.totalorder %v6413_v22, 0  ;;  %vm1722_vm9 = vc.u32 %v8524_v43, %v8526_v16  ;;  %v1723_v5 = vadd.s32 1, %v8527_v59  ;;  %v8552_v61 = vmul.f32 %v1335_v0, %v1333_v9 }
 0x18d   :  { %v8547_v49 = vmul.f32 %v1438_v21, %v12324_v36  ;;  %v8554_v11 = vor.u32 %v1636_v6, %v1635_v23  ;;  %v1720_v28 = vmul.u32 %v1713_v38, %v1704_v15  ;;  %vm1985_vm10 = vcmp.gt.s32.totalorder %v1984_v18, 0 }
 0x18e   :  { %v8556_v3 = vor.u32 4788187, %v1640_v34  ;;  %v1724_v62 = vsel %vm1722_vm9, %v1723_v5, %v8527_v59  ;;  %v12163_v35 = vand.u32 2147483647, %v8494_v19  ;;  %v1986_v30 = vsel %vm1985_vm10, %v1984_v18, 0 }
 0x18f   :  { %v8560_v47 = vsel %vm6414_vm7, 0, %v6413_v22  ;;  %v1834_v24 = vsub.s32 0, %v8542_v26  ;;  %v8563_v50 = vadd.s32 %v1724_v62, %v1720_v28  ;;  %v1875_v7 = vshrl.u32 %v1874_v8, 23 }
 0x190   :  { %v1234_v55 = vxor.u32 2147483648, %v8407_v51  ;;  %v1988_v42 = vand.u32 31, %v1986_v30  ;;  %v8572_v22 = vadd.s32 %v8382_v48, %v8391_v37  ;;  %v8575_v59 = vmul.f32 %v8117_v27, %v319_v33 }
 0x191   :  { %v1535_v25 = vsub.s32 4294967266, %v8560_v47  ;;  %v1981_v9 = vand.u32 8388607, %v12163_v35  ;;  %v6424_v60 = vmin.u32 %v1834_v24, %v8542_v26  ;;  %v1726_v21 = vadd.s32 536870912, %v8563_v50 }
 0x192   :  { %v1989_v6 = vsub.s32 32, %v1988_v42  ;;  %v1991_v0 = vshll.u32 %v12297_v20, %v1988_v42  ;;  %v6427_v34 = vadd.s32 4294967169, %v1875_v7  ;;  %v1994_v27 = vshll.u32 %v12293_v1, %v1988_v42 }
 0x193   :  { %v8588_v23 = vshrl.u32 %v1986_v30, 5  ;;  %v1997_v18 = vshll.u32 %v12294_v44, %v1988_v42  ;;  %v2000_v8 = vshll.u32 %v12295_v14, %v1988_v42  ;;  %v1982_v5 = vor.u32 8388608, %v1981_v9 }
 0x194   :  { %v1992_v48 = vshrl.u32 %v12293_v1, %v1989_v6  ;;  %v1995_v37 = vshrl.u32 %v12294_v44, %v1989_v6  ;;  %v1998_v15 = vshrl.u32 %v12295_v14, %v1989_v6  ;;  %v2001_v36 = vshrl.u32 %v12300_v40, %v1989_v6 }
 0x195   :  { %v12164_v33 = vand.u32 2147483647, %v8508_v58  ;;  %v2003_v35 = vshll.u32 %v12300_v40, %v1988_v42  ;;  %v2004_v17 = vshrl.u32 %v12301_v32, %v1989_v6  ;;  %vm1152_vm12 = vcmp.lt.s32.totalorder %v7842_v39, 0 }
 0x196   :  { %v1993_v28 = vor.u32 %v1992_v48, %v1991_v0  ;;  %v1996_v62 = vor.u32 %v1995_v37, %v1994_v27  ;;  %v1999_v24 = vor.u32 %v1998_v15, %v1997_v18  ;;  %v2002_v7 = vor.u32 %v2001_v36, %v2000_v8 }
 0x197   :  { %vm1049_vm13 = vcmp.lt.s32.totalorder %v7911_v53, 0  ;;  %vm12207_vm15 = vcmp.lt.s32.totalorder %v8015_v31, 0  ;;  %vm1255_vm0 = vcmp.lt.s32.totalorder %v8083_v45, 0  ;;  %v1531_v30 = vsub.s32 32, %v8560_v47 }
 0x198   :  { %v1536_v9 = vadd.s32 127, %v1535_v25  ;;  %v8601_v0 = vshrl.u32 %v1726_v21, 30  ;;  %v1881_v48 = vadd.s32 1, %v6427_v34  ;;  %v1836_v27 = vclz %v6424_v60 }
 0x199   :  { %v2005_v37 = vor.u32 %v2004_v17, %v2003_v35  ;;  %vm2006_vm3 = vcmp.lt.s32.totalorder %v8588_v23, 1  ;;  %vm2009_vm4 = vcmp.lt.s32.totalorder %v8588_v23, 4  ;;  %vm2008_vm5 = vcmp.lt.s32.totalorder %v8588_v23, 3 }
 0x19a   :  { %12325 = vst [vmem:[#allocation39_spill] sm:$0xff] %v8601_v0  ;;  %v2014_v42 = vsel %vm2006_vm3, %v1993_v28, %v1996_v62  ;;  %v2015_v15 = vsel %vm2009_vm4, %v2002_v7, 920167782  ;;  %v2022_v18 = vshll.u32 %v1982_v5, 8  ;;  %vm2007_vm6 = vcmp.lt.s32.totalorder %v8588_v23, 2 }
 0x19b   :  { %v2016_v25 = vsel %vm2008_vm5, %v1999_v24, %v2015_v15  ;;  %v2018_v60 = vsel %vm2006_vm3, %v1996_v62, %v1999_v24  ;;  %v2183_v35 = vand.u32 2139095040, %v8575_v59  ;;  %v1728_v17 = vshll.u32 %v8601_v0, 30 }
 0x19c   :  { %v2017_v21 = vsel %vm2007_vm6, %v2014_v42, %v2016_v25  ;;  %v2019_v34 = vsel %vm2009_vm4, %v2005_v37, 1326507024  ;;  %vm1882_vm7 = vcmp.gt.s32.totalorder %v1881_v48, 0  ;;  %v1990_v8 = vshrl.u32 %v12297_v20, %v1989_v6 }
 0x19d   :  { %v2011_v36 = vsel %vm2009_vm4, %v1999_v24, 2102212464  ;;  %v2020_v5 = vsel %vm2008_vm5, %v2002_v7, %v2019_v34  ;;  %v1878_v15 = vand.u32 8388607, %v12164_v33  ;;  %v1883_v38 = vsel %vm1882_vm7, %v1881_v48, 0 }
 0x19e   :  { %v2021_v56 = vsel %vm2007_vm6, %v2018_v60, %v2020_v5  ;;  %v8624_v57 = vmul.u32.u64.low %v2022_v18, %v2017_v21  ;;  %v8625_v12 = vmul.u32.u64.high %v2022_v18, %v2017_v21, %v8624_v57  ;;  %v6425_v42 = vadd.s32 4294967294, %v1836_v27 }
 0x19f   :  { %v8628_v37 = vmul.u32.u64.low %v2022_v18, %v2021_v56  ;;  %v8629_v25 = vmul.u32.u64.high %v2022_v18, %v2021_v56, %v8628_v37  ;;  %v2184_v6 = vshrl.u32 %v2183_v35, 23  ;;  %v8632_v24 = vsub.s32 %v8563_v50, %v1728_v17 }
 0x1a0   :  { %v2010_v7 = vsel %vm2006_vm3, %v1990_v8, %v1993_v28  ;;  %v2012_v34 = vsel %vm2008_vm5, %v1996_v62, %v2011_v36  ;;  %v1885_v60 = vand.u32 31, %v1883_v38  ;;  %v8643_v48 = vsel %vm1152_vm12, %v1234_v55, %v8407_v51 }
 0x1a1   :  { %12326 = vst [vmem:[#allocation40_spill] sm:$0xff] %v8643_v48  ;;  %v12327_v56 = vxor.u32 2147483648, %v8534_v10  ;;  %v12329_v28 = vxor.u32 2147483648, %v8547_v49  ;;  %v12331_v27 = vxor.u32 2147483648, %v8552_v61  ;;  %v12333_v55 = vand.u32 2147483647, %v8556_v3 }
 0x1a2   :  { %v12334_v35 = vcvt.s32.f32 %v8554_v11  ;;  %v8673_v17 = vshrl.u32 %v8572_v22, %v1531_v30  ;;  %v2032_v21 = vadd.s32 1, %v8625_v12  ;;  %v1537_v8 = vshll.u32 %v1536_v9, 23 }
 0x1a3   :  { %v8650_v50 = vsel %vm1049_vm13, %v12327_v56, %v8534_v10  ;;  %v8657_v62 = vsel %vm12207_vm15, %v12329_v28, %v8547_v49  ;;  %v8664_v51 = vsel %vm1255_vm0, %v12331_v27, %v8552_v61  ;;  %v1886_v49 = vsub.s32 32, %v1885_v60 }
 0x1a4   :  { %12328 = vst [vmem:[#allocation41_spill] sm:$0xff] %v8650_v50  ;;  %12330 = vst [vmem:[#allocation42_spill] sm:$0xff] %v8657_v62  ;;  %v8670_v10 = vmul.f32 %v12334_v35, %v12333_v55  ;;  %vm6426_vm9 = vcmp.lt.s32.totalorder %v6425_v42, 0  ;;  %v2013_v36 = vsel %vm2007_vm6, %v2010_v7, %v2012_v34  ;;  %v1879_v5 = vor.u32 8388608, %v1878_v15 }
 0x1a5   :  { %12332 = vst [vmem:[#allocation43_spill] sm:$0xff] %v8664_v51  ;;  %v1731_v61 = vsub.s32 0, %v8632_v24  ;;  %vm2031_vm10 = vc.u32 %v8629_v25, %v8624_v57  ;;  %v1889_v11 = vshrl.u32 %v12293_v1, %v1886_v49  ;;  %v6439_v3 = vadd.s32 4294967169, %v2184_v6 }
 0x1a6   :  { %v2033_v22 = vsel %vm2031_vm10, %v2032_v21, %v8625_v12  ;;  %v1888_v30 = vshll.u32 %v12297_v20, %v1885_v60  ;;  %v1891_v37 = vshll.u32 %v12293_v1, %v1885_v60  ;;  %v1892_v9 = vshrl.u32 %v12294_v44, %v1886_v49 }
 0x1a7   :  { %v2029_v56 = vmul.u32 %v2022_v18, %v2013_v36  ;;  %v1884_v23 = vshrl.u32 %v1883_v38, 5  ;;  %v1894_v15 = vshll.u32 %v12294_v44, %v1885_v60  ;;  %v1895_v7 = vshrl.u32 %v12295_v14, %v1886_v49 }
 0x1a8   :  { %v8688_v34 = vor.u32 4788187, %v1537_v8  ;;  %v8691_v28 = vsel %vm6426_vm9, 0, %v6425_v42  ;;  %v1890_v6 = vor.u32 %v1889_v11, %v1888_v30  ;;  %v1893_v27 = vor.u32 %v1892_v9, %v1891_v37 }
 0x1a9   :  { %v8693_v12 = vadd.s32 %v2033_v22, %v2029_v56  ;;  %v1896_v55 = vor.u32 %v1895_v7, %v1894_v15  ;;  %v1897_v35 = vshll.u32 %v12295_v14, %v1885_v60  ;;  %v1898_v21 = vshrl.u32 %v12300_v40, %v1886_v49 }
 0x1aa   :  { %v6420_v38 = vmin.u32 %v1731_v61, %v8632_v24  ;;  %v1900_v18 = vshll.u32 %v12300_v40, %v1885_v60  ;;  %v1901_v36 = vshrl.u32 %v12301_v32, %v1886_v49  ;;  %v1919_v8 = vshll.u32 %v1879_v5, 8 }
 0x1ab   :  { %v1899_v33 = vor.u32 %v1898_v21, %v1897_v35  ;;  %vm1903_vm3 = vcmp.lt.s32.totalorder %v1884_v23, 1  ;;  %vm1906_vm4 = vcmp.lt.s32.totalorder %v1884_v23, 4  ;;  %v2190_v42 = vadd.s32 1, %v6439_v3 }
 0x1ac   :  { %v1902_v11 = vor.u32 %v1901_v36, %v1900_v18  ;;  %vm1905_vm5 = vcmp.lt.s32.totalorder %v1884_v23, 3  ;;  %v1908_v22 = vsel %vm1906_vm4, %v1896_v55, 2102212464  ;;  %v1911_v30 = vsel %vm1903_vm3, %v1890_v6, %v1893_v27 }
 0x1ad   :  { %v2035_v37 = vadd.s32 536870912, %v8693_v12  ;;  %v1887_v9 = vshrl.u32 %v12297_v20, %v1886_v49  ;;  %v1912_v56 = vsel %vm1906_vm4, %v1899_v33, 920167782  ;;  %v1915_v15 = vsel %vm1903_vm3, %v1893_v27, %v1896_v55 }
 0x1ae   :  { %v1733_v61 = vclz %v6420_v38  ;;  %vm1904_vm6 = vcmp.lt.s32.totalorder %v1884_v23, 2  ;;  %v1913_v60 = vsel %vm1905_vm5, %v1896_v55, %v1912_v56  ;;  %v1916_v7 = vsel %vm1906_vm4, %v1902_v11, 1326507024 }
 0x1af   :  { %v1907_v4 = vsel %vm1903_vm3, %v1887_v9, %v1890_v6  ;;  %v1909_v5 = vsel %vm1905_vm5, %v1893_v27, %v1908_v22  ;;  %v1914_v35 = vsel %vm1904_vm6, %v1911_v30, %v1913_v60  ;;  %v1917_v21 = vsel %vm1905_vm5, %v1899_v33, %v1916_v7  ;;  %v314_v30 = vpop.permute.xlu0 %313 }
 0x1b0   :  { %v1844_v3 = vsub.s32 4294967266, %v8691_v28  ;;  %v1918_v18 = vsel %vm1904_vm6, %v1915_v15, %v1917_v21  ;;  %v8703_v36 = vmul.u32.u64.low %v1919_v8, %v1914_v35  ;;  %v8704_v0 = vmul.u32.u64.high %v1919_v8, %v1914_v35, %v8703_v36 }
 0x1b1   :  { %v8707_v62 = vshrl.u32 %v2035_v37, 30  ;;  %v8709_v49 = vmul.u32.u64.low %v1919_v8, %v1918_v18  ;;  %v8710_v31 = vmul.u32.u64.high %v1919_v8, %v1918_v18, %v8709_v49  ;;  %vm2191_vm7 = vcmp.gt.s32.totalorder %v2190_v42, 0 }
 0x1b2   :  { %v1532_v23 = vshll.u32 %v8459_v63, %v8560_v47  ;;  %v1840_v6 = vsub.s32 32, %v8691_v28  ;;  %v1910_v27 = vsel %vm1904_vm6, %v1907_v4, %v1909_v5  ;;  %v2192_v33 = vsel %vm2191_vm7, %v2190_v42, 0 }
 0x1b3   :  { %12335 = vst [vmem:[#allocation44_spill] sm:$0xff] %v8707_v62  ;;  %v1824_v55 = vadd.s32 %v8455_v46, %v8462_v54  ;;  %v6421_v38 = vadd.s32 4294967294, %v1733_v61  ;;  %v12171_v11 = vand.u32 2147483647, %v8575_v59  ;;  %v2194_v22 = vand.u32 31, %v2192_v33 }
 0x1b4   :  { %v8719_v37 = vor.u32 %v8673_v17, %v1532_v23  ;;  %v1845_v56 = vadd.s32 127, %v1844_v3  ;;  %v1929_v63 = vadd.s32 1, %v8704_v0  ;;  %v2037_v47 = vshll.u32 %v8707_v62, 30  ;;  %v8732_v17 = vld [vmem:[%s12273_s0] ss:$0 sm:$0xff] }
 0x1b5   :  { %v1926_v4 = vmul.u32 %v1919_v8, %v1910_v27  ;;  %vm1928_vm9 = vc.u32 %v8710_v31, %v8703_v36  ;;  %v2195_v46 = vsub.s32 32, %v2194_v22  ;;  %v1841_v54 = vshll.u32 %v8542_v26, %v8691_v28 }
 0x1b6   :  { %v1842_v42 = vshrl.u32 %v1824_v55, %v1840_v6  ;;  %v1930_v15 = vsel %vm1928_vm9, %v1929_v63, %v8704_v0  ;;  %v8735_v61 = vmul.f32 %v8732_v17, %v314_v30  ;;  %vm6422_vm10 = vcmp.lt.s32.totalorder %v6421_v38, 0 }
 0x1b7   :  { %v1931_v8 = vadd.s32 %v1930_v15, %v1926_v4  ;;  %v2187_v60 = vand.u32 8388607, %v12171_v11  ;;  %v2198_v7 = vshrl.u32 %v12293_v1, %v2195_v46  ;;  %v1846_v5 = vshll.u32 %v1845_v56, 23 }
 0x1b8   :  { %v2201_v26 = vshrl.u32 %v12294_v44, %v2195_v46  ;;  %v2204_v0 = vshrl.u32 %v12295_v14, %v2195_v46  ;;  %v2207_v28 = vshrl.u32 %v12300_v40, %v2195_v46  ;;  %v8744_v35 = vsub.s32 %v8693_v12, %v2037_v47 }
 0x1b9   :  { %v1932_v21 = vadd.s32 536870912, %v1931_v8  ;;  %v2197_v3 = vshll.u32 %v12297_v20, %v2194_v22  ;;  %v2200_v18 = vshll.u32 %v12293_v1, %v2194_v22  ;;  %v8748_v49 = vsel %vm6422_vm10, 0, %v6421_v38 }
 0x1ba   :  { %v2193_v23 = vshrl.u32 %v2192_v33, 5  ;;  %v2203_v6 = vshll.u32 %v12294_v44, %v2194_v22  ;;  %v2206_v27 = vshll.u32 %v12295_v14, %v2194_v22  ;;  %v2188_v30 = vor.u32 8388608, %v2187_v60 }
 0x1bb   :  { %v8752_v55 = vshrl.u32 %v1932_v21, 30  ;;  %v2199_v56 = vor.u32 %v2198_v7, %v2197_v3  ;;  %v2202_v63 = vor.u32 %v2201_v26, %v2200_v18  ;;  %v2209_v47 = vshll.u32 %v12300_v40, %v2194_v22 }
 0x1bc   :  { %v2205_v4 = vor.u32 %v2204_v0, %v2203_v6  ;;  %v2208_v12 = vor.u32 %v2207_v28, %v2206_v27  ;;  %v2210_v15 = vshrl.u32 %v12301_v32, %v2195_v46  ;;  %v8756_v11 = vor.u32 %v1842_v42, %v1841_v54  ;;  %v329_v0 = vpop.permute.xlu1 %328 }
 0x1bd   :  { %12336 = vst [vmem:[#allocation45_spill] sm:$0xff] %v8752_v55  ;;  %v8758_v38 = vor.u32 4788187, %v1846_v5  ;;  %v1741_v33 = vsub.s32 4294967266, %v8748_v49  ;;  %v2040_v9 = vsub.s32 0, %v8744_v35  ;;  %v1934_v21 = vshll.u32 %v8752_v55, 30 }
 0x1be   :  { %v2211_v62 = vor.u32 %v2210_v15, %v2209_v47  ;;  %vm2212_vm3 = vcmp.lt.s32.totalorder %v2193_v23, 1  ;;  %v2080_v60 = vand.u32 2139095040, %v8735_v61  ;;  %vm2214_vm4 = vcmp.lt.s32.totalorder %v2193_v23, 3 }
 0x1bf   :  { %vm2215_vm5 = vcmp.lt.s32.totalorder %v2193_v23, 4  ;;  %v2220_v22 = vsel %vm2212_vm3, %v2199_v56, %v2202_v63  ;;  %v2228_v7 = vshll.u32 %v2188_v30, 8  ;;  %v2224_v42 = vsel %vm2212_vm3, %v2202_v63, %v2205_v4 }
 0x1c0   :  { %v2217_v26 = vsel %vm2215_vm5, %v2205_v4, 2102212464  ;;  %v2221_v54 = vsel %vm2215_vm5, %v2208_v12, 920167782  ;;  %v2225_v5 = vsel %vm2215_vm5, %v2211_v62, 1326507024  ;;  %v6432_v28 = vmin.u32 %v2040_v9, %v8744_v35 }
 0x1c1   :  { %v2196_v3 = vshrl.u32 %v12297_v20, %v2195_v46  ;;  %vm2213_vm6 = vcmp.lt.s32.totalorder %v2193_v23, 2  ;;  %v2222_v18 = vsel %vm2214_vm4, %v2205_v4, %v2221_v54  ;;  %vm12191_vm7 = vcmp.lt.s32.totalorder %v8120_v13, 0 }
 0x1c2   :  { %v8770_v6 = vsub.s32 %v1931_v8, %v1934_v21  ;;  %v2223_v27 = vsel %vm2213_vm6, %v2220_v22, %v2222_v18  ;;  %v2226_v30 = vsel %vm2214_vm4, %v2208_v12, %v2225_v5  ;;  %v2081_v47 = vshrl.u32 %v2080_v60, 23 }
 0x1c3   :  { %v2216_v15 = vsel %vm2212_vm3, %v2196_v3, %v2199_v56  ;;  %v2218_v62 = vsel %vm2214_vm4, %v2202_v63, %v2217_v26  ;;  %v2227_v9 = vsel %vm2213_vm6, %v2224_v42, %v2226_v30  ;;  %v8778_v46 = vmul.f32 %v8732_v17, %v329_v0 }
 0x1c4   :  { %v8780_v55 = vmul.u32.u64.low %v2228_v7, %v2227_v9  ;;  %v8781_v4 = vmul.u32.u64.high %v2228_v7, %v2227_v9, %v8780_v55  ;;  %v8783_v54 = vmul.u32.u64.low %v2228_v7, %v2223_v27  ;;  %v8784_v8 = vmul.u32.u64.high %v2228_v7, %v2223_v27, %v8783_v54 }
 0x1c5   :  { %12337 = vst [vmem:[#allocation46_spill] sm:$0xff] %v8778_v46  ;;  %v1541_v21 = vcvt.s32.f32 %v8719_v37  ;;  %v1742_v12 = vadd.s32 127, %v1741_v33  ;;  %v12176_v60 = vand.u32 2147483647, %v8735_v61  ;;  %v6435_v56 = vadd.s32 4294967169, %v2081_v47 }
 0x1c6   :  { %v1646_v63 = vxor.u32 2147483648, %v8670_v10  ;;  %v2042_v22 = vclz %v6432_v28  ;;  %v1937_v26 = vsub.s32 0, %v8770_v6  ;;  %v2219_v42 = vsel %vm2213_vm6, %v2216_v15, %v2218_v62 }
 0x1c7   :  { %v12338_v5 = vand.u32 2147483647, %v8688_v34  ;;  %v1850_v0 = vcvt.s32.f32 %v8756_v11  ;;  %v2087_v3 = vadd.s32 1, %v6435_v56  ;;  %v2389_v37 = vand.u32 2139095040, %v8778_v46 }
 0x1c8   :  { %v1848_v33 = vand.u32 2147483647, %v8758_v38  ;;  %v1737_v18 = vsub.s32 32, %v8748_v49  ;;  %vm2237_vm9 = vc.u32 %v8781_v4, %v8783_v54  ;;  %v2238_v28 = vadd.s32 1, %v8784_v8  ;;  %v324_v38 = vpop.permute.xlu0 %323 }
 0x1c9   :  { %v8794_v55 = vmul.f32 %v1541_v21, %v12338_v5  ;;  %v1743_v23 = vshll.u32 %v1742_v12, 23  ;;  %v2235_v27 = vmul.u32 %v2228_v7, %v2219_v42  ;;  %v2084_v34 = vand.u32 8388607, %v12176_v60 }
 0x1ca   :  { %vm2088_vm10 = vcmp.gt.s32.totalorder %v2087_v3, 0  ;;  %v6433_v30 = vadd.s32 4294967294, %v2042_v22  ;;  %v6428_v11 = vmin.u32 %v1937_v26, %v8770_v6  ;;  %v2239_v47 = vsel %vm2237_vm9, %v2238_v28, %v8784_v8 }
 0x1cb   :  { %v2089_v15 = vsel %vm2088_vm10, %v2087_v3, 0  ;;  %v8810_v62 = vsel %vm12191_vm7, %v1646_v63, %v8670_v10  ;;  %v1721_v9 = vadd.s32 %v8526_v16, %v8524_v43  ;;  %v2240_v7 = vadd.s32 %v2239_v47, %v2235_v27 }
 0x1cc   :  { %12339 = vst [vmem:[#allocation47_spill] sm:$0xff] %v8810_v62  ;;  %v2390_v21 = vshrl.u32 %v2389_v37, 23  ;;  %v8815_v56 = vmul.f32 %v1850_v0, %v1848_v33  ;;  %v2091_v8 = vand.u32 31, %v2089_v15  ;;  %v8821_v42 = vor.u32 4788187, %v1743_v23 }
 0x1cd   :  { %v8819_v26 = vshrl.u32 %v1721_v9, %v1737_v18  ;;  %v2241_v5 = vadd.s32 536870912, %v2240_v7  ;;  %v8824_v10 = vmul.f32 %v8732_v17, %v324_v38  ;;  %vm6434_vm3 = vcmp.lt.s32.totalorder %v6433_v30, 0 }
 0x1ce   :  { %v1939_v16 = vclz %v6428_v11  ;;  %v2085_v43 = vor.u32 8388608, %v2084_v34  ;;  %v2092_v63 = vsub.s32 32, %v2091_v8  ;;  %v2094_v0 = vshll.u32 %v12297_v20, %v2091_v8 }
 0x1cf   :  { %12340 = vst [vmem:[#allocation48_spill] sm:$0xff] %v8824_v10  ;;  %v8826_v3 = vshrl.u32 %v2241_v5, 30  ;;  %v2097_v37 = vshll.u32 %v12293_v1, %v2091_v8  ;;  %v6447_v33 = vadd.s32 4294967169, %v2390_v21  ;;  %v2100_v23 = vshll.u32 %v12294_v44, %v2091_v8 }
 0x1d0   :  { %v2095_v18 = vshrl.u32 %v12293_v1, %v2092_v63  ;;  %v2098_v28 = vshrl.u32 %v12294_v44, %v2092_v63  ;;  %v2101_v27 = vshrl.u32 %v12295_v14, %v2092_v63  ;;  %v2090_v11 = vshrl.u32 %v2089_v15, 5 }
 0x1d1   :  { %12341 = vst [vmem:[#allocation49_spill] sm:$0xff] %v8826_v3  ;;  %v2243_v47 = vshll.u32 %v8826_v3, 30  ;;  %v2103_v34 = vshll.u32 %v12295_v14, %v2091_v8  ;;  %v2104_v38 = vshrl.u32 %v12300_v40, %v2092_v63  ;;  %v8838_v9 = vsel %vm6434_vm3, 0, %v6433_v30 }
 0x1d2   :  { %v2096_v5 = vor.u32 %v2095_v18, %v2094_v0  ;;  %v2099_v21 = vor.u32 %v2098_v28, %v2097_v37  ;;  %v2102_v60 = vor.u32 %v2101_v27, %v2100_v23  ;;  %v2106_v62 = vshll.u32 %v12300_v40, %v2091_v8 }
 0x1d3   :  { %v8840_v22 = vsub.s32 %v2240_v7, %v2243_v47  ;;  %v2105_v12 = vor.u32 %v2104_v38, %v2103_v34  ;;  %v2107_v13 = vshrl.u32 %v12301_v32, %v2092_v63  ;;  %vm12192_vm4 = vcmp.lt.s32.totalorder %v8248_v2, 0 }
 0x1d4   :  { %v6429_v15 = vadd.s32 4294967294, %v1939_v16  ;;  %v2125_v3 = vshll.u32 %v2085_v43, 8  ;;  %v12183_v51 = vand.u32 2147483647, %v8778_v46  ;;  %v2396_v45 = vadd.s32 1, %v6447_v33 }
 0x1d5   :  { %v2246_v30 = vsub.s32 0, %v8840_v22  ;;  %v2108_v48 = vor.u32 %v2107_v13, %v2106_v62  ;;  %vm2109_vm5 = vcmp.lt.s32.totalorder %v2090_v11, 1  ;;  %vm2112_vm6 = vcmp.lt.s32.totalorder %v2090_v11, 4 }
 0x1d6   :  { %vm2111_vm9 = vcmp.lt.s32.totalorder %v2090_v11, 3  ;;  %v2114_v7 = vsel %vm2112_vm6, %v2102_v60, 2102212464  ;;  %v2117_v0 = vsel %vm2109_vm5, %v2096_v5, %v2099_v21  ;;  %v2118_v37 = vsel %vm2112_vm6, %v2105_v12, 920167782 }
 0x1d7   :  { %v2093_v8 = vshrl.u32 %v12297_v20, %v2092_v63  ;;  %vm2110_vm10 = vcmp.lt.s32.totalorder %v2090_v11, 2  ;;  %v2119_v18 = vsel %vm2111_vm9, %v2102_v60, %v2118_v37  ;;  %v2121_v28 = vsel %vm2109_vm5, %v2099_v21, %v2102_v60 }
 0x1d8   :  { %v6440_v16 = vmin.u32 %v2246_v30, %v8840_v22  ;;  %v2120_v43 = vsel %vm2110_vm10, %v2117_v0, %v2119_v18  ;;  %v2122_v23 = vsel %vm2112_vm6, %v2108_v48, 1326507024  ;;  %vm2397_vm3 = vcmp.gt.s32.totalorder %v2396_v45, 0 }
 0x1d9   :  { %v2046_v33 = vsub.s32 32, %v8838_v9  ;;  %v2113_v13 = vsel %vm2109_vm5, %v2093_v8, %v2096_v5  ;;  %v2115_v62 = vsel %vm2111_vm9, %v2099_v21, %v2114_v7  ;;  %v2123_v27 = vsel %vm2111_vm9, %v2105_v12, %v2122_v23 }
 0x1da   :  { %v2124_v47 = vsel %vm2110_vm10, %v2121_v28, %v2123_v27  ;;  %v8852_v34 = vmul.u32.u64.low %v2125_v3, %v2120_v43  ;;  %v8853_v38 = vmul.u32.u64.high %v2125_v3, %v2120_v43, %v8852_v34  ;;  %v2398_v63 = vsel %vm2397_vm3, %v2396_v45, 0 }
 0x1db   :  { %v2050_v60 = vsub.s32 4294967266, %v8838_v9  ;;  %v8857_v37 = vmul.u32.u64.low %v2125_v3, %v2124_v47  ;;  %v8858_v30 = vmul.u32.u64.high %v2125_v3, %v2124_v47, %v8857_v37  ;;  %v2393_v48 = vand.u32 8388607, %v12183_v51 }
 0x1dc   :  { %v2030_v5 = vadd.s32 %v8624_v57, %v8629_v25  ;;  %vm6430_vm5 = vcmp.lt.s32.totalorder %v6429_v15, 0  ;;  %v2248_v12 = vclz %v6440_v16  ;;  %v2400_v21 = vand.u32 31, %v2398_v63 }
 0x1dd   :  { %v12342_v7 = vxor.u32 2147483648, %v8794_v55  ;;  %v12344_v8 = vshll.u32 %v8632_v24, %v8748_v49  ;;  %v2116_v57 = vsel %vm2110_vm10, %v2113_v13, %v2115_v62  ;;  %v2135_v16 = vadd.s32 1, %v8853_v38 }
 0x1de   :  { %v8880_v28 = vshrl.u32 %v2030_v5, %v2046_v33  ;;  %v2401_v43 = vsub.s32 32, %v2400_v21  ;;  %v2051_v23 = vadd.s32 127, %v2050_v60  ;;  %v2394_v27 = vor.u32 8388608, %v2393_v48 }
 0x1df   :  { %v8869_v45 = vsel %vm12192_vm4, %v12342_v7, %v8794_v55  ;;  %v8876_v18 = vor.u32 %v8819_v26, %v12344_v8  ;;  %v8883_v55 = vsel %vm6430_vm5, 0, %v6429_v15  ;;  %v2286_v47 = vand.u32 2139095040, %v8824_v10 }
 0x1e0   :  { %12343 = vst [vmem:[#allocation50_spill] sm:$0xff] %v8869_v45  ;;  %v6441_v37 = vadd.s32 4294967294, %v2248_v12  ;;  %v2132_v24 = vmul.u32 %v2125_v3, %v2116_v57  ;;  %vm2134_vm6 = vc.u32 %v8858_v30, %v8852_v34  ;;  %v2404_v49 = vshrl.u32 %v12293_v1, %v2401_v43 }
 0x1e1   :  { %v2136_v26 = vsel %vm2134_vm6, %v2135_v16, %v8853_v38  ;;  %v2403_v11 = vshll.u32 %v12297_v20, %v2400_v21  ;;  %v2406_v33 = vshll.u32 %v12293_v1, %v2400_v21  ;;  %v2407_v13 = vshrl.u32 %v12294_v44, %v2401_v43 }
 0x1e2   :  { %v2137_v15 = vadd.s32 %v2136_v26, %v2132_v24  ;;  %v2399_v62 = vshrl.u32 %v2398_v63, 5  ;;  %v2409_v60 = vshll.u32 %v12294_v44, %v2400_v21  ;;  %v2410_v48 = vshrl.u32 %v12295_v14, %v2401_v43 }
 0x1e3   :  { %v2052_v3 = vshll.u32 %v2051_v23, 23  ;;  %v1947_v5 = vsub.s32 4294967266, %v8883_v55  ;;  %v2405_v12 = vor.u32 %v2404_v49, %v2403_v11  ;;  %v2408_v7 = vor.u32 %v2407_v13, %v2406_v33 }
 0x1e4   :  { %v2411_v8 = vor.u32 %v2410_v48, %v2409_v60  ;;  %v2412_v38 = vshll.u32 %v12295_v14, %v2400_v21  ;;  %v2413_v57 = vshrl.u32 %v12300_v40, %v2401_v43  ;;  %v2434_v16 = vshll.u32 %v2394_v27, 8 }
 0x1e5   :  { %v2138_v51 = vadd.s32 536870912, %v2137_v15  ;;  %v2415_v0 = vshll.u32 %v12300_v40, %v2400_v21  ;;  %v2416_v63 = vshrl.u32 %v12301_v32, %v2401_v43  ;;  %v2287_v24 = vshrl.u32 %v2286_v47, 23 }
 0x1e6   :  { %vm6442_vm9 = vcmp.lt.s32.totalorder %v6441_v37, 0  ;;  %v2414_v26 = vor.u32 %v2413_v57, %v2412_v38  ;;  %vm2418_vm10 = vcmp.lt.s32.totalorder %v2399_v62, 1  ;;  %vm2421_vm3 = vcmp.lt.s32.totalorder %v2399_v62, 4 }
 0x1e7   :  { %v2402_v23 = vshrl.u32 %v12297_v20, %v2401_v43  ;;  %v2417_v49 = vor.u32 %v2416_v63, %v2415_v0  ;;  %v2423_v11 = vsel %vm2421_vm3, %v2411_v8, 2102212464  ;;  %v2426_v33 = vsel %vm2418_vm10, %v2405_v12, %v2408_v7 }
 0x1e8   :  { %vm2419_vm5 = vcmp.lt.s32.totalorder %v2399_v62, 2  ;;  %vm2420_vm6 = vcmp.lt.s32.totalorder %v2399_v62, 3  ;;  %v2427_v13 = vsel %vm2421_vm3, %v2414_v26, 920167782  ;;  %v2430_v60 = vsel %vm2418_vm10, %v2408_v7, %v2411_v8 }
 0x1e9   :  { %v8901_v27 = vshrl.u32 %v2138_v51, 30  ;;  %v2422_v48 = vsel %vm2418_vm10, %v2402_v23, %v2405_v12  ;;  %v2428_v21 = vsel %vm2420_vm6, %v2411_v8, %v2427_v13  ;;  %v2431_v25 = vsel %vm2421_vm3, %v2417_v49, 1326507024 }
 0x1ea   :  { %v2424_v45 = vsel %vm2420_vm6, %v2408_v7, %v2423_v11  ;;  %v2429_v47 = vsel %vm2419_vm5, %v2426_v33, %v2428_v21  ;;  %v2432_v38 = vsel %vm2420_vm6, %v2414_v26, %v2431_v25  ;;  %v6443_v57 = vadd.s32 4294967169, %v2287_v24  ;;  %v339_v21 = vpop.permute.xlu1 %338 }
 0x1eb   :  { %12345 = vst [vmem:[#allocation51_spill] sm:$0xff] %v8901_v27  ;;  %v1948_v2 = vadd.s32 127, %v1947_v5  ;;  %v2433_v43 = vsel %vm2419_vm5, %v2430_v60, %v2432_v38  ;;  %v8905_v0 = vmul.u32.u64.low %v2434_v16, %v2429_v47  ;;  %v8906_v63 = vmul.u32.u64.high %v2434_v16, %v2429_v47, %v8905_v0 }
 0x1ec   :  { %v1747_v39 = vcvt.s32.f32 %v8876_v18  ;;  %v2047_v51 = vshll.u32 %v8744_v35, %v8838_v9  ;;  %v8912_v12 = vmul.u32.u64.low %v2434_v16, %v2433_v43  ;;  %v8913_v8 = vmul.u32.u64.high %v2434_v16, %v2433_v43, %v8912_v12 }
 0x1ed   :  { %v8916_v7 = vsel %vm6442_vm9, 0, %v6441_v37  ;;  %v2140_v25 = vshll.u32 %v8901_v27, 30  ;;  %v2425_v5 = vsel %vm2419_vm5, %v2422_v48, %v2424_v45  ;;  %v2293_v24 = vadd.s32 1, %v6443_v57 }
 0x1ee   :  { %v12346_v26 = vand.u32 2147483647, %v8821_v42  ;;  %v2049_v18 = vor.u32 %v8880_v28, %v2047_v51  ;;  %v2053_v49 = vor.u32 4788187, %v2052_v3  ;;  %v12188_v35 = vand.u32 2147483647, %v8824_v10 }
 0x1ef   :  { %v1943_v9 = vsub.s32 32, %v8883_v55  ;;  %v1949_v11 = vshll.u32 %v1948_v2, 23  ;;  %v2444_v37 = vadd.s32 1, %v8906_v63  ;;  %vm2294_vm9 = vcmp.gt.s32.totalorder %v2293_v24, 0 }
 0x1f0   :  { %v8922_v23 = vmul.f32 %v1747_v39, %v12346_v26  ;;  %v2256_v33 = vsub.s32 4294967266, %v8916_v7  ;;  %v2441_v62 = vmul.u32 %v2434_v16, %v2425_v5  ;;  %vm2443_vm10 = vc.u32 %v8913_v8, %v8905_v0 }
 0x1f1   :  { %v2295_v42 = vsel %vm2294_vm9, %v2293_v24, 0  ;;  %v1927_v39 = vadd.s32 %v8703_v36, %v8710_v31  ;;  %v8933_v45 = vsub.s32 %v2137_v15, %v2140_v25  ;;  %v2445_v28 = vsel %vm2443_vm10, %v2444_v37, %v8906_v63 }
 0x1f2   :  { %v2297_v3 = vand.u32 31, %v2295_v42  ;;  %v2054_v13 = vand.u32 2147483647, %v2053_v49  ;;  %v2056_v2 = vcvt.s32.f32 %v2049_v18  ;;  %v2236_v60 = vadd.s32 %v8783_v54, %v8781_v4 }
 0x1f3   :  { %v2446_v48 = vadd.s32 %v2445_v28, %v2441_v62  ;;  %v1944_v16 = vshll.u32 %v8770_v6, %v8883_v55  ;;  %v1945_v47 = vshrl.u32 %v1927_v39, %v1943_v9  ;;  %v8940_v38 = vor.u32 4788187, %v1949_v11 }
 0x1f4   :  { %v2298_v57 = vsub.s32 32, %v2297_v3  ;;  %v2252_v31 = vsub.s32 32, %v8916_v7  ;;  %v2257_v36 = vadd.s32 127, %v2256_v33  ;;  %v2290_v43 = vand.u32 8388607, %v12188_v35 }
 0x1f5   :  { %v2447_v15 = vadd.s32 536870912, %v2446_v48  ;;  %v2143_v63 = vsub.s32 0, %v8933_v45  ;;  %v8949_v51 = vmul.f32 %v8732_v17, %v339_v21  ;;  %v2296_v6 = vshrl.u32 %v2295_v42, 5 }
 0x1f6   :  { %v2301_v4 = vshrl.u32 %v12293_v1, %v2298_v57  ;;  %v2304_v54 = vshrl.u32 %v12294_v44, %v2298_v57  ;;  %v2300_v55 = vshll.u32 %v12297_v20, %v2297_v3  ;;  %v2303_v12 = vshll.u32 %v12293_v1, %v2297_v3 }
 0x1f7   :  { %12347 = vst [vmem:[#allocation52_spill] sm:$0xff] %v8949_v51  ;;  %v2306_v25 = vshll.u32 %v12294_v44, %v2297_v3  ;;  %v8954_v5 = vshrl.u32 %v2447_v15, 30  ;;  %v2307_v24 = vshrl.u32 %v12295_v14, %v2298_v57  ;;  %v2309_v26 = vshll.u32 %v12295_v14, %v2297_v3 }
 0x1f8   :  { %v2310_v18 = vshrl.u32 %v12300_v40, %v2298_v57  ;;  %v2302_v49 = vor.u32 %v2301_v4, %v2300_v55  ;;  %v2305_v9 = vor.u32 %v2304_v54, %v2303_v12  ;;  %v2312_v11 = vshll.u32 %v12300_v40, %v2297_v3 }
 0x1f9   :  { %12348 = vst [vmem:[#allocation53_spill] sm:$0xff] %v8954_v5  ;;  %v2313_v37 = vshrl.u32 %v12301_v32, %v2298_v57  ;;  %v8961_v33 = vmul.f32 %v2056_v2, %v2054_v13  ;;  %v1946_v62 = vor.u32 %v1945_v47, %v1944_v16  ;;  %v2308_v42 = vor.u32 %v2307_v24, %v2306_v25 }
 0x1fa   :  { %v2311_v39 = vor.u32 %v2310_v18, %v2309_v26  ;;  %v1951_v28 = vand.u32 2147483647, %v8940_v38  ;;  %v2254_v21 = vshrl.u32 %v2236_v60, %v2252_v31  ;;  %v2291_v15 = vor.u32 8388608, %v2290_v43  ;;  %v334_v18 = vpop.permute.xlu0 %333 }
 0x1fb   :  { %v2314_v35 = vor.u32 %v2313_v37, %v2312_v11  ;;  %v2258_v27 = vshll.u32 %v2257_v36, 23  ;;  %v2449_v50 = vshll.u32 %v8954_v5, 30  ;;  %vm2315_vm3 = vcmp.lt.s32.totalorder %v2296_v6, 1 }
 0x1fc   :  { %v2595_v4 = vand.u32 2139095040, %v8949_v51  ;;  %v6436_v3 = vmin.u32 %v2143_v63, %v8933_v45  ;;  %vm2317_vm5 = vcmp.lt.s32.totalorder %v2296_v6, 3  ;;  %vm2318_vm6 = vcmp.lt.s32.totalorder %v2296_v6, 4 }
 0x1fd   :  { %v2323_v13 = vsel %vm2315_vm3, %v2302_v49, %v2305_v9  ;;  %vm12205_vm9 = vcmp.lt.s32.totalorder %v8339_v52, 0  ;;  %v2320_v2 = vsel %vm2318_vm6, %v2308_v42, 2102212464  ;;  %v2324_v16 = vsel %vm2318_vm6, %v2311_v39, 920167782 }
 0x1fe   :  { %v2327_v60 = vsel %vm2315_vm3, %v2305_v9, %v2308_v42  ;;  %v2328_v47 = vsel %vm2318_vm6, %v2314_v35, 1326507024  ;;  %v2299_v38 = vshrl.u32 %v12297_v20, %v2298_v57  ;;  %vm2316_vm10 = vcmp.lt.s32.totalorder %v2296_v6, 2 }
 0x1ff   :  { %v2325_v31 = vsel %vm2317_vm5, %v2308_v42, %v2324_v16  ;;  %v2331_v36 = vshll.u32 %v2291_v15, 8  ;;  %v8972_v43 = vsub.s32 %v2446_v48, %v2449_v50  ;;  %v2329_v54 = vsel %vm2317_vm5, %v2311_v39, %v2328_v47 }
 0x200   :  { %v2326_v63 = vsel %vm2316_vm10, %v2323_v13, %v2325_v31  ;;  %v2596_v55 = vshrl.u32 %v2595_v4, 23  ;;  %vm12206_vm7 = vcmp.lt.s32.totalorder %v8367_v41, 0  ;;  %vm12194_vm4 = vcmp.lt.s32.totalorder %v8494_v19, 0 }
 0x201   :  { %v2145_v12 = vclz %v6436_v3  ;;  %v2319_v35 = vsel %vm2315_vm3, %v2299_v38, %v2302_v49  ;;  %v2321_v57 = vsel %vm2317_vm5, %v2305_v9, %v2320_v2  ;;  %v2330_v25 = vsel %vm2316_vm10, %v2327_v60, %v2329_v54 }
 0x202   :  { %v8981_v24 = vmul.u32.u64.low %v2331_v36, %v2330_v25  ;;  %v8982_v26 = vmul.u32.u64.high %v2331_v36, %v2330_v25, %v8981_v24  ;;  %v8984_v50 = vmul.u32.u64.low %v2331_v36, %v2326_v63  ;;  %v8985_v48 = vmul.u32.u64.high %v2331_v36, %v2326_v63, %v8984_v50 }
 0x203   :  { %v1749_v11 = vxor.u32 2147483648, %v8922_v23  ;;  %v2253_v37 = vshll.u32 %v8840_v22, %v8916_v7  ;;  %v2259_v42 = vor.u32 4788187, %v2258_v27  ;;  %v6455_v39 = vadd.s32 4294967169, %v2596_v55 }
 0x204   :  { %v1953_v49 = vcvt.s32.f32 %v1946_v62  ;;  %v2452_v9 = vsub.s32 0, %v8972_v43  ;;  %v2322_v15 = vsel %vm2316_vm10, %v2319_v35, %v2321_v57  ;;  %v12193_v4 = vand.u32 2147483647, %v8949_v51 }
 0x205   :  { %v2255_v3 = vor.u32 %v2254_v21, %v2253_v37  ;;  %v6437_v13 = vadd.s32 4294967294, %v2145_v12  ;;  %v2602_v2 = vadd.s32 1, %v6455_v39  ;;  %v8995_v16 = vmul.f32 %v8732_v17, %v334_v18 }
 0x206   :  { %v2058_v60 = vxor.u32 2147483648, %v8961_v33  ;;  %v8998_v47 = vmul.f32 %v1953_v49, %v1951_v28  ;;  %vm2340_vm3 = vc.u32 %v8982_v26, %v8984_v50  ;;  %v2341_v22 = vadd.s32 1, %v8985_v48 }
 0x207   :  { %12349 = vst [vmem:[#allocation54_spill] sm:$0xff] %v8995_v16  ;;  %v12350_v27 = vxor.u32 2147483648, %v8815_v56  ;;  %v2260_v6 = vand.u32 2147483647, %v2259_v42  ;;  %v2338_v62 = vmul.u32 %v2331_v36, %v2322_v15  ;;  %vm2603_vm5 = vcmp.gt.s32.totalorder %v2602_v2, 0 }
 0x208   :  { %v6448_v21 = vmin.u32 %v2452_v9, %v8972_v43  ;;  %v2342_v28 = vsel %vm2340_vm3, %v2341_v22, %v8985_v48  ;;  %v2599_v38 = vand.u32 8388607, %v12193_v4  ;;  %v2604_v31 = vsel %vm2603_vm5, %v2602_v2, 0  ;;  %v344_v48 = vpop.permute.xlu0 %343 }
 0x209   :  { %v9008_v7 = vsel %vm12205_vm9, %v12350_v27, %v8815_v56  ;;  %v2262_v63 = vcvt.s32.f32 %v2255_v3  ;;  %vm6438_vm6 = vcmp.lt.s32.totalorder %v6437_v13, 0  ;;  %v2343_v54 = vadd.s32 %v2342_v28, %v2338_v62 }
 0x20a   :  { %12351 = vst [vmem:[#allocation55_spill] sm:$0xff] %v9008_v7  ;;  %v2492_v55 = vand.u32 2139095040, %v8995_v16  ;;  %v9018_v56 = vsel %vm12206_vm7, %v1749_v11, %v8922_v23  ;;  %v9023_v36 = vsel %vm12194_vm4, %v2058_v60, %v8961_v33  ;;  %v2606_v35 = vand.u32 31, %v2604_v31 }
 0x20b   :  { %12352 = vst [vmem:[#allocation56_spill] sm:$0xff] %v9018_v56  ;;  %12353 = vst [vmem:[#allocation57_spill] sm:$0xff] %v9023_v36  ;;  %v9026_v57 = vmul.f32 %v2262_v63, %v2260_v6  ;;  %v9030_v25 = vadd.s32 %v8852_v34, %v8858_v30  ;;  %v2344_v24 = vadd.s32 536870912, %v2343_v54  ;;  %v9033_v18 = vsel %vm6438_vm6, 0, %v6437_v13 }
 0x20c   :  { %v2454_v23 = vclz %v6448_v21  ;;  %v2600_v11 = vor.u32 8388608, %v2599_v38  ;;  %v2607_v37 = vsub.s32 32, %v2606_v35  ;;  %v2605_v42 = vshrl.u32 %v2604_v31, 5 }
 0x20d   :  { %v2609_v33 = vshll.u32 %v12297_v20, %v2606_v35  ;;  %v2612_v39 = vshll.u32 %v12293_v1, %v2606_v35  ;;  %v2493_v49 = vshrl.u32 %v2492_v55, 23  ;;  %v2615_v34 = vshll.u32 %v12294_v44, %v2606_v35 }
 0x20e   :  { %v2610_v9 = vshrl.u32 %v12293_v1, %v2607_v37  ;;  %v2613_v15 = vshrl.u32 %v12294_v44, %v2607_v37  ;;  %v2616_v30 = vshrl.u32 %v12295_v14, %v2607_v37  ;;  %v9041_v3 = vshrl.u32 %v2344_v24, 30 }
 0x20f   :  { %v2618_v13 = vshll.u32 %v12295_v14, %v2606_v35  ;;  %v2619_v2 = vshrl.u32 %v12300_v40, %v2607_v37  ;;  %v2621_v60 = vshll.u32 %v12300_v40, %v2606_v35  ;;  %v2622_v62 = vshrl.u32 %v12301_v32, %v2607_v37 }
 0x210   :  { %12354 = vst [vmem:[#allocation58_spill] sm:$0xff] %v9041_v3  ;;  %v2611_v22 = vor.u32 %v2610_v9, %v2609_v33  ;;  %v2614_v27 = vor.u32 %v2613_v15, %v2612_v39  ;;  %v2617_v6 = vor.u32 %v2616_v30, %v2615_v34  ;;  %v2153_v21 = vsub.s32 4294967266, %v9033_v18  ;;  %v349_v34 = vpop.permute.xlu1 %348 }
 0x211   :  { %v6449_v28 = vadd.s32 4294967294, %v2454_v23  ;;  %v2620_v38 = vor.u32 %v2619_v2, %v2618_v13  ;;  %v2640_v31 = vshll.u32 %v2600_v11, 8  ;;  %v2623_v63 = vor.u32 %v2622_v62, %v2621_v60 }
 0x212   :  { %vm2624_vm10 = vcmp.lt.s32.totalorder %v2605_v42, 1  ;;  %vm2627_vm3 = vcmp.lt.s32.totalorder %v2605_v42, 4  ;;  %v6451_v55 = vadd.s32 4294967169, %v2493_v49  ;;  %v2346_v24 = vshll.u32 %v9041_v3, 30 }
 0x213   :  { %v2608_v4 = vshrl.u32 %v12297_v20, %v2607_v37  ;;  %v2629_v12 = vsel %vm2627_vm3, %v2617_v6, 2102212464  ;;  %v2632_v35 = vsel %vm2624_vm10, %v2611_v22, %v2614_v27  ;;  %vm2626_vm5 = vcmp.lt.s32.totalorder %v2605_v42, 3 }
 0x214   :  { %v2633_v33 = vsel %vm2627_vm3, %v2620_v38, 920167782  ;;  %v2636_v39 = vsel %vm2624_vm10, %v2614_v27, %v2617_v6  ;;  %v2637_v9 = vsel %vm2627_vm3, %v2623_v63, 1326507024  ;;  %vm6450_vm6 = vcmp.lt.s32.totalorder %v6449_v28, 0 }
 0x215   :  { %vm2625_vm4 = vcmp.lt.s32.totalorder %v2605_v42, 2  ;;  %v2628_v15 = vsel %vm2624_vm10, %v2608_v4, %v2611_v22  ;;  %v2634_v23 = vsel %vm2626_vm5, %v2617_v6, %v2633_v33  ;;  %v2630_v11 = vsel %vm2626_vm5, %v2614_v27, %v2629_v12 }
 0x216   :  { %v2635_v30 = vsel %vm2625_vm4, %v2632_v35, %v2634_v23  ;;  %v2638_v13 = vsel %vm2626_vm5, %v2620_v38, %v2637_v9  ;;  %v2499_v49 = vadd.s32 1, %v6451_v55  ;;  %v9051_v2 = vsub.s32 %v2343_v54, %v2346_v24 }
 0x217   :  { %v2639_v37 = vsel %vm2625_vm4, %v2636_v39, %v2638_v13  ;;  %v9054_v60 = vmul.u32.u64.low %v2640_v31, %v2635_v30  ;;  %v9055_v62 = vmul.u32.u64.high %v2640_v31, %v2635_v30, %v9054_v60  ;;  %v9062_v4 = vmul.f32 %v8732_v17, %v349_v34 }
 0x218   :  { %v9058_v63 = vmul.u32.u64.low %v2640_v31, %v2639_v37  ;;  %v9059_v5 = vmul.u32.u64.high %v2640_v31, %v2639_v37, %v9058_v63  ;;  %vm2500_vm10 = vcmp.gt.s32.totalorder %v2499_v49, 0  ;;  %v2149_v12 = vsub.s32 32, %v9033_v18 }
 0x219   :  { %12355 = vst [vmem:[#allocation59_spill] sm:$0xff] %v9062_v4  ;;  %v9065_v22 = vadd.s32 127, %v2153_v21  ;;  %v2631_v54 = vsel %vm2625_vm4, %v2628_v15, %v2630_v11  ;;  %v2501_v27 = vsel %vm2500_vm10, %v2499_v49, 0  ;;  %v2442_v6 = vadd.s32 %v8905_v0, %v8913_v8 }
 0x21a   :  { %v9071_v38 = vsel %vm6450_vm6, 0, %v6449_v28  ;;  %v2503_v55 = vand.u32 31, %v2501_v27  ;;  %v9074_v24 = vmul.f32 %v8732_v17, %v344_v48  ;;  %v2349_v33 = vsub.s32 0, %v9051_v2 }
 0x21b   :  { %v2650_v21 = vadd.s32 1, %v9055_v62  ;;  %v12356_v42 = vand.u32 2147483647, %v8995_v16  ;;  %v2647_v9 = vmul.u32 %v2640_v31, %v2631_v54  ;;  %vm2649_vm4 = vc.u32 %v9059_v5, %v9054_v60 }
 0x21c   :  { %v2504_v0 = vsub.s32 32, %v2503_v55  ;;  %v2801_v8 = vand.u32 2139095040, %v9062_v4  ;;  %v2151_v17 = vshrl.u32 %v9030_v25, %v2149_v12  ;;  %v2155_v48 = vshll.u32 %v9065_v22, 23 }
 0x21d   :  { %v2496_v39 = vand.u32 8388607, %v12356_v42  ;;  %v2458_v28 = vsub.s32 32, %v9071_v38  ;;  %v2651_v15 = vsel %vm2649_vm4, %v2650_v21, %v9055_v62  ;;  %v2462_v23 = vsub.s32 4294967266, %v9071_v38 }
 0x21e   :  { %v9090_v34 = vadd.s32 %v2651_v15, %v2647_v9  ;;  %v2507_v31 = vshrl.u32 %v12293_v1, %v2504_v0  ;;  %v6444_v30 = vmin.u32 %v2349_v33, %v9051_v2  ;;  %v2506_v49 = vshll.u32 %v12297_v20, %v2503_v55 }
 0x21f   :  { %v2497_v13 = vor.u32 8388608, %v2496_v39  ;;  %v2510_v25 = vshrl.u32 %v12294_v44, %v2504_v0  ;;  %v2509_v37 = vshll.u32 %v12293_v1, %v2503_v55  ;;  %v2512_v63 = vshll.u32 %v12294_v44, %v2503_v55 }
 0x220   :  { %v2513_v62 = vshrl.u32 %v12295_v14, %v2504_v0  ;;  %v2802_v12 = vshrl.u32 %v2801_v8, 23  ;;  %v2460_v22 = vshrl.u32 %v2442_v6, %v2458_v28  ;;  %v2653_v54 = vadd.s32 536870912, %v9090_v34 }
 0x221   :  { %v2502_v21 = vshrl.u32 %v2501_v27, 5  ;;  %v2508_v42 = vor.u32 %v2507_v31, %v2506_v49  ;;  %v2511_v9 = vor.u32 %v2510_v25, %v2509_v37  ;;  %v2515_v33 = vshll.u32 %v12295_v14, %v2503_v55 }
 0x222   :  { %v2514_v15 = vor.u32 %v2513_v62, %v2512_v63  ;;  %v2516_v39 = vshrl.u32 %v12300_v40, %v2504_v0  ;;  %v2463_v11 = vadd.s32 127, %v2462_v23  ;;  %v2351_v35 = vclz %v6444_v30 }
 0x223   :  { %v2518_v3 = vshll.u32 %v12300_v40, %v2503_v55  ;;  %v2519_v36 = vshrl.u32 %v12301_v32, %v2504_v0  ;;  %v2505_v19 = vshrl.u32 %v12297_v20, %v2504_v0  ;;  %v2537_v6 = vshll.u32 %v2497_v13, 8 }
 0x224   :  { %v2517_v8 = vor.u32 %v2516_v39, %v2515_v33  ;;  %v6463_v28 = vadd.s32 4294967169, %v2802_v12  ;;  %v9106_v7 = vshrl.u32 %v2653_v54, 30  ;;  %vm2521_vm3 = vcmp.lt.s32.totalorder %v2502_v21, 1 }
 0x225   :  { %v2520_v27 = vor.u32 %v2519_v36, %v2518_v3  ;;  %vm2524_vm5 = vcmp.lt.s32.totalorder %v2502_v21, 4  ;;  %vm2523_vm6 = vcmp.lt.s32.totalorder %v2502_v21, 3  ;;  %v2529_v49 = vsel %vm2521_vm3, %v2508_v42, %v2511_v9 }
 0x226   :  { %12357 = vst [vmem:[#allocation60_spill] sm:$0xff] %v9106_v7  ;;  %v2526_v31 = vsel %vm2524_vm5, %v2514_v15, 2102212464  ;;  %v2530_v25 = vsel %vm2524_vm5, %v2517_v8, 920167782  ;;  %v6445_v23 = vadd.s32 4294967294, %v2351_v35  ;;  %v2533_v55 = vsel %vm2521_vm3, %v2511_v9, %v2514_v15 }
 0x227   :  { %vm2522_vm10 = vcmp.lt.s32.totalorder %v2502_v21, 2  ;;  %v2531_v30 = vsel %vm2523_vm6, %v2514_v15, %v2530_v25  ;;  %v2464_v37 = vshll.u32 %v2463_v11, 23  ;;  %v2525_v63 = vsel %vm2521_vm3, %v2505_v19, %v2508_v42 }
 0x228   :  { %v2532_v0 = vsel %vm2522_vm10, %v2529_v49, %v2531_v30  ;;  %v2534_v62 = vsel %vm2524_vm5, %v2520_v27, 1326507024  ;;  %v2527_v13 = vsel %vm2523_vm6, %v2511_v9, %v2526_v31  ;;  %v2459_v36 = vshll.u32 %v8972_v43, %v9071_v38 }
 0x229   :  { %v2535_v12 = vsel %vm2523_vm6, %v2517_v8, %v2534_v62  ;;  %v9109_v54 = vmul.u32.u64.low %v2537_v6, %v2532_v0  ;;  %v9110_v33 = vmul.u32.u64.high %v2537_v6, %v2532_v0, %v9109_v54  ;;  %v2655_v3 = vshll.u32 %v9106_v7, 30 }
 0x22a   :  { %v2536_v35 = vsel %vm2522_vm10, %v2533_v55, %v2535_v12  ;;  %v2808_v39 = vadd.s32 1, %v6463_v28  ;;  %v12358_v19 = vshll.u32 %v8933_v45, %v9033_v18  ;;  %vm6446_vm4 = vcmp.lt.s32.totalorder %v6445_v23, 0 }
 0x22b   :  { %v9120_v42 = vmul.u32.u64.low %v2537_v6, %v2536_v35  ;;  %v9121_v9 = vmul.u32.u64.high %v2537_v6, %v2536_v35, %v9120_v42  ;;  %v2156_v15 = vor.u32 4788187, %v2155_v48  ;;  %v2461_v8 = vor.u32 %v2460_v22, %v2459_v36 }
 0x22c   :  { %v2152_v11 = vor.u32 %v2151_v17, %v12358_v19  ;;  %v2528_v27 = vsel %vm2522_vm10, %v2525_v63, %v2527_v13  ;;  %vm2809_vm3 = vcmp.gt.s32.totalorder %v2808_v39, 0  ;;  %v2465_v31 = vor.u32 4788187, %v2464_v37 }
 0x22d   :  { %v2547_v43 = vadd.s32 1, %v9110_v33  ;;  %v12359_v38 = vand.u32 2147483647, %v9062_v4  ;;  %v2810_v28 = vsel %vm2809_vm3, %v2808_v39, 0  ;;  %v9127_v25 = vsel %vm6446_vm4, 0, %v6445_v23 }
 0x22e   :  { %v9130_v45 = vsub.s32 %v9090_v34, %v2655_v3  ;;  %v2812_v18 = vand.u32 31, %v2810_v28  ;;  %v2698_v17 = vand.u32 2139095040, %v9074_v24  ;;  %v2159_v22 = vcvt.s32.f32 %v2152_v11 }
 0x22f   :  { %v2805_v49 = vand.u32 8388607, %v12359_v38  ;;  %v2544_v21 = vmul.u32 %v2537_v6, %v2528_v27  ;;  %vm2546_vm5 = vc.u32 %v9121_v9, %v9109_v54  ;;  %v2157_v30 = vand.u32 2147483647, %v2156_v15 }
 0x230   :  { %v2468_v55 = vcvt.s32.f32 %v2461_v8  ;;  %v2548_v37 = vsel %vm2546_vm5, %v2547_v43, %v9110_v33  ;;  %v2813_v63 = vsub.s32 32, %v2812_v18  ;;  %v2466_v23 = vand.u32 2147483647, %v2465_v31 }
 0x231   :  { %v2355_v0 = vsub.s32 32, %v9127_v25  ;;  %v2549_v34 = vadd.s32 %v2548_v37, %v2544_v21  ;;  %v2806_v62 = vor.u32 8388608, %v2805_v49  ;;  %v2359_v13 = vsub.s32 4294967266, %v9127_v25 }
 0x232   :  { %v2658_v12 = vsub.s32 0, %v9130_v45  ;;  %v2815_v36 = vshll.u32 %v12297_v20, %v2812_v18  ;;  %v2699_v6 = vshrl.u32 %v2698_v17, 23  ;;  %v2816_v35 = vshrl.u32 %v12293_v1, %v2813_v63 }
 0x233   :  { %v2550_v3 = vadd.s32 536870912, %v2549_v34  ;;  %v2819_v39 = vshrl.u32 %v12294_v44, %v2813_v63  ;;  %v2822_v33 = vshrl.u32 %v12295_v14, %v2813_v63  ;;  %v2818_v19 = vshll.u32 %v12293_v1, %v2812_v18 }
 0x234   :  { %v2821_v11 = vshll.u32 %v12294_v44, %v2812_v18  ;;  %v2824_v42 = vshll.u32 %v12295_v14, %v2812_v18  ;;  %v2825_v15 = vshrl.u32 %v12300_v40, %v2813_v63  ;;  %v9148_v8 = vmul.f32 %v2159_v22, %v2157_v30 }
 0x235   :  { %v9150_v27 = vmul.f32 %v2468_v55, %v2466_v23  ;;  %v2339_v31 = vadd.s32 %v8984_v50, %v8982_v26  ;;  %v2811_v43 = vshrl.u32 %v2810_v28, 5  ;;  %v2817_v38 = vor.u32 %v2816_v35, %v2815_v36 }
 0x236   :  { %v2820_v49 = vor.u32 %v2819_v39, %v2818_v19  ;;  %v2823_v17 = vor.u32 %v2822_v33, %v2821_v11  ;;  %v2826_v21 = vor.u32 %v2825_v15, %v2824_v42  ;;  %v9154_v48 = vshrl.u32 %v2550_v3, 30 }
 0x237   :  { %v2357_v37 = vshrl.u32 %v2339_v31, %v2355_v0  ;;  %v2827_v7 = vshll.u32 %v12300_v40, %v2812_v18  ;;  %v2828_v52 = vshrl.u32 %v12301_v32, %v2813_v63  ;;  %v2360_v56 = vadd.s32 127, %v2359_v13 }
 0x238   :  { %12360 = vst [vmem:[#allocation61_spill] sm:$0xff] %v9154_v48  ;;  %v6456_v22 = vmin.u32 %v2658_v12, %v9130_v45  ;;  %v2846_v30 = vshll.u32 %v2806_v62, 8  ;;  %v6459_v55 = vadd.s32 4294967169, %v2699_v6  ;;  %vm1873_vm6 = vcmp.lt.s32.totalorder %v8508_v58, 0 }
 0x239   :  { %v2814_v26 = vshrl.u32 %v12297_v20, %v2813_v63  ;;  %v2829_v50 = vor.u32 %v2828_v52, %v2827_v7  ;;  %vm2830_vm10 = vcmp.lt.s32.totalorder %v2811_v43, 1  ;;  %vm2833_vm4 = vcmp.lt.s32.totalorder %v2811_v43, 4 }
 0x23a   :  { %vm12220_vm3 = vcmp.lt.s32.totalorder %v8575_v59, 0  ;;  %vm2832_vm5 = vcmp.lt.s32.totalorder %v2811_v43, 3  ;;  %v2835_v28 = vsel %vm2833_vm4, %v2823_v17, 2102212464  ;;  %v2838_v23 = vsel %vm2830_vm10, %v2817_v38, %v2820_v49 }
 0x23b   :  { %v2839_v18 = vsel %vm2833_vm4, %v2826_v21, 920167782  ;;  %v2552_v0 = vshll.u32 %v9154_v48, 30  ;;  %vm2831_vm9 = vcmp.lt.s32.totalorder %v2811_v43, 2  ;;  %v2842_v12 = vsel %vm2830_vm10, %v2820_v49, %v2823_v17 }
 0x23c   :  { %v2840_v13 = vsel %vm2832_vm5, %v2823_v17, %v2839_v18  ;;  %vm12221_vm7 = vcmp.lt.s32.totalorder %v8735_v61, 0  ;;  %vm12215_vm15 = vcmp.lt.s32.totalorder %v8778_v46, 0  ;;  %v2660_v62 = vclz %v6456_v22 }
 0x23d   :  { %v2834_v63 = vsel %vm2830_vm10, %v2814_v26, %v2817_v38  ;;  %v2841_v52 = vsel %vm2831_vm9, %v2838_v23, %v2840_v13  ;;  %v2843_v7 = vsel %vm2833_vm4, %v2829_v50, 1326507024  ;;  %v2836_v36 = vsel %vm2832_vm5, %v2820_v49, %v2835_v28  ;;  %v359_v50 = vpop.permute.xlu1 %358 }
 0x23e   :  { %v2844_v6 = vsel %vm2832_vm5, %v2826_v21, %v2843_v7  ;;  %v9166_v3 = vmul.u32.u64.low %v2846_v30, %v2841_v52  ;;  %v9167_v35 = vmul.u32.u64.high %v2846_v30, %v2841_v52, %v9166_v3  ;;  %v2361_v39 = vshll.u32 %v2360_v56, 23 }
 0x23f   :  { %v2845_v33 = vsel %vm2831_vm9, %v2842_v12, %v2844_v6  ;;  %v12208_v19 = vand.u32 2147483647, %v9074_v24  ;;  %v2705_v11 = vadd.s32 1, %v6459_v55  ;;  %v2356_v42 = vshll.u32 %v9051_v2, %v9127_v25  ;;  %v9210_v12 = vld [vmem:[%s12273_s0] ss:$0 sm:$0xff] }
 0x240   :  { %v9174_v15 = vsub.s32 %v2549_v34, %v2552_v0  ;;  %v9176_v31 = vmul.u32.u64.low %v2846_v30, %v2845_v33  ;;  %v9177_v38 = vmul.u32.u64.high %v2846_v30, %v2845_v33, %v9176_v31  ;;  %v2161_v49 = vxor.u32 2147483648, %v9148_v8 }
 0x241   :  { %v6457_v17 = vadd.s32 4294967294, %v2660_v62  ;;  %v2837_v21 = vsel %vm2831_vm9, %v2834_v63, %v2836_v36  ;;  %vm2706_vm10 = vcmp.gt.s32.totalorder %v2705_v11, 0  ;;  %v2470_v56 = vxor.u32 2147483648, %v9150_v27 }
 0x242   :  { %v9182_v22 = vor.u32 %v2357_v37, %v2356_v42  ;;  %v2856_v55 = vadd.s32 1, %v9167_v35  ;;  %v2707_v26 = vsel %vm2706_vm10, %v2705_v11, 0  ;;  %v12361_v2 = vxor.u32 2147483648, %v8998_v47 }
 0x243   :  { %v9192_v34 = vor.u32 4788187, %v2361_v39  ;;  %v2702_v43 = vand.u32 8388607, %v12208_v19  ;;  %v2709_v28 = vand.u32 31, %v2707_v26  ;;  %v12362_v37 = vxor.u32 2147483648, %v9026_v57 }
 0x244   :  { %v9190_v25 = vsel %vm1873_vm6, %v12361_v2, %v8998_v47  ;;  %v2555_v18 = vsub.s32 0, %v9174_v15  ;;  %v2853_v0 = vmul.u32 %v2846_v30, %v2837_v21  ;;  %vm2855_vm9 = vc.u32 %v9177_v38, %v9166_v3 }
 0x245   :  { %v9201_v23 = vsel %vm12220_vm3, %v12362_v37, %v9026_v57  ;;  %vm6458_vm4 = vcmp.lt.s32.totalorder %v6457_v17, 0  ;;  %v2857_v47 = vsel %vm2855_vm9, %v2856_v55, %v9167_v35  ;;  %v2710_v13 = vsub.s32 32, %v2709_v28 }
 0x246   :  { %v9213_v62 = vmul.f32 %v9210_v12, %v359_v50  ;;  %v9218_v57 = vsel %vm12221_vm7, %v2161_v49, %v9148_v8  ;;  %v9223_v30 = vsel %vm12215_vm15, %v2470_v56, %v9150_v27  ;;  %v2365_v63 = vcvt.s32.f32 %v9182_v22 }
 0x247   :  { %12364 = vst [vmem:[#allocation63_spill] sm:$0xff] %v9223_v30  ;;  %v2858_v52 = vadd.s32 %v2857_v47, %v2853_v0  ;;  %v2363_v7 = vand.u32 2147483647, %v9192_v34  ;;  %v2703_v36 = vor.u32 8388608, %v2702_v43  ;;  %v2713_v6 = vshrl.u32 %v12293_v1, %v2710_v13 }
 0x248   :  { %12363 = vst [vmem:[#allocation62_spill] sm:$0xff] %v9213_v62  ;;  %v2716_v35 = vshrl.u32 %v12294_v44, %v2710_v13  ;;  %v9229_v39 = vsel %vm6458_vm4, 0, %v6457_v17  ;;  %v6452_v8 = vmin.u32 %v2555_v18, %v9174_v15  ;;  %v2712_v11 = vshll.u32 %v12297_v20, %v2709_v28 }
 0x249   :  { %v2859_v33 = vadd.s32 536870912, %v2858_v52  ;;  %v2715_v27 = vshll.u32 %v12293_v1, %v2709_v28  ;;  %v2718_v42 = vshll.u32 %v12294_v44, %v2709_v28  ;;  %v2719_v31 = vshrl.u32 %v12295_v14, %v2710_v13 }
 0x24a   :  { %v3007_v49 = vand.u32 2139095040, %v9213_v62  ;;  %v2708_v21 = vshrl.u32 %v2707_v26, 5  ;;  %v2714_v56 = vor.u32 %v2713_v6, %v2712_v11  ;;  %v2721_v22 = vshll.u32 %v12295_v14, %v2709_v28 }
 0x24b   :  { %v2722_v17 = vshrl.u32 %v12300_v40, %v2710_v13  ;;  %v2717_v55 = vor.u32 %v2716_v35, %v2715_v27  ;;  %v2720_v50 = vor.u32 %v2719_v31, %v2718_v42  ;;  %v2724_v2 = vshll.u32 %v12300_v40, %v2709_v28 }
 0x24c   :  { %v2725_v34 = vshrl.u32 %v12301_v32, %v2710_v13  ;;  %v2664_v43 = vsub.s32 32, %v9229_v39  ;;  %v9242_v37 = vshrl.u32 %v2859_v33, 30  ;;  %v2668_v26 = vsub.s32 4294967266, %v9229_v39 }
 0x24d   :  { %v2723_v18 = vor.u32 %v2722_v17, %v2721_v22  ;;  %v2557_v47 = vclz %v6452_v8  ;;  %v3008_v11 = vshrl.u32 %v3007_v49, 23  ;;  %v2711_v19 = vshrl.u32 %v12297_v20, %v2710_v13 }
 0x24e   :  { %12365 = vst [vmem:[#allocation64_spill] sm:$0xff] %v9242_v37  ;;  %v2726_v6 = vor.u32 %v2725_v34, %v2724_v2  ;;  %vm2727_vm5 = vcmp.lt.s32.totalorder %v2708_v21, 1  ;;  %vm2730_vm10 = vcmp.lt.s32.totalorder %v2708_v21, 4  ;;  %v2743_v35 = vshll.u32 %v2703_v36, 8 }
 0x24f   :  { %vm2729_vm9 = vcmp.lt.s32.totalorder %v2708_v21, 3  ;;  %v2732_v28 = vsel %vm2730_vm10, %v2720_v50, 2102212464  ;;  %v2735_v27 = vsel %vm2727_vm5, %v2714_v56, %v2717_v55  ;;  %v2736_v42 = vsel %vm2730_vm10, %v2723_v18, 920167782 }
 0x250   :  { %v2861_v33 = vshll.u32 %v9242_v37, 30  ;;  %vm2728_vm4 = vcmp.lt.s32.totalorder %v2708_v21, 2  ;;  %v2737_v31 = vsel %vm2729_vm9, %v2720_v50, %v2736_v42  ;;  %v2739_v22 = vsel %vm2727_vm5, %v2717_v55, %v2720_v50 }
 0x251   :  { %v6453_v17 = vadd.s32 4294967294, %v2557_v47  ;;  %v2738_v8 = vsel %vm2728_vm4, %v2735_v27, %v2737_v31  ;;  %v2740_v49 = vsel %vm2730_vm10, %v2726_v6, 1326507024  ;;  %v6471_v2 = vadd.s32 4294967169, %v3008_v11 }
 0x252   :  { %v2669_v13 = vadd.s32 127, %v2668_v26  ;;  %v2731_v34 = vsel %vm2727_vm5, %v2711_v19, %v2714_v56  ;;  %v2733_v36 = vsel %vm2729_vm9, %v2717_v55, %v2732_v28  ;;  %v2741_v0 = vsel %vm2729_vm9, %v2723_v18, %v2740_v49  ;;  %v354_v26 = vpop.permute.xlu0 %353 }
 0x253   :  { %v2742_v48 = vsel %vm2728_vm4, %v2739_v22, %v2741_v0  ;;  %v9253_v30 = vmul.u32.u64.low %v2743_v35, %v2738_v8  ;;  %v9254_v46 = vmul.u32.u64.high %v2743_v35, %v2738_v8, %v9253_v30  ;;  %v3014_v37 = vadd.s32 1, %v6471_v2 }
 0x254   :  { %v2648_v50 = vadd.s32 %v9054_v60, %v9059_v5  ;;  %v9259_v47 = vsub.s32 %v2858_v52, %v2861_v33  ;;  %v9261_v27 = vmul.u32.u64.low %v2743_v35, %v2742_v48  ;;  %v9262_v6 = vmul.u32.u64.high %v2743_v35, %v2742_v48, %v9261_v27 }
 0x255   :  { %v9264_v11 = vmul.f32 %v2365_v63, %v2363_v7  ;;  %vm6454_vm5 = vcmp.lt.s32.totalorder %v6453_v17, 0  ;;  %v2734_v19 = vsel %vm2728_vm4, %v2731_v34, %v2733_v36  ;;  %vm3015_vm10 = vcmp.gt.s32.totalorder %v3014_v37, 0 }
 0x256   :  { %v2666_v56 = vshrl.u32 %v2648_v50, %v2664_v43  ;;  %v2670_v55 = vshll.u32 %v2669_v13, 23  ;;  %v12366_v18 = vand.u32 2147483647, %v9213_v62  ;;  %v3016_v28 = vsel %vm3015_vm10, %v3014_v37, 0 }
 0x257   :  { %v2665_v5 = vshll.u32 %v9130_v45, %v9229_v39  ;;  %v2753_v60 = vadd.s32 1, %v9254_v46  ;;  %v3018_v48 = vand.u32 31, %v3016_v28  ;;  %v9273_v52 = vmul.f32 %v9210_v12, %v354_v26 }
 0x258   :  { %v3011_v0 = vand.u32 8388607, %v12366_v18  ;;  %v9275_v63 = vsel %vm6454_vm5, 0, %v6453_v17  ;;  %v2864_v7 = vsub.s32 0, %v9259_v47  ;;  %v2750_v21 = vmul.u32 %v2743_v35, %v2734_v19 }
 0x259   :  { %vm2752_vm9 = vc.u32 %v9262_v6, %v9253_v30  ;;  %v2545_v37 = vadd.s32 %v9109_v54, %v9121_v9  ;;  %v3019_v39 = vsub.s32 32, %v3018_v48  ;;  %v9284_v42 = vor.u32 %v2666_v56, %v2665_v5 }
 0x25a   :  { %v2754_v45 = vsel %vm2752_vm9, %v2753_v60, %v9254_v46  ;;  %v9286_v33 = vor.u32 4788187, %v2670_v55  ;;  %v3012_v22 = vor.u32 8388608, %v3011_v0  ;;  %v2561_v17 = vsub.s32 32, %v9275_v63 }
 0x25b   :  { %v2755_v31 = vadd.s32 %v2754_v45, %v2750_v21  ;;  %v2565_v35 = vsub.s32 4294967266, %v9275_v63  ;;  %v3022_v8 = vshrl.u32 %v12293_v1, %v3019_v39  ;;  %v3025_v49 = vshrl.u32 %v12294_v44, %v3019_v39 }
 0x25c   :  { %v6464_v2 = vmin.u32 %v2864_v7, %v9259_v47  ;;  %v3021_v46 = vshll.u32 %v12297_v20, %v3018_v48  ;;  %v2904_v9 = vand.u32 2139095040, %v9273_v52  ;;  %v3017_v13 = vshrl.u32 %v3016_v28, 5 }
 0x25d   :  { %v2756_v54 = vadd.s32 536870912, %v2755_v31  ;;  %v3024_v34 = vshll.u32 %v12293_v1, %v3018_v48  ;;  %v3027_v36 = vshll.u32 %v12294_v44, %v3018_v48  ;;  %v3028_v50 = vshrl.u32 %v12295_v14, %v3019_v39 }
 0x25e   :  { %v3023_v26 = vor.u32 %v3022_v8, %v3021_v46  ;;  %v3030_v19 = vshll.u32 %v12295_v14, %v3018_v48  ;;  %v3031_v56 = vshrl.u32 %v12300_v40, %v3019_v39  ;;  %v3033_v0 = vshll.u32 %v12300_v40, %v3018_v48 }
 0x25f   :  { %v9298_v27 = vshrl.u32 %v2756_v54, 30  ;;  %v3026_v55 = vor.u32 %v3025_v49, %v3024_v34  ;;  %v3029_v18 = vor.u32 %v3028_v50, %v3027_v36  ;;  %v3034_v5 = vshrl.u32 %v12301_v32, %v3019_v39 }
 0x260   :  { %v2563_v28 = vshrl.u32 %v2545_v37, %v2561_v17  ;;  %v3032_v7 = vor.u32 %v3031_v56, %v3030_v19  ;;  %v12216_v21 = vand.u32 2147483647, %v9273_v52  ;;  %v2566_v45 = vadd.s32 127, %v2565_v35 }
 0x261   :  { %12367 = vst [vmem:[#allocation65_spill] sm:$0xff] %v9298_v27  ;;  %v2758_v60 = vshll.u32 %v9298_v27, 30  ;;  %v2866_v54 = vclz %v6464_v2  ;;  %v3035_v43 = vor.u32 %v3034_v5, %v3033_v0  ;;  %v2905_v8 = vshrl.u32 %v2904_v9, 23 }
 0x262   :  { %v3020_v46 = vshrl.u32 %v12297_v20, %v3019_v39  ;;  %vm3036_vm4 = vcmp.lt.s32.totalorder %v3017_v13, 1  ;;  %vm3039_vm5 = vcmp.lt.s32.totalorder %v3017_v13, 4  ;;  %v3052_v49 = vshll.u32 %v3012_v22, 8 }
 0x263   :  { %vm3038_vm10 = vcmp.lt.s32.totalorder %v3017_v13, 3  ;;  %v3041_v34 = vsel %vm3039_vm5, %v3029_v18, 2102212464  ;;  %v3044_v48 = vsel %vm3036_vm4, %v3023_v26, %v3026_v55  ;;  %v3045_v36 = vsel %vm3039_vm5, %v3032_v7, 920167782 }
 0x264   :  { %vm12219_vm9 = vcmp.lt.s32.totalorder %v8824_v10, 0  ;;  %v9309_v37 = vsub.s32 %v2755_v31, %v2758_v60  ;;  %vm3037_vm15 = vcmp.lt.s32.totalorder %v3017_v13, 2  ;;  %v3046_v17 = vsel %vm3038_vm10, %v3029_v18, %v3045_v36 }
 0x265   :  { %v3048_v35 = vsel %vm3036_vm4, %v3026_v55, %v3029_v18  ;;  %v6465_v2 = vadd.s32 4294967294, %v2866_v54  ;;  %v3047_v39 = vsel %vm3037_vm15, %v3044_v48, %v3046_v17  ;;  %v3049_v9 = vsel %vm3039_vm5, %v3035_v43, 1326507024 }
 0x266   :  { %v6467_v50 = vadd.s32 4294967169, %v2905_v8  ;;  %v2567_v22 = vshll.u32 %v2566_v45, 23  ;;  %v3040_v19 = vsel %vm3036_vm4, %v3020_v46, %v3023_v26  ;;  %v3042_v56 = vsel %vm3038_vm10, %v3026_v55, %v3041_v34  ;;  %v369_v26 = vpop.permute.xlu1 %368 }
 0x267   :  { %v3050_v0 = vsel %vm3038_vm10, %v3032_v7, %v3049_v9  ;;  %v9318_v5 = vmul.u32.u64.low %v3052_v49, %v3047_v39  ;;  %v9319_v60 = vmul.u32.u64.high %v3052_v49, %v3047_v39, %v9318_v5  ;;  %v2562_v18 = vshll.u32 %v9174_v15, %v9275_v63 }
 0x268   :  { %v3051_v31 = vsel %vm3037_vm15, %v3048_v35, %v3050_v0  ;;  %v2911_v36 = vadd.s32 1, %v6467_v50  ;;  %v2761_v43 = vsub.s32 0, %v9309_v37  ;;  %v2672_v55 = vand.u32 2147483647, %v9286_v33 }
 0x269   :  { %v9325_v54 = vmul.u32.u64.low %v3052_v49, %v3051_v31  ;;  %v9326_v45 = vmul.u32.u64.high %v3052_v49, %v3051_v31, %v9325_v54  ;;  %vm6466_vm4 = vcmp.lt.s32.totalorder %v6465_v2, 0  ;;  %v3043_v7 = vsel %vm3037_vm15, %v3040_v19, %v3042_v56 }
 0x26a   :  { %vm2912_vm5 = vcmp.gt.s32.totalorder %v2911_v36, 0  ;;  %v2674_v8 = vcvt.s32.f32 %v9284_v42  ;;  %v2564_v46 = vor.u32 %v2563_v28, %v2562_v18  ;;  %v2568_v34 = vor.u32 4788187, %v2567_v22 }
 0x26b   :  { %v2913_v48 = vsel %vm2912_vm5, %v2911_v36, 0  ;;  %v3062_v17 = vadd.s32 1, %v9319_v60  ;;  %v2908_v15 = vand.u32 8388607, %v12216_v21  ;;  %v9335_v35 = vmul.f32 %v9210_v12, %v369_v26 }
 0x26c   :  { %v2915_v63 = vand.u32 31, %v2913_v48  ;;  %v9337_v39 = vsel %vm6466_vm4, 0, %v6465_v2  ;;  %v6460_v33 = vmin.u32 %v2761_v43, %v9309_v37  ;;  %v3059_v13 = vmul.u32 %v3052_v49, %v3043_v7 }
 0x26d   :  { %vm3061_vm15 = vc.u32 %v9326_v45, %v9318_v5  ;;  %v12368_v42 = vxor.u32 2147483648, %v9264_v11  ;;  %v9349_v9 = vmul.f32 %v2674_v8, %v2672_v55  ;;  %v2569_v2 = vand.u32 2147483647, %v2568_v34 }
 0x26e   :  { %v3063_v50 = vsel %vm3061_vm15, %v3062_v17, %v9319_v60  ;;  %v2916_v22 = vsub.s32 32, %v2915_v63  ;;  %v2571_v19 = vcvt.s32.f32 %v2564_v46  ;;  %v9354_v49 = vadd.s32 %v9166_v3, %v9177_v38 }
 0x26f   :  { %v9347_v28 = vsel %vm12219_vm9, %v12368_v42, %v9264_v11  ;;  %v3064_v56 = vadd.s32 %v3063_v50, %v3059_v13  ;;  %v2874_v0 = vsub.s32 4294967266, %v9337_v39  ;;  %v2909_v31 = vor.u32 8388608, %v2908_v15 }
 0x270   :  { %12369 = vst [vmem:[#allocation66_spill] sm:$0xff] %v9347_v28  ;;  %v2919_v36 = vshrl.u32 %v12293_v1, %v2916_v22  ;;  %v2922_v11 = vshrl.u32 %v12294_v44, %v2916_v22  ;;  %v2763_v18 = vclz %v6460_v33  ;;  %v2918_v54 = vshll.u32 %v12297_v20, %v2915_v63 }
 0x271   :  { %v3065_v43 = vadd.s32 536870912, %v3064_v56  ;;  %v3213_v60 = vand.u32 2139095040, %v9335_v35  ;;  %v2914_v26 = vshrl.u32 %v2913_v48, 5  ;;  %v2921_v55 = vshll.u32 %v12293_v1, %v2915_v63 }
 0x272   :  { %v2924_v3 = vshll.u32 %v12294_v44, %v2915_v63  ;;  %v2925_v38 = vshrl.u32 %v12295_v14, %v2916_v22  ;;  %v2920_v8 = vor.u32 %v2919_v36, %v2918_v54  ;;  %v2927_v46 = vshll.u32 %v12295_v14, %v2915_v63 }
 0x273   :  { %v9364_v7 = vshrl.u32 %v3065_v43, 30  ;;  %v2928_v34 = vshrl.u32 %v12300_v40, %v2916_v22  ;;  %v2923_v17 = vor.u32 %v2922_v11, %v2921_v55  ;;  %v2930_v33 = vshll.u32 %v12300_v40, %v2915_v63 }
 0x274   :  { %v2926_v15 = vor.u32 %v2925_v38, %v2924_v3  ;;  %v2931_v13 = vshrl.u32 %v12301_v32, %v2916_v22  ;;  %v2572_v48 = vmul.f32 %v2571_v19, %v2569_v2  ;;  %v2870_v42 = vsub.s32 32, %v9337_v39 }
 0x275   :  { %12370 = vst [vmem:[#allocation67_spill] sm:$0xff] %v9364_v7  ;;  %v3067_v50 = vshll.u32 %v9364_v7, 30  ;;  %v2929_v21 = vor.u32 %v2928_v34, %v2927_v46  ;;  %v2875_v27 = vadd.s32 127, %v2874_v0  ;;  %v6461_v43 = vadd.s32 4294967294, %v2763_v18 }
 0x276   :  { %v2932_v28 = vor.u32 %v2931_v13, %v2930_v33  ;;  %v3214_v36 = vshrl.u32 %v3213_v60, 23  ;;  %v2917_v54 = vshrl.u32 %v12297_v20, %v2916_v22  ;;  %vm2933_vm10 = vcmp.lt.s32.totalorder %v2914_v26, 1 }
 0x277   :  { %vm2936_vm4 = vcmp.lt.s32.totalorder %v2914_v26, 4  ;;  %v2949_v11 = vshll.u32 %v2909_v31, 8  ;;  %vm2935_vm5 = vcmp.lt.s32.totalorder %v2914_v26, 3  ;;  %v2941_v63 = vsel %vm2933_vm10, %v2920_v8, %v2923_v17 }
 0x278   :  { %v2938_v55 = vsel %vm2936_vm4, %v2926_v15, 2102212464  ;;  %v2942_v3 = vsel %vm2936_vm4, %v2929_v21, 920167782  ;;  %vm12236_vm15 = vcmp.lt.s32.totalorder %v8949_v51, 0  ;;  %vm12237_vm9 = vcmp.lt.s32.totalorder %v8995_v16, 0 }
 0x279   :  { %v9376_v2 = vsub.s32 %v3064_v56, %v3067_v50  ;;  %vm2934_vm3 = vcmp.lt.s32.totalorder %v2914_v26, 2  ;;  %v2943_v19 = vsel %vm2935_vm5, %v2926_v15, %v2942_v3  ;;  %v2945_v0 = vsel %vm2933_vm10, %v2923_v17, %v2926_v15  ;;  %v364_v50 = vpop.permute.xlu0 %363 }
 0x27a   :  { %vm6462_vm7 = vcmp.lt.s32.totalorder %v6461_v43, 0  ;;  %v2944_v22 = vsel %vm2934_vm3, %v2941_v63, %v2943_v19  ;;  %v2946_v31 = vsel %vm2936_vm4, %v2932_v28, 1326507024  ;;  %v6479_v18 = vadd.s32 4294967169, %v3214_v36 }
 0x27b   :  { %v2937_v60 = vsel %vm2933_vm10, %v2917_v54, %v2920_v8  ;;  %v2939_v38 = vsel %vm2935_vm5, %v2923_v17, %v2938_v55  ;;  %v2947_v46 = vsel %vm2935_vm5, %v2929_v21, %v2946_v31  ;;  %v12222_v34 = vand.u32 2147483647, %v9335_v35 }
 0x27c   :  { %v2948_v56 = vsel %vm2934_vm3, %v2945_v0, %v2947_v46  ;;  %v9386_v33 = vmul.u32.u64.low %v2949_v11, %v2944_v22  ;;  %v9387_v13 = vmul.u32.u64.high %v2949_v11, %v2944_v22, %v9386_v33  ;;  %v3220_v15 = vadd.s32 1, %v6479_v18 }
 0x27d   :  { %v9390_v3 = vsel %vm6462_vm7, 0, %v6461_v43  ;;  %v3070_v28 = vsub.s32 0, %v9376_v2  ;;  %v9393_v36 = vmul.u32.u64.low %v2949_v11, %v2948_v56  ;;  %v9394_v8 = vmul.u32.u64.high %v2949_v11, %v2948_v56, %v9393_v36 }
 0x27e   :  { %v2676_v17 = vxor.u32 2147483648, %v9349_v9  ;;  %v2573_v21 = vxor.u32 2147483648, %v2572_v48  ;;  %v2940_v54 = vsel %vm2934_vm3, %v2937_v60, %v2939_v38  ;;  %vm3221_vm10 = vcmp.gt.s32.totalorder %v3220_v15, 0 }
 0x27f   :  { %v2872_v55 = vshrl.u32 %v9354_v49, %v2870_v42  ;;  %v2876_v63 = vshll.u32 %v2875_v27, 23  ;;  %v3222_v19 = vsel %vm3221_vm10, %v3220_v15, 0  ;;  %v9400_v0 = vmul.f32 %v9210_v12, %v364_v50 }
 0x280   :  { %v2771_v43 = vsub.s32 4294967266, %v9390_v3  ;;  %v2959_v22 = vadd.s32 1, %v9387_v13  ;;  %v3217_v31 = vand.u32 8388607, %v12222_v34  ;;  %v3224_v18 = vand.u32 31, %v3222_v19 }
 0x281   :  { %v2871_v26 = vshll.u32 %v9259_v47, %v9337_v39  ;;  %v6472_v60 = vmin.u32 %v3070_v28, %v9376_v2  ;;  %v2956_v38 = vmul.u32 %v2949_v11, %v2940_v54  ;;  %vm2958_vm7 = vc.u32 %v9394_v8, %v9386_v33 }
 0x282   :  { %v9414_v27 = vsel %vm12236_vm15, %v2676_v17, %v9349_v9  ;;  %v9418_v49 = vsel %vm12237_vm9, %v2573_v21, %v2572_v48  ;;  %v2960_v42 = vsel %vm2958_vm7, %v2959_v22, %v9387_v13  ;;  %v3225_v46 = vsub.s32 32, %v3224_v18 }
 0x283   :  { %12371 = vst [vmem:[#allocation68_spill] sm:$0xff] %v9414_v27  ;;  %12372 = vst [vmem:[#allocation69_spill] sm:$0xff] %v9418_v49  ;;  %v9421_v56 = vor.u32 %v2872_v55, %v2871_v26  ;;  %v9423_v47 = vor.u32 4788187, %v2876_v63  ;;  %v2751_v39 = vadd.s32 %v9253_v30, %v9262_v6  ;;  %v2961_v11 = vadd.s32 %v2960_v42, %v2956_v38 }
 0x284   :  { %v2772_v15 = vadd.s32 127, %v2771_v43  ;;  %v3218_v50 = vor.u32 8388608, %v3217_v31  ;;  %v3228_v9 = vshrl.u32 %v12293_v1, %v3225_v46  ;;  %v3231_v28 = vshrl.u32 %v12294_v44, %v3225_v46 }
 0x285   :  { %v3072_v36 = vclz %v6472_v60  ;;  %v2962_v48 = vadd.s32 536870912, %v2961_v11  ;;  %v3227_v17 = vshll.u32 %v12297_v20, %v3224_v18  ;;  %v3110_v13 = vand.u32 2139095040, %v9400_v0 }
 0x286   :  { %v3223_v21 = vshrl.u32 %v3222_v19, 5  ;;  %v3230_v54 = vshll.u32 %v12293_v1, %v3224_v18  ;;  %v3233_v55 = vshll.u32 %v12294_v44, %v3224_v18  ;;  %v3234_v30 = vshrl.u32 %v12295_v14, %v3225_v46 }
 0x287   :  { %v9434_v6 = vshrl.u32 %v2962_v48, 30  ;;  %v3229_v63 = vor.u32 %v3228_v9, %v3227_v17  ;;  %v3236_v43 = vshll.u32 %v12295_v14, %v3224_v18  ;;  %v3237_v22 = vshrl.u32 %v12300_v40, %v3225_v46 }
 0x288   :  { %v3232_v31 = vor.u32 %v3231_v28, %v3230_v54  ;;  %v3235_v26 = vor.u32 %v3234_v30, %v3233_v55  ;;  %v3239_v60 = vshll.u32 %v12300_v40, %v3224_v18  ;;  %v3240_v38 = vshrl.u32 %v12301_v32, %v3225_v46 }
 0x289   :  { %12373 = vst [vmem:[#allocation70_spill] sm:$0xff] %v9434_v6  ;;  %v2767_v19 = vsub.s32 32, %v9390_v3  ;;  %v2773_v42 = vshll.u32 %v2772_v15, 23  ;;  %v2964_v34 = vshll.u32 %v9434_v6, 30  ;;  %v3238_v7 = vor.u32 %v3237_v22, %v3236_v43 }
 0x28a   :  { %v6473_v27 = vadd.s32 4294967294, %v3072_v36  ;;  %v3241_v48 = vor.u32 %v3240_v38, %v3239_v60  ;;  %v3258_v51 = vshll.u32 %v3218_v50, 8  ;;  %v3111_v9 = vshrl.u32 %v3110_v13, 23 }
 0x28b   :  { %v9442_v17 = vsub.s32 %v2961_v11, %v2964_v34  ;;  %v3226_v49 = vshrl.u32 %v12297_v20, %v3225_v46  ;;  %vm3242_vm3 = vcmp.lt.s32.totalorder %v3223_v21, 1  ;;  %vm3245_vm4 = vcmp.lt.s32.totalorder %v3223_v21, 4 }
 0x28c   :  { %vm3244_vm5 = vcmp.lt.s32.totalorder %v3223_v21, 3  ;;  %v3247_v18 = vsel %vm3245_vm4, %v3235_v26, 2102212464  ;;  %v3250_v28 = vsel %vm3242_vm3, %v3229_v63, %v3232_v31  ;;  %v3251_v54 = vsel %vm3245_vm4, %v3238_v7, 920167782 }
 0x28d   :  { %v2967_v55 = vsub.s32 0, %v9442_v17  ;;  %vm3243_vm10 = vcmp.lt.s32.totalorder %v3223_v21, 2  ;;  %v3252_v15 = vsel %vm3244_vm5, %v3235_v26, %v3251_v54  ;;  %v3254_v30 = vsel %vm3242_vm3, %v3232_v31, %v3235_v26 }
 0x28e   :  { %vm6474_vm7 = vcmp.lt.s32.totalorder %v6473_v27, 0  ;;  %v3253_v36 = vsel %vm3243_vm10, %v3250_v28, %v3252_v15  ;;  %v3255_v50 = vsel %vm3245_vm4, %v3241_v48, 1326507024  ;;  %v6475_v13 = vadd.s32 4294967169, %v3111_v9  ;;  %v379_v48 = vpop.permute.xlu1 %378 }
 0x28f   :  { %v6468_v34 = vmin.u32 %v2967_v55, %v9442_v17  ;;  %v3246_v11 = vsel %vm3242_vm3, %v3226_v49, %v3229_v63  ;;  %v3248_v46 = vsel %vm3244_vm5, %v3232_v31, %v3247_v18  ;;  %v3256_v43 = vsel %vm3244_vm5, %v3238_v7, %v3255_v50 }
 0x290   :  { %v3257_v22 = vsel %vm3243_vm10, %v3254_v30, %v3256_v43  ;;  %v9449_v60 = vmul.u32.u64.low %v3258_v51, %v3253_v36  ;;  %v9450_v38 = vmul.u32.u64.high %v3258_v51, %v3253_v36, %v9449_v60  ;;  %v3117_v6 = vadd.s32 1, %v6475_v13 }
 0x291   :  { %v2878_v54 = vand.u32 2147483647, %v9423_v47  ;;  %v2880_v26 = vcvt.s32.f32 %v9421_v56  ;;  %v9455_v16 = vmul.u32.u64.low %v3258_v51, %v3257_v22  ;;  %v9456_v28 = vmul.u32.u64.high %v3258_v51, %v3257_v22, %v9455_v16 }
 0x292   :  { %v2769_v9 = vshrl.u32 %v2751_v39, %v2767_v19  ;;  %v9459_v49 = vsel %vm6474_vm7, 0, %v6473_v27  ;;  %v3249_v7 = vsel %vm3243_vm10, %v3246_v11, %v3248_v46  ;;  %vm3118_vm3 = vcmp.gt.s32.totalorder %v3117_v6, 0 }
 0x293   :  { %v9462_v63 = vor.u32 4788187, %v2773_v42  ;;  %v2969_v31 = vclz %v6468_v34  ;;  %v12231_v18 = vand.u32 2147483647, %v9400_v0  ;;  %v3119_v55 = vsel %vm3118_vm3, %v3117_v6, 0 }
 0x294   :  { %v2768_v56 = vshll.u32 %v9309_v37, %v9390_v3  ;;  %v3268_v47 = vadd.s32 1, %v9450_v38  ;;  %v3121_v16 = vand.u32 31, %v3119_v55  ;;  %v9469_v39 = vmul.f32 %v9210_v12, %v379_v48 }
 0x295   :  { %v9471_v27 = vmul.f32 %v2880_v26, %v2878_v54  ;;  %v3080_v21 = vsub.s32 4294967266, %v9459_v49  ;;  %v3265_v19 = vmul.u32 %v3258_v51, %v3249_v7  ;;  %vm3267_vm4 = vc.u32 %v9456_v28, %v9449_v60 }
 0x296   :  { %v9476_v42 = vor.u32 %v2769_v9, %v2768_v56  ;;  %v3060_v6 = vadd.s32 %v9318_v5, %v9326_v45  ;;  %v3269_v37 = vsel %vm3267_vm4, %v3268_v47, %v9450_v38  ;;  %v3122_v3 = vsub.s32 32, %v3121_v16 }
 0x297   :  { %v6469_v30 = vadd.s32 4294967294, %v2969_v31  ;;  %v3270_v36 = vadd.s32 %v3269_v37, %v3265_v19  ;;  %v3114_v50 = vand.u32 8388607, %v12231_v18  ;;  %v3076_v51 = vsub.s32 32, %v9459_v49 }
 0x298   :  { %v3125_v13 = vshrl.u32 %v12293_v1, %v3122_v3  ;;  %v3128_v34 = vshrl.u32 %v12294_v44, %v3122_v3  ;;  %v3081_v46 = vadd.s32 127, %v3080_v21  ;;  %v3124_v45 = vshll.u32 %v12297_v20, %v3121_v16 }
 0x299   :  { %v3271_v5 = vadd.s32 536870912, %v3270_v36  ;;  %v3419_v43 = vand.u32 2139095040, %v9469_v39  ;;  %v3120_v22 = vshrl.u32 %v3119_v55, 5  ;;  %v3127_v38 = vshll.u32 %v12293_v1, %v3121_v16 }
 0x29a   :  { %v3130_v54 = vshll.u32 %v12294_v44, %v3121_v16  ;;  %v3131_v26 = vshrl.u32 %v12295_v14, %v3122_v3  ;;  %vm6470_vm5 = vcmp.lt.s32.totalorder %v6469_v30, 0  ;;  %v3126_v48 = vor.u32 %v3125_v13, %v3124_v45 }
 0x29b   :  { %v3133_v9 = vshll.u32 %v12295_v14, %v3121_v16  ;;  %v3134_v7 = vshrl.u32 %v12300_v40, %v3122_v3  ;;  %v3129_v31 = vor.u32 %v3128_v34, %v3127_v38  ;;  %v3136_v47 = vshll.u32 %v12300_v40, %v3121_v16 }
 0x29c   :  { %v3132_v56 = vor.u32 %v3131_v26, %v3130_v54  ;;  %v3137_v21 = vshrl.u32 %v12301_v32, %v3122_v3  ;;  %v3077_v55 = vshll.u32 %v9376_v2, %v9459_v49  ;;  %v9499_v19 = vshrl.u32 %v3271_v5, 30 }
 0x29d   :  { %v3115_v37 = vor.u32 8388608, %v3114_v50  ;;  %v3135_v18 = vor.u32 %v3134_v7, %v3133_v9  ;;  %v3078_v11 = vshrl.u32 %v3060_v6, %v3076_v51  ;;  %v3082_v15 = vshll.u32 %v3081_v46, 23 }
 0x29e   :  { %12374 = vst [vmem:[#allocation71_spill] sm:$0xff] %v9499_v19  ;;  %v3138_v13 = vor.u32 %v3137_v21, %v3136_v47  ;;  %v3420_v45 = vshrl.u32 %v3419_v43, 23  ;;  %v9502_v10 = vsel %vm6470_vm5, 0, %v6469_v30  ;;  %v3123_v34 = vshrl.u32 %v12297_v20, %v3122_v3 }
 0x29f   :  { %vm3139_vm10 = vcmp.lt.s32.totalorder %v3120_v22, 1  ;;  %vm3142_vm7 = vcmp.lt.s32.totalorder %v3120_v22, 4  ;;  %vm3141_vm3 = vcmp.lt.s32.totalorder %v3120_v22, 3  ;;  %v3273_v2 = vshll.u32 %v9499_v19, 30 }
 0x2a0   :  { %v3144_v16 = vsel %vm3142_vm7, %v3132_v56, 2102212464  ;;  %v3147_v38 = vsel %vm3139_vm10, %v3126_v48, %v3129_v31  ;;  %v3148_v54 = vsel %vm3142_vm7, %v3135_v18, 920167782  ;;  %vm3140_vm4 = vcmp.lt.s32.totalorder %v3120_v22, 2 }
 0x2a1   :  { %v3149_v49 = vsel %vm3141_vm3, %v3132_v56, %v3148_v54  ;;  %v3151_v50 = vsel %vm3139_vm10, %v3129_v31, %v3132_v56  ;;  %v3152_v51 = vsel %vm3142_vm7, %v3138_v13, 1326507024  ;;  %v3155_v46 = vshll.u32 %v3115_v37, 8 }
 0x2a2   :  { %v3150_v6 = vsel %vm3140_vm4, %v3147_v38, %v3149_v49  ;;  %v6487_v5 = vadd.s32 4294967169, %v3420_v45  ;;  %v2977_v30 = vsub.s32 4294967266, %v9502_v10  ;;  %v3143_v43 = vsel %vm3139_vm10, %v3123_v34, %v3126_v48 }
 0x2a3   :  { %v3145_v3 = vsel %vm3141_vm3, %v3129_v31, %v3144_v16  ;;  %v3153_v26 = vsel %vm3141_vm3, %v3135_v18, %v3152_v51  ;;  %v9509_v7 = vmul.u32.u64.low %v3155_v46, %v3150_v6  ;;  %v9510_v47 = vmul.u32.u64.high %v3155_v46, %v3150_v6, %v9509_v7  ;;  %v374_v18 = vpop.permute.xlu0 %373 }
 0x2a4   :  { %v3154_v9 = vsel %vm3140_vm4, %v3151_v50, %v3153_v26  ;;  %v3426_v21 = vadd.s32 1, %v6487_v5  ;;  %v2777_v54 = vcvt.s32.f32 %v9476_v42  ;;  %v9514_v56 = vsub.s32 %v3270_v36, %v3273_v2 }
 0x2a5   :  { %v9516_v38 = vmul.u32.u64.low %v3155_v46, %v3154_v9  ;;  %v9517_v13 = vmul.u32.u64.high %v3155_v46, %v3154_v9, %v9516_v38  ;;  %v3079_v45 = vor.u32 %v3078_v11, %v3077_v55  ;;  %v3146_v48 = vsel %vm3140_vm4, %v3143_v43, %v3145_v3 }
 0x2a6   :  { %vm3427_vm5 = vcmp.gt.s32.totalorder %v3426_v21, 0  ;;  %v12375_v31 = vand.u32 2147483647, %v9462_v63  ;;  %v3083_v16 = vor.u32 4788187, %v3082_v15  ;;  %v2973_v2 = vsub.s32 32, %v9502_v10 }
 0x2a7   :  { %v12376_v49 = vand.u32 2147483647, %v9469_v39  ;;  %v3428_v36 = vsel %vm3427_vm5, %v3426_v21, 0  ;;  %v2978_v50 = vadd.s32 127, %v2977_v30  ;;  %v3165_v6 = vadd.s32 1, %v9510_v47 }
 0x2a8   :  { %v9523_v34 = vmul.f32 %v2777_v54, %v12375_v31  ;;  %v3430_v51 = vand.u32 31, %v3428_v36  ;;  %v3276_v11 = vsub.s32 0, %v9514_v56  ;;  %v3162_v22 = vmul.u32 %v3155_v46, %v3146_v48 }
 0x2a9   :  { %v3423_v42 = vand.u32 8388607, %v12376_v49  ;;  %vm3164_vm10 = vc.u32 %v9517_v13, %v9509_v7  ;;  %v9533_v63 = vmul.f32 %v9210_v12, %v374_v18  ;;  %v3086_v15 = vcvt.s32.f32 %v3079_v45 }
 0x2aa   :  { %v2957_v55 = vadd.s32 %v9386_v33, %v9394_v8  ;;  %v3166_v5 = vsel %vm3164_vm10, %v3165_v6, %v9510_v47  ;;  %v3431_v43 = vsub.s32 32, %v3430_v51  ;;  %v3084_v30 = vand.u32 2147483647, %v3083_v16 }
 0x2ab   :  { %12377 = vst [vmem:[#allocation72_spill] sm:$0xff] %v9533_v63  ;;  %v2974_v3 = vshll.u32 %v9442_v17, %v9502_v10  ;;  %v3167_v26 = vadd.s32 %v3166_v5, %v3162_v22  ;;  %v3424_v9 = vor.u32 8388608, %v3423_v42  ;;  %v2979_v21 = vshll.u32 %v2978_v50, 23 }
 0x2ac   :  { %v2975_v46 = vshrl.u32 %v2957_v55, %v2973_v2  ;;  %v3434_v54 = vshrl.u32 %v12293_v1, %v3431_v43  ;;  %v3437_v38 = vshrl.u32 %v12294_v44, %v3431_v43  ;;  %v6480_v45 = vmin.u32 %v3276_v11, %v9514_v56 }
 0x2ad   :  { %v3168_v48 = vadd.s32 536870912, %v3167_v26  ;;  %v3433_v33 = vshll.u32 %v12297_v20, %v3430_v51  ;;  %v3316_v8 = vand.u32 2139095040, %v9533_v63  ;;  %v3429_v47 = vshrl.u32 %v3428_v36, 5 }
 0x2ae   :  { %v3436_v18 = vshll.u32 %v12293_v1, %v3430_v51  ;;  %v3439_v10 = vshll.u32 %v12294_v44, %v3430_v51  ;;  %v3440_v17 = vshrl.u32 %v12295_v14, %v3431_v43  ;;  %v3442_v49 = vshll.u32 %v12295_v14, %v3430_v51 }
 0x2af   :  { %v9548_v31 = vshrl.u32 %v3168_v48, 30  ;;  %v3435_v16 = vor.u32 %v3434_v54, %v3433_v33  ;;  %v3443_v42 = vshrl.u32 %v12300_v40, %v3431_v43  ;;  %v3445_v6 = vshll.u32 %v12300_v40, %v3430_v51 }
 0x2b0   :  { %v3438_v2 = vor.u32 %v3437_v38, %v3436_v18  ;;  %v3441_v50 = vor.u32 %v3440_v17, %v3439_v10  ;;  %v3446_v11 = vshrl.u32 %v12301_v32, %v3431_v43  ;;  %v3087_v36 = vmul.f32 %v3086_v15, %v3084_v30 }
 0x2b1   :  { %12378 = vst [vmem:[#allocation73_spill] sm:$0xff] %v9548_v31  ;;  %v2976_v22 = vor.u32 %v2975_v46, %v2974_v3  ;;  %v3170_v55 = vshll.u32 %v9548_v31, 30  ;;  %v3444_v5 = vor.u32 %v3443_v42, %v3442_v49  ;;  %vm12257_vm7 = vcmp.lt.s32.totalorder %v9062_v4, 0 }
 0x2b2   :  { %v2980_v48 = vor.u32 4788187, %v2979_v21  ;;  %v3278_v37 = vclz %v6480_v45  ;;  %v3447_v54 = vor.u32 %v3446_v11, %v3445_v6  ;;  %v3317_v33 = vshrl.u32 %v3316_v8, 23 }
 0x2b3   :  { %v3432_v19 = vshrl.u32 %v12297_v20, %v3431_v43  ;;  %vm3448_vm3 = vcmp.lt.s32.totalorder %v3429_v47, 1  ;;  %vm3451_vm4 = vcmp.lt.s32.totalorder %v3429_v47, 4  ;;  %v3464_v38 = vshll.u32 %v3424_v9, 8 }
 0x2b4   :  { %vm3450_vm5 = vcmp.lt.s32.totalorder %v3429_v47, 3  ;;  %v3453_v51 = vsel %vm3451_vm4, %v3441_v50, 2102212464  ;;  %v3456_v18 = vsel %vm3448_vm3, %v3435_v16, %v3438_v2  ;;  %v3457_v15 = vsel %vm3451_vm4, %v3444_v5, 920167782 }
 0x2b5   :  { %vm12262_vm10 = vcmp.lt.s32.totalorder %v9074_v24, 0  ;;  %vm12243_vm15 = vcmp.lt.s32.totalorder %v9213_v62, 0  ;;  %v9560_v30 = vsub.s32 %v3167_v26, %v3170_v55  ;;  %vm3449_vm9 = vcmp.lt.s32.totalorder %v3429_v47, 2 }
 0x2b6   :  { %v3458_v3 = vsel %vm3450_vm5, %v3441_v50, %v3457_v15  ;;  %v3460_v46 = vsel %vm3448_vm3, %v3438_v2, %v3441_v50  ;;  %v6481_v43 = vadd.s32 4294967294, %v3278_v37  ;;  %v3461_v9 = vsel %vm3451_vm4, %v3447_v54, 1326507024  ;;  %v389_v37 = vpop.permute.xlu1 %388 }
 0x2b7   :  { %v3459_v21 = vsel %vm3449_vm9, %v3456_v18, %v3458_v3  ;;  %v6483_v45 = vadd.s32 4294967169, %v3317_v33  ;;  %v3452_v8 = vsel %vm3448_vm3, %v3432_v19, %v3435_v16  ;;  %v3454_v10 = vsel %vm3450_vm5, %v3438_v2, %v3453_v51 }
 0x2b8   :  { %v3462_v17 = vsel %vm3450_vm5, %v3444_v5, %v3461_v9  ;;  %v12238_v49 = vand.u32 2147483647, %v9533_v63  ;;  %v9570_v42 = vmul.u32.u64.low %v3464_v38, %v3459_v21  ;;  %v9571_v6 = vmul.u32.u64.high %v3464_v38, %v3459_v21, %v9570_v42  ;;  %v384_v9 = vpop.permute.xlu0 %383 }
 0x2b9   :  { %v3463_v26 = vsel %vm3449_vm9, %v3460_v46, %v3462_v17  ;;  %v3323_v50 = vadd.s32 1, %v6483_v45  ;;  %v2779_v11 = vxor.u32 2147483648, %v9523_v34  ;;  %v3173_v55 = vsub.s32 0, %v9560_v30 }
 0x2ba   :  { %v9576_v54 = vmul.u32.u64.low %v3464_v38, %v3463_v26  ;;  %v9577_v19 = vmul.u32.u64.high %v3464_v38, %v3463_v26, %v9576_v54  ;;  %v3088_v16 = vxor.u32 2147483648, %v3087_v36  ;;  %vm6482_vm3 = vcmp.lt.s32.totalorder %v6481_v43, 0 }
 0x2bb   :  { %v3455_v2 = vsel %vm3449_vm9, %v3452_v8, %v3454_v10  ;;  %vm3324_vm4 = vcmp.gt.s32.totalorder %v3323_v50, 0  ;;  %v12379_v5 = vxor.u32 2147483648, %v9471_v27  ;;  %v2981_v51 = vand.u32 2147483647, %v2980_v48 }
 0x2bc   :  { %v3325_v18 = vsel %vm3324_vm4, %v3323_v50, 0  ;;  %v9588_v15 = vmul.f32 %v9210_v12, %v389_v37  ;;  %v2983_v3 = vcvt.s32.f32 %v2976_v22  ;;  %v3474_v46 = vadd.s32 1, %v9571_v6 }
 0x2bd   :  { %v9585_v33 = vsel %vm12257_vm7, %v12379_v5, %v9471_v27  ;;  %v3320_v47 = vand.u32 8388607, %v12238_v49  ;;  %v3327_v21 = vand.u32 31, %v3325_v18  ;;  %v9593_v45 = vsel %vm6482_vm3, 0, %v6481_v43 }
 0x2be   :  { %12380 = vst [vmem:[#allocation74_spill] sm:$0xff] %v9585_v33  ;;  %12381 = vst [vmem:[#allocation75_spill] sm:$0xff] %v9588_v15  ;;  %v6476_v8 = vmin.u32 %v3173_v55, %v9560_v30  ;;  %v3471_v10 = vmul.u32 %v3464_v38, %v3455_v2  ;;  %vm3473_vm9 = vc.u32 %v9577_v19, %v9570_v42  ;;  %v3286_v37 = vsub.s32 4294967266, %v9593_v45 }
 0x2bf   :  { %v9601_v27 = vsel %vm12262_vm10, %v2779_v11, %v9523_v34  ;;  %v9605_v22 = vsel %vm12243_vm15, %v3088_v16, %v3087_v36  ;;  %v3475_v48 = vsel %vm3473_vm9, %v3474_v46, %v9571_v6  ;;  %v3328_v17 = vsub.s32 32, %v3327_v21 }
 0x2c0   :  { %12382 = vst [vmem:[#allocation76_spill] sm:$0xff] %v9605_v22  ;;  %v9608_v43 = vmul.f32 %v2983_v3, %v2981_v51  ;;  %v3266_v38 = vadd.s32 %v9449_v60, %v9456_v28  ;;  %v3476_v26 = vadd.s32 %v3475_v48, %v3471_v10  ;;  %v9613_v50 = vmul.f32 %v9210_v12, %v384_v9 }
 0x2c1   :  { %v3321_v34 = vor.u32 8388608, %v3320_v47  ;;  %v3331_v11 = vshrl.u32 %v12293_v1, %v3328_v17  ;;  %v3334_v36 = vshrl.u32 %v12294_v44, %v3328_v17  ;;  %v3175_v55 = vclz %v6476_v8 }
 0x2c2   :  { %v3477_v54 = vadd.s32 536870912, %v3476_v26  ;;  %v3330_v6 = vshll.u32 %v12297_v20, %v3327_v21  ;;  %v3625_v16 = vand.u32 2139095040, %v9588_v15  ;;  %v3326_v2 = vshrl.u32 %v3325_v18, 5 }
 0x2c3   :  { %v3333_v60 = vshll.u32 %v12293_v1, %v3327_v21  ;;  %v3336_v28 = vshll.u32 %v12294_v44, %v3327_v21  ;;  %v3337_v12 = vshrl.u32 %v12295_v14, %v3328_v17  ;;  %v3339_v3 = vshll.u32 %v12295_v14, %v3327_v21 }
 0x2c4   :  { %v9623_v5 = vshrl.u32 %v3477_v54, 30  ;;  %v3332_v51 = vor.u32 %v3331_v11, %v3330_v6  ;;  %v3340_v46 = vshrl.u32 %v12300_v40, %v3328_v17  ;;  %v3342_v8 = vshll.u32 %v12300_v40, %v3327_v21 }
 0x2c5   :  { %v3335_v47 = vor.u32 %v3334_v36, %v3333_v60  ;;  %v3338_v9 = vor.u32 %v3337_v12, %v3336_v28  ;;  %v3343_v10 = vshrl.u32 %v12301_v32, %v3328_v17  ;;  %v3282_v48 = vsub.s32 32, %v9593_v45 }
 0x2c6   :  { %12383 = vst [vmem:[#allocation77_spill] sm:$0xff] %v9623_v5  ;;  %v3479_v49 = vshll.u32 %v9623_v5, 30  ;;  %v3341_v31 = vor.u32 %v3340_v46, %v3339_v3  ;;  %v3287_v54 = vadd.s32 127, %v3286_v37  ;;  %v6477_v63 = vadd.s32 4294967294, %v3175_v55 }
 0x2c7   :  { %v3344_v11 = vor.u32 %v3343_v10, %v3342_v8  ;;  %v3626_v6 = vshrl.u32 %v3625_v16, 23  ;;  %v3329_v22 = vshrl.u32 %v12297_v20, %v3328_v17  ;;  %vm3345_vm5 = vcmp.lt.s32.totalorder %v3326_v2, 1  ;;  %v3725_v10 = vld [vmem:[%s12384_s4] sm:$0xff] }
 0x2c8   :  { %vm3348_vm3 = vcmp.lt.s32.totalorder %v3326_v2, 4  ;;  %v3361_v36 = vshll.u32 %v3321_v34, 8  ;;  %vm3347_vm4 = vcmp.lt.s32.totalorder %v3326_v2, 3  ;;  %v3353_v60 = vsel %vm3345_vm5, %v3332_v51, %v3335_v47 }
 0x2c9   :  { %v3350_v21 = vsel %vm3348_vm3, %v3338_v9, 2102212464  ;;  %v3354_v28 = vsel %vm3348_vm3, %v3341_v31, 920167782  ;;  %v9634_v12 = vsub.s32 %v3476_v26, %v3479_v49  ;;  %vm3346_vm9 = vcmp.lt.s32.totalorder %v3326_v2, 2  ;;  %v3726_v49 = vld [vmem:[%s12384_s4 + $0x8] sm:$0xff] }
 0x2ca   :  { %v3355_v18 = vsel %vm3347_vm4, %v3338_v9, %v3354_v28  ;;  %v3357_v3 = vsel %vm3345_vm5, %v3335_v47, %v3338_v9  ;;  %vm6478_vm15 = vcmp.lt.s32.totalorder %v6477_v63, 0  ;;  %v3358_v55 = vsel %vm3348_vm3, %v3344_v11, 1326507024 }
 0x2cb   :  { %v3356_v37 = vsel %vm3346_vm9, %v3353_v60, %v3355_v18  ;;  %v6495_v16 = vadd.s32 4294967169, %v3626_v6  ;;  %v3288_v17 = vshll.u32 %v3287_v54, 23  ;;  %v3349_v46 = vsel %vm3345_vm5, %v3329_v22, %v3332_v51  ;;  %v3727_v22 = vld [vmem:[%s12384_s4 + $0x10] sm:$0xff] }
 0x2cc   :  { %v3351_v34 = vsel %vm3347_vm4, %v3335_v47, %v3350_v21  ;;  %v3359_v8 = vsel %vm3347_vm4, %v3341_v31, %v3358_v55  ;;  %v9646_v9 = vmul.u32.u64.low %v3361_v36, %v3356_v37  ;;  %v9647_v28 = vmul.u32.u64.high %v3361_v36, %v3356_v37, %v9646_v9  ;;  %v3728_v31 = vld [vmem:[%s12384_s4 + $0x18] sm:$0xff] }
 0x2cd   :  { %v3360_v26 = vsel %vm3346_vm9, %v3357_v3, %v3359_v8  ;;  %v3632_v18 = vadd.s32 1, %v6495_v16  ;;  %v9656_v51 = vsel %vm6478_vm15, 0, %v6477_v63  ;;  %v3482_v47 = vsub.s32 0, %v9634_v12  ;;  %v3729_v3 = vld [vmem:[%s12384_s4 + $0x20] sm:$0xff]  ;;  %v3730_v8 = vld [vmem:[%s12384_s4 + $0x28] sm:$0xff] }
 0x2ce   :  { %v9659_v54 = vmul.u32.u64.low %v3361_v36, %v3360_v26  ;;  %v9660_v11 = vmul.u32.u64.high %v3361_v36, %v3360_v26, %v9659_v54  ;;  %v3284_v6 = vshrl.u32 %v3266_v38, %v3282_v48  ;;  %v3352_v21 = vsel %vm3346_vm9, %v3349_v46, %v3351_v34 }
 0x2cf   :  { %vm3633_vm5 = vcmp.gt.s32.totalorder %v3632_v18, 0  ;;  %v6799_v60 = vpack.c.bf16 %v3726_v49, %v3725_v10  ;;  %v9666_v37 = vor.u32 4788187, %v3288_v17  ;;  %v12244_v55 = vand.u32 2147483647, %v9588_v15 }
 0x2d0   :  { %v3634_v63 = vsel %vm3633_vm5, %v3632_v18, 0  ;;  %v6803_v16 = vpack.c.bf16 %v3728_v31, %v3727_v22  ;;  %v3283_v38 = vshll.u32 %v9514_v56, %v9593_v45  ;;  %v3183_v2 = vsub.s32 4294967266, %v9656_v51 }
 0x2d1   :  { %v3371_v48 = vadd.s32 1, %v9647_v28  ;;  %v3636_v46 = vand.u32 31, %v3634_v63  ;;  %6800 = vmatprep.subr.bf16.mxu1 %v6799_v60  ;;  %v3163_v17 = vadd.s32 %v9509_v7, %v9517_v13  ;;  %v6488_v34 = vmin.u32 %v3482_v47, %v9634_v12 }
 0x2d2   :  { %v3368_v10 = vmul.u32 %v3361_v36, %v3352_v21  ;;  %vm3370_vm15 = vc.u32 %v9660_v11, %v9646_v9  ;;  %6802 = vmatpush3.bf16.msra.mxu1 %v6799_v60  ;;  %v9681_v49 = vor.u32 %v3284_v6, %v3283_v38  ;;  %v6807_v26 = vpack.c.bf16 %v3730_v8, %v3729_v3 }
 0x2d3   :  { %v3372_v56 = vsel %vm3370_vm15, %v3371_v48, %v9647_v28  ;;  %v3637_v45 = vsub.s32 32, %v3636_v46  ;;  %6804 = vmatprep.subr.bf16.mxu1 %v6803_v16  ;;  %v3629_v7 = vand.u32 8388607, %v12244_v55  ;;  %v3179_v36 = vsub.s32 32, %v9656_v51 }
 0x2d4   :  { %v3373_v22 = vadd.s32 %v3372_v56, %v3368_v10  ;;  %v9689_v31 = vadd.s32 127, %v3183_v2  ;;  %v3484_v28 = vclz %v6488_v34  ;;  %v3639_v21 = vshll.u32 %v12297_v20, %v3636_v46 }
 0x2d5   :  { %v3640_v47 = vshrl.u32 %v12293_v1, %v3637_v45  ;;  %v3643_v54 = vshrl.u32 %v12294_v44, %v3637_v45  ;;  %v3522_v60 = vand.u32 2139095040, %v9613_v50  ;;  %v3635_v3 = vshrl.u32 %v3634_v63, 5 }
 0x2d6   :  { %v3374_v6 = vadd.s32 536870912, %v3373_v22  ;;  %6806 = vmatpush3.bf16.msra.mxu1 %v6803_v16  ;;  %v3642_v8 = vshll.u32 %v12293_v1, %v3636_v46  ;;  %v3645_v38 = vshll.u32 %v12294_v44, %v3636_v46  ;;  %v3646_v48 = vshrl.u32 %v12295_v14, %v3637_v45 }
 0x2d7   :  { %6808 = vmatprep.subr.bf16.mxu1 %v6807_v26  ;;  %v3641_v10 = vor.u32 %v3640_v47, %v3639_v21  ;;  %v3648_v56 = vshll.u32 %v12295_v14, %v3636_v46  ;;  %v3649_v34 = vshrl.u32 %v12300_v40, %v3637_v45  ;;  %v3651_v13 = vshll.u32 %v12300_v40, %v3636_v46 }
 0x2d8   :  { %v9698_v2 = vshrl.u32 %v3374_v6, 30  ;;  %v3644_v55 = vor.u32 %v3643_v54, %v3642_v8  ;;  %v3647_v18 = vor.u32 %v3646_v48, %v3645_v38  ;;  %v3652_v63 = vshrl.u32 %v12301_v32, %v3637_v45  ;;  %v3731_v48 = vld [vmem:[%s12384_s4 + $0x30] sm:$0xff] }
 0x2d9   :  { %v3181_v16 = vshrl.u32 %v3163_v17, %v3179_v36  ;;  %v3630_v15 = vor.u32 8388608, %v3629_v7  ;;  %v3650_v62 = vor.u32 %v3649_v34, %v3648_v56  ;;  %v3185_v6 = vshll.u32 %v9689_v31, 23  ;;  %v3732_v56 = vld [vmem:[%s12384_s4 + $0x38] sm:$0xff]  ;;  %s12451_s4 = sld [smem:[#allocation83_spill]] }
 0x2da   :  { %v3376_v5 = vshll.u32 %v9698_v2, 30  ;;  %6810 = vmatpush3.bf16.msra.mxu1 %v6807_v26  ;;  %v6489_v33 = vadd.s32 4294967294, %v3484_v28  ;;  %v3653_v47 = vor.u32 %v3652_v63, %v3651_v13  ;;  %v3523_v21 = vshrl.u32 %v3522_v60, 23 }
 0x2db   :  { %vm12253_vm3 = vcmp.lt.s32.totalorder %v9273_v52, 0  ;;  %v3638_v54 = vshrl.u32 %v12297_v20, %v3637_v45  ;;  %vm3654_vm4 = vcmp.lt.s32.totalorder %v3635_v3, 1  ;;  %vm3657_vm9 = vcmp.lt.s32.totalorder %v3635_v3, 4 }
 0x2dc   :  { %v9707_v4 = vsub.s32 %v3373_v22, %v3376_v5  ;;  %vm3656_vm5 = vcmp.lt.s32.totalorder %v3635_v3, 3  ;;  %v3659_v46 = vsel %vm3657_vm9, %v3647_v18, 2102212464  ;;  %v3662_v17 = vsel %vm3654_vm4, %v3641_v10, %v3644_v55 }
 0x2dd   :  { %v3663_v36 = vsel %vm3657_vm9, %v3650_v62, 920167782  ;;  %vm3655_vm15 = vcmp.lt.s32.totalorder %v3635_v3, 2  ;;  %v3666_v31 = vsel %vm3654_vm4, %v3644_v55, %v3647_v18  ;;  %v3667_v28 = vsel %vm3657_vm9, %v3653_v47, 1326507024 }
 0x2de   :  { %v3379_v7 = vsub.s32 0, %v9707_v4  ;;  %v3664_v26 = vsel %vm3656_vm5, %v3647_v18, %v3663_v36  ;;  %v3670_v60 = vshll.u32 %v3630_v15, 8  ;;  %v6491_v8 = vadd.s32 4294967169, %v3523_v21 }
 0x2df   :  { %v3665_v13 = vsel %vm3655_vm15, %v3662_v17, %v3664_v26  ;;  %v3658_v22 = vsel %vm3654_vm4, %v3638_v54, %v3641_v10  ;;  %v3660_v45 = vsel %vm3656_vm5, %v3644_v55, %v3659_v46  ;;  %v3668_v38 = vsel %vm3656_vm5, %v3650_v62, %v3667_v28 }
 0x2e0   :  { %v6484_v5 = vmin.u32 %v3379_v7, %v9707_v4  ;;  %v3669_v18 = vsel %vm3655_vm15, %v3666_v31, %v3668_v38  ;;  %v9720_v34 = vmul.u32.u64.low %v3670_v60, %v3665_v13  ;;  %v9721_v63 = vmul.u32.u64.high %v3670_v60, %v3665_v13, %v9720_v34 }
 0x2e1   :  { %v3529_v15 = vadd.s32 1, %v6491_v8  ;;  %v3180_v10 = vshll.u32 %v9560_v30, %v9656_v51  ;;  %vm6490_vm4 = vcmp.lt.s32.totalorder %v6489_v33, 0  ;;  %v3661_v21 = vsel %vm3655_vm15, %v3658_v22, %v3660_v45 }
 0x2e2   :  { %v9726_v62 = vmul.u32.u64.low %v3670_v60, %v3669_v18  ;;  %v9727_v55 = vmul.u32.u64.high %v3670_v60, %v3669_v18, %v9726_v62  ;;  %v3381_v47 = vclz %v6484_v5  ;;  %v6811_v54 = vpack.c.bf16 %v3732_v56, %v3731_v48 }
 0x2e3   :  { %vm3530_vm9 = vcmp.gt.s32.totalorder %v3529_v15, 0  ;;  %v3292_v46 = vcvt.s32.f32 %v9681_v49  ;;  %v9731_v17 = vor.u32 %v3181_v16, %v3180_v10  ;;  %v9733_v36 = vor.u32 4788187, %v3185_v6 }
 0x2e4   :  { %v3531_v7 = vsel %vm3530_vm9, %v3529_v15, 0  ;;  %v12385_v26 = vxor.u32 2147483648, %v9608_v43  ;;  %v3680_v51 = vadd.s32 1, %v9721_v63  ;;  %v12386_v3 = vand.u32 2147483647, %v9613_v50  ;;  %6812 = vmatprep.subr.bf16.mxu1 %v6811_v54 }
 0x2e5   :  { %v3533_v13 = vand.u32 31, %v3531_v7  ;;  %v12387_v49 = vand.u32 2147483647, %v9666_v37  ;;  %v9750_v6 = vsel %vm6490_vm4, 0, %v6489_v33  ;;  %v3677_v28 = vmul.u32 %v3670_v60, %v3661_v21  ;;  %6814 = vmatpush3.bf16.msra.mxu1 %v6811_v54 }
 0x2e6   :  { %v9740_v30 = vsel %vm12253_vm3, %v12385_v26, %v9608_v43  ;;  %v3526_v31 = vand.u32 8388607, %v12386_v3  ;;  %vm3679_vm5 = vc.u32 %v9727_v55, %v9720_v34  ;;  %v3472_v43 = vadd.s32 %v9570_v42, %v9577_v19 }
 0x2e7   :  { %v9747_v16 = vmul.f32 %v3292_v46, %v12387_v49  ;;  %v6485_v8 = vadd.s32 4294967294, %v3381_v47  ;;  %v3681_v5 = vsel %vm3679_vm5, %v3680_v51, %v9721_v63  ;;  %v3534_v22 = vsub.s32 32, %v3533_v13 }
 0x2e8   :  { %v9761_v33 = vadd.s32 %v9646_v9, %v9660_v11  ;;  %v3682_v60 = vadd.s32 %v3681_v5, %v3677_v28  ;;  %v3488_v38 = vsub.s32 32, %v9750_v6  ;;  %v3527_v48 = vor.u32 8388608, %v3526_v31 }
 0x2e9   :  { %v3537_v56 = vshrl.u32 %v12293_v1, %v3534_v22  ;;  %v3540_v42 = vshrl.u32 %v12294_v44, %v3534_v22  ;;  %v3492_v19 = vsub.s32 4294967266, %v9750_v6  ;;  %v3532_v63 = vshrl.u32 %v3531_v7, 5 }
 0x2ea   :  { %v3683_v18 = vadd.s32 536870912, %v3682_v60  ;;  %v3536_v15 = vshll.u32 %v12297_v20, %v3533_v13  ;;  %vm6486_vm15 = vcmp.lt.s32.totalorder %v6485_v8, 0  ;;  %v3539_v10 = vshll.u32 %v12293_v1, %v3533_v13 }
 0x2eb   :  { %v3542_v9 = vshll.u32 %v12294_v44, %v3533_v13  ;;  %v3543_v11 = vshrl.u32 %v12295_v14, %v3534_v22  ;;  %v3545_v21 = vshll.u32 %v12295_v14, %v3533_v13  ;;  %v3546_v54 = vshrl.u32 %v12300_v40, %v3534_v22 }
 0x2ec   :  { %v9771_v62 = vshrl.u32 %v3683_v18, 30  ;;  %v3538_v47 = vor.u32 %v3537_v56, %v3536_v15  ;;  %v3541_v46 = vor.u32 %v3540_v42, %v3539_v10  ;;  %v3548_v7 = vshll.u32 %v12300_v40, %v3533_v13 }
 0x2ed   :  { %v3544_v26 = vor.u32 %v3543_v11, %v3542_v9  ;;  %v3549_v51 = vshrl.u32 %v12301_v32, %v3534_v22  ;;  %v3489_v3 = vshll.u32 %v9634_v12, %v9750_v6  ;;  %v3490_v31 = vshrl.u32 %v3472_v43, %v3488_v38 }
 0x2ee   :  { %12388 = vst [vmem:[#allocation78_spill] sm:$0xff] %v9771_v62  ;;  %v3685_v49 = vshll.u32 %v9771_v62, 30  ;;  %v3547_v28 = vor.u32 %v3546_v54, %v3545_v21  ;;  %v3493_v5 = vadd.s32 127, %v3492_v19  ;;  %v9781_v56 = vsel %vm6486_vm15, 0, %v6485_v8  ;;  %v12391_v62 = vld [vmem:[#allocation17_spill] sm:$0xff] }
 0x2ef   :  { %v3550_v18 = vor.u32 %v3549_v51, %v3548_v7  ;;  %v3567_v15 = vshll.u32 %v3527_v48, 8  ;;  %v3535_v42 = vshrl.u32 %v12297_v20, %v3534_v22  ;;  %vm3551_vm4 = vcmp.lt.s32.totalorder %v3532_v63, 1 }
 0x2f0   :  { %v9783_v37 = vsub.s32 %v3682_v60, %v3685_v49  ;;  %vm3554_vm9 = vcmp.lt.s32.totalorder %v3532_v63, 4  ;;  %vm3553_vm5 = vcmp.lt.s32.totalorder %v3532_v63, 3  ;;  %v3559_v10 = vsel %vm3551_vm4, %v3538_v47, %v3541_v46 }
 0x2f1   :  { %v3556_v13 = vsel %vm3554_vm9, %v3544_v26, 2102212464  ;;  %v3560_v12 = vsel %vm3554_vm9, %v3547_v28, 920167782  ;;  %vm3552_vm3 = vcmp.lt.s32.totalorder %v3532_v63, 2  ;;  %v3563_v38 = vsel %vm3551_vm4, %v3541_v46, %v3544_v26 }
 0x2f2   :  { %v3688_v6 = vsub.s32 0, %v9783_v37  ;;  %v3561_v43 = vsel %vm3553_vm5, %v3544_v26, %v3560_v12  ;;  %v3389_v8 = vsub.s32 4294967266, %v9781_v56  ;;  %v3564_v48 = vsel %vm3554_vm9, %v3550_v18, 1326507024 }
 0x2f3   :  { %v3562_v19 = vsel %vm3552_vm3, %v3559_v10, %v3561_v43  ;;  %v12254_v60 = vand.u32 2147483647, %v7754_v29  ;;  %v3555_v9 = vsel %vm3551_vm4, %v3535_v42, %v3538_v47  ;;  %v3557_v11 = vsel %vm3553_vm5, %v3541_v46, %v3556_v13  ;;  %v12389_v10 = vld [vmem:[#allocation20_spill] sm:$0xff]  ;;  %v12390_v46 = vld [vmem:[#allocation18_spill] sm:$0xff] }
 0x2f4   :  { %v6496_v22 = vmin.u32 %v3688_v6, %v9783_v37  ;;  %v3565_v21 = vsel %vm3553_vm5, %v3547_v28, %v3564_v48  ;;  %v3494_v54 = vshll.u32 %v3493_v5, 23  ;;  %v447_v18 = vshrl.u32 %v12293_v1, %v12389_v10 }
 0x2f5   :  { %v3566_v7 = vsel %vm3552_vm3, %v3563_v38, %v3565_v21  ;;  %v9792_v51 = vmul.u32.u64.low %v3567_v15, %v3562_v19  ;;  %v9793_v49 = vmul.u32.u64.high %v3567_v15, %v3562_v19, %v9792_v51  ;;  %v3558_v43 = vsel %vm3552_vm3, %v3555_v9, %v3557_v11 }
 0x2f6   :  { %v3690_v26 = vclz %v6496_v22  ;;  %v9796_v12 = vmul.u32.u64.low %v3567_v15, %v3566_v7  ;;  %v9797_v45 = vmul.u32.u64.high %v3567_v15, %v3566_v7, %v9796_v12  ;;  %v436_v47 = vand.u32 8388607, %v12254_v60 }
 0x2f7   :  { %v446_v28 = vshll.u32 %v12297_v20, %v12390_v46  ;;  %v450_v5 = vshrl.u32 %v12294_v44, %v12389_v10  ;;  %v9808_v42 = vadd.s32 127, %v3389_v8  ;;  %v453_v6 = vshrl.u32 %v12295_v14, %v12389_v10 }
 0x2f8   :  { %v6497_v13 = vadd.s32 4294967294, %v3690_v26  ;;  %v456_v38 = vshrl.u32 %v12300_v40, %v12389_v10  ;;  %v3577_v63 = vadd.s32 1, %v9793_v49  ;;  %v449_v19 = vshll.u32 %v12293_v1, %v12390_v46 }
 0x2f9   :  { %v455_v48 = vshll.u32 %v12295_v14, %v12390_v46  ;;  %v459_v22 = vshrl.u32 %v12301_v32, %v12389_v10  ;;  %v3574_v8 = vmul.u32 %v3567_v15, %v3558_v43  ;;  %vm3576_vm3 = vc.u32 %v9797_v45, %v9792_v51 }
 0x2fa   :  { %v448_v9 = vor.u32 %v447_v18, %v446_v28  ;;  %v452_v11 = vshll.u32 %v12294_v44, %v12390_v46  ;;  %v3578_v21 = vsel %vm3576_vm3, %v3577_v63, %v9793_v49  ;;  %v451_v7 = vor.u32 %v450_v5, %v449_v19 }
 0x2fb   :  { %v457_v26 = vor.u32 %v456_v38, %v455_v48  ;;  %v458_v1 = vshll.u32 %v12300_v40, %v12390_v46  ;;  %v3491_v12 = vor.u32 %v3490_v31, %v3489_v3  ;;  %vm6498_vm15 = vcmp.lt.s32.totalorder %v6497_v13, 0 }
 0x2fc   :  { %v3579_v14 = vadd.s32 %v3578_v21, %v3574_v8  ;;  %v454_v60 = vor.u32 %v453_v6, %v452_v11  ;;  %v3495_v32 = vor.u32 4788187, %v3494_v54  ;;  %v437_v15 = vor.u32 8388608, %v436_v47 }
 0x2fd   :  { %v445_v43 = vshrl.u32 %v12297_v20, %v12389_v10  ;;  %v460_v18 = vor.u32 %v459_v22, %v458_v1  ;;  %v3385_v28 = vsub.s32 32, %v9781_v56  ;;  %vm461_vm4 = vcmp.lt.s32.totalorder %v12391_v62, 1 }
 0x2fe   :  { %v3580_v44 = vadd.s32 536870912, %v3579_v14  ;;  %vm464_vm9 = vcmp.lt.s32.totalorder %v12391_v62, 4  ;;  %v3391_v49 = vshll.u32 %v9808_v42, 23  ;;  %v9834_v40 = vsel %vm6498_vm15, 0, %v6497_v13 }
 0x2ff   :  { %v469_v3 = vsel %vm461_vm4, %v448_v9, %v451_v7  ;;  %v470_v31 = vsel %vm464_vm9, %v457_v26, 920167782  ;;  %vm462_vm5 = vcmp.lt.s32.totalorder %v12391_v62, 2  ;;  %vm463_vm3 = vcmp.lt.s32.totalorder %v12391_v62, 3 }
 0x300   :  { %v9838_v54 = vshrl.u32 %v3580_v44, 30  ;;  %v466_v20 = vsel %vm464_vm9, %v454_v60, 2102212464  ;;  %v471_v10 = vsel %vm463_vm3, %v454_v60, %v470_v31  ;;  %v473_v47 = vsel %vm461_vm4, %v451_v7, %v454_v60 }
 0x301   :  { %v474_v46 = vsel %vm464_vm9, %v460_v18, 1326507024  ;;  %v477_v5 = vshll.u32 %v437_v15, 8  ;;  %v3698_v42 = vsub.s32 4294967266, %v9834_v40  ;;  %v465_v6 = vsel %vm461_vm4, %v445_v43, %v448_v9 }
 0x302   :  { %v3582_v13 = vshll.u32 %v9838_v54, 30  ;;  %v472_v38 = vsel %vm462_vm5, %v469_v3, %v471_v10  ;;  %v467_v63 = vsel %vm463_vm3, %v451_v7, %v466_v20  ;;  %v475_v19 = vsel %vm463_vm3, %v457_v26, %v474_v46  ;;  %v12394_v26 = vld [vmem:[#allocation9_spill] sm:$0xff] }
 0x303   :  { %v9850_v48 = vmul.u32.u64.low %v477_v5, %v472_v38  ;;  %v9851_v22 = vmul.u32.u64.high %v477_v5, %v472_v38, %v9850_v48  ;;  %v12392_v60 = vand.u32 2147483647, %v9733_v36  ;;  %v12393_v8 = vcvt.s32.f32 %v9731_v17 }
 0x304   :  { %v3387_v21 = vshrl.u32 %v9761_v33, %v3385_v28  ;;  %v9859_v1 = vsub.s32 %v3579_v14, %v3582_v13  ;;  %v476_v9 = vsel %vm462_vm5, %v473_v47, %v475_v19  ;;  %v3496_v15 = vand.u32 2147483647, %v3495_v32  ;;  %v12398_v14 = vld [vmem:[#allocation31_spill] sm:$0xff] }
 0x305   :  { %v3190_v11 = vmul.f32 %v12393_v8, %v12392_v60  ;;  %v9863_v43 = vmul.u32.u64.low %v477_v5, %v476_v9  ;;  %v9864_v7 = vmul.u32.u64.high %v477_v5, %v476_v9, %v9863_v43  ;;  %v12395_v18 = vand.u32 2147483647, %v12394_v26  ;;  %v12399_v47 = vld [vmem:[#allocation15_spill] sm:$0xff] }
 0x306   :  { %v3386_v17 = vshll.u32 %v9707_v4, %v9781_v56  ;;  %v3585_v36 = vsub.s32 0, %v9859_v1  ;;  %v468_v33 = vsel %vm462_vm5, %v465_v6, %v467_v63  ;;  %vm12259_vm4 = vcmp.lt.s32.totalorder %v9335_v35, 0  ;;  %v12400_v43 = vld [vmem:[#allocation7_spill] sm:$0xff] }
 0x307   :  { %vm9868_vm15 = vcmp.le.f32.partialorder %v12395_v18, 0.7853982  ;;  %vm12260_vm9 = vcmp.lt.s32.totalorder %v9400_v0, 0  ;;  %v3498_v28 = vcvt.s32.f32 %v3491_v12  ;;  %v3392_v3 = vor.u32 4788187, %v3391_v49 }
 0x308   :  { %v620_v32 = vsel %vm9868_vm15, %v12394_v26, %v12398_v14  ;;  %v3699_v31 = vadd.s32 127, %v3698_v42  ;;  %v487_v20 = vadd.s32 1, %v9851_v22  ;;  %v3388_v4 = vor.u32 %v3387_v21, %v3386_v17 }
 0x309   :  { %v3694_v56 = vsub.s32 32, %v9834_v40  ;;  %v6492_v62 = vmin.u32 %v3585_v36, %v9859_v1  ;;  %6975 = vcosq.f32 %v620_v32  ;;  %vm12258_vm5 = vcmp.lt.s32.totalorder %v9469_v39, 0 }
 0x30a   :  { %v484_v10 = vmul.u32 %v477_v5, %v468_v33  ;;  %vm486_vm3 = vc.u32 %v9864_v7, %v9850_v48  ;;  %v618_v46 = vsub.s32 4, %v12399_v47  ;;  %6977 = vsinq.f32 %v620_v32  ;;  %v12405_v33 = vld [vmem:[#allocation24_spill] sm:$0xff] }
 0x30b   :  { %v3499_v12 = vmul.f32 %v3498_v28, %v3496_v15  ;;  %v3678_v49 = vadd.s32 %v9720_v34, %v9727_v55  ;;  %v3587_v42 = vclz %v6492_v62  ;;  %v488_v13 = vsel %vm486_vm3, %v487_v20, %v9851_v22  ;;  %v12404_v55 = vld [vmem:[#allocation10_spill] sm:$0xff] }
 0x30c   :  { %v3294_v6 = vxor.u32 2147483648, %v9747_v16  ;;  %v3393_v38 = vand.u32 2147483647, %v3392_v3  ;;  %v3700_v63 = vshll.u32 %v3699_v31, 23  ;;  %v489_v19 = vadd.s32 %v488_v13, %v484_v10 }
 0x30d   :  { %v3191_v60 = vxor.u32 2147483648, %v3190_v11  ;;  %v3395_v5 = vcvt.s32.f32 %v3388_v4  ;;  %v3696_v8 = vshrl.u32 %v3678_v49, %v3694_v56  ;;  %v6493_v21 = vadd.s32 4294967294, %v3587_v42 }
 0x30e   :  { %v490_v9 = vadd.s32 536870912, %v489_v19  ;;  %v619_v15 = vsel %vm534_vm1, %v618_v46, %v12399_v47  ;;  %v12401_v18 = vand.u32 2147483647, %v12400_v43  ;;  %v721_v22 = vsub.s32 4, %v12404_v55 }
 0x30f   :  { %v3500_v17 = vxor.u32 2147483648, %v3499_v12  ;;  %v3695_v36 = vshll.u32 %v9783_v37, %v9834_v40  ;;  %vm6494_vm3 = vcmp.lt.s32.totalorder %v6493_v21, 0  ;;  %v9910_v32 = vmul.f32 %v3395_v5, %v3393_v38 }
 0x310   :  { %vm9899_vm7 = vcmp.le.f32.partialorder %v12401_v18, 0.7853982  ;;  %v3701_v28 = vor.u32 4788187, %v3700_v63  ;;  %v3590_v3 = vsel %vm6494_vm3, 0, %v6493_v21  ;;  %v491_v31 = vshrl.u32 %v490_v9, 30 }
 0x311   :  { %v723_v14 = vsel %vm9899_vm7, %v12400_v43, %v12405_v33  ;;  %v9915_v20 = vsel %vm12259_vm4, %v3294_v6, %v9747_v16  ;;  %v9919_v4 = vsel %vm12260_vm9, %v3191_v60, %v3190_v11  ;;  %v3697_v37 = vor.u32 %v3696_v8, %v3695_v36  ;;  %v12406_v11 = vld [vmem:[#allocation8_spill] sm:$0xff]  ;;  %v12414_v9 = vld [vmem:[#allocation13_spill] sm:$0xff] }
 0x312   :  { %v621_v40 = vsel %vm9868_vm15, 0, %v619_v15  ;;  %v3595_v56 = vsub.s32 4294967266, %v3590_v3  ;;  %v492_v62 = vshll.u32 %v491_v31, 30  ;;  %v722_v10 = vsel %vm637_vm14, %v721_v22, %v12404_v55  ;;  %v12413_v63 = vld [vmem:[#allocation28_spill] sm:$0xff] }
 0x313   :  { %6979 = vsinq.f32 %v723_v14  ;;  %v6976_v47 = vpop.eup %6975  ;;  %v9928_v16 = vsel %vm12258_vm5, %v3500_v17, %v3499_v12  ;;  %vm431_vm1 = vcmp.lt.s32.totalorder %v7754_v29, 0  ;;  %v12407_v46 = vand.u32 2147483647, %v12406_v11 }
 0x314   :  { %6981 = vcosq.f32 %v723_v14  ;;  %v6978_v49 = vpop.eup %6977  ;;  %v3702_v13 = vand.u32 2147483647, %v3701_v28  ;;  %v12410_v6 = vand.u32 2147483647, %v7754_v29  ;;  %v9944_v12 = vsub.s32 %v489_v19, %v492_v62 }
 0x315   :  { %vm9933_vm3 = vcmp.le.f32.partialorder %v12407_v46, 0.7853982  ;;  %v3591_v5 = vsub.s32 32, %v3590_v3  ;;  %v625_v8 = vand.u32 3, %v621_v40  ;;  %v724_v21 = vsel %vm9899_vm7, 0, %v722_v10 }
 0x316   :  { %vm9940_vm14 = vcmp.le.f32.partialorder %v12410_v6, 0.7853982  ;;  %v826_v60 = vsel %vm9933_vm3, %v12406_v11, %v12413_v63  ;;  %v824_v15 = vsub.s32 4, %v12414_v9  ;;  %v3704_v18 = vcvt.s32.f32 %v3697_v37  ;;  %v12415_v63 = vld [vmem:[#allocation12_spill] sm:$0xff] }
 0x317   :  { %v3596_v55 = vadd.s32 127, %v3595_v56  ;;  %v495_v22 = vsub.s32 0, %v9944_v12  ;;  %v515_v17 = vsub.s32 4, %v491_v31  ;;  %v3575_v19 = vadd.s32 %v9792_v51, %v9797_v45 }
 0x318   :  { %v628_v36 = vxor.u32 2147483648, %v6978_v49  ;;  %v631_v33 = vxor.u32 2147483648, %v6976_v47  ;;  %6983 = vcosq.f32 %v826_v60  ;;  %v9956_v14 = vmul.f32 %v3704_v18, %v3702_v13 }
 0x319   :  { %v6372_v28 = vmin.u32 %v495_v22, %v9944_v12  ;;  %v9959_v40 = vand.u32 3, %v724_v21  ;;  %6985 = vsinq.f32 %v826_v60  ;;  %v3593_v34 = vshrl.u32 %v3575_v19, %v3591_v5  ;;  %v12430_v5 = vld [vmem:[#allocation26_spill] sm:$0xff] }
 0x31a   :  { %v485_v37 = vadd.s32 %v9850_v48, %v9864_v7  ;;  %vm627_vm7 = vcmp.eq.s32.totalorder %v625_v8, 0  ;;  %v825_v56 = vsel %vm740_vm8, %v824_v15, %v12414_v9  ;;  %v3597_v45 = vshll.u32 %v3596_v55, 23 }
 0x31b   :  { %v497_v51 = vclz %v6372_v28  ;;  %v516_v62 = vsel %vm431_vm1, %v515_v17, %v491_v31  ;;  %vm624_vm15 = vweird.f32 %v12394_v26  ;;  %vm630_vm5 = vcmp.eq.s32.totalorder %v625_v8, 2 }
 0x31c   :  { %v3592_v10 = vshll.u32 %v9859_v1, %v3590_v3  ;;  %vm626_vm4 = vcmp.lt.s32.totalorder %v625_v8, 2  ;;  %v629_v46 = vsel %vm627_vm7, %v6976_v47, %v628_v36  ;;  %v632_v13 = vsel %vm630_vm5, %v631_v33, %v6978_v49  ;;  %v12419_v3 = vld [vmem:[#allocation19_spill] sm:$0xff] }
 0x31d   :  { %v6980_v6 = vpop.eup %6979  ;;  %v6373_v48 = vadd.s32 4294967294, %v497_v51  ;;  %vm730_vm9 = vcmp.eq.s32.totalorder %v9959_v40, 0  ;;  %v827_v7 = vsel %vm9933_vm3, 0, %v825_v56  ;;  %v12416_v60 = vand.u32 2147483647, %v12415_v63  ;;  %v12420_v49 = vld [vmem:[#allocation35_spill] sm:$0xff] }
 0x31e   :  { %v6982_v31 = vpop.eup %6981  ;;  %v3594_v21 = vor.u32 %v3593_v34, %v3592_v10  ;;  %v518_v1 = vsel %vm9940_vm14, 0, %v516_v62  ;;  %v927_v47 = vsub.s32 4, %v12419_v3  ;;  %v3598_v44 = vor.u32 4788187, %v3597_v45  ;;  %v12421_v36 = vld [vmem:[#allocation11_spill] sm:$0xff]  ;;  %v12425_v51 = vld [vmem:[#allocation32_spill] sm:$0xff] }
 0x31f   :  { %vm9975_vm8 = vcmp.le.f32.partialorder %v12416_v60, 0.7853982  ;;  %vm6374_vm5 = vcmp.lt.s32.totalorder %v6373_v48, 0  ;;  %v633_v9 = vsel %vm626_vm4, %v629_v46, %v632_v13  ;;  %vm729_vm3 = vcmp.lt.s32.totalorder %v9959_v40, 2 }
 0x320   :  { %v929_v8 = vsel %vm9975_vm8, %v12415_v63, %v12420_v49  ;;  %v500_v15 = vsel %vm6374_vm5, 0, %v6373_v48  ;;  %v731_v18 = vxor.u32 2147483648, %v6980_v6  ;;  %v9987_v55 = vand.u32 3, %v827_v7  ;;  %v12426_v7 = vld [vmem:[#allocation16_spill] sm:$0xff] }
 0x321   :  { %6987 = vcosq.f32 %v929_v8  ;;  %v501_v22 = vsub.s32 32, %v500_v15  ;;  %v505_v17 = vsub.s32 4294967266, %v500_v15  ;;  %v734_v19 = vxor.u32 2147483648, %v6982_v31 }
 0x322   :  { %6989 = vsinq.f32 %v929_v8  ;;  %v12422_v33 = vand.u32 2147483647, %v12421_v36  ;;  %v6984_v34 = vpop.eup %6983  ;;  %v9995_v56 = vand.u32 3, %v518_v1  ;;  %vm733_vm4 = vcmp.eq.s32.totalorder %v9959_v40, 2  ;;  %v12436_v40 = vld [vmem:[#allocation22_spill] sm:$0xff] }
 0x323   :  { %v928_v45 = vsel %vm843_vm11, %v927_v47, %v12419_v3  ;;  %v6986_v10 = vpop.eup %6985  ;;  %v502_v46 = vshll.u32 %v9944_v12, %v500_v15  ;;  %v503_v13 = vshrl.u32 %v485_v37, %v501_v22  ;;  %v506_v48 = vadd.s32 127, %v505_v17  ;;  %v12431_v22 = vld [vmem:[#allocation41_spill] sm:$0xff] }
 0x324   :  { %vm9991_vm7 = vcmp.le.f32.partialorder %v12422_v33, 0.7853982  ;;  %vm727_vm5 = vweird.f32 %v12400_v43  ;;  %v1030_v60 = vsub.s32 4, %v12426_v7  ;;  %v3599_v1 = vand.u32 2147483647, %v3598_v44 }
 0x325   :  { %v1032_v62 = vsel %vm9991_vm7, %v12421_v36, %v12425_v51  ;;  %v3601_v49 = vcvt.s32.f32 %v3594_v21  ;;  %v10010_v8 = vsel %vm624_vm15, nan, %v633_v9  ;;  %v504_v3 = vor.u32 %v503_v13, %v502_v46 }
 0x326   :  { %6991 = vcosq.f32 %v1032_v62  ;;  %v507_v47 = vshll.u32 %v506_v48, 23  ;;  %v732_v33 = vsel %vm730_vm9, %v6982_v31, %v731_v18  ;;  %v735_v12 = vsel %vm733_vm4, %v734_v19, %v6980_v6 }
 0x327   :  { %vm832_vm11 = vcmp.lt.s32.totalorder %v9987_v55, 2  ;;  %v834_v37 = vxor.u32 2147483648, %v6986_v10  ;;  %v837_v15 = vxor.u32 2147483648, %v6984_v34  ;;  %v930_v21 = vsel %vm9975_vm8, 0, %v928_v45 }
 0x328   :  { %6993 = vsinq.f32 %v1032_v62  ;;  %v508_v26 = vor.u32 4788187, %v507_v47  ;;  %vm833_vm15 = vcmp.eq.s32.totalorder %v9987_v55, 0  ;;  %v1031_v44 = vsel %vm946_vm2, %v1030_v60, %v12426_v7  ;;  %v12432_v47 = vld [vmem:[#allocation14_spill] sm:$0xff] }
 0x329   :  { %v12427_v31 = vand.u32 2147483647, %v7911_v53  ;;  %v10029_v6 = vmul.f32 %v3601_v49, %v3599_v1  ;;  %vm836_vm4 = vcmp.eq.s32.totalorder %v9987_v55, 2  ;;  %v1133_v18 = vsub.s32 4, %v12430_v5 }
 0x32a   :  { %v509_v45 = vand.u32 2147483647, %v508_v26  ;;  %v511_v51 = vcvt.s32.f32 %v504_v3  ;;  %v736_v62 = vsel %vm729_vm3, %v732_v33, %v735_v12  ;;  %vm830_vm2 = vweird.f32 %v12406_v11 }
 0x32b   :  { %vm10025_vm9 = vcmp.le.f32.partialorder %v12427_v31, 0.7853982  ;;  %v6988_v19 = vpop.eup %6987  ;;  %v934_v46 = vand.u32 3, %v930_v21  ;;  %v835_v48 = vsel %vm833_vm15, %v6984_v34, %v834_v37  ;;  %v838_v7 = vsel %vm836_vm4, %v837_v15, %v6986_v10  ;;  %v12437_v34 = vld [vmem:[#allocation40_spill] sm:$0xff] }
 0x32c   :  { %v1135_v17 = vsel %vm10025_vm9, %v7911_v53, %v12431_v22  ;;  %v6990_v13 = vpop.eup %6989  ;;  %v1033_v60 = vsel %vm9991_vm7, 0, %v1031_v44  ;;  %v512_v1 = vmul.f32 %v511_v51, %v509_v45  ;;  %v940_v49 = vxor.u32 2147483648, %v6988_v19  ;;  %v12438_v45 = vld [vmem:[#allocation23_spill] sm:$0xff] }
 0x32d   :  { %6995 = vcosq.f32 %v1135_v17  ;;  %v12433_v31 = vand.u32 2147483647, %v12432_v47  ;;  %v1236_v3 = vsub.s32 4, %v12436_v40  ;;  %v10051_v33 = vsel %vm727_vm5, nan, %v736_v62  ;;  %v84_v62 = vld [vmem:[%s12451_s4 + $0x8] sm:$0xff] }
 0x32e   :  { %v1134_v28 = vsel %vm1049_vm13, %v1133_v18, %v12430_v5  ;;  %6997 = vsinq.f32 %v1135_v17  ;;  %v513_v12 = vxor.u32 2147483648, %v512_v1  ;;  %vm935_vm3 = vcmp.lt.s32.totalorder %v934_v46, 2 }
 0x32f   :  { %vm10044_vm8 = vcmp.le.f32.partialorder %v12433_v31, 0.7853982  ;;  %vm936_vm7 = vcmp.eq.s32.totalorder %v934_v46, 0  ;;  %v937_v37 = vxor.u32 2147483648, %v6990_v13  ;;  %v839_v43 = vsel %vm832_vm11, %v835_v48, %v838_v7 }
 0x330   :  { %v1238_v10 = vsel %vm10044_vm8, %v12432_v47, %v12437_v34  ;;  %v6992_v15 = vpop.eup %6991  ;;  %vm933_vm5 = vweird.f32 %v12415_v63  ;;  %vm939_vm15 = vcmp.eq.s32.totalorder %v934_v46, 2  ;;  %v1037_v21 = vand.u32 3, %v1033_v60  ;;  %v12443_v60 = vld [vmem:[#allocation43_spill] sm:$0xff]  ;;  %v12444_v34 = vld [vmem:[#allocation21_spill] sm:$0xff] }
 0x331   :  { %6999 = vcosq.f32 %v1238_v10  ;;  %v514_v44 = vsel %vm431_vm1, %v513_v12, %v512_v1  ;;  %v941_v5 = vsel %vm939_vm15, %v940_v49, %v6990_v13  ;;  %v1136_v18 = vsel %vm10025_vm9, 0, %v1134_v28  ;;  %v12442_v13 = vld [vmem:[#allocation30_spill] sm:$0xff] }
 0x332   :  { %v1237_v22 = vsel %vm1152_vm12, %v1236_v3, %v12436_v40  ;;  %v6994_v17 = vpop.eup %6993  ;;  %v517_v55 = vsel %vm9940_vm14, %v7754_v29, %v514_v44  ;;  %7001 = vsinq.f32 %v1238_v10  ;;  %v12439_v51 = vand.u32 2147483647, %v12438_v45  ;;  %v12448_v44 = vld [vmem:[#allocation27_spill] sm:$0xff]  ;;  %v83_v63 = vld [vmem:[%s12451_s4] sm:$0xff] }
 0x333   :  { %v1339_v48 = vsub.s32 4, %v12442_v13  ;;  %7003 = vcosq.f32 %v517_v55  ;;  %v938_v9 = vsel %vm936_vm7, %v6988_v19, %v937_v37  ;;  %v1043_v7 = vxor.u32 2147483648, %v6992_v15 }
 0x334   :  { %vm10075_vm13 = vcmp.le.f32.partialorder %v12439_v51, 0.7853982  ;;  %7005 = vsinq.f32 %v517_v55  ;;  %v10087_v38 = vsel %vm830_vm2, nan, %v839_v43  ;;  %v1040_v49 = vxor.u32 2147483648, %v6994_v17 }
 0x335   :  { %v1341_v1 = vsel %vm10075_vm13, %v12438_v45, %v12443_v60  ;;  %v1239_v31 = vsel %vm10044_vm8, 0, %v1237_v22  ;;  %vm1036_vm12 = vweird.f32 %v12421_v36  ;;  %v10092_v40 = vand.u32 3, %v1136_v18  ;;  %v12449_v18 = vld [vmem:[#allocation42_spill] sm:$0xff] }
 0x336   :  { %v1340_v19 = vsel %vm1255_vm0, %v1339_v48, %v12442_v13  ;;  %7007 = vcosq.f32 %v1341_v1  ;;  %v942_v28 = vsel %vm935_vm3, %v938_v9, %v941_v5  ;;  %vm1038_vm1 = vcmp.lt.s32.totalorder %v1037_v21, 2 }
 0x337   :  { %v6996_v3 = vpop.eup %6995  ;;  %vm1042_vm14 = vcmp.eq.s32.totalorder %v1037_v21, 2  ;;  %7009 = vsinq.f32 %v1341_v1  ;;  %vm527_vm11 = vcmp.eq.s32.totalorder %v9995_v56, 2  ;;  %vm1039_vm9 = vcmp.eq.s32.totalorder %v1037_v21, 0  ;;  %v82_v21 = vld [vmem:[%s12463_s28] sm:$0xff] }
 0x338   :  { %v1044_v11 = vsel %vm1042_vm14, %v1043_v7, %v6994_v17  ;;  %v10099_v26 = vand.u32 3, %v1239_v31  ;;  %v12445_v10 = vand.u32 2147483647, %v12444_v34  ;;  %v6998_v37 = vpop.eup %6997  ;;  %vm524_vm0 = vcmp.eq.s32.totalorder %v9995_v56, 0 }
 0x339   :  { %v1041_v46 = vsel %vm1039_vm9, %v6992_v15, %v1040_v49  ;;  %v1342_v43 = vsel %vm10075_vm13, 0, %v1340_v19  ;;  %v1442_v5 = vsub.s32 4, %v12448_v44  ;;  %vm523_vm2 = vcmp.lt.s32.totalorder %v9995_v56, 2  ;;  %v12452_v49 = vld [vmem:[#allocation29_spill] sm:$0xff]  ;;  %v12456_v19 = vld [vmem:[#allocation36_spill] sm:$0xff] }
 0x33a   :  { %vm10103_vm4 = vcmp.le.f32.partialorder %v12445_v10, 0.7853982  ;;  %vm3740_vm8 = vcmask 523264   ;;  %v10118_v17 = vsel %vm933_vm5, nan, %v942_v28  ;;  %vm1141_vm3 = vcmp.lt.s32.totalorder %v10092_v40, 2 }
 0x33b   :  { %v1444_v22 = vsel %vm10103_vm4, %v12444_v34, %v12449_v18  ;;  %vm1142_vm7 = vcmp.eq.s32.totalorder %v10092_v40, 0  ;;  %vm1145_vm15 = vcmp.eq.s32.totalorder %v10092_v40, 2  ;;  %v7000_v15 = vpop.eup %6999  ;;  %vm521_vm13 = vweird.f32 %v7754_v29 }
 0x33c   :  { %v1146_v55 = vxor.u32 2147483648, %v6996_v3  ;;  %vm12450_vm14 = vcmp.lt.s32.totalorder %v12444_v34, 0  ;;  %7011 = vcosq.f32 %v1444_v22  ;;  %v1045_v13 = vsel %vm1038_vm1, %v1041_v46, %v1044_v11  ;;  %v7002_v60 = vpop.eup %7001 }
 0x33d   :  { %v1443_v51 = vsel %vm12450_vm14, %v1442_v5, %v12448_v44  ;;  %v1143_v48 = vxor.u32 2147483648, %v6998_v37  ;;  %vm1244_vm5 = vcmp.lt.s32.totalorder %v10099_v26, 2  ;;  %v10135_v9 = vand.u32 3, %v1342_v43  ;;  %v7004_v11 = vpop.eup %7003  ;;  %v12457_v43 = vld [vmem:[#allocation50_spill] sm:$0xff] }
 0x33e   :  { %7013 = vsinq.f32 %v1444_v22  ;;  %v12261_v7 = vmov 0.0|0.0   ;;  %vm1245_vm9 = vcmp.eq.s32.totalorder %v10099_v26, 0  ;;  %v1249_v1 = vxor.u32 2147483648, %v7000_v15  ;;  %v7006_v18 = vpop.eup %7005 }
 0x33f   :  { %6796 = vmatprep.subr.bf16.mxu0 %v12261_v7  ;;  %6827 = vmatprep.subr.bf16.mxu1 %v12261_v7  ;;  %v12453_v31 = vand.u32 2147483647, %v12452_v49  ;;  %v1545_v28 = vsub.s32 4, %v12456_v19  ;;  %v1246_v10 = vxor.u32 2147483648, %v7002_v60  ;;  %v1445_v46 = vsel %vm10103_vm4, 0, %v1443_v51 }
 0x340   :  { %v6797_v5 = vpack.c.bf16 %v84_v62, %v83_v63  ;;  %v528_v22 = vxor.u32 2147483648, %v7004_v11  ;;  %v1147_v7 = vsel %vm1145_vm15, %v1146_v55, %v6998_v37  ;;  %vm1248_vm1 = vcmp.eq.s32.totalorder %v10099_v26, 2  ;;  %v7008_v42 = vpop.eup %7007 }
 0x341   :  { %vm10142_vm14 = vcmp.le.f32.partialorder %v12453_v31, 0.7853982  ;;  %v10155_v31 = vsel %vm1036_vm12, nan, %v1045_v13  ;;  %v525_v12 = vxor.u32 2147483648, %v7006_v18  ;;  %v1144_v51 = vsel %vm1142_vm7, %v6996_v3, %v1143_v48  ;;  %v7010_v63 = vpop.eup %7009 }
 0x342   :  { %v1547_v44 = vsel %vm10142_vm14, %v12452_v49, %v12457_v43  ;;  %vm1348_vm4 = vcmp.eq.s32.totalorder %v10135_v9, 0  ;;  %6798 = vmatpush3.bf16.msra.mxu0 %v6797_v5  ;;  %v529_v36 = vsel %vm527_vm11, %v528_v22, %v7006_v18  ;;  %vm1139_vm12 = vweird.f32 %v7911_v53  ;;  %v12465_v18 = vld [vmem:[#allocation47_spill] sm:$0xff] }
 0x343   :  { %7015 = vcosq.f32 %v1547_v44  ;;  %vm1242_vm10 = vweird.f32 %v12432_v47  ;;  %v1250_v37 = vsel %vm1248_vm1, %v1249_v1, %v7002_v60  ;;  %v1449_v55 = vand.u32 3, %v1445_v46  ;;  %v12464_v46 = vld [vmem:[#allocation34_spill] sm:$0xff] }
 0x344   :  { %vm12458_vm15 = vcmp.lt.s32.totalorder %v12452_v49, 0  ;;  %v526_v3 = vsel %vm524_vm0, %v7004_v11, %v525_v12  ;;  %v1247_v13 = vsel %vm1245_vm9, %v7000_v15, %v1246_v10  ;;  %v1352_v48 = vxor.u32 2147483648, %v7008_v42 }
 0x345   :  { %v1546_v62 = vsel %vm12458_vm15, %v1545_v28, %v12456_v19  ;;  %7017 = vsinq.f32 %v1547_v44  ;;  %v530_v43 = vsel %vm523_vm2, %v526_v3, %v529_v36  ;;  %v1148_v5 = vsel %vm1141_vm3, %v1144_v51, %v1147_v7  ;;  %v12459_v7 = vld [vmem:[#allocation25_spill] sm:$0xff]  ;;  %v12470_v3 = vld [vmem:[#allocation39_spill] sm:$0xff] }
 0x346   :  { %vm1347_vm11 = vcmp.lt.s32.totalorder %v10135_v9, 2  ;;  %vm1351_vm7 = vcmp.eq.s32.totalorder %v10135_v9, 2  ;;  %v531_v60 = vsel %vm521_vm13, nan, %v530_v43  ;;  %v1349_v1 = vxor.u32 2147483648, %v7010_v63  ;;  %v7012_v15 = vpop.eup %7011  ;;  %v12489_v28 = vld [vmem:[#allocation57_spill] sm:$0xff] }
 0x347   :  { %v1548_v19 = vsel %vm10142_vm14, 0, %v1546_v62  ;;  %6681 = vmatprep.mubr.msk.f32.mxu1 %vm3740_vm8, %v531_v60  ;;  %v1251_v56 = vsel %vm1244_vm5, %v1247_v13, %v1250_v37  ;;  %vm1451_vm0 = vcmp.eq.s32.totalorder %v1449_v55, 0  ;;  %vm1454_vm2 = vcmp.eq.s32.totalorder %v1449_v55, 2 }
 0x348   :  { %vm7401_vm3 = vmmov 0   ;;  %v7402_v40 = vmov 0.0   ;;  %v12460_v29 = vand.u32 2147483647, %v12459_v7  ;;  %v7014_v11 = vpop.eup %7013  ;;  %6682 = vmatmul.mubr.msk.f32.vlgmr.msra.gmra.mrb[0].mxu1 %vm3740_vm8, %v10010_v8  ;;  %vm1345_vm5 = vweird.f32 %v12438_v45  ;;  %v12483_v45 = vld [vmem:[#allocation45_spill] sm:$0xff] }
 0x349   :  { %6662 = vmatprep.mubr.msk.f32.mxu0 %vm7401_vm3, %v7402_v40  ;;  %v1353_v26 = vsel %vm1351_vm7, %v1352_v48, %v7010_v63  ;;  %vm1448_vm9 = vweird.f32 %v12444_v34  ;;  %v1455_v10 = vxor.u32 2147483648, %v7012_v15  ;;  %v1648_v44 = vsub.s32 4, %v12464_v46  ;;  %6684 = vmatprep.mubr.msk.f32.mxu1 %vm3740_vm8, %v10051_v33 }
 0x34a   :  { %vm10191_vm13 = vcmp.le.f32.partialorder %v12460_v29, 0.7853982  ;;  %v1452_v12 = vxor.u32 2147483648, %v7014_v11  ;;  %v1552_v8 = vand.u32 3, %v1548_v19  ;;  %vm92_vm14 = vcmask 130048  }
 0x34b   :  { %v1650_v22 = vsel %vm10191_vm13, %v12459_v7, %v12465_v18  ;;  %v1350_v51 = vsel %vm1348_vm4, %v7008_v42, %v1349_v1  ;;  %vm12466_vm1 = vcmp.lt.s32.totalorder %v12459_v7, 0  ;;  %6663 = vmatmul.mubr.msk.f32.vlgmr.msra.gmra.mrb[0].mxu0 %vm92_vm14, %v82_v21  ;;  %v12467_v36 = vand.u32 2147483647, %v8367_v41  ;;  %v12471_v42 = vld [vmem:[#allocation56_spill] sm:$0xff] }
 0x34c   :  { %7019 = vcosq.f32 %v1650_v22  ;;  %v1649_v63 = vsel %vm12466_vm1, %v1648_v44, %v12464_v46  ;;  %v1453_v33 = vsel %vm1451_vm0, %v7012_v15, %v1452_v12  ;;  %v1456_v62 = vsel %vm1454_vm2, %v1455_v10, %v7014_v11  ;;  %6685 = vmatmul.mubr.msk.f32.gmra.mrb[2].mxu1 %vm3740_vm8, %v10087_v38  ;;  %v12477_v11 = vld [vmem:[#allocation38_spill] sm:$0xff]  ;;  %v12478_v10 = vld [vmem:[#allocation55_spill] sm:$0xff] }
 0x34d   :  { %7021 = vsinq.f32 %v1650_v22  ;;  %vm10219_vm15 = vcmp.le.f32.partialorder %v12467_v36, 0.7853982  ;;  %v1751_v13 = vsub.s32 4, %v12470_v3  ;;  %v7016_v43 = vpop.eup %7015  ;;  %v1149_v60 = vsel %vm1139_vm12, nan, %v1148_v5  ;;  %6687 = vmatprep.mubr.msk.f32.mxu1 %vm3740_vm8, %v10118_v17 }
 0x34e   :  { %v1753_v48 = vsel %vm10219_vm15, %v8367_v41, %v12471_v42  ;;  %v1252_v1 = vsel %vm1242_vm10, nan, %v1251_v56  ;;  %vm1450_vm4 = vcmp.lt.s32.totalorder %v1449_v55, 2  ;;  %vm1551_vm7 = vweird.f32 %v12452_v49  ;;  %v12473_v56 = vld [vmem:[#allocation33_spill] sm:$0xff] }
 0x34f   :  { %7023 = vcosq.f32 %v1753_v48  ;;  %v1558_v19 = vxor.u32 2147483648, %v7016_v43  ;;  %v1651_v15 = vsel %vm10191_vm13, 0, %v1649_v63  ;;  %vm12472_vm0 = vcmp.lt.s32.totalorder %v8367_v41, 0  ;;  %v7018_v53 = vpop.eup %7017 }
 0x350   :  { %v1752_v38 = vsel %vm12472_vm0, %v1751_v13, %v12470_v3  ;;  %7025 = vsinq.f32 %v1753_v48  ;;  %v1354_v47 = vsel %vm1347_vm11, %v1350_v51, %v1353_v26  ;;  %v1457_v55 = vsel %vm1450_vm4, %v1453_v33, %v1456_v62  ;;  %6688 = vmatmul.mubr.msk.f32.gmra.mrb[4].mxu1 %vm3740_vm8, %v10155_v31 }
 0x351   :  { %vm1553_vm10 = vcmp.lt.s32.totalorder %v1552_v8, 2  ;;  %v1754_v17 = vsel %vm10219_vm15, 0, %v1752_v38  ;;  %vm1554_vm12 = vcmp.eq.s32.totalorder %v1552_v8, 0  ;;  %v1555_v5 = vxor.u32 2147483648, %v7018_v53  ;;  %6690 = vmatprep.mubr.msk.f32.mxu1 %vm3740_vm8, %v1149_v60 }
 0x352   :  { %vm1557_vm2 = vcmp.eq.s32.totalorder %v1552_v8, 2  ;;  %v12474_v29 = vand.u32 2147483647, %v12473_v56  ;;  %v1655_v9 = vand.u32 3, %v1651_v15  ;;  %v1854_v26 = vsub.s32 4, %v12477_v11 }
 0x353   :  { %v1559_v21 = vsel %vm1557_vm2, %v1558_v19, %v7018_v53  ;;  %v1355_v44 = vsel %vm1345_vm5, nan, %v1354_v47  ;;  %v1458_v18 = vsel %vm1448_vm9, nan, %v1457_v55  ;;  %v1556_v22 = vsel %vm1554_vm12, %v7016_v43, %v1555_v5  ;;  %v12484_v53 = vld [vmem:[#allocation37_spill] sm:$0xff]  ;;  %v12488_v5 = vld [vmem:[#allocation44_spill] sm:$0xff] }
 0x354   :  { %vm10250_vm13 = vcmp.le.f32.partialorder %v12474_v29, 0.7853982  ;;  %v1758_v12 = vand.u32 3, %v1754_v17  ;;  %vm1654_vm11 = vweird.f32 %v12459_v7  ;;  %vm12479_vm1 = vcmp.lt.s32.totalorder %v12473_v56, 0  ;;  %6691 = vmatmul.mubr.msk.f32.gmra.mrb[6].mxu1 %vm3740_vm8, %v1252_v1 }
 0x355   :  { %v1856_v46 = vsel %vm10250_vm13, %v12473_v56, %v12478_v10  ;;  %v1855_v31 = vsel %vm12479_vm1, %v1854_v26, %v12477_v11  ;;  %v12480_v51 = vand.u32 2147483647, %v8508_v58  ;;  %v1957_v36 = vsub.s32 4, %v12483_v45  ;;  %6693 = vmatprep.mubr.msk.f32.mxu1 %vm3740_vm8, %v1355_v44 }
 0x356   :  { %7027 = vcosq.f32 %v1856_v46  ;;  %v7020_v37 = vpop.eup %7019  ;;  %v1560_v34 = vsel %vm1553_vm10, %v1556_v22, %v1559_v21  ;;  %v1857_v33 = vsel %vm10250_vm13, 0, %v1855_v31  ;;  %vm1656_vm5 = vcmp.lt.s32.totalorder %v1655_v9, 2 }
 0x357   :  { %vm10272_vm15 = vcmp.le.f32.partialorder %v12480_v51, 0.7853982  ;;  %7029 = vsinq.f32 %v1856_v46  ;;  %v7022_v3 = vpop.eup %7021  ;;  %v1661_v13 = vxor.u32 2147483648, %v7020_v37  ;;  %v1958_v42 = vsel %vm1873_vm6, %v1957_v36, %v12483_v45  ;;  %v12494_v51 = vld [vmem:[#allocation51_spill] sm:$0xff] }
 0x358   :  { %v1959_v62 = vsel %vm10272_vm15, %v8508_v58, %v9190_v25  ;;  %vm1657_vm9 = vcmp.eq.s32.totalorder %v1655_v9, 0  ;;  %v1658_v8 = vxor.u32 2147483648, %v7022_v3  ;;  %vm1660_vm4 = vcmp.eq.s32.totalorder %v1655_v9, 2  ;;  %6694 = vmatmul.mubr.msk.f32.gmra.mrb[8].mxu1 %vm3740_vm8, %v1458_v18 }
 0x359   :  { %7031 = vcosq.f32 %v1959_v62  ;;  %v7024_v48 = vpop.eup %7023  ;;  %v1561_v25 = vsel %vm1551_vm7, nan, %v1560_v34  ;;  %v1662_v43 = vsel %vm1660_vm4, %v1661_v13, %v7022_v3  ;;  %vm1763_vm0 = vcmp.eq.s32.totalorder %v1758_v12, 2 }
 0x35a   :  { %7033 = vsinq.f32 %v1959_v62  ;;  %v1861_v60 = vand.u32 3, %v1857_v33  ;;  %v7026_v1 = vpop.eup %7025  ;;  %v1659_v19 = vsel %vm1657_vm9, %v7020_v37, %v1658_v8  ;;  %v1764_v15 = vxor.u32 2147483648, %v7024_v48  ;;  %6696 = vmatprep.mubr.msk.f32.mxu1 %vm3740_vm8, %v1561_v25 }
 0x35b   :  { %v1960_v38 = vsel %vm10272_vm15, 0, %v1958_v42  ;;  %v12485_v47 = vand.u32 2147483647, %v12484_v53  ;;  %v1663_v49 = vsel %vm1656_vm5, %v1659_v19, %v1662_v43  ;;  %v1761_v17 = vxor.u32 2147483648, %v7026_v1 }
 0x35c   :  { %v2060_v29 = vsub.s32 4, %v12488_v5  ;;  %vm1757_vm7 = vweird.f32 %v8367_v41  ;;  %vm1760_vm10 = vcmp.eq.s32.totalorder %v1758_v12, 0  ;;  %v1765_v11 = vsel %vm1763_vm0, %v1764_v15, %v7026_v1  ;;  %v12499_v1 = vld [vmem:[#allocation49_spill] sm:$0xff] }
 0x35d   :  { %vm10295_vm6 = vcmp.le.f32.partialorder %v12485_v47, 0.7853982  ;;  %vm1860_vm12 = vweird.f32 %v12473_v56  ;;  %vm1759_vm2 = vcmp.lt.s32.totalorder %v1758_v12, 2  ;;  %v1762_v26 = vsel %vm1760_vm10, %v7024_v48, %v1761_v17 }
 0x35e   :  { %v2062_v21 = vsel %vm10295_vm6, %v12484_v53, %v12489_v28  ;;  %v1964_v9 = vand.u32 3, %v1960_v38  ;;  %v1664_v10 = vsel %vm1654_vm11, nan, %v1663_v49  ;;  %v1766_v46 = vsel %vm1759_vm2, %v1762_v26, %v1765_v11  ;;  %v12505_v26 = vld [vmem:[#allocation58_spill] sm:$0xff] }
 0x35f   :  { %7035 = vcosq.f32 %v2062_v21  ;;  %vm1862_vm13 = vcmp.lt.s32.totalorder %v1861_v60, 2  ;;  %6697 = vmatmul.mubr.msk.f32.gmra.mrb[10].mxu1 %vm3740_vm8, %v1664_v10  ;;  %v1767_v18 = vsel %vm1757_vm7, nan, %v1766_v46  ;;  %vm1863_vm1 = vcmp.eq.s32.totalorder %v1861_v60, 0  ;;  %v12506_v46 = vld [vmem:[#allocation66_spill] sm:$0xff] }
 0x360   :  { %7037 = vsinq.f32 %v2062_v21  ;;  %v7028_v44 = vpop.eup %7027  ;;  %vm12490_vm15 = vcmp.lt.s32.totalorder %v12484_v53, 0  ;;  %v12491_v22 = vand.u32 2147483647, %v8735_v61  ;;  %6699 = vmatprep.mubr.msk.f32.mxu1 %vm3740_vm8, %v1767_v18  ;;  %vm1866_vm11 = vcmp.eq.s32.totalorder %v1861_v60, 2 }
 0x361   :  { %v2061_v41 = vsel %vm12490_vm15, %v2060_v29, %v12488_v5  ;;  %v7030_v7 = vpop.eup %7029  ;;  %v1867_v31 = vxor.u32 2147483648, %v7028_v44  ;;  %v2163_v63 = vsub.s32 4, %v12494_v51  ;;  %vm1965_vm9 = vcmp.lt.s32.totalorder %v1964_v9, 2 }
 0x362   :  { %vm10317_vm5 = vcmp.le.f32.partialorder %v12491_v22, 0.7853982  ;;  %v1864_v37 = vxor.u32 2147483648, %v7030_v7  ;;  %vm1966_vm4 = vcmp.eq.s32.totalorder %v1964_v9, 0  ;;  %vm1969_vm0 = vcmp.eq.s32.totalorder %v1964_v9, 2 }
 0x363   :  { %v2165_v45 = vsel %vm10317_vm5, %v8735_v61, %v9218_v57  ;;  %v7032_v36 = vpop.eup %7031  ;;  %v1868_v33 = vsel %vm1866_vm11, %v1867_v31, %v7030_v7  ;;  %v2063_v3 = vsel %vm10295_vm6, 0, %v2061_v41  ;;  %v12495_v8 = vand.u32 2147483647, %v8575_v59 }
 0x364   :  { %v7034_v34 = vpop.eup %7033  ;;  %v1970_v62 = vxor.u32 2147483648, %v7032_v36  ;;  %7039 = vcosq.f32 %v2165_v45  ;;  %v1865_v13 = vsel %vm1863_vm1, %v7028_v44, %v1864_v37  ;;  %vm12498_vm10 = vcmp.lt.s32.totalorder %v8735_v61, 0  ;;  %v12512_v37 = vld [vmem:[#allocation53_spill] sm:$0xff] }
 0x365   :  { %v1967_v42 = vxor.u32 2147483648, %v7034_v34  ;;  %7041 = vsinq.f32 %v2165_v45  ;;  %vm10332_vm7 = vcmp.le.f32.partialorder %v12495_v8, 0.7853982  ;;  %v1869_v48 = vsel %vm1862_vm13, %v1865_v13, %v1868_v33 }
 0x366   :  { %v1971_v25 = vsel %vm1969_vm0, %v1970_v62, %v7034_v34  ;;  %v2164_v43 = vsel %vm12498_vm10, %v2163_v63, %v12494_v51  ;;  %v2266_v19 = vsub.s32 4, %v12499_v1  ;;  %v1870_v15 = vsel %vm1860_vm12, nan, %v1869_v48  ;;  %v12508_v63 = vld [vmem:[#allocation46_spill] sm:$0xff] }
 0x367   :  { %v1968_v38 = vsel %vm1966_vm4, %v7032_v36, %v1967_v42  ;;  %v2067_v47 = vand.u32 3, %v2063_v3  ;;  %v2268_v55 = vsel %vm10332_vm7, %v8575_v59, %v9201_v23  ;;  %v3603_v60 = vxor.u32 2147483648, %v10029_v6  ;;  %6700 = vmatmul.mubr.msk.f32.gmra.mrb[12].mxu1 %vm3740_vm8, %v1870_v15  ;;  %v12513_v42 = vld [vmem:[#allocation63_spill] sm:$0xff]  ;;  %v12527_v36 = vld [vmem:[#allocation68_spill] sm:$0xff] }
 0x368   :  { %vm1963_vm6 = vweird.f32 %v8508_v58  ;;  %v1972_v49 = vsel %vm1965_vm9, %v1968_v38, %v1971_v25  ;;  %vm2066_vm2 = vweird.f32 %v12484_v53  ;;  %v2166_v5 = vsel %vm10317_vm5, 0, %v2164_v43  ;;  %v12501_v58 = vld [vmem:[#allocation48_spill] sm:$0xff] }
 0x369   :  { %v7036_v56 = vpop.eup %7035  ;;  %v1973_v17 = vsel %vm1963_vm6, nan, %v1972_v49  ;;  %vm12500_vm12 = vcmp.lt.s32.totalorder %v8575_v59, 0  ;;  %7043 = vcosq.f32 %v2268_v55  ;;  %v12502_v21 = vand.u32 2147483647, %v12501_v58 }
 0x36a   :  { %v2267_v29 = vsel %vm12500_vm12, %v2266_v19, %v12499_v1  ;;  %v7038_v23 = vpop.eup %7037  ;;  %6702 = vmatprep.mubr.msk.f32.mxu1 %vm3740_vm8, %v1973_v17  ;;  %v2073_v28 = vxor.u32 2147483648, %v7036_v56  ;;  %7045 = vsinq.f32 %v2268_v55  ;;  %v2369_v9 = vsub.s32 4, %v12505_v26  ;;  %v12515_v19 = vld [vmem:[#allocation54_spill] sm:$0xff] }
 0x36b   :  { %vm10361_vm13 = vcmp.le.f32.partialorder %v12502_v21, 0.7853982  ;;  %vm2069_vm1 = vcmp.eq.s32.totalorder %v2067_v47, 0  ;;  %v2070_v10 = vxor.u32 2147483648, %v7038_v23  ;;  %vm2072_vm15 = vcmp.eq.s32.totalorder %v2067_v47, 2 }
 0x36c   :  { %v2371_v44 = vsel %vm10361_vm13, %v12501_v58, %v12506_v46  ;;  %v2074_v18 = vsel %vm2072_vm15, %v2073_v28, %v7038_v23  ;;  %v2170_v41 = vand.u32 3, %v2166_v5  ;;  %vm12507_vm5 = vcmp.lt.s32.totalorder %v12501_v58, 0  ;;  %v12520_v5 = vld [vmem:[#allocation69_spill] sm:$0xff] }
 0x36d   :  { %v2370_v22 = vsel %vm12507_vm5, %v2369_v9, %v12505_v26  ;;  %7047 = vcosq.f32 %v2371_v44  ;;  %vm2068_vm11 = vcmp.lt.s32.totalorder %v2067_v47, 2  ;;  %v2071_v12 = vsel %vm2069_vm1, %v7036_v56, %v2070_v10  ;;  %v12519_v56 = vld [vmem:[#allocation61_spill] sm:$0xff] }
 0x36e   :  { %vm2169_vm9 = vweird.f32 %v8735_v61  ;;  %v2269_v7 = vsel %vm10332_vm7, 0, %v2267_v29  ;;  %v7040_v31 = vpop.eup %7039  ;;  %v2075_v51 = vsel %vm2068_vm11, %v2071_v12, %v2074_v18  ;;  %7049 = vsinq.f32 %v2371_v44  ;;  %v12522_v18 = vld [vmem:[#allocation52_spill] sm:$0xff] }
 0x36f   :  { %v12509_v45 = vand.u32 2147483647, %v12508_v63  ;;  %v2472_v34 = vsub.s32 4, %v12512_v37  ;;  %v7042_v33 = vpop.eup %7041  ;;  %v2076_v62 = vsel %vm2066_vm2, nan, %v2075_v51  ;;  %v2176_v3 = vxor.u32 2147483648, %v7040_v31  ;;  %v12526_v51 = vld [vmem:[#allocation60_spill] sm:$0xff] }
 0x370   :  { %v2372_v13 = vsel %vm10361_vm13, 0, %v2370_v22  ;;  %6703 = vmatmul.mubr.msk.f32.gmra.mrb[14].mxu1 %vm3740_vm8, %v2076_v62  ;;  %v2173_v57 = vxor.u32 2147483648, %v7042_v33  ;;  %vm2175_vm0 = vcmp.eq.s32.totalorder %v2170_v41, 2  ;;  %vm12514_vm7 = vcmp.lt.s32.totalorder %v12508_v63, 0  ;;  %v12539_v22 = vld [vmem:[#allocation74_spill] sm:$0xff] }
 0x371   :  { %vm10378_vm4 = vcmp.le.f32.partialorder %v12509_v45, 0.7853982  ;;  %v2473_v48 = vsel %vm12514_vm7, %v2472_v34, %v12512_v37  ;;  %vm2171_vm10 = vcmp.lt.s32.totalorder %v2170_v41, 2  ;;  %vm2172_vm6 = vcmp.eq.s32.totalorder %v2170_v41, 0 }
 0x372   :  { %v2474_v8 = vsel %vm10378_vm4, %v12508_v63, %v12513_v42  ;;  %v2177_v53 = vsel %vm2175_vm0, %v2176_v3, %v7042_v33  ;;  %v2273_v25 = vand.u32 3, %v2269_v7  ;;  %v2174_v43 = vsel %vm2172_vm6, %v7040_v31, %v2173_v57 }
 0x373   :  { %7051 = vcosq.f32 %v2474_v8  ;;  %v2376_v1 = vand.u32 3, %v2372_v13  ;;  %v12516_v15 = vand.u32 2147483647, %v12515_v19  ;;  %v7044_v47 = vpop.eup %7043  ;;  %v2178_v55 = vsel %vm2171_vm10, %v2174_v43, %v2177_v53  ;;  %v12529_v53 = vld [vmem:[#allocation65_spill] sm:$0xff] }
 0x374   :  { %7053 = vsinq.f32 %v2474_v8  ;;  %v2475_v49 = vsel %vm10378_vm4, 0, %v2473_v48  ;;  %v2575_v17 = vsub.s32 4, %v12519_v56  ;;  %v7046_v23 = vpop.eup %7045  ;;  %v2179_v28 = vsel %vm2169_vm9, nan, %v2178_v55 }
 0x375   :  { %vm10397_vm2 = vcmp.le.f32.partialorder %v12516_v15, 0.7853982  ;;  %vm2272_vm12 = vweird.f32 %v8575_v59  ;;  %v2279_v21 = vxor.u32 2147483648, %v7044_v47  ;;  %6705 = vmatprep.mubr.msk.f32.mxu1 %vm3740_vm8, %v2179_v28  ;;  %vm2274_vm13 = vcmp.lt.s32.totalorder %v2273_v25, 2 }
 0x376   :  { %v2577_v29 = vsel %vm10397_vm2, %v12515_v19, %v12520_v5  ;;  %vm2275_vm1 = vcmp.eq.s32.totalorder %v2273_v25, 0  ;;  %v2276_v11 = vxor.u32 2147483648, %v7046_v23  ;;  %vm2278_vm15 = vcmp.eq.s32.totalorder %v2273_v25, 2 }
 0x377   :  { %7055 = vcosq.f32 %v2577_v29  ;;  %v7048_v26 = vpop.eup %7047  ;;  %v2280_v9 = vsel %vm2278_vm15, %v2279_v21, %v7046_v23  ;;  %v2479_v10 = vand.u32 3, %v2475_v49  ;;  %vm12521_vm5 = vcmp.lt.s32.totalorder %v12515_v19, 0 }
 0x378   :  { %v2576_v46 = vsel %vm12521_vm5, %v2575_v17, %v12519_v56  ;;  %7057 = vsinq.f32 %v2577_v29  ;;  %v2277_v61 = vsel %vm2275_vm1, %v7044_v47, %v2276_v11  ;;  %vm2381_vm11 = vcmp.eq.s32.totalorder %v2376_v1, 2  ;;  %v7050_v12 = vpop.eup %7049 }
 0x379   :  { %v2382_v44 = vxor.u32 2147483648, %v7048_v26  ;;  %v12523_v41 = vand.u32 2147483647, %v12522_v18  ;;  %v2281_v7 = vsel %vm2274_vm13, %v2277_v61, %v2280_v9  ;;  %v2578_v31 = vsel %vm10397_vm2, 0, %v2576_v46  ;;  %v12534_v9 = vld [vmem:[#allocation59_spill] sm:$0xff]  ;;  %v12538_v61 = vld [vmem:[#allocation64_spill] sm:$0xff] }
 0x37a   :  { %v2678_v45 = vsub.s32 4, %v12526_v51  ;;  %v2282_v34 = vsel %vm2272_vm12, nan, %v2281_v7  ;;  %vm2375_vm4 = vweird.f32 %v12501_v58  ;;  %v2379_v33 = vxor.u32 2147483648, %v7050_v12  ;;  %v12557_v46 = vld [vmem:[#allocation73_spill] sm:$0xff] }
 0x37b   :  { %vm10417_vm9 = vcmp.le.f32.partialorder %v12523_v41, 0.7853982  ;;  %v2383_v62 = vsel %vm2381_vm11, %v2382_v44, %v7050_v12  ;;  %6706 = vmatmul.mubr.msk.f32.gmra.mrb[16].mxu1 %vm3740_vm8, %v2282_v34  ;;  %vm2377_vm0 = vcmp.lt.s32.totalorder %v2376_v1, 2  ;;  %vm2378_vm7 = vcmp.eq.s32.totalorder %v2376_v1, 0 }
 0x37c   :  { %v2680_v37 = vsel %vm10417_vm9, %v12522_v18, %v12527_v36  ;;  %vm2478_vm10 = vweird.f32 %v12508_v63  ;;  %vm2484_vm6 = vcmp.eq.s32.totalorder %v2479_v10, 2  ;;  %v2380_v13 = vsel %vm2378_vm7, %v7048_v26, %v2379_v33  ;;  %v12544_v36 = vld [vmem:[#allocation70_spill] sm:$0xff] }
 0x37d   :  { %v7052_v3 = vpop.eup %7051  ;;  %v2582_v8 = vand.u32 3, %v2578_v31  ;;  %7059 = vcosq.f32 %v2680_v37  ;;  %v2384_v48 = vsel %vm2377_vm0, %v2380_v13, %v2383_v62  ;;  %vm2581_vm2 = vweird.f32 %v12515_v19 }
 0x37e   :  { %v2485_v42 = vxor.u32 2147483648, %v7052_v3  ;;  %v7054_v57 = vpop.eup %7053  ;;  %vm12528_vm12 = vcmp.lt.s32.totalorder %v12522_v18, 0  ;;  %7061 = vsinq.f32 %v2680_v37  ;;  %v2781_v25 = vsub.s32 4, %v12529_v53 }
 0x37f   :  { %v2679_v59 = vsel %vm12528_vm12, %v2678_v45, %v12526_v51  ;;  %v2385_v43 = vsel %vm2375_vm4, nan, %v2384_v48  ;;  %v2482_v1 = vxor.u32 2147483648, %v7054_v57  ;;  %v12530_v38 = vand.u32 2147483647, %v9074_v24 }
 0x380   :  { %v2486_v15 = vsel %vm2484_vm6, %v2485_v42, %v7054_v57  ;;  %6708 = vmatprep.mubr.msk.f32.mxu1 %vm3740_vm8, %v2385_v43  ;;  %vm2480_vm1 = vcmp.lt.s32.totalorder %v2479_v10, 2  ;;  %vm2481_vm15 = vcmp.eq.s32.totalorder %v2479_v10, 0  ;;  %vm12533_vm5 = vcmp.lt.s32.totalorder %v9074_v24, 0 }
 0x381   :  { %vm10442_vm13 = vcmp.le.f32.partialorder %v12530_v38, 0.7853982  ;;  %v7056_v55 = vpop.eup %7055  ;;  %v2782_v49 = vsel %vm12533_vm5, %v2781_v25, %v12529_v53  ;;  %v2483_v56 = vsel %vm2481_vm15, %v7052_v3, %v2482_v1  ;;  %v2681_v5 = vsel %vm10417_vm9, 0, %v2679_v59  ;;  %v12546_v25 = vld [vmem:[#allocation62_spill] sm:$0xff] }
 0x382   :  { %v2783_v58 = vsel %vm10442_vm13, %v9074_v24, %v9601_v27  ;;  %v2588_v17 = vxor.u32 2147483648, %v7056_v55  ;;  %v7058_v29 = vpop.eup %7057  ;;  %v2487_v23 = vsel %vm2480_vm1, %v2483_v56, %v2486_v15  ;;  %vm2587_vm11 = vcmp.eq.s32.totalorder %v2582_v8, 2  ;;  %v12550_v15 = vld [vmem:[#allocation67_spill] sm:$0xff] }
 0x383   :  { %7063 = vcosq.f32 %v2783_v58  ;;  %v2784_v28 = vsel %vm10442_vm13, 0, %v2782_v49  ;;  %v2488_v21 = vsel %vm2478_vm10, nan, %v2487_v23  ;;  %vm2583_vm4 = vcmp.lt.s32.totalorder %v2582_v8, 2 }
 0x384   :  { %7065 = vsinq.f32 %v2783_v58  ;;  %v2585_v11 = vxor.u32 2147483648, %v7058_v29  ;;  %v2589_v26 = vsel %vm2587_vm11, %v2588_v17, %v7058_v29  ;;  %6709 = vmatmul.mubr.msk.f32.gmra.mrb[18].mxu1 %vm3740_vm8, %v2488_v21  ;;  %vm2584_vm0 = vcmp.eq.s32.totalorder %v2582_v8, 0  ;;  %v12551_v58 = vld [vmem:[#allocation76_spill] sm:$0xff] }
 0x385   :  { %vm2684_vm7 = vweird.f32 %v12522_v18  ;;  %v2685_v27 = vand.u32 3, %v2681_v5  ;;  %v12535_v10 = vand.u32 2147483647, %v12534_v9  ;;  %v2884_v44 = vsub.s32 4, %v12538_v61  ;;  %v12552_v29 = vld [vmem:[#allocation72_spill] sm:$0xff] }
 0x386   :  { %v2586_v41 = vsel %vm2584_vm0, %v7056_v55, %v2585_v11  ;;  %v2788_v63 = vand.u32 3, %v2784_v28  ;;  %v12540_v7 = vand.u32 2147483647, %v9273_v52  ;;  %vm12543_vm6 = vcmp.lt.s32.totalorder %v12534_v9, 0 }
 0x387   :  { %vm10464_vm9 = vcmp.le.f32.partialorder %v12535_v10, 0.7853982  ;;  %v2590_v51 = vsel %vm2583_vm4, %v2586_v41, %v2589_v26  ;;  %v2885_v45 = vsel %vm12543_vm6, %v2884_v44, %v12538_v61  ;;  %v2987_v37 = vsub.s32 4, %v12544_v36  ;;  %v7060_v34 = vpop.eup %7059 }
 0x388   :  { %v2886_v12 = vsel %vm10464_vm9, %v12534_v9, %v12539_v22  ;;  %vm10475_vm10 = vcmp.le.f32.partialorder %v12540_v7, 0.7853982  ;;  %v2591_v33 = vsel %vm2581_vm2, nan, %v2590_v51  ;;  %v2887_v62 = vsel %vm10464_vm9, 0, %v2885_v45  ;;  %v7062_v13 = vpop.eup %7061 }
 0x389   :  { %7067 = vcosq.f32 %v2886_v12  ;;  %v2989_v3 = vsel %vm10475_vm10, %v9273_v52, %v9740_v30  ;;  %6711 = vmatprep.mubr.msk.f32.mxu1 %vm3740_vm8, %v2591_v33  ;;  %vm2686_vm12 = vcmp.lt.s32.totalorder %v2685_v27, 2  ;;  %v2691_v42 = vxor.u32 2147483648, %v7060_v34 }
 0x38a   :  { %7069 = vsinq.f32 %v2886_v12  ;;  %vm12545_vm13 = vcmp.lt.s32.totalorder %v9273_v52, 0  ;;  %vm2687_vm2 = vcmp.eq.s32.totalorder %v2685_v27, 0  ;;  %v2688_v19 = vxor.u32 2147483648, %v7062_v13 }
 0x38b   :  { %v2988_v8 = vsel %vm12545_vm13, %v2987_v37, %v12544_v36  ;;  %7071 = vcosq.f32 %v2989_v3  ;;  %vm2690_vm1 = vcmp.eq.s32.totalorder %v2685_v27, 2  ;;  %vm2787_vm15 = vweird.f32 %v9074_v24 }
 0x38c   :  { %7073 = vsinq.f32 %v2989_v3  ;;  %v2692_v57 = vsel %vm2690_vm1, %v2691_v42, %v7062_v13  ;;  %vm2789_vm5 = vcmp.lt.s32.totalorder %v2788_v63, 2  ;;  %v2891_v48 = vand.u32 3, %v2887_v62 }
 0x38d   :  { %v7064_v30 = vpop.eup %7063  ;;  %v2689_v59 = vsel %vm2687_vm2, %v7060_v34, %v2688_v19  ;;  %v2990_v53 = vsel %vm10475_vm10, 0, %v2988_v8  ;;  %v12547_v43 = vand.u32 2147483647, %v12546_v25  ;;  %v3090_v38 = vsub.s32 4, %v12550_v15 }
 0x38e   :  { %v7066_v47 = vpop.eup %7065  ;;  %v2693_v55 = vsel %vm2686_vm12, %v2689_v59, %v2692_v57  ;;  %vm2790_vm4 = vcmp.eq.s32.totalorder %v2788_v63, 0  ;;  %v2794_v49 = vxor.u32 2147483648, %v7064_v30  ;;  %vm2793_vm0 = vcmp.eq.s32.totalorder %v2788_v63, 2  ;;  %v12562_v57 = vld [vmem:[#allocation71_spill] sm:$0xff] }
 0x38f   :  { %vm10500_vm11 = vcmp.le.f32.partialorder %v12547_v43, 0.7853982  ;;  %v2694_v17 = vsel %vm2684_vm7, nan, %v2693_v55  ;;  %v2791_v5 = vxor.u32 2147483648, %v7066_v47  ;;  %vm2890_vm9 = vweird.f32 %v12534_v9 }
 0x390   :  { %v3092_v56 = vsel %vm10500_vm11, %v12546_v25, %v12551_v58  ;;  %vm3315_vm10 = vcmp.lt.s32.totalorder %v12552_v29, 0  ;;  %6712 = vmatmul.mubr.msk.f32.gmra.mrb[20].mxu1 %vm3740_vm8, %v2694_v17  ;;  %v2795_v23 = vsel %vm2793_vm0, %v2794_v49, %v7066_v47  ;;  %v2994_v28 = vand.u32 3, %v2990_v53 }
 0x391   :  { %vm12553_vm6 = vcmp.lt.s32.totalorder %v12546_v25, 0  ;;  %7075 = vcosq.f32 %v3092_v56  ;;  %vm3521_vm12 = vcmp.lt.s32.totalorder %v9613_v50, 0  ;;  %v2792_v11 = vsel %vm2790_vm4, %v7064_v30, %v2791_v5 }
 0x392   :  { %v3091_v21 = vsel %vm12553_vm6, %v3090_v38, %v12550_v15  ;;  %vm2892_vm13 = vcmp.lt.s32.totalorder %v2891_v48, 2  ;;  %7077 = vsinq.f32 %v3092_v56  ;;  %v12554_v18 = vand.u32 2147483647, %v9400_v0 }
 0x393   :  { %v7068_v27 = vpop.eup %7067  ;;  %v2796_v10 = vsel %vm2789_vm5, %v2792_v11, %v2795_v23  ;;  %vm2893_vm2 = vcmp.eq.s32.totalorder %v2891_v48, 0  ;;  %v3193_v61 = vsub.s32 4, %v12557_v46  ;;  %v3093_v7 = vsel %vm10500_vm11, 0, %v3091_v21 }
 0x394   :  { %vm10521_vm7 = vcmp.le.f32.partialorder %v12554_v18, 0.7853982  ;;  %v7070_v41 = vpop.eup %7069  ;;  %v2797_v22 = vsel %vm2787_vm15, nan, %v2796_v10  ;;  %v2897_v12 = vxor.u32 2147483648, %v7068_v27  ;;  %vm2896_vm1 = vcmp.eq.s32.totalorder %v2891_v48, 2 }
 0x395   :  { %v3195_v44 = vsel %vm10521_vm7, %v9400_v0, %v9919_v4  ;;  %v7072_v31 = vpop.eup %7071  ;;  %6714 = vmatprep.mubr.msk.f32.mxu1 %vm3740_vm8, %v2797_v22  ;;  %v2894_v63 = vxor.u32 2147483648, %v7070_v41  ;;  %vm2995_vm5 = vcmp.lt.s32.totalorder %v2994_v28, 2  ;;  %vm2996_vm4 = vcmp.eq.s32.totalorder %v2994_v28, 0 }
 0x396   :  { %7079 = vcosq.f32 %v3195_v44  ;;  %v7074_v51 = vpop.eup %7073  ;;  %v2898_v45 = vsel %vm2896_vm1, %v2897_v12, %v7070_v41  ;;  %v3000_v36 = vxor.u32 2147483648, %v7072_v31  ;;  %vm12558_vm0 = vcmp.lt.s32.totalorder %v9400_v0, 0 }
 0x397   :  { %v3194_v24 = vsel %vm12558_vm0, %v3193_v61, %v12557_v46  ;;  %7081 = vsinq.f32 %v3195_v44  ;;  %v2895_v4 = vsel %vm2893_vm2, %v7068_v27, %v2894_v63  ;;  %v2997_v37 = vxor.u32 2147483648, %v7074_v51  ;;  %v12572_v44 = vld [vmem:[#allocation77_spill] sm:$0xff] }
 0x398   :  { %vm2999_vm15 = vcmp.eq.s32.totalorder %v2994_v28, 2  ;;  %v3097_v34 = vand.u32 3, %v3093_v7  ;;  %v2899_v33 = vsel %vm2892_vm13, %v2895_v4, %v2898_v45  ;;  %v3196_v3 = vsel %vm10521_vm7, 0, %v3194_v24 }
 0x399   :  { %v3001_v62 = vsel %vm2999_vm15, %v3000_v36, %v7074_v51  ;;  %v12559_v13 = vand.u32 2147483647, %v9335_v35  ;;  %v2900_v8 = vsel %vm2890_vm9, nan, %v2899_v33  ;;  %v2998_v19 = vsel %vm2996_vm4, %v7072_v31, %v2997_v37 }
 0x39a   :  { %v3296_v30 = vsub.s32 4, %v12562_v57  ;;  %v12563_v59 = vxor.u32 2147483648, %v9910_v32  ;;  %v3706_v43 = vxor.u32 2147483648, %v9956_v14  ;;  %6715 = vmatmul.mubr.msk.f32.gmra.mrb[22].mxu1 %vm3740_vm8, %v2900_v8  ;;  %vm2993_vm9 = vweird.f32 %v9273_v52 }
 0x39b   :  { %vm10545_vm11 = vcmp.le.f32.partialorder %v12559_v13, 0.7853982  ;;  %v3002_v9 = vsel %vm2995_vm5, %v2998_v19, %v3001_v62  ;;  %v7076_v1 = vpop.eup %7075  ;;  %v3200_v38 = vand.u32 3, %v3196_v3  ;;  %v12565_v52 = vand.u32 2147483647, %v12552_v29 }
 0x39c   :  { %v3298_v48 = vsel %vm10545_vm11, %v9335_v35, %v9915_v20  ;;  %v3398_v53 = vsel %vm3315_vm10, %v12563_v59, %v9910_v32  ;;  %v3604_v20 = vsel %vm3521_vm12, %v3603_v60, %v10029_v6  ;;  %v3003_v15 = vsel %vm2993_vm9, nan, %v3002_v9  ;;  %v7078_v47 = vpop.eup %7077  ;;  %v12564_v32 = vld [vmem:[#allocation75_spill] sm:$0xff] }
 0x39d   :  { %7083 = vcosq.f32 %v3298_v48  ;;  %vm3624_vm6 = vcmp.lt.s32.totalorder %v12564_v32, 0  ;;  %6717 = vmatprep.mubr.msk.f32.mxu1 %vm3740_vm8, %v3003_v15  ;;  %v3103_v55 = vxor.u32 2147483648, %v7076_v1  ;;  %vm10574_vm13 = vcmp.le.f32.partialorder %v12565_v52, 0.7853982 }
 0x39e   :  { %7085 = vsinq.f32 %v3298_v48  ;;  %v3399_v58 = vsub.s32 4, %v9698_v2  ;;  %v3100_v56 = vxor.u32 2147483648, %v7078_v47  ;;  %vm3102_vm7 = vcmp.eq.s32.totalorder %v3097_v34, 2 }
 0x39f   :  { %vm12568_vm2 = vcmp.lt.s32.totalorder %v9335_v35, 0  ;;  %v3401_v60 = vsel %vm10574_vm13, %v12552_v29, %v3398_v53  ;;  %vm3096_vm1 = vweird.f32 %v12546_v25  ;;  %vm3099_vm5 = vcmp.eq.s32.totalorder %v3097_v34, 0  ;;  %v12580_v53 = vld [vmem:[#allocation78_spill] sm:$0xff] }
 0x3a0   :  { %v3297_v6 = vsel %vm12568_vm2, %v3296_v30, %v12562_v57  ;;  %v7080_v17 = vpop.eup %7079  ;;  %v3104_v5 = vsel %vm3102_vm7, %v3103_v55, %v7078_v47  ;;  %7087 = vcosq.f32 %v3401_v60  ;;  %vm3098_vm4 = vcmp.lt.s32.totalorder %v3097_v34, 2 }
 0x3a1   :  { %v3101_v23 = vsel %vm3099_vm5, %v7076_v1, %v3100_v56  ;;  %vm3205_vm0 = vcmp.eq.s32.totalorder %v3200_v38, 2  ;;  %v3206_v28 = vxor.u32 2147483648, %v7080_v17  ;;  %v7082_v21 = vpop.eup %7081  ;;  %v3299_v18 = vsel %vm10545_vm11, 0, %v3297_v6 }
 0x3a2   :  { %v3105_v11 = vsel %vm3098_vm4, %v3101_v23, %v3104_v5  ;;  %v3400_v26 = vsel %vm3315_vm10, %v3399_v58, %v9698_v2  ;;  %7089 = vsinq.f32 %v3401_v60  ;;  %v3203_v10 = vxor.u32 2147483648, %v7082_v21 }
 0x3a3   :  { %v3106_v27 = vsel %vm3096_vm1, nan, %v3105_v11  ;;  %v3207_v25 = vsel %vm3205_vm0, %v3206_v28, %v7082_v21  ;;  %v12569_v46 = vand.u32 2147483647, %v9469_v39  ;;  %vm3199_vm9 = vweird.f32 %v9400_v0 }
 0x3a4   :  { %6718 = vmatmul.mubr.msk.f32.gmra.mrb[24].mxu1 %vm3740_vm8, %v3106_v27  ;;  %vm3202_vm7 = vcmp.eq.s32.totalorder %v3200_v38, 0  ;;  %v3502_v41 = vsub.s32 4, %v12572_v44  ;;  %vm3201_vm10 = vcmp.lt.s32.totalorder %v3200_v38, 2  ;;  %v3303_v12 = vand.u32 3, %v3299_v18 }
 0x3a5   :  { %vm10593_vm15 = vcmp.le.f32.partialorder %v12569_v46, 0.7853982  ;;  %v3204_v22 = vsel %vm3202_vm7, %v7080_v17, %v3203_v10  ;;  %v3402_v7 = vsel %vm10574_vm13, 0, %v3400_v26  ;;  %v12573_v63 = vand.u32 2147483647, %v9613_v50 }
 0x3a6   :  { %v3504_v2 = vsel %vm10593_vm15, %v9469_v39, %v9928_v16  ;;  %v3208_v31 = vsel %vm3201_vm10, %v3204_v22, %v3207_v25  ;;  %v3605_v51 = vsub.s32 4, %v9838_v54  ;;  %v3707_v16 = vsel %vm3624_vm6, %v3706_v43, %v9956_v14 }
 0x3a7   :  { %7091 = vcosq.f32 %v3504_v2  ;;  %vm10608_vm11 = vcmp.le.f32.partialorder %v12573_v63, 0.7853982  ;;  %v7084_v45 = vpop.eup %7083  ;;  %v3209_v36 = vsel %vm3199_vm9, nan, %v3208_v31  ;;  %v3406_v34 = vand.u32 3, %v3402_v7 }
 0x3a8   :  { %7093 = vsinq.f32 %v3504_v2  ;;  %v3607_v24 = vsel %vm10608_vm11, %v9613_v50, %v3604_v20  ;;  %v7086_v4 = vpop.eup %7085  ;;  %6720 = vmatprep.mubr.msk.f32.mxu1 %vm3740_vm8, %v3209_v36  ;;  %v3309_v37 = vxor.u32 2147483648, %v7084_v45  ;;  %vm12576_vm13 = vcmp.lt.s32.totalorder %v9469_v39, 0 }
 0x3a9   :  { %v3503_v33 = vsel %vm12576_vm13, %v3502_v41, %v12572_v44  ;;  %7095 = vcosq.f32 %v3607_v24  ;;  %vm3302_vm2 = vweird.f32 %v9335_v35  ;;  %v3306_v62 = vxor.u32 2147483648, %v7086_v4 }
 0x3aa   :  { %vm3308_vm1 = vcmp.eq.s32.totalorder %v3303_v12, 2  ;;  %7097 = vsinq.f32 %v3607_v24  ;;  %v7088_v14 = vpop.eup %7087  ;;  %vm3304_vm5 = vcmp.lt.s32.totalorder %v3303_v12, 2  ;;  %vm3305_vm4 = vcmp.eq.s32.totalorder %v3303_v12, 0 }
 0x3ab   :  { %v3310_v3 = vsel %vm3308_vm1, %v3309_v37, %v7086_v4  ;;  %v3606_v13 = vsel %vm3521_vm12, %v3605_v51, %v9838_v54  ;;  %v3307_v42 = vsel %vm3305_vm4, %v7084_v45, %v3306_v62  ;;  %v3412_v8 = vxor.u32 2147483648, %v7088_v14 }
 0x3ac   :  { %v3505_v19 = vsel %vm10593_vm15, 0, %v3503_v33  ;;  %v12577_v57 = vand.u32 2147483647, %v12564_v32  ;;  %v7090_v48 = vpop.eup %7089  ;;  %v3311_v59 = vsel %vm3304_vm5, %v3307_v42, %v3310_v3  ;;  %vm3411_vm9 = vcmp.eq.s32.totalorder %v3406_v34, 2 }
 0x3ad   :  { %v3708_v43 = vsub.s32 4, %v12580_v53  ;;  %v3312_v9 = vsel %vm3302_vm2, nan, %v3311_v59  ;;  %v3409_v1 = vxor.u32 2147483648, %v7090_v48  ;;  %v3413_v20 = vsel %vm3411_vm9, %v3412_v8, %v7090_v48  ;;  %v6366_v59 = vld [vmem:[%s12581_s29] ss:$0 sm:$0xff]  ;;  %s12584_s29 = sld [smem:[#allocation82_spill]] }
 0x3ae   :  { %vm10631_vm0 = vcmp.le.f32.partialorder %v12577_v57, 0.7853982  ;;  %v3608_v15 = vsel %vm10608_vm11, 0, %v3606_v13  ;;  %6721 = vmatmul.mubr.msk.f32.gmra.mrb[26].mxu1 %vm3740_vm8, %v3312_v9  ;;  %vm3408_vm12 = vcmp.eq.s32.totalorder %v3406_v34, 0  ;;  %v3509_v38 = vand.u32 3, %v3505_v19 }
 0x3af   :  { %v3710_v54 = vsel %vm10631_vm0, %v12564_v32, %v3707_v16  ;;  %vm3407_vm15 = vcmp.lt.s32.totalorder %v3406_v34, 2  ;;  %v3410_v47 = vsel %vm3408_vm12, %v7088_v14, %v3409_v1  ;;  %vm3405_vm7 = vweird.f32 %v12552_v29 }
 0x3b0   :  { %7099 = vcosq.f32 %v3710_v54  ;;  %v3414_v52 = vsel %vm3407_vm15, %v3410_v47, %v3413_v20  ;;  %v3612_v49 = vand.u32 3, %v3608_v15  ;;  %v3709_v35 = vsel %vm3624_vm6, %v3708_v43, %v12580_v53 }
 0x3b1   :  { %7101 = vsinq.f32 %v3710_v54  ;;  %v7092_v55 = vpop.eup %7091  ;;  %v3415_v56 = vsel %vm3405_vm7, nan, %v3414_v52  ;;  %vm3514_vm10 = vcmp.eq.s32.totalorder %v3509_v38, 2  ;;  %vm3511_vm11 = vcmp.eq.s32.totalorder %v3509_v38, 0 }
 0x3b2   :  { %v7094_v58 = vpop.eup %7093  ;;  %v3515_v6 = vxor.u32 2147483648, %v7092_v55  ;;  %6723 = vmatprep.mubr.msk.f32.mxu1 %vm3740_vm8, %v3415_v56  ;;  %v3711_v29 = vsel %vm10631_vm0, 0, %v3709_v35  ;;  %vm3510_vm13 = vcmp.lt.s32.totalorder %v3509_v38, 2  ;;  %vm3617_vm2 = vcmp.eq.s32.totalorder %v3612_v49, 2 }
 0x3b3   :  { %v7096_v60 = vpop.eup %7095  ;;  %v3512_v17 = vxor.u32 2147483648, %v7094_v58  ;;  %vm3508_vm6 = vweird.f32 %v9469_v39  ;;  %vm3614_vm1 = vcmp.eq.s32.totalorder %v3612_v49, 0  ;;  %vm3613_vm5 = vcmp.lt.s32.totalorder %v3612_v49, 2 }
 0x3b4   :  { %v7098_v5 = vpop.eup %7097  ;;  %v3516_v23 = vsel %vm3514_vm10, %v3515_v6, %v7094_v58  ;;  %v3618_v28 = vxor.u32 2147483648, %v7096_v60  ;;  %v3715_v25 = vand.u32 3, %v3711_v29  ;;  %vm3611_vm4 = vweird.f32 %v9613_v50  ;;  %v10662_v50 = vld [vmem:[%s12081_s9] ss:$0 sm:$0xff] }
 0x3b5   :  { %v3513_v21 = vsel %vm3511_vm11, %v7092_v55, %v3512_v17  ;;  %v3615_v11 = vxor.u32 2147483648, %v7098_v5  ;;  %vm3714_vm15 = vweird.f32 %v12564_v32  ;;  %vm168_vm7 = vcmask 261120  }
 0x3b6   :  { %v3517_v18 = vsel %vm3510_vm13, %v3513_v21, %v3516_v23  ;;  %v3619_v26 = vsel %vm3617_vm2, %v3618_v28, %v7098_v5  ;;  %vm3720_vm0 = vcmp.eq.s32.totalorder %v3715_v25, 2  ;;  %vm3717_vm9 = vcmp.eq.s32.totalorder %v3715_v25, 0 }
 0x3b7   :  { %v3518_v27 = vsel %vm3508_vm6, nan, %v3517_v18  ;;  %v3616_v10 = vsel %vm3614_vm1, %v7096_v60, %v3615_v11  ;;  %vm3716_vm12 = vcmp.lt.s32.totalorder %v3715_v25, 2  ;;  %vm6265_vm10 = vcmask 1041409  }
 0x3b8   :  { %6724 = vmatmul.mubr.msk.f32.gmra.mrb[28].mxu1 %vm3740_vm8, %v3518_v27  ;;  %v3620_v46 = vsel %vm3613_vm5, %v3616_v10, %v3619_v26  ;;  %vm6267_vm11 = vcmask 1042434   ;;  %vm6269_vm13 = vcmask 1043459   ;;  %vm6271_vm2 = vcmask 1044484  }
 0x3b9   :  { %v3621_v44 = vsel %vm3611_vm4, nan, %v3620_v46  ;;  %vm6273_vm6 = vcmask 1045509   ;;  %vm6275_vm1 = vcmask 1046534   ;;  %vm6277_vm5 = vcmask 1047559  }
 0x3ba   :  { %v7100_v61 = vpop.eup %7099  ;;  %6726 = vmatprep.mubr.msk.f32.mxu1 %vm3740_vm8, %v3621_v44 }
 0x3bb   :  { %v7102_v41 = vpop.eup %7101  ;;  %v3721_v2 = vxor.u32 2147483648, %v7100_v61 }
 0x3bc   :  { %v3718_v22 = vxor.u32 2147483648, %v7102_v41 }
 0x3bd   :  { %v3722_v39 = vsel %vm3720_vm0, %v3721_v2, %v7102_v41 }
 0x3be   :  { %v3719_v12 = vsel %vm3717_vm9, %v7100_v61, %v3718_v22 }
 0x3bf   :  { %v3723_v7 = vsel %vm3716_vm12, %v3719_v12, %v3722_v39 }
 0x3c0   :  { %v3724_v31 = vsel %vm3714_vm15, nan, %v3723_v7 }
 0x3c1   :  { %6727 = vmatmul.mubr.msk.f32.gmra.mrb[30].mxu1 %vm3740_vm8, %v3724_v31  ;;  %vm6116_vm8 = vcmask 130112  }
 0x3c2   :  { %6793 = vmatprep.mubr.msk.f32.mxu1 %vm7401_vm3, %v7402_v40  ;;  %vm6123_vm3 = vcmask 195712  }
 0x41b   :  { %v6683_v63 = vpop.f32.mrb[0].mxu1 }
 0x41c   :  { %v10665_v0 = vadd.f32 %v6683_v63, %v10662_v50  ;;  %v3903_v51 = vpop.f32.mrb[1].mxu1 }
 0x41d   :  { %v10668_v32 = vadd.f32 %v10662_v50, %v3903_v51 }
 0x41e   :  { %v162_v45 = vpop.f32.mrb[0].mxu0  ;;  %v4067_v16 = vsel %vm168_vm7, %v10665_v0, 0.0 }
 0x41f   :  { %v6664_v36 = vpop.f32.mrb[1].mxu0  ;;  %v6686_v24 = vpop.f32.mrb[2].mxu1  ;;  %4068 = vadd.xlane.f32.xlu1 %v4067_v16  ;;  %v4064_v4 = vsel %vm168_vm7, %v10668_v32, 0.0  ;;  %v10708_v15 = vadd.f32 %v6366_v59, %v162_v45 }
 0x420   :  { %v10675_v37 = vadd.f32 %v6686_v24, %v10662_v50  ;;  %v3913_v34 = vpop.f32.mrb[3].mxu1  ;;  %4065 = vadd.xlane.f32.xlu0 %v4064_v4 }
 0x421   :  { %v10680_v62 = vadd.f32 %v10662_v50, %v3913_v34  ;;  %v169_v35 = vsel %vm168_vm7, %v10708_v15, 0.0 }
 0x422   :  { %v4073_v33 = vsel %vm168_vm7, %v10675_v37, 0.0 }
 0x423   :  { %v6689_v14 = vpop.f32.mrb[4].mxu1  ;;  %v4070_v57 = vsel %vm168_vm7, %v10680_v62, 0.0 }
 0x424   :  { %v3923_v3 = vpop.f32.mrb[5].mxu1  ;;  %4074 = vadd.xlane.f32.xlu0 %v4073_v33  ;;  %v10686_v42 = vadd.f32 %v6689_v14, %v10662_v50 }
 0x425   :  { %v10683_v13 = vadd.f32 %v10662_v50, %v3923_v3 }
 0x426   :  { %v4079_v9 = vsel %vm168_vm7, %v10686_v42, 0.0 }
 0x427   :  { %v6692_v8 = vpop.f32.mrb[6].mxu1  ;;  %v4076_v19 = vsel %vm168_vm7, %v10683_v13, 0.0 }
 0x428   :  { %v3933_v30 = vpop.f32.mrb[7].mxu1  ;;  %4077 = vadd.xlane.f32.xlu1 %v4076_v19  ;;  %4071 = vadd.xlane.f32.xlu0 %v4070_v57  ;;  %v10699_v53 = vadd.f32 %v6692_v8, %v10662_v50 }
 0x429   :  { %v10693_v48 = vadd.f32 %v10662_v50, %v3933_v30 }
 0x42a   :  { %v4085_v52 = vsel %vm168_vm7, %v10699_v53, 0.0 }
 0x42b   :  { %v6695_v43 = vpop.f32.mrb[8].mxu1  ;;  %v4082_v54 = vsel %vm168_vm7, %v10693_v48, 0.0 }
 0x42c   :  { %v3943_v1 = vpop.f32.mrb[9].mxu1  ;;  %4083 = vadd.xlane.f32.xlu1 %v4082_v54  ;;  %4080 = vadd.xlane.f32.xlu0 %v4079_v9  ;;  %v10711_v38 = vadd.f32 %v6695_v43, %v10662_v50 }
 0x42d   :  { %v10706_v20 = vadd.f32 %v10662_v50, %v3943_v1 }
 0x42e   :  { %v4091_v6 = vsel %vm168_vm7, %v10711_v38, 0.0 }
 0x42f   :  { %v4088_v55 = vsel %vm168_vm7, %v10706_v20, 0.0 }
 0x430   :  { %4089 = vadd.xlane.f32.xlu1 %v4088_v55  ;;  %4086 = vadd.xlane.f32.xlu0 %v4085_v52 }
 0x432   :  { %v6698_v47 = vpop.f32.mrb[10].mxu1 }
 0x433   :  { %v3953_v49 = vpop.f32.mrb[11].mxu1  ;;  %v10720_v58 = vadd.f32 %v6698_v47, %v10662_v50 }
 0x434   :  { %v10723_v56 = vadd.f32 %v10662_v50, %v3953_v49  ;;  %4092 = vadd.xlane.f32.xlu0 %v4091_v6  ;;  %170 = vadd.xlane.f32.xlu1 %v169_v35 }
 0x435   :  { %v4097_v28 = vsel %vm168_vm7, %v10720_v58, 0.0 }
 0x436   :  { %v4094_v23 = vsel %vm168_vm7, %v10723_v56, 0.0 }
 0x438   :  { %4095 = vadd.xlane.f32.xlu0 %v4094_v23  ;;  %4098 = vadd.xlane.f32.xlu1 %v4097_v28 }
 0x43a   :  { %v6701_v60 = vpop.f32.mrb[12].mxu1 }
 0x43b   :  { %v10728_v17 = vadd.f32 %v6701_v60, %v10662_v50  ;;  %v3963_v5 = vpop.f32.mrb[13].mxu1 }
 0x43c   :  { %v10735_v29 = vadd.f32 %v10662_v50, %v3963_v5 }
 0x43d   :  { %v4103_v11 = vsel %vm168_vm7, %v10728_v17, 0.0 }
 0x43e   :  { %v4100_v21 = vsel %vm168_vm7, %v10735_v29, 0.0  ;;  %4104 = vadd.xlane.f32.xlu1 %v4103_v11 }
 0x43f   :  { %4101 = vadd.xlane.f32.xlu0 %v4100_v21 }
 0x443   :  { %v6704_v18 = vpop.f32.mrb[14].mxu1 }
 0x444   :  { %v10742_v26 = vadd.f32 %v6704_v18, %v10662_v50  ;;  %v3973_v27 = vpop.f32.mrb[15].mxu1 }
 0x445   :  { %v10745_v10 = vadd.f32 %v10662_v50, %v3973_v27 }
 0x446   :  { %v4109_v25 = vsel %vm168_vm7, %v10742_v26, 0.0 }
 0x447   :  { %v4106_v46 = vsel %vm168_vm7, %v10745_v10, 0.0  ;;  %4110 = vadd.xlane.f32.xlu1 %v4109_v25 }
 0x448   :  { %4107 = vadd.xlane.f32.xlu0 %v4106_v46 }
 0x44e   :  { %v6707_v61 = vpop.f32.mrb[16].mxu1 }
 0x44f   :  { %v10752_v44 = vadd.f32 %v6707_v61, %v10662_v50  ;;  %v3983_v41 = vpop.f32.mrb[17].mxu1 }
 0x450   :  { %v10755_v2 = vadd.f32 %v10662_v50, %v3983_v41 }
 0x451   :  { %v4115_v22 = vsel %vm168_vm7, %v10752_v44, 0.0 }
 0x452   :  { %v4112_v39 = vsel %vm168_vm7, %v10755_v2, 0.0  ;;  %4116 = vadd.xlane.f32.xlu1 %v4115_v22 }
 0x453   :  { %4113 = vadd.xlane.f32.xlu0 %v4112_v39 }
 0x457   :  { %v6710_v12 = vpop.f32.mrb[18].mxu1 }
 0x458   :  { %v10762_v7 = vadd.f32 %v6710_v12, %v10662_v50  ;;  %v3993_v31 = vpop.f32.mrb[19].mxu1 }
 0x459   :  { %v10765_v63 = vadd.f32 %v10662_v50, %v3993_v31 }
 0x45a   :  { %v4121_v51 = vsel %vm168_vm7, %v10762_v7, 0.0 }
 0x45b   :  { %v4118_v45 = vsel %vm168_vm7, %v10765_v63, 0.0  ;;  %4122 = vadd.xlane.f32.xlu1 %v4121_v51 }
 0x45c   :  { %4119 = vadd.xlane.f32.xlu0 %v4118_v45 }
 0x463   :  { %v6713_v16 = vpop.f32.mrb[20].mxu1 }
 0x464   :  { %v10772_v36 = vadd.f32 %v6713_v16, %v10662_v50  ;;  %v4003_v24 = vpop.f32.mrb[21].mxu1 }
 0x465   :  { %v10775_v4 = vadd.f32 %v10662_v50, %v4003_v24 }
 0x466   :  { %v4127_v34 = vsel %vm168_vm7, %v10772_v36, 0.0 }
 0x467   :  { %v4124_v33 = vsel %vm168_vm7, %v10775_v4, 0.0  ;;  %4128 = vadd.xlane.f32.xlu1 %v4127_v34 }
 0x468   :  { %4125 = vadd.xlane.f32.xlu0 %v4124_v33 }
 0x46d   :  { %v6716_v14 = vpop.f32.mrb[22].mxu1 }
 0x46e   :  { %v10782_v3 = vadd.f32 %v6716_v14, %v10662_v50  ;;  %v4013_v8 = vpop.f32.mrb[23].mxu1 }
 0x46f   :  { %v10785_v19 = vadd.f32 %v10662_v50, %v4013_v8 }
 0x470   :  { %v4133_v57 = vsel %vm168_vm7, %v10782_v3, 0.0 }
 0x471   :  { %v4130_v30 = vsel %vm168_vm7, %v10785_v19, 0.0  ;;  %4134 = vadd.xlane.f32.xlu1 %v4133_v57 }
 0x472   :  { %4131 = vadd.xlane.f32.xlu0 %v4130_v30 }
 0x477   :  { %v6719_v59 = vpop.f32.mrb[24].mxu1 }
 0x478   :  { %v10792_v43 = vadd.f32 %v6719_v59, %v10662_v50  ;;  %v4023_v54 = vpop.f32.mrb[25].mxu1 }
 0x479   :  { %v10795_v9 = vadd.f32 %v10662_v50, %v4023_v54 }
 0x47a   :  { %v4139_v1 = vsel %vm168_vm7, %v10792_v43, 0.0 }
 0x47b   :  { %v4136_v47 = vsel %vm168_vm7, %v10795_v9, 0.0  ;;  %4140 = vadd.xlane.f32.xlu1 %v4139_v1 }
 0x47c   :  { %4137 = vadd.xlane.f32.xlu0 %v4136_v47 }
 0x481   :  { %v6722_v55 = vpop.f32.mrb[26].mxu1 }
 0x482   :  { %v10802_v52 = vadd.f32 %v6722_v55, %v10662_v50  ;;  %v4033_v49 = vpop.f32.mrb[27].mxu1 }
 0x483   :  { %v10805_v35 = vadd.f32 %v10662_v50, %v4033_v49 }
 0x484   :  { %v4145_v6 = vsel %vm168_vm7, %v10802_v52, 0.0 }
 0x485   :  { %v4142_v60 = vsel %vm168_vm7, %v10805_v35, 0.0  ;;  %4146 = vadd.xlane.f32.xlu1 %v4145_v6 }
 0x486   :  { %4143 = vadd.xlane.f32.xlu0 %v4142_v60 }
 0x48b   :  { %v6725_v5 = vpop.f32.mrb[28].mxu1 }
 0x48c   :  { %v10812_v23 = vadd.f32 %v6725_v5, %v10662_v50  ;;  %v4043_v28 = vpop.f32.mrb[29].mxu1 }
 0x48d   :  { %v10815_v21 = vadd.f32 %v10662_v50, %v4043_v28 }
 0x48e   :  { %v4151_v11 = vsel %vm168_vm7, %v10812_v23, 0.0 }
 0x48f   :  { %v4148_v18 = vsel %vm168_vm7, %v10815_v21, 0.0  ;;  %4152 = vadd.xlane.f32.xlu1 %v4151_v11 }
 0x490   :  { %4149 = vadd.xlane.f32.xlu0 %v4148_v18 }
 0x494   :  { %v6728_v27 = vpop.f32.mrb[30].mxu1 }
 0x495   :  { %v10822_v25 = vadd.f32 %v6728_v27, %v10662_v50  ;;  %v4053_v46 = vpop.f32.mrb[31].mxu1 }
 0x496   :  { %v10825_v61 = vadd.f32 %v10662_v50, %v4053_v46 }
 0x497   :  { %v4157_v41 = vsel %vm168_vm7, %v10822_v25, 0.0 }
 0x498   :  { %v4154_v22 = vsel %vm168_vm7, %v10825_v61, 0.0  ;;  %4158 = vadd.xlane.f32.xlu1 %v4157_v41 }
 0x499   :  { %4155 = vadd.xlane.f32.xlu0 %v4154_v22 }
 0x4ac   :  { %v4069_v39 = vpop.xlane.xlu1 %4068 }
 0x4ad   :  { %v4161_v12 = vmul.f32 0.03125, %v4069_v39  ;;  %v4066_v31 = vpop.xlane.xlu0 %4065 }
 0x4ae   :  { %v4160_v51 = vmul.f32 0.03125, %v4066_v31 }
 0x4af   :  { %v10832_v45 = vsub.f32 %v10665_v0, %v4161_v12 }
 0x4b0   :  { %v10835_v16 = vsub.f32 %v10668_v32, %v4160_v51 }
 0x4b1   :  { %v4075_v50 = vpop.xlane.xlu0 %4074  ;;  %v4225_v24 = vmul.f32 %v10832_v45, %v10832_v45 }
 0x4b2   :  { %v4163_v34 = vmul.f32 0.03125, %v4075_v50  ;;  %v4224_v33 = vmul.f32 %v10835_v16, %v10835_v16 }
 0x4b3   :  { %v4259_v14 = vsel %vm168_vm7, %v4225_v24, 0.0 }
 0x4b4   :  { %v10843_v8 = vsub.f32 %v10675_v37, %v4163_v34  ;;  %4260 = vadd.xlane.f32.xlu1 %v4259_v14  ;;  %v4256_v0 = vsel %vm168_vm7, %v4224_v33, 0.0 }
 0x4b5   :  { %v4078_v57 = vpop.xlane.xlu1 %4077  ;;  %4257 = vadd.xlane.f32.xlu0 %v4256_v0  ;;  %v4072_v32 = vpop.xlane.xlu0 %4071 }
 0x4b6   :  { %v4164_v30 = vmul.f32 0.03125, %v4078_v57  ;;  %v4162_v59 = vmul.f32 0.03125, %v4072_v32  ;;  %v4227_v54 = vmul.f32 %v10843_v8, %v10843_v8 }
 0x4b8   :  { %v10849_v1 = vsub.f32 %v10683_v13, %v4164_v30  ;;  %v10852_v47 = vsub.f32 %v10680_v62, %v4162_v59  ;;  %v4265_v37 = vsel %vm168_vm7, %v4227_v54, 0.0 }
 0x4b9   :  { %v4084_v55 = vpop.xlane.xlu1 %4083  ;;  %v4081_v49 = vpop.xlane.xlu0 %4080  ;;  %4266 = vadd.xlane.f32.xlu1 %v4265_v37 }
 0x4ba   :  { %v4166_v6 = vmul.f32 0.03125, %v4084_v55  ;;  %v4165_v60 = vmul.f32 0.03125, %v4081_v49  ;;  %v4226_v5 = vmul.f32 %v10852_v47, %v10852_v47  ;;  %v4228_v62 = vmul.f32 %v10849_v1, %v10849_v1 }
 0x4bc   :  { %v10858_v28 = vsub.f32 %v10693_v48, %v4166_v6  ;;  %v10861_v11 = vsub.f32 %v10686_v42, %v4165_v60  ;;  %v4262_v13 = vsel %vm168_vm7, %v4226_v5, 0.0  ;;  %v4268_v12 = vsel %vm168_vm7, %v4228_v62, 0.0 }
 0x4bd   :  { %v4090_v18 = vpop.xlane.xlu1 %4089  ;;  %4263 = vadd.xlane.f32.xlu0 %v4262_v13  ;;  %v4087_v27 = vpop.xlane.xlu0 %4086 }
 0x4be   :  { %v4168_v46 = vmul.f32 0.03125, %v4090_v18  ;;  %v4167_v41 = vmul.f32 0.03125, %v4087_v27  ;;  %v4229_v22 = vmul.f32 %v10861_v11, %v10861_v11  ;;  %v4230_v48 = vmul.f32 %v10858_v28, %v10858_v28 }
 0x4c0   :  { %v10871_v39 = vsub.f32 %v10706_v20, %v4168_v46  ;;  %v10874_v42 = vsub.f32 %v10699_v53, %v4167_v41  ;;  %v4271_v31 = vsel %vm168_vm7, %v4229_v22, 0.0  ;;  %v4274_v14 = vsel %vm168_vm7, %v4230_v48, 0.0 }
 0x4c1   :  { %4269 = vadd.xlane.f32.xlu0 %v4268_v12  ;;  %v4093_v51 = vpop.xlane.xlu0 %4092  ;;  %4272 = vadd.xlane.f32.xlu1 %v4271_v31  ;;  %v171_v50 = vpop.xlane.xlu1 %170 }
 0x4c2   :  { %v4169_v24 = vmul.f32 0.03125, %v4093_v51  ;;  %v173_v34 = vmul.f32 0.03125, %v171_v50  ;;  %v4231_v33 = vmul.f32 %v10874_v42, %v10874_v42  ;;  %v4232_v57 = vmul.f32 %v10871_v39, %v10871_v39 }
 0x4c4   :  { %v10882_v20 = vsub.f32 %v10711_v38, %v4169_v24  ;;  %v10885_v53 = vsub.f32 %v10708_v15, %v173_v34  ;;  %v4277_v0 = vsel %vm168_vm7, %v4231_v33, 0.0  ;;  %v4280_v49 = vsel %vm168_vm7, %v4232_v57, 0.0 }
 0x4c5   :  { %4275 = vadd.xlane.f32.xlu0 %v4274_v14  ;;  %v4096_v32 = vpop.xlane.xlu0 %4095  ;;  %4278 = vadd.xlane.f32.xlu1 %v4277_v0  ;;  %v4099_v30 = vpop.xlane.xlu1 %4098 }
 0x4c6   :  { %v4170_v59 = vmul.f32 0.03125, %v4096_v32  ;;  %v4171_v54 = vmul.f32 0.03125, %v4099_v30  ;;  %v4233_v37 = vmul.f32 %v10882_v20, %v10882_v20  ;;  %v175_v38 = vmul.f32 %v10885_v53, %v10885_v53 }
 0x4c8   :  { %v10895_v15 = vsub.f32 %v10723_v56, %v4170_v59  ;;  %v10898_v55 = vsub.f32 %v10720_v58, %v4171_v54  ;;  %v4283_v6 = vsel %vm168_vm7, %v4233_v37, 0.0  ;;  %v176_v27 = vsel %vm168_vm7, %v175_v38, 0.0 }
 0x4c9   :  { %4281 = vadd.xlane.f32.xlu0 %v4280_v49  ;;  %4284 = vadd.xlane.f32.xlu1 %v4283_v6 }
 0x4ca   :  { %v4234_v18 = vmul.f32 %v10895_v15, %v10895_v15  ;;  %v4235_v41 = vmul.f32 %v10898_v55, %v10898_v55 }
 0x4cb   :  { %v4105_v5 = vpop.xlane.xlu1 %4104 }
 0x4cc   :  { %v4102_v60 = vpop.xlane.xlu0 %4101  ;;  %v4173_v62 = vmul.f32 0.03125, %v4105_v5  ;;  %v4286_v46 = vsel %vm168_vm7, %v4234_v18, 0.0 }
 0x4cd   :  { %v4172_v13 = vmul.f32 0.03125, %v4102_v60  ;;  %4287 = vadd.xlane.f32.xlu1 %v4286_v46  ;;  %177 = vadd.xlane.f32.xlu0 %v176_v27 }
 0x4ce   :  { %v10909_v58 = vsub.f32 %v10728_v17, %v4173_v62 }
 0x4cf   :  { %v10906_v56 = vsub.f32 %v10735_v29, %v4172_v13  ;;  %v4289_v29 = vsel %vm168_vm7, %v4235_v41, 0.0 }
 0x4d0   :  { %v4237_v17 = vmul.f32 %v10909_v58, %v10909_v58 }
 0x4d1   :  { %v4236_v22 = vmul.f32 %v10906_v56, %v10906_v56  ;;  %4290 = vadd.xlane.f32.xlu0 %v4289_v29 }
 0x4d2   :  { %v4295_v33 = vsel %vm168_vm7, %v4237_v17, 0.0 }
 0x4d3   :  { %v4292_v51 = vsel %vm168_vm7, %v4236_v22, 0.0 }
 0x4d4   :  { %v4111_v48 = vpop.xlane.xlu1 %4110  ;;  %4293 = vadd.xlane.f32.xlu1 %v4292_v51 }
 0x4d5   :  { %v4108_v12 = vpop.xlane.xlu0 %4107  ;;  %v4175_v31 = vmul.f32 0.03125, %v4111_v48  ;;  %4296 = vadd.xlane.f32.xlu0 %v4295_v33 }
 0x4d6   :  { %v4174_v50 = vmul.f32 0.03125, %v4108_v12 }
 0x4d7   :  { %v10921_v24 = vsub.f32 %v10742_v26, %v4175_v31 }
 0x4d8   :  { %v10924_v34 = vsub.f32 %v10745_v10, %v4174_v50 }
 0x4d9   :  { %v4239_v14 = vmul.f32 %v10921_v24, %v10921_v24 }
 0x4da   :  { %v4238_v0 = vmul.f32 %v10924_v34, %v10924_v34 }
 0x4db   :  { %v4301_v32 = vsel %vm168_vm7, %v4239_v14, 0.0 }
 0x4dc   :  { %v4298_v57 = vsel %vm168_vm7, %v4238_v0, 0.0  ;;  %4302 = vadd.xlane.f32.xlu0 %v4301_v32 }
 0x4dd   :  { %4299 = vadd.xlane.f32.xlu1 %v4298_v57 }
 0x4df   :  { %v4117_v30 = vpop.xlane.xlu1 %4116 }
 0x4e0   :  { %v4114_v26 = vpop.xlane.xlu0 %4113  ;;  %v4177_v59 = vmul.f32 0.03125, %v4117_v30 }
 0x4e1   :  { %v4176_v10 = vmul.f32 0.03125, %v4114_v26 }
 0x4e2   :  { %v10934_v54 = vsub.f32 %v10752_v44, %v4177_v59 }
 0x4e3   :  { %v10937_v37 = vsub.f32 %v10755_v2, %v4176_v10 }
 0x4e4   :  { %v4241_v38 = vmul.f32 %v10934_v54, %v10934_v54 }
 0x4e5   :  { %v4240_v49 = vmul.f32 %v10937_v37, %v10937_v37 }
 0x4e6   :  { %v4307_v6 = vsel %vm168_vm7, %v4241_v38, 0.0 }
 0x4e7   :  { %v4304_v5 = vsel %vm168_vm7, %v4240_v49, 0.0  ;;  %4308 = vadd.xlane.f32.xlu0 %v4307_v6 }
 0x4e8   :  { %v4123_v60 = vpop.xlane.xlu1 %4122  ;;  %4305 = vadd.xlane.f32.xlu1 %v4304_v5 }
 0x4e9   :  { %v4120_v13 = vpop.xlane.xlu0 %4119  ;;  %v4179_v62 = vmul.f32 0.03125, %v4123_v60 }
 0x4ea   :  { %v4178_v44 = vmul.f32 0.03125, %v4120_v13 }
 0x4eb   :  { %v10946_v18 = vsub.f32 %v10762_v7, %v4179_v62 }
 0x4ec   :  { %v10949_v2 = vsub.f32 %v10765_v63, %v4178_v44 }
 0x4ed   :  { %v4243_v27 = vmul.f32 %v10946_v18, %v10946_v18 }
 0x4ee   :  { %v4242_v46 = vmul.f32 %v10949_v2, %v10949_v2 }
 0x4ef   :  { %v4313_v41 = vsel %vm168_vm7, %v4243_v27, 0.0 }
 0x4f0   :  { %v4310_v22 = vsel %vm168_vm7, %v4242_v46, 0.0  ;;  %4314 = vadd.xlane.f32.xlu0 %v4313_v41 }
 0x4f1   :  { %4311 = vadd.xlane.f32.xlu1 %v4310_v22 }
 0x4f4   :  { %v4129_v48 = vpop.xlane.xlu1 %4128 }
 0x4f5   :  { %v4126_v12 = vpop.xlane.xlu0 %4125  ;;  %v4181_v31 = vmul.f32 0.03125, %v4129_v48 }
 0x4f6   :  { %v4180_v7 = vmul.f32 0.03125, %v4126_v12 }
 0x4f7   :  { %v10958_v51 = vsub.f32 %v10772_v36, %v4181_v31 }
 0x4f8   :  { %v10961_v63 = vsub.f32 %v10775_v4, %v4180_v7 }
 0x4f9   :  { %v4245_v29 = vmul.f32 %v10958_v51, %v10958_v51 }
 0x4fa   :  { %v4244_v17 = vmul.f32 %v10961_v63, %v10961_v63 }
 0x4fb   :  { %v4319_v50 = vsel %vm168_vm7, %v4245_v29, 0.0 }
 0x4fc   :  { %v4316_v33 = vsel %vm168_vm7, %v4244_v17, 0.0  ;;  %4320 = vadd.xlane.f32.xlu0 %v4319_v50 }
 0x4fd   :  { %4317 = vadd.xlane.f32.xlu1 %v4316_v33 }
 0x4fe   :  { %v4135_v14 = vpop.xlane.xlu1 %4134 }
 0x4ff   :  { %v4132_v0 = vpop.xlane.xlu0 %4131  ;;  %v4183_v57 = vmul.f32 0.03125, %v4135_v14 }
 0x500   :  { %v4182_v36 = vmul.f32 0.03125, %v4132_v0 }
 0x501   :  { %v10970_v32 = vsub.f32 %v10782_v3, %v4183_v57 }
 0x502   :  { %v10973_v4 = vsub.f32 %v10785_v19, %v4182_v36 }
 0x503   :  { %v4247_v30 = vmul.f32 %v10970_v32, %v10970_v32 }
 0x504   :  { %v4246_v26 = vmul.f32 %v10973_v4, %v10973_v4 }
 0x505   :  { %v4325_v59 = vsel %vm168_vm7, %v4247_v30, 0.0 }
 0x506   :  { %v4322_v38 = vsel %vm168_vm7, %v4246_v26, 0.0  ;;  %4326 = vadd.xlane.f32.xlu0 %v4325_v59 }
 0x507   :  { %4323 = vadd.xlane.f32.xlu1 %v4322_v38 }
 0x508   :  { %v4141_v10 = vpop.xlane.xlu1 %4140 }
 0x509   :  { %v4138_v49 = vpop.xlane.xlu0 %4137  ;;  %v4185_v6 = vmul.f32 0.03125, %v4141_v10 }
 0x50a   :  { %v4184_v3 = vmul.f32 0.03125, %v4138_v49 }
 0x50b   :  { %v10982_v60 = vsub.f32 %v10792_v43, %v4185_v6 }
 0x50c   :  { %v10985_v19 = vsub.f32 %v10795_v9, %v4184_v3 }
 0x50d   :  { %v4249_v5 = vmul.f32 %v10982_v60, %v10982_v60 }
 0x50e   :  { %v4248_v13 = vmul.f32 %v10985_v19, %v10985_v19 }
 0x50f   :  { %v4331_v62 = vsel %vm168_vm7, %v4249_v5, 0.0 }
 0x510   :  { %v4328_v44 = vsel %vm168_vm7, %v4248_v13, 0.0  ;;  %4332 = vadd.xlane.f32.xlu0 %v4331_v62  ;;  %v4840_v13 = vld [vmem:[%s12084_s12 + $0x10] sm:$0xff]  ;;  %v4841_v62 = vld [vmem:[%s12084_s12 + $0x18] sm:$0xff] }
 0x511   :  { %4329 = vadd.xlane.f32.xlu1 %v4328_v44  ;;  %v6819_v44 = vpack.c.bf16 %v4841_v62, %v4840_v13 }
 0x512   :  { %v4147_v27 = vpop.xlane.xlu1 %4146 }
 0x513   :  { %v4144_v46 = vpop.xlane.xlu0 %4143  ;;  %v4187_v41 = vmul.f32 0.03125, %v4147_v27 }
 0x514   :  { %v4186_v43 = vmul.f32 0.03125, %v4144_v46 }
 0x515   :  { %v10994_v22 = vsub.f32 %v10802_v52, %v4187_v41 }
 0x516   :  { %v10997_v9 = vsub.f32 %v10805_v35, %v4186_v43 }
 0x517   :  { %v4251_v48 = vmul.f32 %v10994_v22, %v10994_v22 }
 0x518   :  { %v4250_v12 = vmul.f32 %v10997_v9, %v10997_v9 }
 0x519   :  { %v4337_v31 = vsel %vm168_vm7, %v4251_v48, 0.0 }
 0x51a   :  { %v4334_v7 = vsel %vm168_vm7, %v4250_v12, 0.0  ;;  %4338 = vadd.xlane.f32.xlu0 %v4337_v31 }
 0x51b   :  { %4335 = vadd.xlane.f32.xlu1 %v4334_v7 }
 0x51c   :  { %v4153_v29 = vpop.xlane.xlu1 %4152 }
 0x51d   :  { %v4150_v17 = vpop.xlane.xlu0 %4149  ;;  %v4189_v50 = vmul.f32 0.03125, %v4153_v29 }
 0x51e   :  { %v4188_v52 = vmul.f32 0.03125, %v4150_v17 }
 0x51f   :  { %v11006_v33 = vsub.f32 %v10812_v23, %v4189_v50 }
 0x520   :  { %v11009_v35 = vsub.f32 %v10815_v21, %v4188_v52 }
 0x521   :  { %v4253_v14 = vmul.f32 %v11006_v33, %v11006_v33 }
 0x522   :  { %v4252_v0 = vmul.f32 %v11009_v35, %v11009_v35 }
 0x523   :  { %v4343_v57 = vsel %vm168_vm7, %v4253_v14, 0.0 }
 0x524   :  { %v4340_v30 = vsel %vm168_vm7, %v4252_v0, 0.0  ;;  %4344 = vadd.xlane.f32.xlu0 %v4343_v57 }
 0x525   :  { %v4159_v36 = vpop.xlane.xlu1 %4158  ;;  %4341 = vadd.xlane.f32.xlu1 %v4340_v30 }
 0x526   :  { %v4156_v26 = vpop.xlane.xlu0 %4155  ;;  %v4191_v59 = vmul.f32 0.03125, %v4159_v36 }
 0x527   :  { %v4190_v23 = vmul.f32 0.03125, %v4156_v26  ;;  %v11044_v26 = vld [vmem:[%s12082_s10] ss:$0 sm:$0xff] }
 0x528   :  { %v11018_v10 = vsub.f32 %v10822_v25, %v4191_v59  ;;  %v4838_v25 = vld [vmem:[%s12084_s12] sm:$0xff] }
 0x529   :  { %v11021_v21 = vsub.f32 %v10825_v61, %v4190_v23  ;;  %v4839_v61 = vld [vmem:[%s12084_s12 + $0x8] sm:$0xff] }
 0x52a   :  { %v4255_v38 = vmul.f32 %v11018_v10, %v11018_v10  ;;  %v6815_v5 = vpack.c.bf16 %v4839_v61, %v4838_v25 }
 0x52b   :  { %v4254_v49 = vmul.f32 %v11021_v21, %v11021_v21 }
 0x52c   :  { %v4349_v6 = vsel %vm168_vm7, %v4255_v38, 0.0  ;;  %6816 = vmatprep.subr.bf16.mxu0 %v6815_v5 }
 0x52d   :  { %v4346_v3 = vsel %vm168_vm7, %v4254_v49, 0.0  ;;  %4350 = vadd.xlane.f32.xlu0 %v4349_v6  ;;  %6818 = vmatpush3.bf16.msra.mxu0 %v6815_v5  ;;  %v11050_v6 = vld [vmem:[%s12083_s11] ss:$0 sm:$0xff] }
 0x52e   :  { %4347 = vadd.xlane.f32.xlu1 %v4346_v3  ;;  %6820 = vmatprep.subr.bf16.mxu0 %v6819_v44 }
 0x531   :  { %6822 = vmatpush3.bf16.msra.mxu0 %v6819_v44 }
 0x541   :  { %v4261_v27 = vpop.xlane.xlu1 %4260 }
 0x542   :  { %v4353_v46 = vmul.f32 0.03125, %v4261_v27  ;;  %v4258_v41 = vpop.xlane.xlu0 %4257 }
 0x543   :  { %v4352_v43 = vmul.f32 0.03125, %v4258_v41 }
 0x544   :  { %v4385_v48 = vadd.f32 1e-05, %v4353_v46 }
 0x545   :  { %v4384_v12 = vadd.f32 1e-05, %v4352_v43 }
 0x546   :  { %7103 = vrsqrt.f32 %v4385_v48  ;;  %v4267_v31 = vpop.xlane.xlu1 %4266 }
 0x547   :  { %7105 = vrsqrt.f32 %v4384_v12  ;;  %v4355_v7 = vmul.f32 0.03125, %v4267_v31 }
 0x549   :  { %v4387_v29 = vadd.f32 1e-05, %v4355_v7 }
 0x54a   :  { %v4264_v17 = vpop.xlane.xlu0 %4263 }
 0x54b   :  { %7107 = vrsqrt.f32 %v4387_v29  ;;  %v4354_v50 = vmul.f32 0.03125, %v4264_v17 }
 0x54d   :  { %v4386_v52 = vadd.f32 1e-05, %v4354_v50 }
 0x54e   :  { %v4270_v14 = vpop.xlane.xlu0 %4269  ;;  %v4273_v0 = vpop.xlane.xlu1 %4272 }
 0x54f   :  { %7109 = vrsqrt.f32 %v4386_v52  ;;  %v4356_v57 = vmul.f32 0.03125, %v4270_v14  ;;  %v4357_v36 = vmul.f32 0.03125, %v4273_v0 }
 0x550   :  { %v7104_v30 = vpop.eup %7103 }
 0x551   :  { %v7106_v59 = vpop.eup %7105  ;;  %v4449_v23 = vmul.f32 %v7104_v30, %v10832_v45  ;;  %v4388_v38 = vadd.f32 1e-05, %v4356_v57  ;;  %v4389_v49 = vadd.f32 1e-05, %v4357_v36 }
 0x552   :  { %v4448_v3 = vmul.f32 %v7106_v59, %v10835_v16  ;;  %v4276_v25 = vpop.xlane.xlu0 %4275  ;;  %v4279_v61 = vpop.xlane.xlu1 %4278 }
 0x553   :  { %v4487_v5 = vmul.f32 %v11044_v26, %v4449_v23  ;;  %7111 = vrsqrt.f32 %v4388_v38  ;;  %v4358_v13 = vmul.f32 0.03125, %v4276_v25  ;;  %v4359_v62 = vmul.f32 0.03125, %v4279_v61 }
 0x554   :  { %v4486_v44 = vmul.f32 %v11044_v26, %v4448_v3  ;;  %7113 = vrsqrt.f32 %v4389_v49  ;;  %v4721_v61 = vlaneseq }
 0x555   :  { %v7108_v45 = vpop.eup %7107  ;;  %v4525_v27 = vadd.f32 %v11050_v6, %v4487_v5  ;;  %v4390_v46 = vadd.f32 1e-05, %v4358_v13  ;;  %v4391_v41 = vadd.f32 1e-05, %v4359_v62 }
 0x556   :  { %v4524_v43 = vadd.f32 %v11050_v6, %v4486_v44  ;;  %v4451_v48 = vmul.f32 %v7108_v45, %v10843_v8  ;;  %v4282_v16 = vpop.xlane.xlu0 %4281  ;;  %v4285_v12 = vpop.xlane.xlu1 %4284  ;;  %v7403_v44 = vmov 1966171168  }
 0x557   :  { %v4557_v31 = vsub.f32 0.0, %v4525_v27  ;;  %7115 = vrsqrt.f32 %v4390_v46  ;;  %v4360_v7 = vmul.f32 0.03125, %v4282_v16  ;;  %v4361_v29 = vmul.f32 0.03125, %v4285_v12 }
 0x558   :  { %v4556_v17 = vsub.f32 0.0, %v4524_v43  ;;  %v4489_v50 = vmul.f32 %v11044_v26, %v4451_v48  ;;  %7117 = vrsqrt.f32 %v4391_v41  ;;  %v11062_v45 = vunpack.c.l.s4 %v7403_v44 }
 0x559   :  { %v7110_v52 = vpop.eup %7109  ;;  %v4590_v14 = vmul.f32 1.442695, %v4557_v31  ;;  %v4392_v0 = vadd.f32 1e-05, %v4360_v7  ;;  %v4393_v30 = vadd.f32 1e-05, %v4361_v29 }
 0x55a   :  { %v4527_v57 = vadd.f32 %v11050_v6, %v4489_v50  ;;  %v4450_v36 = vmul.f32 %v7110_v52, %v10852_v47  ;;  %v178_v59 = vpop.xlane.xlu0 %177  ;;  %v4288_v8 = vpop.xlane.xlu1 %4287  ;;  %v4588_v49 = vmul.f32 1.442695, %v4556_v17  ;;  %v11069_v17 = vshrl.u32 %v4721_v61, 7 }
 0x55b   :  { %7119 = vpow2.f32 %v4590_v14  ;;  %v179_v23 = vmul.f32 0.03125, %v178_v59  ;;  %v4362_v38 = vmul.f32 0.03125, %v4288_v8  ;;  %v5910_v59 = vld [vmem:[%s12090_s18 + $0x8] sm:$0xff]  ;;  %v5912_v8 = vld [vmem:[%s12090_s18 + $0x18] sm:$0xff] }
 0x55c   :  { %v4559_v3 = vsub.f32 0.0, %v4527_v57  ;;  %v4488_v25 = vmul.f32 %v11044_v26, %v4450_v36  ;;  %7121 = vrsqrt.f32 %v4392_v0 }
 0x55d   :  { %v7112_v5 = vpop.eup %7111  ;;  %v180_v13 = vadd.f32 1e-05, %v179_v23  ;;  %v4394_v62 = vadd.f32 1e-05, %v4362_v38  ;;  %7123 = vrsqrt.f32 %v4393_v30 }
 0x55e   :  { %v7114_v27 = vpop.eup %7113  ;;  %v4594_v47 = vmul.f32 1.442695, %v4559_v3  ;;  %v4526_v46 = vadd.f32 %v11050_v6, %v4488_v25  ;;  %v4452_v41 = vmul.f32 %v7112_v5, %v10849_v1  ;;  %v4291_v43 = vpop.xlane.xlu0 %4290 }
 0x55f   :  { %v4453_v16 = vmul.f32 %v7114_v27, %v10861_v11  ;;  %7125 = vrsqrt.f32 %v180_v13  ;;  %v4363_v12 = vmul.f32 0.03125, %v4291_v43 }
 0x560   :  { %7127 = vpow2.f32 %v4588_v49  ;;  %v4558_v7 = vsub.f32 0.0, %v4526_v46  ;;  %v4490_v29 = vmul.f32 %v11044_v26, %v4452_v41 }
 0x561   :  { %v4294_v48 = vpop.xlane.xlu1 %4293  ;;  %v7116_v50 = vpop.eup %7115  ;;  %v4491_v52 = vmul.f32 %v11044_v26, %v4453_v16  ;;  %7129 = vrsqrt.f32 %v4394_v62  ;;  %v4395_v1 = vadd.f32 1e-05, %v4363_v12 }
 0x562   :  { %v4364_v31 = vmul.f32 0.03125, %v4294_v48  ;;  %v7118_v0 = vpop.eup %7117  ;;  %7131 = vpow2.f32 %v4594_v47  ;;  %v4592_v57 = vmul.f32 1.442695, %v4558_v7  ;;  %v4528_v11 = vadd.f32 %v11050_v6, %v4490_v29  ;;  %v4297_v30 = vpop.xlane.xlu0 %4296 }
 0x563   :  { %v4454_v36 = vmul.f32 %v7116_v50, %v10858_v28  ;;  %v4529_v23 = vadd.f32 %v11050_v6, %v4491_v52  ;;  %v4455_v38 = vmul.f32 %v7118_v0, %v10874_v42  ;;  %7133 = vrsqrt.f32 %v4395_v1 }
 0x564   :  { %v4396_v14 = vadd.f32 1e-05, %v4364_v31  ;;  %v4365_v49 = vmul.f32 0.03125, %v4297_v30  ;;  %7135 = vpow2.f32 %v4592_v57  ;;  %v4560_v3 = vsub.f32 0.0, %v4528_v11  ;;  %v6368_v57 = vld [vmem:[%s12582_s7] ss:$0 sm:$0xff] }
 0x565   :  { %v4492_v25 = vmul.f32 %v11044_v26, %v4454_v36  ;;  %v6823_v28 = vpack.c.bf16 %v5912_v8, %v5910_v59  ;;  %v7120_v5 = vpop.eup %7119  ;;  %v4561_v13 = vsub.f32 0.0, %v4529_v23  ;;  %v4493_v62 = vmul.f32 %v11044_v26, %v4455_v38 }
 0x566   :  { %7137 = vrsqrt.f32 %v4396_v14  ;;  %v4397_v44 = vadd.f32 1e-05, %v4365_v49  ;;  %v4653_v47 = vadd.f32 1.0, %v7120_v5  ;;  %v4596_v46 = vmul.f32 1.442695, %v4560_v3  ;;  %v7122_v48 = vpop.eup %7121 }
 0x567   :  { %v4530_v41 = vadd.f32 %v11050_v6, %v4492_v25  ;;  %6824 = vmatprep.subr.bf16.mxu0 %v6823_v28  ;;  %v4598_v16 = vmul.f32 1.442695, %v4561_v13  ;;  %v4531_v12 = vadd.f32 %v11050_v6, %v4493_v62  ;;  %v7124_v7 = vpop.eup %7123  ;;  %v4456_v50 = vmul.f32 %v7122_v48, %v10871_v39 }
 0x568   :  { %7139 = vrsqrt.f32 %v4397_v44  ;;  %v4457_v0 = vmul.f32 %v7124_v7, %v10882_v20  ;;  %v4720_v11 = vunpack.c.0.s8 %v11062_v45  ;;  %v6369_v20 = vld [vmem:[%s12583_s23] ss:$0 sm:$0xff]  ;;  %v11104_v13 = vsub.s32 0, %v11069_v17 }
 0x569   :  { %v4303_v42 = vpop.xlane.xlu0 %4302  ;;  %7141 = vrcp.f32 %v4653_v47  ;;  %v4562_v29 = vsub.f32 0.0, %v4530_v41  ;;  %v7126_v1 = vpop.eup %7125  ;;  %v4563_v14 = vsub.f32 0.0, %v4531_v12  ;;  %v4494_v59 = vmul.f32 %v11044_v26, %v4456_v50 }
 0x56a   :  { %v4300_v27 = vpop.xlane.xlu1 %4299  ;;  %v4367_v31 = vmul.f32 0.03125, %v4303_v42  ;;  %7143 = vpow2.f32 %v4596_v46  ;;  %v7128_v36 = vpop.eup %7127  ;;  %v182_v8 = vmul.f32 %v7126_v1, %v10885_v53  ;;  %v4495_v38 = vmul.f32 %v11044_v26, %v4457_v0 }
 0x56b   :  { %v4366_v43 = vmul.f32 0.03125, %v4300_v27  ;;  %7145 = vpow2.f32 %v4598_v16  ;;  %v4600_v30 = vmul.f32 1.442695, %v4562_v29  ;;  %v7130_v39 = vpop.eup %7129  ;;  %v4602_v23 = vmul.f32 1.442695, %v4563_v14 }
 0x56c   :  { %v4399_v49 = vadd.f32 1e-05, %v4367_v31  ;;  %v11098_v3 = vpop.eup %7131  ;;  %v4532_v45 = vadd.f32 %v11050_v6, %v4494_v59  ;;  %v189_v25 = vmul.f32 %v6368_v57, %v182_v8  ;;  %v4458_v28 = vmul.f32 %v7130_v39, %v10895_v15 }
 0x56d   :  { %v4398_v52 = vadd.f32 1e-05, %v4366_v43  ;;  %v7134_v5 = vpop.eup %7133  ;;  %v4533_v53 = vadd.f32 %v11050_v6, %v4495_v38  ;;  %v11109_v16 = vsub.s32 %v4720_v11, %v11069_v17 }
 0x56e   :  { %v7136_v62 = vpop.eup %7135  ;;  %v4564_v44 = vsub.f32 0.0, %v4532_v45  ;;  %v196_v27 = vadd.f32 %v6369_v20, %v189_v25  ;;  %v4496_v47 = vmul.f32 %v11044_v26, %v4458_v28  ;;  %v4459_v46 = vmul.f32 %v7134_v5, %v10898_v55 }
 0x56f   :  { %7147 = vrsqrt.f32 %v4398_v52  ;;  %v4565_v42 = vsub.f32 0.0, %v4533_v53  ;;  %v4654_v28 = vadd.f32 1.0, %v7136_v62 }
 0x570   :  { %7149 = vpow2.f32 %v4600_v30  ;;  %v7138_v43 = vpop.eup %7137  ;;  %v4604_v12 = vmul.f32 1.442695, %v4564_v44  ;;  %v11111_v31 = vmax.f32 %v196_v27, 0.0  ;;  %v4534_v7 = vadd.f32 %v11050_v6, %v4496_v47 }
 0x571   :  { %7151 = vpow2.f32 %v4602_v23  ;;  %v4497_v29 = vmul.f32 %v11044_v26, %v4459_v46  ;;  %v4606_v52 = vmul.f32 1.442695, %v4565_v42  ;;  %v4460_v55 = vmul.f32 %v7138_v43, %v10906_v56 }
 0x572   :  { %7153 = vrsqrt.f32 %v4399_v49  ;;  %v7140_v50 = vpop.eup %7139  ;;  %v4566_v57 = vsub.f32 0.0, %v4534_v7  ;;  %v4652_v30 = vadd.f32 1.0, %v7128_v36  ;;  %v11123_v56 = vrot.slane %v11111_v31, %v11109_v16 }
 0x573   :  { %v11116_v0 = vpop.eup %7141  ;;  %7155 = vpow2.f32 %v4604_v12  ;;  %v4535_v11 = vadd.f32 %v11050_v6, %v4497_v29  ;;  %v4498_v8 = vmul.f32 %v11044_v26, %v4460_v55  ;;  %v4461_v39 = vmul.f32 %v7140_v50, %v10909_v58 }
 0x574   :  { %v4309_v41 = vpop.xlane.xlu0 %4308  ;;  %v7144_v59 = vpop.eup %7143  ;;  %7157 = vpow2.f32 %v4606_v52  ;;  %v4608_v20 = vmul.f32 1.442695, %v4566_v57  ;;  %v11130_v27 = vrot.slane %v11123_v56, %v11109_v16  ;;  %v5909_v57 = vld [vmem:[%s12090_s18] sm:$0xff] }
 0x575   :  { %v4306_v48 = vpop.xlane.xlu1 %4305  ;;  %v4369_v15 = vmul.f32 0.03125, %v4309_v41  ;;  %v7146_v38 = vpop.eup %7145  ;;  %v4567_v49 = vsub.f32 0.0, %v4535_v11  ;;  %v4536_v25 = vadd.f32 %v11050_v6, %v4498_v8  ;;  %v4499_v36 = vmul.f32 %v11044_v26, %v4461_v39  ;;  %v5911_v11 = vld [vmem:[%s12090_s18 + $0x10] sm:$0xff] }
 0x576   :  { %v4368_v1 = vmul.f32 0.03125, %v4306_v48 }
 0x577   :  { %v4401_v14 = vadd.f32 1e-05, %v4369_v15  ;;  %v4610_v53 = vmul.f32 1.442695, %v4567_v49  ;;  %v4568_v46 = vsub.f32 0.0, %v4536_v25  ;;  %v4537_v41 = vadd.f32 %v11050_v6, %v4499_v36 }
 0x578   :  { %v4400_v23 = vadd.f32 1e-05, %v4368_v1  ;;  %v11138_v1 = vrot.slane %v11130_v27, %v11104_v13 }
 0x579   :  { %7159 = vrsqrt.f32 %v4401_v14  ;;  %v7148_v45 = vpop.eup %7147  ;;  %v4612_v12 = vmul.f32 1.442695, %v4568_v46  ;;  %v4569_v7 = vsub.f32 0.0, %v4537_v41  ;;  %v4655_v14 = vadd.f32 1.0, %v11098_v3 }
 0x57a   :  { %7161 = vrsqrt.f32 %v4400_v23  ;;  %v7150_v5 = vpop.eup %7149  ;;  %v4462_v58 = vmul.f32 %v7148_v45, %v10924_v34  ;;  %v4656_v23 = vadd.f32 1.0, %v7144_v59  ;;  %v6825_v45 = vpack.c.bf16 %v5911_v11, %v5909_v57 }
 0x57b   :  { %7163 = vpow2.f32 %v4608_v20  ;;  %v7152_v47 = vpop.eup %7151  ;;  %v4614_v55 = vmul.f32 1.442695, %v4569_v7  ;;  %v4732_v41 = vcombine.high %v11123_v56, %v11123_v56 }
 0x57c   :  { %7165 = vrcp.f32 %v4652_v30  ;;  %v4500_v62 = vmul.f32 %v11044_v26, %v4462_v58  ;;  %v7154_v15 = vpop.eup %7153  ;;  %v4659_v56 = vadd.f32 1.0, %v7152_v47 }
 0x57d   :  { %v4315_v44 = vpop.xlane.xlu0 %4314  ;;  %7167 = vpow2.f32 %v4610_v53  ;;  %v4463_v29 = vmul.f32 %v7154_v15, %v10921_v24  ;;  %v7156_v30 = vpop.eup %7155  ;;  %v4657_v53 = vadd.f32 1.0, %v7146_v38  ;;  %v11165_v47 = vrot.slane %v4732_v41, %v11109_v16 }
 0x57e   :  { %v4312_v43 = vpop.xlane.xlu1 %4311  ;;  %v4371_v42 = vmul.f32 0.03125, %v4315_v44  ;;  %7169 = vrcp.f32 %v4654_v28  ;;  %v4538_v34 = vadd.f32 %v11050_v6, %v4500_v62  ;;  %v7158_v39 = vpop.eup %7157  ;;  %v4807_v28 = vmul.f32 %v11116_v0, %v11138_v1 }
 0x57f   :  { %v4370_v48 = vmul.f32 0.03125, %v4312_v43  ;;  %7171 = vpow2.f32 %v4612_v12  ;;  %v4501_v8 = vmul.f32 %v11044_v26, %v4463_v29 }
 0x580   :  { %v4403_v52 = vadd.f32 1e-05, %v4371_v42  ;;  %v4570_v24 = vsub.f32 0.0, %v4538_v34 }
 0x581   :  { %v4402_v50 = vadd.f32 1e-05, %v4370_v48  ;;  %v4539_v3 = vadd.f32 %v11050_v6, %v4501_v8 }
 0x582   :  { %v4616_v49 = vmul.f32 1.442695, %v4570_v24 }
 0x583   :  { %7173 = vrsqrt.f32 %v4402_v50  ;;  %v7160_v20 = vpop.eup %7159  ;;  %v4571_v44 = vsub.f32 0.0, %v4539_v3 }
 0x584   :  { %7175 = vpow2.f32 %v4614_v55  ;;  %v7162_v25 = vpop.eup %7161  ;;  %v4465_v36 = vmul.f32 %v7160_v20, %v10934_v54  ;;  %v4658_v54 = vadd.f32 1.0, %v7150_v5  ;;  %v4660_v20 = vadd.f32 1.0, %v7156_v30 }
 0x585   :  { %7177 = vrsqrt.f32 %v4403_v52  ;;  %v7164_v58 = vpop.eup %7163  ;;  %v4464_v46 = vmul.f32 %v7162_v25, %v10937_v37  ;;  %v4618_v0 = vmul.f32 1.442695, %v4571_v44  ;;  %v4762_v25 = vcombine.high %v11130_v27, %v11130_v27 }
 0x586   :  { %7179 = vrcp.f32 %v4655_v14  ;;  %v7166_v43 = vpop.eup %7165  ;;  %v4503_v42 = vmul.f32 %v11044_v26, %v4465_v36  ;;  %v4661_v36 = vadd.f32 1.0, %v7158_v39 }
 0x587   :  { %7181 = vpow2.f32 %v4616_v49  ;;  %v7168_v15 = vpop.eup %7167  ;;  %v4502_v38 = vmul.f32 %v11044_v26, %v4464_v46  ;;  %v4806_v7 = vmul.f32 %v7166_v43, %v11138_v1  ;;  %v4662_v46 = vadd.f32 1.0, %v7164_v58 }
 0x588   :  { %7183 = vrcp.f32 %v4656_v23  ;;  %v7170_v34 = vpop.eup %7169  ;;  %v4541_v37 = vadd.f32 %v11050_v6, %v4503_v42  ;;  %v4773_v43 = vrot.slane %v11165_v47, %v11104_v13  ;;  %v4663_v58 = vadd.f32 1.0, %v7168_v15 }
 0x589   :  { %v4321_v59 = vpop.xlane.xlu0 %4320  ;;  %7185 = vrcp.f32 %v4657_v53  ;;  %v4540_v50 = vadd.f32 %v11050_v6, %v4502_v38  ;;  %6737 = vmatprep.mubr.msk.f32.mxu0 %vm168_vm7, %v4806_v7  ;;  %v4808_v5 = vmul.f32 %v7170_v34, %v11138_v1  ;;  %v7172_v55 = vpop.eup %7171 }
 0x58a   :  { %v4318_v62 = vpop.xlane.xlu1 %4317  ;;  %v4373_v48 = vmul.f32 0.03125, %v4321_v59  ;;  %7187 = vpow2.f32 %v4618_v0  ;;  %v4573_v14 = vsub.f32 0.0, %v4541_v37  ;;  %6738 = vmatmul.mubr.msk.f32.vlgmr.msra.gmra.mrb[2].mxu0 %vm168_vm7, %v4807_v28  ;;  %v4664_v34 = vadd.f32 1.0, %v7172_v55 }
 0x58b   :  { %v4372_v12 = vmul.f32 0.03125, %v4318_v62  ;;  %v4572_v11 = vsub.f32 0.0, %v4540_v50  ;;  %6740 = vmatprep.mubr.msk.f32.mxu0 %vm168_vm7, %v4808_v5  ;;  %6826 = vmatpush1.bf16.msra.mxu0 %v6825_v45  ;;  %v4777_v5 = vrot.slane %v4762_v25, %v11104_v13 }
 0x58c   :  { %v4405_v29 = vadd.f32 1e-05, %v4373_v48  ;;  %v4622_v8 = vmul.f32 1.442695, %v4573_v14 }
 0x58d   :  { %v4404_v52 = vadd.f32 1e-05, %v4372_v12  ;;  %v7174_v57 = vpop.eup %7173  ;;  %v4620_v3 = vmul.f32 1.442695, %v4572_v11 }
 0x58e   :  { %7189 = vrsqrt.f32 %v4405_v29  ;;  %v7176_v24 = vpop.eup %7175  ;;  %v4466_v23 = vmul.f32 %v7174_v57, %v10949_v2  ;;  %v4717_v29 = vcombine.high %v11111_v31, %v11111_v31 }
 0x58f   :  { %7191 = vrsqrt.f32 %v4404_v52  ;;  %v7178_v49 = vpop.eup %7177  ;;  %v4665_v14 = vadd.f32 1.0, %v7176_v24 }
 0x590   :  { %7193 = vrcp.f32 %v4658_v54  ;;  %v7180_v28 = vpop.eup %7179  ;;  %v4504_v53 = vmul.f32 %v11044_v26, %v4466_v23  ;;  %v4467_v44 = vmul.f32 %v7178_v49, %v10946_v18 }
 0x591   :  { %7195 = vrcp.f32 %v4659_v56  ;;  %v7182_v59 = vpop.eup %7181  ;;  %v4809_v30 = vmul.f32 %v7180_v28, %v11138_v1 }
 0x592   :  { %7197 = vpow2.f32 %v4622_v8  ;;  %v7184_v42 = vpop.eup %7183  ;;  %v4542_v27 = vadd.f32 %v11050_v6, %v4504_v53  ;;  %v4505_v39 = vmul.f32 %v11044_v26, %v4467_v44  ;;  %v4666_v23 = vadd.f32 1.0, %v7182_v59 }
 0x593   :  { %v4327_v45 = vpop.xlane.xlu0 %4326  ;;  %7199 = vpow2.f32 %v4620_v3  ;;  %6741 = vmatmul.mubr.msk.f32.gmra.mrb[4].mxu0 %vm168_vm7, %v4809_v30  ;;  %v4810_v18 = vmul.f32 %v7184_v42, %v4773_v43  ;;  %v7186_v54 = vpop.eup %7185 }
 0x594   :  { %v4324_v2 = vpop.xlane.xlu1 %4323  ;;  %v4375_v41 = vmul.f32 0.03125, %v4327_v45  ;;  %7201 = vrcp.f32 %v4660_v20  ;;  %v4574_v0 = vsub.f32 0.0, %v4542_v27  ;;  %v4543_v1 = vadd.f32 %v11050_v6, %v4505_v39  ;;  %v7188_v12 = vpop.eup %7187 }
 0x595   :  { %v4374_v62 = vmul.f32 0.03125, %v4324_v2  ;;  %7203 = vrcp.f32 %v4661_v36  ;;  %6743 = vmatprep.mubr.msk.f32.mxu0 %vm168_vm7, %v4810_v18  ;;  %v4811_v7 = vmul.f32 %v7186_v54, %v4773_v43 }
 0x596   :  { %v4407_v48 = vadd.f32 1e-05, %v4375_v41  ;;  %7205 = vrcp.f32 %v4662_v46  ;;  %v4624_v56 = vmul.f32 1.442695, %v4574_v0  ;;  %v4575_v50 = vsub.f32 0.0, %v4543_v1 }
 0x597   :  { %v4406_v38 = vadd.f32 1e-05, %v4374_v62  ;;  %6744 = vmatmul.mubr.msk.f32.gmra.mrb[6].mxu0 %vm168_vm7, %v4811_v7  ;;  %v11198_v7 = vrot.slane %v4717_v29, %v11109_v16 }
 0x598   :  { %7207 = vrsqrt.f32 %v4407_v48  ;;  %v7190_v37 = vpop.eup %7189  ;;  %v4626_v11 = vmul.f32 1.442695, %v4575_v50  ;;  %v4764_v48 = vcombine.high %v11165_v47, %v11165_v47 }
 0x599   :  { %7209 = vrsqrt.f32 %v4406_v38  ;;  %v7192_v15 = vpop.eup %7191  ;;  %v4469_v52 = vmul.f32 %v7190_v37, %v10958_v51 }
 0x59a   :  { %7211 = vrcp.f32 %v4663_v58  ;;  %v7194_v57 = vpop.eup %7193  ;;  %v4468_v55 = vmul.f32 %v7192_v15, %v10961_v63  ;;  %v4667_v63 = vadd.f32 1.0, %v7188_v12 }
 0x59b   :  { %7213 = vpow2.f32 %v4624_v56  ;;  %v7196_v31 = vpop.eup %7195  ;;  %v4507_v20 = vmul.f32 %v11044_v26, %v4469_v52  ;;  %v4812_v36 = vmul.f32 %v7194_v57, %v4773_v43 }
 0x59c   :  { %7215 = vrcp.f32 %v4664_v34  ;;  %v7198_v51 = vpop.eup %7197  ;;  %v4506_v25 = vmul.f32 %v11044_v26, %v4468_v55  ;;  %v4813_v24 = vmul.f32 %v7196_v31, %v4773_v43  ;;  %v11209_v31 = vrot.slane %v11198_v7, %v11109_v16 }
 0x59d   :  { %v4333_v8 = vpop.xlane.xlu0 %4332  ;;  %7217 = vpow2.f32 %v4626_v11  ;;  %v7200_v53 = vpop.eup %7199  ;;  %v4545_v44 = vadd.f32 %v11050_v6, %v4507_v20  ;;  %6746 = vmatprep.mubr.msk.f32.mxu0 %vm168_vm7, %v4812_v36  ;;  %v4669_v0 = vadd.f32 1.0, %v7198_v51 }
 0x59e   :  { %v4330_v49 = vpop.xlane.xlu1 %4329  ;;  %v4377_v3 = vmul.f32 0.03125, %v4333_v8  ;;  %7219 = vrcp.f32 %v4665_v14  ;;  %v7202_v46 = vpop.eup %7201  ;;  %v4544_v59 = vadd.f32 %v11050_v6, %v4506_v25  ;;  %6747 = vmatmul.mubr.msk.f32.gmra.mrb[8].mxu0 %vm168_vm7, %v4813_v24  ;;  %v4668_v41 = vadd.f32 1.0, %v7200_v53 }
 0x59f   :  { %v4376_v28 = vmul.f32 0.03125, %v4330_v49  ;;  %7221 = vrcp.f32 %v4666_v23  ;;  %v7204_v30 = vpop.eup %7203  ;;  %v4577_v42 = vsub.f32 0.0, %v4545_v44  ;;  %v4814_v43 = vmul.f32 %v7202_v46, %v4777_v5 }
 0x5a0   :  { %v4409_v45 = vadd.f32 1e-05, %v4377_v3  ;;  %v7206_v27 = vpop.eup %7205  ;;  %v4576_v39 = vsub.f32 0.0, %v4544_v59  ;;  %v4815_v62 = vmul.f32 %v7204_v30, %v4777_v5  ;;  %v4785_v30 = vrot.slane %v11209_v31, %v11104_v13 }
 0x5a1   :  { %v4408_v2 = vadd.f32 1e-05, %v4376_v28  ;;  %v4630_v58 = vmul.f32 1.442695, %v4577_v42  ;;  %6749 = vmatprep.mubr.msk.f32.mxu0 %vm168_vm7, %v4814_v43  ;;  %v4816_v54 = vmul.f32 %v7206_v27, %v4777_v5 }
 0x5a2   :  { %7223 = vrsqrt.f32 %v4409_v45  ;;  %v7208_v18 = vpop.eup %7207  ;;  %v4628_v38 = vmul.f32 1.442695, %v4576_v39  ;;  %6750 = vmatmul.mubr.msk.f32.gmra.mrb[10].mxu0 %vm168_vm7, %v4815_v62 }
 0x5a3   :  { %7225 = vrsqrt.f32 %v4408_v2  ;;  %v7210_v1 = vpop.eup %7209  ;;  %v4471_v12 = vmul.f32 %v7208_v18, %v10970_v32  ;;  %6752 = vmatprep.mubr.msk.f32.mxu0 %vm168_vm7, %v4816_v54  ;;  %v4781_v32 = vrot.slane %v4764_v48, %v11104_v13 }
 0x5a4   :  { %7227 = vrcp.f32 %v4667_v63  ;;  %v7212_v34 = vpop.eup %7211  ;;  %v4470_v47 = vmul.f32 %v7210_v1, %v10973_v4 }
 0x5a5   :  { %7229 = vrcp.f32 %v4668_v41  ;;  %v7214_v37 = vpop.eup %7213  ;;  %v4509_v56 = vmul.f32 %v11044_v26, %v4471_v12  ;;  %v4817_v15 = vmul.f32 %v7212_v34, %v4777_v5 }
 0x5a6   :  { %7231 = vpow2.f32 %v4630_v58  ;;  %v7216_v52 = vpop.eup %7215  ;;  %v4508_v14 = vmul.f32 %v11044_v26, %v4470_v47  ;;  %v4670_v11 = vadd.f32 1.0, %v7214_v37 }
 0x5a7   :  { %7233 = vpow2.f32 %v4628_v38  ;;  %v4339_v50 = vpop.xlane.xlu0 %4338  ;;  %v7218_v55 = vpop.eup %7217  ;;  %v4547_v4 = vadd.f32 %v11050_v6, %v4509_v56  ;;  %6753 = vmatmul.mubr.msk.f32.gmra.mrb[12].mxu0 %vm168_vm7, %v4817_v15  ;;  %v4818_v23 = vmul.f32 %v7216_v52, %v4781_v32  ;;  %v4733_v52 = vcombine.high %v11198_v7, %v11198_v7 }
 0x5a8   :  { %v4336_v57 = vpop.xlane.xlu1 %4335  ;;  %v4379_v29 = vmul.f32 0.03125, %v4339_v50  ;;  %7235 = vrcp.f32 %v4669_v0  ;;  %v7220_v5 = vpop.eup %7219  ;;  %v4546_v20 = vadd.f32 %v11050_v6, %v4508_v14  ;;  %v4671_v3 = vadd.f32 1.0, %v7218_v55 }
 0x5a9   :  { %v4378_v8 = vmul.f32 0.03125, %v4336_v57  ;;  %7237 = vrcp.f32 %v4670_v11  ;;  %v7222_v36 = vpop.eup %7221  ;;  %v4579_v51 = vsub.f32 0.0, %v4547_v4  ;;  %6755 = vmatprep.mubr.msk.f32.mxu0 %vm168_vm7, %v4818_v23  ;;  %v4819_v28 = vmul.f32 %v7220_v5, %v4781_v32 }
 0x5aa   :  { %v4411_v49 = vadd.f32 1e-05, %v4379_v29  ;;  %v4578_v53 = vsub.f32 0.0, %v4546_v20  ;;  %v4820_v44 = vmul.f32 %v7222_v36, %v4781_v32  ;;  %v11232_v7 = vrot.slane %v4733_v52, %v11109_v16 }
 0x5ab   :  { %v4410_v25 = vadd.f32 1e-05, %v4378_v8  ;;  %v4634_v63 = vmul.f32 1.442695, %v4579_v51  ;;  %6756 = vmatmul.mubr.msk.f32.gmra.mrb[14].mxu0 %vm168_vm7, %v4819_v28 }
 0x5ac   :  { %v7224_v24 = vpop.eup %7223  ;;  %7239 = vrsqrt.f32 %v4411_v49  ;;  %v4632_v2 = vmul.f32 1.442695, %v4578_v53  ;;  %6758 = vmatprep.mubr.msk.f32.mxu0 %vm168_vm7, %v4820_v44 }
 0x5ad   :  { %v7226_v45 = vpop.eup %7225  ;;  %v4473_v46 = vmul.f32 %v7224_v24, %v10982_v60  ;;  %7241 = vrsqrt.f32 %v4410_v25 }
 0x5ae   :  { %v7228_v59 = vpop.eup %7227  ;;  %v4472_v41 = vmul.f32 %v7226_v45, %v10985_v19  ;;  %7243 = vrcp.f32 %v4671_v3 }
 0x5af   :  { %v7230_v42 = vpop.eup %7229  ;;  %7245 = vpow2.f32 %v4634_v63  ;;  %v4511_v43 = vmul.f32 %v11044_v26, %v4473_v46  ;;  %v4821_v27 = vmul.f32 %v7228_v59, %v4781_v32  ;;  %v4789_v63 = vrot.slane %v11232_v7, %v11104_v13 }
 0x5b0   :  { %v7232_v39 = vpop.eup %7231  ;;  %7247 = vpow2.f32 %v4632_v2  ;;  %v4510_v60 = vmul.f32 %v11044_v26, %v4472_v41  ;;  %v4822_v48 = vmul.f32 %v7230_v42, %v4785_v30 }
 0x5b1   :  { %v4345_v62 = vpop.xlane.xlu0 %4344  ;;  %v7234_v18 = vpop.eup %7233  ;;  %v4549_v19 = vadd.f32 %v11050_v6, %v4511_v43  ;;  %6759 = vmatmul.mubr.msk.f32.gmra.mrb[16].mxu0 %vm168_vm7, %v4821_v27  ;;  %v4673_v0 = vadd.f32 1.0, %v7232_v39 }
 0x5b2   :  { %v4342_v58 = vpop.xlane.xlu1 %4341  ;;  %v4381_v54 = vmul.f32 0.03125, %v4345_v62  ;;  %v7236_v1 = vpop.eup %7235  ;;  %v4548_v38 = vadd.f32 %v11050_v6, %v4510_v60  ;;  %6761 = vmatprep.mubr.msk.f32.mxu0 %vm168_vm7, %v4822_v48  ;;  %v4672_v34 = vadd.f32 1.0, %v7234_v18 }
 0x5b3   :  { %v4380_v12 = vmul.f32 0.03125, %v4342_v58  ;;  %v4581_v47 = vsub.f32 0.0, %v4549_v19  ;;  %v4823_v56 = vmul.f32 %v7236_v1, %v4785_v30  ;;  %7249 = vrcp.f32 %v4673_v0  ;;  %v7238_v50 = vpop.eup %7237 }
 0x5b4   :  { %v4413_v37 = vadd.f32 1e-05, %v4381_v54  ;;  %v4580_v15 = vsub.f32 0.0, %v4548_v38  ;;  %7251 = vrcp.f32 %v4672_v34  ;;  %v4824_v57 = vmul.f32 %v7238_v50, %v4785_v30 }
 0x5b5   :  { %v4412_v32 = vadd.f32 1e-05, %v4380_v12  ;;  %v4638_v14 = vmul.f32 1.442695, %v4581_v47  ;;  %6762 = vmatmul.mubr.msk.f32.gmra.mrb[18].mxu0 %vm168_vm7, %v4823_v56 }
 0x5b6   :  { %7253 = vrsqrt.f32 %v4413_v37  ;;  %v7240_v29 = vpop.eup %7239  ;;  %v4636_v11 = vmul.f32 1.442695, %v4580_v15  ;;  %6764 = vmatprep.mubr.msk.f32.mxu0 %vm168_vm7, %v4824_v57 }
 0x5b7   :  { %7255 = vrsqrt.f32 %v4412_v32  ;;  %v7242_v55 = vpop.eup %7241  ;;  %v4475_v4 = vmul.f32 %v7240_v29, %v10994_v22 }
 0x5b8   :  { %7257 = vpow2.f32 %v4638_v14  ;;  %v7244_v8 = vpop.eup %7243  ;;  %v4474_v23 = vmul.f32 %v7242_v55, %v10997_v9  ;;  %v4763_v14 = vcombine.high %v11209_v31, %v11209_v31 }
 0x5b9   :  { %7259 = vpow2.f32 %v4636_v11  ;;  %v7246_v20 = vpop.eup %7245  ;;  %v4513_v49 = vmul.f32 %v11044_v26, %v4475_v4  ;;  %v4825_v51 = vmul.f32 %v7244_v8, %v4785_v30 }
 0x5ba   :  { %v4351_v5 = vpop.xlane.xlu0 %4350  ;;  %v7248_v25 = vpop.eup %7247  ;;  %v4512_v28 = vmul.f32 %v11044_v26, %v4474_v23  ;;  %v4675_v24 = vadd.f32 1.0, %v7246_v20  ;;  %v4793_v23 = vrot.slane %v4763_v14, %v11104_v13 }
 0x5bb   :  { %v4348_v3 = vpop.xlane.xlu1 %4347  ;;  %v4383_v36 = vmul.f32 0.03125, %v4351_v5  ;;  %v4551_v53 = vadd.f32 %v11050_v6, %v4513_v49  ;;  %6765 = vmatmul.mubr.msk.f32.gmra.mrb[20].mxu0 %vm168_vm7, %v4825_v51  ;;  %v4674_v9 = vadd.f32 1.0, %v7248_v25 }
 0x5bc   :  { %v4382_v22 = vmul.f32 0.03125, %v4348_v3  ;;  %v4550_v16 = vadd.f32 %v11050_v6, %v4512_v28  ;;  %7261 = vrcp.f32 %v4675_v24 }
 0x5bd   :  { %v4415_v44 = vadd.f32 1e-05, %v4383_v36  ;;  %v7250_v46 = vpop.eup %7249  ;;  %v4583_v59 = vsub.f32 0.0, %v4551_v53 }
 0x5be   :  { %v4414_v45 = vadd.f32 1e-05, %v4382_v22  ;;  %v7252_v2 = vpop.eup %7251  ;;  %v4582_v41 = vsub.f32 0.0, %v4550_v16  ;;  %v4827_v30 = vmul.f32 %v7250_v46, %v4789_v63 }
 0x5bf   :  { %7263 = vrsqrt.f32 %v4415_v44  ;;  %v4642_v43 = vmul.f32 1.442695, %v4583_v59  ;;  %v4826_v27 = vmul.f32 %v7252_v2, %v4789_v63  ;;  %v4765_v2 = vcombine.high %v11232_v7, %v11232_v7 }
 0x5c0   :  { %7265 = vrsqrt.f32 %v4414_v45  ;;  %v7254_v42 = vpop.eup %7253  ;;  %v4640_v60 = vmul.f32 1.442695, %v4582_v41 }
 0x5c1   :  { %7267 = vrcp.f32 %v4674_v9  ;;  %v7256_v39 = vpop.eup %7255  ;;  %v4477_v62 = vmul.f32 %v7254_v42, %v11006_v33  ;;  %6767 = vmatprep.mubr.msk.f32.mxu0 %vm168_vm7, %v4826_v27 }
 0x5c2   :  { %v7258_v48 = vpop.eup %7257  ;;  %7269 = vpow2.f32 %v4642_v43  ;;  %v4476_v18 = vmul.f32 %v7256_v39, %v11009_v35  ;;  %6768 = vmatmul.mubr.msk.f32.gmra.mrb[22].mxu0 %vm168_vm7, %v4827_v30  ;;  %v4797_v43 = vrot.slane %v4765_v2, %v11104_v13 }
 0x5c3   :  { %v7260_v19 = vpop.eup %7259  ;;  %7271 = vpow2.f32 %v4640_v60  ;;  %v4515_v58 = vmul.f32 %v11044_v26, %v4477_v62  ;;  %v4677_v54 = vadd.f32 1.0, %v7258_v48 }
 0x5c4   :  { %v4514_v0 = vmul.f32 %v11044_v26, %v4476_v18  ;;  %v4676_v1 = vadd.f32 1.0, %v7260_v19 }
 0x5c5   :  { %v4553_v38 = vadd.f32 %v11050_v6, %v4515_v58  ;;  %7273 = vrcp.f32 %v4677_v54  ;;  %v7368_v58 = vld [vmem:[%s12463_s28] sm:$0xff] }
 0x5c6   :  { %v4552_v33 = vadd.f32 %v11050_v6, %v4514_v0  ;;  %7275 = vrcp.f32 %v4676_v1  ;;  %v7262_v12 = vpop.eup %7261  ;;  %v7366_v6 = vld [vmem:[%s12082_s10] ss:$0 sm:$0xff] }
 0x5c7   :  { %v4585_v35 = vsub.f32 0.0, %v4553_v38  ;;  %v4829_v26 = vmul.f32 %v7262_v12, %v4789_v63  ;;  %v11281_v54 = vld [vmem:[%s12085_s13] ss:$0 sm:$0xff] }
 0x5c8   :  { %v4584_v47 = vsub.f32 0.0, %v4552_v33 }
 0x5c9   :  { %v7264_v34 = vpop.eup %7263  ;;  %v4646_v56 = vmul.f32 1.442695, %v4585_v35 }
 0x5ca   :  { %v7266_v37 = vpop.eup %7265  ;;  %v4479_v50 = vmul.f32 %v7264_v34, %v11018_v10  ;;  %v4644_v32 = vmul.f32 1.442695, %v4584_v47  ;;  %v7367_v10 = vld [vmem:[%s12083_s11] ss:$0 sm:$0xff] }
 0x5cb   :  { %v7268_v15 = vpop.eup %7267  ;;  %v4478_v52 = vmul.f32 %v7266_v37, %v11021_v21  ;;  %7277 = vpow2.f32 %v4646_v56 }
 0x5cc   :  { %v4517_v57 = vmul.f32 %v7366_v6, %v4479_v50  ;;  %v4828_v29 = vmul.f32 %v7268_v15, %v4789_v63  ;;  %v7270_v11 = vpop.eup %7269  ;;  %7279 = vpow2.f32 %v4644_v32 }
 0x5cd   :  { %v4516_v55 = vmul.f32 %v7366_v6, %v4478_v52  ;;  %v7272_v4 = vpop.eup %7271  ;;  %v4679_v8 = vadd.f32 1.0, %v7270_v11 }
 0x5ce   :  { %v4555_v21 = vadd.f32 %v7367_v10, %v4517_v57  ;;  %6770 = vmatprep.mubr.msk.f32.mxu0 %vm168_vm7, %v4828_v29  ;;  %v4678_v5 = vadd.f32 1.0, %v7272_v4 }
 0x5cf   :  { %v4554_v31 = vadd.f32 %v7367_v10, %v4516_v55  ;;  %6771 = vmatmul.mubr.msk.f32.gmra.mrb[24].mxu0 %vm168_vm7, %v4829_v26  ;;  %v7274_v20 = vpop.eup %7273  ;;  %7281 = vrcp.f32 %v4679_v8 }
 0x5d0   :  { %v4587_v49 = vsub.f32 0.0, %v4555_v21  ;;  %v7276_v3 = vpop.eup %7275  ;;  %v4831_v51 = vmul.f32 %v7274_v20, %v4793_v23  ;;  %7283 = vrcp.f32 %v4678_v5 }
 0x5d1   :  { %v4586_v36 = vsub.f32 0.0, %v4554_v31  ;;  %v4830_v28 = vmul.f32 %v7276_v3, %v4793_v23 }
 0x5d2   :  { %v4650_v25 = vmul.f32 1.442695, %v4587_v49 }
 0x5d3   :  { %v4648_v22 = vmul.f32 1.442695, %v4586_v36  ;;  %6773 = vmatprep.mubr.msk.f32.mxu0 %vm168_vm7, %v4830_v28 }
 0x5d4   :  { %7285 = vpow2.f32 %v4650_v25  ;;  %6774 = vmatmul.mubr.msk.f32.gmra.mrb[26].mxu0 %vm168_vm7, %v4831_v51 }
 0x5d5   :  { %7287 = vpow2.f32 %v4648_v22  ;;  %v7278_v24 = vpop.eup %7277 }
 0x5d6   :  { %v7280_v53 = vpop.eup %7279  ;;  %v4681_v44 = vadd.f32 1.0, %v7278_v24 }
 0x5d7   :  { %v4680_v9 = vadd.f32 1.0, %v7280_v53 }
 0x5d8   :  { %7289 = vrcp.f32 %v4681_v44 }
 0x5d9   :  { %v7282_v16 = vpop.eup %7281  ;;  %7291 = vrcp.f32 %v4680_v9 }
 0x5da   :  { %v7284_v45 = vpop.eup %7283  ;;  %v4833_v63 = vmul.f32 %v7282_v16, %v4793_v23 }
 0x5db   :  { %v4832_v46 = vmul.f32 %v7284_v45, %v4793_v23 }
 0x5dd   :  { %6776 = vmatprep.mubr.msk.f32.mxu0 %vm168_vm7, %v4832_v46 }
 0x5de   :  { %v7286_v59 = vpop.eup %7285  ;;  %6777 = vmatmul.mubr.msk.f32.gmra.mrb[28].mxu0 %vm168_vm7, %v4833_v63 }
 0x5df   :  { %v7288_v41 = vpop.eup %7287  ;;  %v4683_v30 = vadd.f32 1.0, %v7286_v59 }
 0x5e0   :  { %v4682_v42 = vadd.f32 1.0, %v7288_v41 }
 0x5e1   :  { %7293 = vrcp.f32 %v4683_v30 }
 0x5e2   :  { %7295 = vrcp.f32 %v4682_v42  ;;  %v7290_v27 = vpop.eup %7289 }
 0x5e3   :  { %v7292_v39 = vpop.eup %7291  ;;  %v4835_v60 = vmul.f32 %v7290_v27, %v4797_v43 }
 0x5e4   :  { %v4834_v62 = vmul.f32 %v7292_v39, %v4797_v43 }
 0x5e6   :  { %6779 = vmatprep.mubr.msk.f32.mxu0 %vm168_vm7, %v4834_v62 }
 0x5e7   :  { %6780 = vmatmul.mubr.msk.f32.gmra.mrb[30].mxu0 %vm168_vm7, %v4835_v60 }
 0x5eb   :  { %v7294_v48 = vpop.eup %7293 }
 0x5ec   :  { %v7296_v18 = vpop.eup %7295  ;;  %v4837_v7 = vmul.f32 %v7294_v48, %v4797_v43 }
 0x5ed   :  { %v4836_v19 = vmul.f32 %v7296_v18, %v4797_v43 }
 0x5ef   :  { %6782 = vmatprep.mubr.msk.f32.mxu0 %vm168_vm7, %v4836_v19 }
 0x5f0   :  { %6783 = vmatmul.mubr.msk.f32.gmra.mrb[32].mxu0 %vm168_vm7, %v4837_v7 }
 0x5f1   :  { %5989 = vmatprep.mubr.f32.mxu0 %v7402_v40 }
 0x5f4   :  { %6571 = vmatmul.mubr.msk.f32.vlgmr.msra.gmra.mrb[34].mxu0 %vm92_vm14, %v7368_v58  ;;  %vm6130_vm14 = vcmask 261312  }
 0x65d   :  { %v6739_v0 = vpop.f32.mrb[2].mxu0 }
 0x65e   :  { %v11284_v1 = vadd.f32 %v6739_v0, %v11281_v54  ;;  %v5011_v38 = vpop.f32.mrb[3].mxu0 }
 0x65f   :  { %v11287_v33 = vadd.f32 %v11281_v54, %v5011_v38 }
 0x660   :  { %v5175_v40 = vsel %vm168_vm7, %v11284_v1, 0.0 }
 0x661   :  { %5176 = vadd.xlane.f32.xlu0 %v5175_v40  ;;  %v5172_v12 = vsel %vm168_vm7, %v11287_v33, 0.0 }
 0x662   :  { %5173 = vadd.xlane.f32.xlu1 %v5172_v12 }
 0x666   :  { %v6742_v35 = vpop.f32.mrb[4].mxu0 }
 0x667   :  { %v11294_v34 = vadd.f32 %v6742_v35, %v11281_v54  ;;  %v5021_v47 = vpop.f32.mrb[5].mxu0 }
 0x668   :  { %v11297_v37 = vadd.f32 %v11281_v54, %v5021_v47 }
 0x669   :  { %v5181_v56 = vsel %vm168_vm7, %v11294_v34, 0.0 }
 0x66a   :  { %v6745_v50 = vpop.f32.mrb[6].mxu0  ;;  %5182 = vadd.xlane.f32.xlu1 %v5181_v56  ;;  %v5178_v14 = vsel %vm168_vm7, %v11297_v37, 0.0 }
 0x66b   :  { %v11302_v15 = vadd.f32 %v6745_v50, %v11281_v54  ;;  %v5031_v32 = vpop.f32.mrb[7].mxu0 }
 0x66c   :  { %v11305_v52 = vadd.f32 %v11281_v54, %v5031_v32 }
 0x66d   :  { %v5187_v26 = vsel %vm168_vm7, %v11302_v15, 0.0 }
 0x66e   :  { %5188 = vadd.xlane.f32.xlu0 %v5187_v26  ;;  %5179 = vadd.xlane.f32.xlu1 %v5178_v14  ;;  %v5184_v11 = vsel %vm168_vm7, %v11305_v52, 0.0 }
 0x671   :  { %v6748_v6 = vpop.f32.mrb[8].mxu0 }
 0x672   :  { %v11312_v57 = vadd.f32 %v6748_v6, %v11281_v54  ;;  %v5041_v29 = vpop.f32.mrb[9].mxu0  ;;  %5185 = vadd.xlane.f32.xlu1 %v5184_v11 }
 0x673   :  { %v11317_v55 = vadd.f32 %v11281_v54, %v5041_v29 }
 0x674   :  { %v5193_v4 = vsel %vm168_vm7, %v11312_v57, 0.0 }
 0x675   :  { %5194 = vadd.xlane.f32.xlu0 %v5193_v4  ;;  %v6751_v10 = vpop.f32.mrb[10].mxu0  ;;  %v5190_v23 = vsel %vm168_vm7, %v11317_v55, 0.0 }
 0x676   :  { %v5051_v21 = vpop.f32.mrb[11].mxu0  ;;  %v11325_v31 = vadd.f32 %v6751_v10, %v11281_v54 }
 0x677   :  { %v11322_v8 = vadd.f32 %v11281_v54, %v5051_v21 }
 0x678   :  { %v5199_v51 = vsel %vm168_vm7, %v11325_v31, 0.0 }
 0x679   :  { %5191 = vadd.xlane.f32.xlu0 %v5190_v23  ;;  %v5196_v5 = vsel %vm168_vm7, %v11322_v8, 0.0 }
 0x67a   :  { %v6754_v20 = vpop.f32.mrb[12].mxu0  ;;  %5197 = vadd.xlane.f32.xlu1 %v5196_v5 }
 0x67b   :  { %v11332_v49 = vadd.f32 %v6754_v20, %v11281_v54  ;;  %v5061_v3 = vpop.f32.mrb[13].mxu0 }
 0x67c   :  { %v11335_v36 = vadd.f32 %v11281_v54, %v5061_v3 }
 0x67d   :  { %5200 = vadd.xlane.f32.xlu0 %v5199_v51  ;;  %v5205_v53 = vsel %vm168_vm7, %v11332_v49, 0.0 }
 0x67e   :  { %v6757_v25 = vpop.f32.mrb[14].mxu0  ;;  %v5202_v28 = vsel %vm168_vm7, %v11335_v36, 0.0 }
 0x67f   :  { %v11342_v22 = vadd.f32 %v6757_v25, %v11281_v54  ;;  %v5071_v24 = vpop.f32.mrb[15].mxu0  ;;  %5203 = vadd.xlane.f32.xlu1 %v5202_v28 }
 0x680   :  { %v11347_v44 = vadd.f32 %v11281_v54, %v5071_v24 }
 0x681   :  { %v5211_v9 = vsel %vm168_vm7, %v11342_v22, 0.0  ;;  %5206 = vadd.xlane.f32.xlu0 %v5205_v53 }
 0x682   :  { %v5208_v46 = vsel %vm168_vm7, %v11347_v44, 0.0 }
 0x683   :  { %5212 = vadd.xlane.f32.xlu1 %v5211_v9 }
 0x684   :  { %v6760_v16 = vpop.f32.mrb[16].mxu0 }
 0x685   :  { %v11352_v45 = vadd.f32 %v6760_v16, %v11281_v54  ;;  %v5081_v63 = vpop.f32.mrb[17].mxu0  ;;  %5209 = vadd.xlane.f32.xlu0 %v5208_v46 }
 0x686   :  { %v11357_v59 = vadd.f32 %v11281_v54, %v5081_v63 }
 0x687   :  { %v5217_v43 = vsel %vm168_vm7, %v11352_v45, 0.0 }
 0x688   :  { %v6763_v2 = vpop.f32.mrb[18].mxu0  ;;  %v5214_v41 = vsel %vm168_vm7, %v11357_v59, 0.0 }
 0x689   :  { %v11362_v30 = vadd.f32 %v6763_v2, %v11281_v54  ;;  %v5091_v42 = vpop.f32.mrb[19].mxu0  ;;  %5215 = vadd.xlane.f32.xlu1 %v5214_v41  ;;  %5218 = vadd.xlane.f32.xlu0 %v5217_v43 }
 0x68a   :  { %v11367_v27 = vadd.f32 %v11281_v54, %v5091_v42 }
 0x68b   :  { %v5223_v39 = vsel %vm168_vm7, %v11362_v30, 0.0 }
 0x68c   :  { %v5220_v60 = vsel %vm168_vm7, %v11367_v27, 0.0 }
 0x68d   :  { %5224 = vadd.xlane.f32.xlu1 %v5223_v39  ;;  %5221 = vadd.xlane.f32.xlu0 %v5220_v60 }
 0x68e   :  { %v6766_v62 = vpop.f32.mrb[20].mxu0 }
 0x68f   :  { %v11374_v48 = vadd.f32 %v6766_v62, %v11281_v54  ;;  %v5101_v18 = vpop.f32.mrb[21].mxu0 }
 0x690   :  { %v11377_v7 = vadd.f32 %v11281_v54, %v5101_v18 }
 0x691   :  { %v5229_v19 = vsel %vm168_vm7, %v11374_v48, 0.0 }
 0x692   :  { %v5226_v58 = vsel %vm168_vm7, %v11377_v7, 0.0  ;;  %5230 = vadd.xlane.f32.xlu0 %v5229_v19 }
 0x693   :  { %5227 = vadd.xlane.f32.xlu1 %v5226_v58 }
 0x695   :  { %v6769_v0 = vpop.f32.mrb[22].mxu0 }
 0x696   :  { %v11384_v38 = vadd.f32 %v6769_v0, %v11281_v54  ;;  %v5111_v40 = vpop.f32.mrb[23].mxu0 }
 0x697   :  { %v11387_v12 = vadd.f32 %v11281_v54, %v5111_v40 }
 0x698   :  { %v5235_v35 = vsel %vm168_vm7, %v11384_v38, 0.0 }
 0x699   :  { %v5232_v47 = vsel %vm168_vm7, %v11387_v12, 0.0  ;;  %5236 = vadd.xlane.f32.xlu1 %v5235_v35 }
 0x69a   :  { %5233 = vadd.xlane.f32.xlu0 %v5232_v47 }
 0x6a2   :  { %v6772_v56 = vpop.f32.mrb[24].mxu0 }
 0x6a3   :  { %v11394_v50 = vadd.f32 %v6772_v56, %v11281_v54  ;;  %v5121_v32 = vpop.f32.mrb[25].mxu0 }
 0x6a4   :  { %v11397_v26 = vadd.f32 %v11281_v54, %v5121_v32 }
 0x6a5   :  { %v5241_v14 = vsel %vm168_vm7, %v11394_v50, 0.0 }
 0x6a6   :  { %5242 = vadd.xlane.f32.xlu0 %v5241_v14  ;;  %v5238_v6 = vsel %vm168_vm7, %v11397_v26, 0.0 }
 0x6a7   :  { %5239 = vadd.xlane.f32.xlu1 %v5238_v6  ;;  %v6775_v29 = vpop.f32.mrb[26].mxu0 }
 0x6a8   :  { %v11404_v11 = vadd.f32 %v6775_v29, %v11281_v54  ;;  %v5131_v4 = vpop.f32.mrb[27].mxu0 }
 0x6a9   :  { %v11407_v10 = vadd.f32 %v11281_v54, %v5131_v4 }
 0x6aa   :  { %v5247_v21 = vsel %vm168_vm7, %v11404_v11, 0.0 }
 0x6ab   :  { %v5244_v23 = vsel %vm168_vm7, %v11407_v10, 0.0  ;;  %5248 = vadd.xlane.f32.xlu1 %v5247_v21 }
 0x6ac   :  { %5245 = vadd.xlane.f32.xlu0 %v5244_v23 }
 0x6b1   :  { %v6778_v5 = vpop.f32.mrb[28].mxu0 }
 0x6b2   :  { %v11414_v20 = vadd.f32 %v6778_v5, %v11281_v54  ;;  %v5141_v3 = vpop.f32.mrb[29].mxu0 }
 0x6b3   :  { %v11417_v51 = vadd.f32 %v11281_v54, %v5141_v3 }
 0x6b4   :  { %v5253_v25 = vsel %vm168_vm7, %v11414_v20, 0.0 }
 0x6b5   :  { %5254 = vadd.xlane.f32.xlu0 %v5253_v25  ;;  %v5250_v28 = vsel %vm168_vm7, %v11417_v51, 0.0 }
 0x6b6   :  { %5251 = vadd.xlane.f32.xlu1 %v5250_v28 }
 0x6ba   :  { %v6781_v24 = vpop.f32.mrb[30].mxu0 }
 0x6bb   :  { %v11424_v53 = vadd.f32 %v6781_v24, %v11281_v54  ;;  %v5151_v9 = vpop.f32.mrb[31].mxu0 }
 0x6bc   :  { %v11427_v16 = vadd.f32 %v11281_v54, %v5151_v9 }
 0x6bd   :  { %v5259_v63 = vsel %vm168_vm7, %v11424_v53, 0.0 }
 0x6be   :  { %v5256_v46 = vsel %vm168_vm7, %v11427_v16, 0.0  ;;  %5260 = vadd.xlane.f32.xlu1 %v5259_v63 }
 0x6bf   :  { %5257 = vadd.xlane.f32.xlu0 %v5256_v46 }
 0x6c3   :  { %v6784_v2 = vpop.f32.mrb[32].mxu0 }
 0x6c4   :  { %v11434_v41 = vadd.f32 %v6784_v2, %v11281_v54  ;;  %v5161_v42 = vpop.f32.mrb[33].mxu0 }
 0x6c5   :  { %v11437_v43 = vadd.f32 %v11281_v54, %v5161_v42 }
 0x6c6   :  { %v5265_v39 = vsel %vm168_vm7, %v11434_v41, 0.0 }
 0x6c7   :  { %5266 = vadd.xlane.f32.xlu0 %v5265_v39  ;;  %v5262_v60 = vsel %vm168_vm7, %v11437_v43, 0.0  ;;  %v11443_v62 = vpop.f32.mrb[34].mxu0 }
 0x6c8   :  { %5263 = vadd.xlane.f32.xlu1 %v5262_v60  ;;  %v11445_v18 = vpop.f32.mrb[35].mxu0 }
 0x6ee   :  { %v5177_v19 = vpop.xlane.xlu0 %5176 }
 0x6ef   :  { %v5269_v58 = vmul.f32 0.03125, %v5177_v19  ;;  %v5174_v0 = vpop.xlane.xlu1 %5173 }
 0x6f0   :  { %v5268_v40 = vmul.f32 0.03125, %v5174_v0 }
 0x6f1   :  { %v11448_v35 = vsub.f32 %v11284_v1, %v5269_v58 }
 0x6f2   :  { %v11451_v54 = vsub.f32 %v11287_v33, %v5268_v40 }
 0x6f3   :  { %v5333_v47 = vmul.f32 %v11448_v35, %v11448_v35 }
 0x6f4   :  { %v5332_v56 = vmul.f32 %v11451_v54, %v11451_v54 }
 0x6f5   :  { %v5367_v14 = vsel %vm168_vm7, %v5333_v47, 0.0 }
 0x6f6   :  { %5368 = vadd.xlane.f32.xlu0 %v5367_v14  ;;  %v5364_v29 = vsel %vm168_vm7, %v5332_v56, 0.0 }
 0x6f7   :  { %v5183_v32 = vpop.xlane.xlu1 %5182  ;;  %5365 = vadd.xlane.f32.xlu1 %v5364_v29 }
 0x6f8   :  { %v5271_v6 = vmul.f32 0.03125, %v5183_v32 }
 0x6fa   :  { %v11460_v1 = vsub.f32 %v11294_v34, %v5271_v6 }
 0x6fb   :  { %v5189_v4 = vpop.xlane.xlu0 %5188  ;;  %v5180_v33 = vpop.xlane.xlu1 %5179 }
 0x6fc   :  { %v5273_v21 = vmul.f32 0.03125, %v5189_v4  ;;  %v5270_v23 = vmul.f32 0.03125, %v5180_v33  ;;  %v5335_v5 = vmul.f32 %v11460_v1, %v11460_v1 }
 0x6fe   :  { %v11465_v3 = vsub.f32 %v11302_v15, %v5273_v21  ;;  %v11468_v25 = vsub.f32 %v11297_v37, %v5270_v23  ;;  %v5373_v28 = vsel %vm168_vm7, %v5335_v5, 0.0 }
 0x6ff   :  { %5374 = vadd.xlane.f32.xlu1 %v5373_v28  ;;  %v5186_v24 = vpop.xlane.xlu1 %5185 }
 0x700   :  { %v5272_v34 = vmul.f32 0.03125, %v5186_v24  ;;  %v5337_v63 = vmul.f32 %v11465_v3, %v11465_v3  ;;  %v5334_v46 = vmul.f32 %v11468_v25, %v11468_v25 }
 0x702   :  { %v5195_v9 = vpop.xlane.xlu0 %5194  ;;  %v11476_v42 = vsub.f32 %v11305_v52, %v5272_v34  ;;  %v5379_v15 = vsel %vm168_vm7, %v5337_v63, 0.0  ;;  %v5370_v37 = vsel %vm168_vm7, %v5334_v46, 0.0 }
 0x703   :  { %v5275_v2 = vmul.f32 0.03125, %v5195_v9  ;;  %5380 = vadd.xlane.f32.xlu0 %v5379_v15  ;;  %5371 = vadd.xlane.f32.xlu1 %v5370_v37 }
 0x704   :  { %v5336_v19 = vmul.f32 %v11476_v42, %v11476_v42 }
 0x705   :  { %v11481_v39 = vsub.f32 %v11312_v57, %v5275_v2 }
 0x706   :  { %v5192_v60 = vpop.xlane.xlu0 %5191  ;;  %v5376_v47 = vsel %vm168_vm7, %v5336_v19, 0.0 }
 0x707   :  { %v5274_v58 = vmul.f32 0.03125, %v5192_v60  ;;  %v5198_v0 = vpop.xlane.xlu1 %5197  ;;  %v5339_v40 = vmul.f32 %v11481_v39, %v11481_v39  ;;  %5377 = vadd.xlane.f32.xlu1 %v5376_v47 }
 0x708   :  { %v5276_v52 = vmul.f32 0.03125, %v5198_v0 }
 0x709   :  { %v11489_v56 = vsub.f32 %v11317_v55, %v5274_v58  ;;  %v5385_v57 = vsel %vm168_vm7, %v5339_v40, 0.0 }
 0x70a   :  { %v11493_v32 = vsub.f32 %v11322_v8, %v5276_v52  ;;  %5386 = vadd.xlane.f32.xlu0 %v5385_v57  ;;  %v5201_v14 = vpop.xlane.xlu0 %5200 }
 0x70b   :  { %v5277_v6 = vmul.f32 0.03125, %v5201_v14  ;;  %v5338_v29 = vmul.f32 %v11489_v56, %v11489_v56 }
 0x70c   :  { %v5204_v4 = vpop.xlane.xlu1 %5203  ;;  %v5340_v21 = vmul.f32 %v11493_v32, %v11493_v32 }
 0x70d   :  { %v5278_v33 = vmul.f32 0.03125, %v5204_v4  ;;  %v11500_v55 = vsub.f32 %v11325_v31, %v5277_v6  ;;  %v5382_v23 = vsel %vm168_vm7, %v5338_v29, 0.0 }
 0x70e   :  { %5383 = vadd.xlane.f32.xlu0 %v5382_v23  ;;  %v5207_v5 = vpop.xlane.xlu0 %5206  ;;  %v5388_v28 = vsel %vm168_vm7, %v5340_v21, 0.0 }
 0x70f   :  { %v11504_v8 = vsub.f32 %v11335_v36, %v5278_v33  ;;  %v5279_v24 = vmul.f32 0.03125, %v5207_v5  ;;  %5389 = vadd.xlane.f32.xlu1 %v5388_v28  ;;  %v5341_v9 = vmul.f32 %v11500_v55, %v11500_v55 }
 0x710   :  { %v5213_v34 = vpop.xlane.xlu1 %5212 }
 0x711   :  { %v5281_v63 = vmul.f32 0.03125, %v5213_v34  ;;  %v5342_v31 = vmul.f32 %v11504_v8, %v11504_v8  ;;  %v11512_v46 = vsub.f32 %v11332_v49, %v5279_v24  ;;  %v5391_v2 = vsel %vm168_vm7, %v5341_v9, 0.0 }
 0x712   :  { %5392 = vadd.xlane.f32.xlu0 %v5391_v2  ;;  %v5210_v36 = vpop.xlane.xlu0 %5209 }
 0x713   :  { %v11516_v15 = vsub.f32 %v11342_v22, %v5281_v63  ;;  %v5394_v37 = vsel %vm168_vm7, %v5342_v31, 0.0  ;;  %v5280_v60 = vmul.f32 0.03125, %v5210_v36  ;;  %v5343_v19 = vmul.f32 %v11512_v46, %v11512_v46 }
 0x714   :  { %5395 = vadd.xlane.f32.xlu1 %v5394_v37 }
 0x715   :  { %v5345_v49 = vmul.f32 %v11516_v15, %v11516_v15  ;;  %v11524_v40 = vsub.f32 %v11347_v44, %v5280_v60  ;;  %v5397_v52 = vsel %vm168_vm7, %v5343_v19, 0.0 }
 0x716   :  { %v5216_v58 = vpop.xlane.xlu1 %5215  ;;  %5398 = vadd.xlane.f32.xlu0 %v5397_v52  ;;  %v5219_v22 = vpop.xlane.xlu0 %5218 }
 0x717   :  { %v5282_v0 = vmul.f32 0.03125, %v5216_v58  ;;  %v5403_v57 = vsel %vm168_vm7, %v5345_v49, 0.0  ;;  %v5283_v14 = vmul.f32 0.03125, %v5219_v22  ;;  %v5344_v6 = vmul.f32 %v11524_v40, %v11524_v40 }
 0x718   :  { %5404 = vadd.xlane.f32.xlu1 %v5403_v57 }
 0x719   :  { %v11528_v47 = vsub.f32 %v11357_v59, %v5282_v0  ;;  %v11536_v33 = vsub.f32 %v11352_v45, %v5283_v14  ;;  %v5400_v21 = vsel %vm168_vm7, %v5344_v6, 0.0 }
 0x71a   :  { %v5225_v29 = vpop.xlane.xlu1 %5224  ;;  %5401 = vadd.xlane.f32.xlu0 %v5400_v21  ;;  %v5222_v59 = vpop.xlane.xlu0 %5221 }
 0x71b   :  { %v5285_v4 = vmul.f32 0.03125, %v5225_v29  ;;  %v5346_v44 = vmul.f32 %v11528_v47, %v11528_v47  ;;  %v5284_v28 = vmul.f32 0.03125, %v5222_v59  ;;  %v5347_v24 = vmul.f32 %v11536_v33, %v11536_v33 }
 0x71d   :  { %v11540_v23 = vsub.f32 %v11362_v30, %v5285_v4  ;;  %v5406_v5 = vsel %vm168_vm7, %v5346_v44, 0.0  ;;  %v11548_v45 = vsub.f32 %v11367_v27, %v5284_v28  ;;  %v5409_v34 = vsel %vm168_vm7, %v5347_v24, 0.0 }
 0x71e   :  { %5407 = vadd.xlane.f32.xlu1 %v5406_v5  ;;  %5410 = vadd.xlane.f32.xlu0 %v5409_v34 }
 0x71f   :  { %v5349_v9 = vmul.f32 %v11540_v23, %v11540_v23  ;;  %v5231_v31 = vpop.xlane.xlu0 %5230  ;;  %v5348_v37 = vmul.f32 %v11548_v45, %v11548_v45 }
 0x720   :  { %v5228_v63 = vpop.xlane.xlu1 %5227  ;;  %v5287_v36 = vmul.f32 0.03125, %v5231_v31 }
 0x721   :  { %v5286_v30 = vmul.f32 0.03125, %v5228_v63  ;;  %v5415_v2 = vsel %vm168_vm7, %v5349_v9, 0.0  ;;  %v5412_v27 = vsel %vm168_vm7, %v5348_v37, 0.0 }
 0x722   :  { %5416 = vadd.xlane.f32.xlu1 %v5415_v2  ;;  %v11558_v19 = vsub.f32 %v11374_v48, %v5287_v36  ;;  %5413 = vadd.xlane.f32.xlu0 %v5412_v27 }
 0x723   :  { %v11555_v60 = vsub.f32 %v11377_v7, %v5286_v30 }
 0x724   :  { %v5351_v49 = vmul.f32 %v11558_v19, %v11558_v19 }
 0x725   :  { %v5350_v58 = vmul.f32 %v11555_v60, %v11555_v60 }
 0x726   :  { %v5237_v0 = vpop.xlane.xlu1 %5236  ;;  %v5421_v7 = vsel %vm168_vm7, %v5351_v49, 0.0 }
 0x727   :  { %v5234_v52 = vpop.xlane.xlu0 %5233  ;;  %v5289_v22 = vmul.f32 0.03125, %v5237_v0  ;;  %v5418_v57 = vsel %vm168_vm7, %v5350_v58, 0.0  ;;  %5422 = vadd.xlane.f32.xlu0 %v5421_v7 }
 0x728   :  { %v5288_v14 = vmul.f32 0.03125, %v5234_v52  ;;  %5419 = vadd.xlane.f32.xlu1 %v5418_v57 }
 0x729   :  { %v11568_v48 = vsub.f32 %v11384_v38, %v5289_v22 }
 0x72a   :  { %v11571_v6 = vsub.f32 %v11387_v12, %v5288_v14 }
 0x72b   :  { %v5353_v29 = vmul.f32 %v11568_v48, %v11568_v48 }
 0x72c   :  { %v5352_v4 = vmul.f32 %v11571_v6, %v11571_v6 }
 0x72d   :  { %v5427_v44 = vsel %vm168_vm7, %v5353_v29, 0.0 }
 0x72e   :  { %v5424_v21 = vsel %vm168_vm7, %v5352_v4, 0.0  ;;  %5428 = vadd.xlane.f32.xlu1 %v5427_v44 }
 0x72f   :  { %5425 = vadd.xlane.f32.xlu0 %v5424_v21 }
 0x733   :  { %v5243_v59 = vpop.xlane.xlu0 %5242 }
 0x734   :  { %v5291_v5 = vmul.f32 0.03125, %v5243_v59  ;;  %v5240_v38 = vpop.xlane.xlu1 %5239 }
 0x735   :  { %v5290_v28 = vmul.f32 0.03125, %v5240_v38 }
 0x736   :  { %v11580_v24 = vsub.f32 %v11394_v50, %v5291_v5 }
 0x737   :  { %v11583_v12 = vsub.f32 %v11397_v26, %v5290_v28 }
 0x738   :  { %v5355_v9 = vmul.f32 %v11580_v24, %v11580_v24  ;;  %v5249_v34 = vpop.xlane.xlu1 %5248 }
 0x739   :  { %v5354_v63 = vmul.f32 %v11583_v12, %v11583_v12  ;;  %v5246_v31 = vpop.xlane.xlu0 %5245  ;;  %v5293_v30 = vmul.f32 0.03125, %v5249_v34 }
 0x73a   :  { %v5433_v2 = vsel %vm168_vm7, %v5355_v9, 0.0  ;;  %v5292_v36 = vmul.f32 0.03125, %v5246_v31  ;;  %v11624_v9 = vsub.s32 1, %v11069_v17 }
 0x73b   :  { %5434 = vadd.xlane.f32.xlu0 %v5433_v2  ;;  %v5430_v37 = vsel %vm168_vm7, %v5354_v63, 0.0  ;;  %v11592_v50 = vsub.f32 %v11404_v11, %v5293_v30  ;;  %v5913_v63 = vld [vmem:[%s12091_s19] sm:$0x3] }
 0x73c   :  { %5431 = vadd.xlane.f32.xlu1 %v5430_v37  ;;  %v11595_v26 = vsub.f32 %v11407_v10, %v5292_v36  ;;  %v5918_v36 = vrot.slane %v5913_v63, %v11104_v13  ;;  %v5922_v37 = vrot.slane %v5913_v63, %v11624_v9 }
 0x73d   :  { %v5357_v27 = vmul.f32 %v11592_v50, %v11592_v50 }
 0x73e   :  { %v5356_v58 = vmul.f32 %v11595_v26, %v11595_v26 }
 0x73f   :  { %v5439_v0 = vsel %vm168_vm7, %v5357_v27, 0.0 }
 0x740   :  { %v5436_v49 = vsel %vm168_vm7, %v5356_v58, 0.0  ;;  %5440 = vadd.xlane.f32.xlu1 %v5439_v0 }
 0x741   :  { %5437 = vadd.xlane.f32.xlu0 %v5436_v49  ;;  %v11642_v49 = vadd.f32 %v11443_v62, %v5918_v36 }
 0x742   :  { %v5255_v52 = vpop.xlane.xlu0 %5254 }
 0x743   :  { %v5295_v22 = vmul.f32 0.03125, %v5255_v52  ;;  %v5252_v11 = vpop.xlane.xlu1 %5251  ;;  %v11645_v52 = vadd.f32 %v11445_v18, %v5922_v37 }
 0x744   :  { %v5294_v57 = vmul.f32 0.03125, %v5252_v11 }
 0x745   :  { %v11604_v14 = vsub.f32 %v11414_v20, %v5295_v22 }
 0x746   :  { %v11607_v10 = vsub.f32 %v11417_v51, %v5294_v57 }
 0x747   :  { %v5359_v7 = vmul.f32 %v11604_v14, %v11604_v14 }
 0x748   :  { %v5358_v29 = vmul.f32 %v11607_v10, %v11607_v10 }
 0x749   :  { %v5445_v4 = vsel %vm168_vm7, %v5359_v7, 0.0 }
 0x74a   :  { %5446 = vadd.xlane.f32.xlu0 %v5445_v4  ;;  %v5442_v44 = vsel %vm168_vm7, %v5358_v29, 0.0 }
 0x74b   :  { %v5261_v21 = vpop.xlane.xlu1 %5260  ;;  %5443 = vadd.xlane.f32.xlu1 %v5442_v44 }
 0x74c   :  { %v5258_v59 = vpop.xlane.xlu0 %5257  ;;  %v5297_v5 = vmul.f32 0.03125, %v5261_v21 }
 0x74d   :  { %v5296_v20 = vmul.f32 0.03125, %v5258_v59 }
 0x74e   :  { %v11616_v38 = vsub.f32 %v11424_v53, %v5297_v5 }
 0x74f   :  { %v11619_v51 = vsub.f32 %v11427_v16, %v5296_v20 }
 0x750   :  { %v5361_v28 = vmul.f32 %v11616_v38, %v11616_v38 }
 0x751   :  { %v5360_v34 = vmul.f32 %v11619_v51, %v11619_v51 }
 0x752   :  { %v5451_v31 = vsel %vm168_vm7, %v5361_v28, 0.0 }
 0x753   :  { %v5448_v30 = vsel %vm168_vm7, %v5360_v34, 0.0  ;;  %5452 = vadd.xlane.f32.xlu1 %v5451_v31 }
 0x754   :  { %v5267_v53 = vpop.xlane.xlu0 %5266  ;;  %5449 = vadd.xlane.f32.xlu0 %v5448_v30 }
 0x755   :  { %v5299_v16 = vmul.f32 0.03125, %v5267_v53  ;;  %v5264_v2 = vpop.xlane.xlu1 %5263 }
 0x756   :  { %v5298_v27 = vmul.f32 0.03125, %v5264_v2  ;;  %v11658_v2 = vld [vmem:[%s12086_s14] ss:$0 sm:$0xff] }
 0x757   :  { %v11636_v58 = vsub.f32 %v11434_v41, %v5299_v16 }
 0x758   :  { %v11639_v0 = vsub.f32 %v11437_v43, %v5298_v27  ;;  %v5998_v43 = vadd.f32 %v11645_v52, %v11642_v49 }
 0x759   :  { %v5363_v22 = vmul.f32 %v11636_v58, %v11636_v58 }
 0x75a   :  { %v5362_v11 = vmul.f32 %v11639_v0, %v11639_v0 }
 0x75b   :  { %v5457_v57 = vsel %vm168_vm7, %v5363_v22, 0.0 }
 0x75c   :  { %5458 = vadd.xlane.f32.xlu0 %v5457_v57  ;;  %v5454_v41 = vsel %vm168_vm7, %v5362_v11, 0.0  ;;  %v11664_v57 = vld [vmem:[%s12087_s15] ss:$0 sm:$0xff] }
 0x75d   :  { %5455 = vadd.xlane.f32.xlu1 %v5454_v41 }
 0x761   :  { %5999 = vadd.xlane.f32.xlu1 %v5998_v43 }
 0x783   :  { %v5369_v62 = vpop.xlane.xlu0 %5368 }
 0x784   :  { %v5461_v7 = vmul.f32 0.03125, %v5369_v62  ;;  %v5366_v18 = vpop.xlane.xlu1 %5365 }
 0x785   :  { %v5460_v29 = vmul.f32 0.03125, %v5366_v18 }
 0x786   :  { %v5493_v4 = vadd.f32 1e-05, %v5461_v7 }
 0x787   :  { %v5492_v44 = vadd.f32 1e-05, %v5460_v29 }
 0x788   :  { %7297 = vrsqrt.f32 %v5493_v4 }
 0x789   :  { %7299 = vrsqrt.f32 %v5492_v44 }
 0x78c   :  { %v5375_v21 = vpop.xlane.xlu1 %5374 }
 0x78d   :  { %v5463_v59 = vmul.f32 0.03125, %v5375_v21  ;;  %v11673_v21 = vld [vmem:[%s12088_s16] ss:$0 sm:$0xff] }
 0x78f   :  { %v5495_v5 = vadd.f32 1e-05, %v5463_v59 }
 0x790   :  { %v5381_v20 = vpop.xlane.xlu0 %5380  ;;  %v5372_v28 = vpop.xlane.xlu1 %5371 }
 0x791   :  { %7301 = vrsqrt.f32 %v5495_v5  ;;  %v5465_v34 = vmul.f32 0.03125, %v5381_v20  ;;  %v5462_v63 = vmul.f32 0.03125, %v5372_v28 }
 0x792   :  { %v7298_v30 = vpop.eup %7297 }
 0x793   :  { %v5497_v31 = vadd.f32 1e-05, %v5465_v34  ;;  %v5494_v53 = vadd.f32 1e-05, %v5462_v63  ;;  %v7300_v36 = vpop.eup %7299  ;;  %v5557_v22 = vmul.f32 %v7298_v30, %v11448_v35 }
 0x794   :  { %v5378_v16 = vpop.xlane.xlu1 %5377  ;;  %v5556_v41 = vmul.f32 %v7300_v36, %v11451_v54 }
 0x795   :  { %7303 = vrsqrt.f32 %v5497_v31  ;;  %v5464_v27 = vmul.f32 0.03125, %v5378_v16  ;;  %v5595_v62 = vmul.f32 %v11658_v2, %v5557_v22 }
 0x796   :  { %7305 = vrsqrt.f32 %v5494_v53  ;;  %v5594_v18 = vmul.f32 %v11658_v2, %v5556_v41 }
 0x797   :  { %v5387_v37 = vpop.xlane.xlu0 %5386  ;;  %v5496_v43 = vadd.f32 1e-05, %v5464_v27  ;;  %v5633_v4 = vadd.f32 %v11664_v57, %v5595_v62 }
 0x798   :  { %v5467_v11 = vmul.f32 0.03125, %v5387_v37  ;;  %v5632_v54 = vadd.f32 %v11664_v57, %v5594_v18 }
 0x799   :  { %7307 = vrsqrt.f32 %v5496_v43  ;;  %v5665_v20 = vmax.f32 %v5633_v4, 0.0 }
 0x79a   :  { %v5499_v7 = vadd.f32 1e-05, %v5467_v11  ;;  %v5664_v34 = vmax.f32 %v5632_v54, 0.0 }
 0x79b   :  { %v5384_v29 = vpop.xlane.xlu0 %5383  ;;  %v7302_v59 = vpop.eup %7301  ;;  %v5704_v30 = vmul.f32 %v11673_v21, %v5665_v20 }
 0x79c   :  { %7309 = vrsqrt.f32 %v5499_v7  ;;  %v5466_v35 = vmul.f32 0.03125, %v5384_v29  ;;  %v5390_v44 = vpop.xlane.xlu1 %5389  ;;  %v5559_v63 = vmul.f32 %v7302_v59, %v11460_v1  ;;  %v5703_v37 = vmul.f32 %v11673_v21, %v5664_v34 }
 0x79d   :  { %v5468_v5 = vmul.f32 0.03125, %v5390_v44  ;;  %v5738_v41 = vsel %vm168_vm7, %v5704_v30, 0.0 }
 0x79e   :  { %v5498_v28 = vadd.f32 1e-05, %v5466_v35  ;;  %v5597_v27 = vmul.f32 %v11658_v2, %v5559_v63  ;;  %5739 = vadd.xlane.f32.xlu1 %v5738_v41  ;;  %v5735_v1 = vsel %vm168_vm7, %v5703_v37, 0.0 }
 0x79f   :  { %v5500_v31 = vadd.f32 1e-05, %v5468_v5  ;;  %v5393_v53 = vpop.xlane.xlu0 %5392  ;;  %v7304_v22 = vpop.eup %7303  ;;  %5736 = vadd.xlane.f32.xlu0 %v5735_v1 }
 0x7a0   :  { %7311 = vrsqrt.f32 %v5498_v28  ;;  %v5469_v16 = vmul.f32 0.03125, %v5393_v53  ;;  %v7306_v43 = vpop.eup %7305  ;;  %v5635_v7 = vadd.f32 %v11664_v57, %v5597_v27  ;;  %v5561_v18 = vmul.f32 %v7304_v22, %v11465_v3 }
 0x7a1   :  { %v5396_v36 = vpop.xlane.xlu1 %5395  ;;  %7313 = vrsqrt.f32 %v5500_v31  ;;  %v5558_v35 = vmul.f32 %v7306_v43, %v11468_v25 }
 0x7a2   :  { %v5470_v11 = vmul.f32 0.03125, %v5396_v36  ;;  %v5501_v62 = vadd.f32 1e-05, %v5469_v16  ;;  %v5667_v59 = vmax.f32 %v5635_v7, 0.0  ;;  %v5599_v5 = vmul.f32 %v11658_v2, %v5561_v18 }
 0x7a3   :  { %v5399_v29 = vpop.xlane.xlu0 %5398  ;;  %v7308_v20 = vpop.eup %7307  ;;  %v5596_v34 = vmul.f32 %v11658_v2, %v5558_v35 }
 0x7a4   :  { %v5502_v4 = vadd.f32 1e-05, %v5470_v11  ;;  %7315 = vrsqrt.f32 %v5501_v62  ;;  %v5471_v44 = vmul.f32 0.03125, %v5399_v29  ;;  %v5706_v3 = vmul.f32 %v11673_v21, %v5667_v59 }
 0x7a5   :  { %v5405_v54 = vpop.xlane.xlu1 %5404  ;;  %v5637_v53 = vadd.f32 %v11664_v57, %v5599_v5  ;;  %v5560_v30 = vmul.f32 %v7308_v20, %v11476_v42  ;;  %v5634_v36 = vadd.f32 %v11664_v57, %v5596_v34 }
 0x7a6   :  { %7317 = vrsqrt.f32 %v5502_v4  ;;  %v5473_v28 = vmul.f32 0.03125, %v5405_v54  ;;  %v7310_v63 = vpop.eup %7309  ;;  %v5503_v31 = vadd.f32 1e-05, %v5471_v44  ;;  %v5744_v22 = vsel %vm168_vm7, %v5706_v3, 0.0 }
 0x7a7   :  { %v5402_v25 = vpop.xlane.xlu0 %5401  ;;  %v5563_v37 = vmul.f32 %v7310_v63, %v11481_v39  ;;  %v5669_v41 = vmax.f32 %v5637_v53, 0.0  ;;  %5745 = vadd.xlane.f32.xlu0 %v5744_v22  ;;  %v5666_v62 = vmax.f32 %v5634_v36, 0.0  ;;  %v5598_v29 = vmul.f32 %v11658_v2, %v5560_v30 }
 0x7a8   :  { %v5505_v16 = vadd.f32 1e-05, %v5473_v28  ;;  %7319 = vrsqrt.f32 %v5503_v31  ;;  %v5472_v27 = vmul.f32 0.03125, %v5402_v25 }
 0x7a9   :  { %v5601_v1 = vmul.f32 %v11658_v2, %v5563_v37  ;;  %v5708_v18 = vmul.f32 %v11673_v21, %v5669_v41  ;;  %v5705_v44 = vmul.f32 %v11673_v21, %v5666_v62  ;;  %v5636_v34 = vadd.f32 %v11664_v57, %v5598_v29 }
 0x7aa   :  { %7321 = vrsqrt.f32 %v5505_v16  ;;  %v7312_v7 = vpop.eup %7311  ;;  %v5504_v42 = vadd.f32 1e-05, %v5472_v27 }
 0x7ab   :  { %v5408_v11 = vpop.xlane.xlu1 %5407  ;;  %v7314_v4 = vpop.eup %7313  ;;  %v5639_v54 = vadd.f32 %v11664_v57, %v5601_v1  ;;  %v5562_v59 = vmul.f32 %v7312_v7, %v11489_v56  ;;  %v5750_v20 = vsel %vm168_vm7, %v5708_v18, 0.0  ;;  %v5741_v63 = vsel %vm168_vm7, %v5705_v44, 0.0 }
 0x7ac   :  { %v5474_v43 = vmul.f32 0.03125, %v5408_v11  ;;  %v5411_v39 = vpop.xlane.xlu0 %5410  ;;  %7323 = vrsqrt.f32 %v5504_v42  ;;  %5751 = vadd.xlane.f32.xlu1 %v5750_v20  ;;  %5742 = vadd.xlane.f32.xlu0 %v5741_v63  ;;  %v5668_v25 = vmax.f32 %v5636_v34, 0.0  ;;  %v5564_v56 = vmul.f32 %v7314_v4, %v11493_v32 }
 0x7ad   :  { %v5475_v5 = vmul.f32 0.03125, %v5411_v39  ;;  %v5671_v3 = vmax.f32 %v5639_v54, 0.0  ;;  %v5600_v16 = vmul.f32 %v11658_v2, %v5562_v59 }
 0x7ae   :  { %v5506_v35 = vadd.f32 1e-05, %v5474_v43  ;;  %v7316_v53 = vpop.eup %7315  ;;  %v5707_v43 = vmul.f32 %v11673_v21, %v5668_v25  ;;  %v5602_v7 = vmul.f32 %v11658_v2, %v5564_v56 }
 0x7af   :  { %v5417_v28 = vpop.xlane.xlu1 %5416  ;;  %v5507_v30 = vadd.f32 1e-05, %v5475_v5  ;;  %v5710_v22 = vmul.f32 %v11673_v21, %v5671_v3  ;;  %v5565_v11 = vmul.f32 %v7316_v53, %v11500_v55  ;;  %v5638_v62 = vadd.f32 %v11664_v57, %v5600_v16 }
 0x7b0   :  { %7325 = vrsqrt.f32 %v5506_v35  ;;  %v5477_v31 = vmul.f32 0.03125, %v5417_v28  ;;  %v7318_v36 = vpop.eup %7317  ;;  %v5414_v37 = vpop.xlane.xlu0 %5413  ;;  %v5747_v29 = vsel %vm168_vm7, %v5707_v43, 0.0  ;;  %v5640_v59 = vadd.f32 %v11664_v57, %v5602_v7 }
 0x7b1   :  { %7327 = vrsqrt.f32 %v5507_v30  ;;  %v5476_v41 = vmul.f32 0.03125, %v5414_v37  ;;  %v5756_v1 = vsel %vm168_vm7, %v5710_v22, 0.0  ;;  %v5603_v32 = vmul.f32 %v11658_v2, %v5565_v11  ;;  %5748 = vadd.xlane.f32.xlu0 %v5747_v29 }
 0x7b2   :  { %v5509_v27 = vadd.f32 1e-05, %v5477_v31  ;;  %v7320_v42 = vpop.eup %7319  ;;  %5757 = vadd.xlane.f32.xlu1 %v5756_v1  ;;  %v5670_v55 = vmax.f32 %v5638_v62, 0.0  ;;  %v5566_v39 = vmul.f32 %v7318_v36, %v11504_v8  ;;  %v5672_v3 = vmax.f32 %v5640_v59, 0.0 }
 0x7b3   :  { %v5508_v18 = vadd.f32 1e-05, %v5476_v41  ;;  %v5641_v5 = vadd.f32 %v11664_v57, %v5603_v32  ;;  %v5567_v20 = vmul.f32 %v7320_v42, %v11512_v46 }
 0x7b4   :  { %7329 = vrsqrt.f32 %v5509_v27  ;;  %v7322_v35 = vpop.eup %7321  ;;  %v5423_v44 = vpop.xlane.xlu0 %5422  ;;  %v5709_v34 = vmul.f32 %v11673_v21, %v5670_v55  ;;  %v5604_v63 = vmul.f32 %v11658_v2, %v5566_v39  ;;  %v5711_v37 = vmul.f32 %v11673_v21, %v5672_v3 }
 0x7b5   :  { %v5420_v4 = vpop.xlane.xlu1 %5419  ;;  %7331 = vrsqrt.f32 %v5508_v18  ;;  %v5479_v28 = vmul.f32 0.03125, %v5423_v44  ;;  %v5673_v53 = vmax.f32 %v5641_v5, 0.0  ;;  %v5605_v8 = vmul.f32 %v11658_v2, %v5567_v20 }
 0x7b6   :  { %v5478_v54 = vmul.f32 0.03125, %v5420_v4  ;;  %v7324_v30 = vpop.eup %7323  ;;  %v5753_v16 = vsel %vm168_vm7, %v5709_v34, 0.0  ;;  %v5642_v56 = vadd.f32 %v11664_v57, %v5604_v63  ;;  %v5569_v36 = vmul.f32 %v7322_v35, %v11516_v15 }
 0x7b7   :  { %v5511_v25 = vadd.f32 1e-05, %v5479_v28  ;;  %5754 = vadd.xlane.f32.xlu1 %v5753_v16  ;;  %v5712_v27 = vmul.f32 %v11673_v21, %v5673_v53  ;;  %v5643_v22 = vadd.f32 %v11664_v57, %v5605_v8  ;;  %v5568_v43 = vmul.f32 %v7324_v30, %v11524_v40 }
 0x7b8   :  { %v5510_v31 = vadd.f32 1e-05, %v5478_v54  ;;  %v5674_v41 = vmax.f32 %v5642_v56, 0.0  ;;  %v5607_v62 = vmul.f32 %v11658_v2, %v5569_v36  ;;  %v5759_v7 = vsel %vm168_vm7, %v5711_v37, 0.0 }
 0x7b9   :  { %v5762_v32 = vsel %vm168_vm7, %v5712_v27, 0.0  ;;  %v5675_v42 = vmax.f32 %v5643_v22, 0.0  ;;  %5760 = vadd.xlane.f32.xlu0 %v5759_v7  ;;  %v5606_v55 = vmul.f32 %v11658_v2, %v5568_v43 }
 0x7ba   :  { %v7326_v46 = vpop.eup %7325  ;;  %7333 = vrsqrt.f32 %v5510_v31  ;;  %v5713_v4 = vmul.f32 %v11673_v21, %v5674_v41  ;;  %v5645_v39 = vadd.f32 %v11664_v57, %v5607_v62 }
 0x7bb   :  { %7335 = vrsqrt.f32 %v5511_v25  ;;  %v5429_v11 = vpop.xlane.xlu1 %5428  ;;  %v7328_v18 = vpop.eup %7327  ;;  %5763 = vadd.xlane.f32.xlu1 %v5762_v32  ;;  %v5714_v44 = vmul.f32 %v11673_v21, %v5675_v42  ;;  %v5570_v59 = vmul.f32 %v7326_v46, %v11528_v47  ;;  %v5644_v28 = vadd.f32 %v11664_v57, %v5606_v55 }
 0x7bc   :  { %v5426_v1 = vpop.xlane.xlu0 %5425  ;;  %v5481_v15 = vmul.f32 0.03125, %v5429_v11  ;;  %v5571_v54 = vmul.f32 %v7328_v18, %v11536_v33  ;;  %v5765_v20 = vsel %vm168_vm7, %v5713_v4, 0.0  ;;  %v5677_v34 = vmax.f32 %v5645_v39, 0.0 }
 0x7bd   :  { %v5480_v29 = vmul.f32 0.03125, %v5426_v1  ;;  %v5768_v63 = vsel %vm168_vm7, %v5714_v44, 0.0  ;;  %v5608_v3 = vmul.f32 %v11658_v2, %v5570_v59  ;;  %5766 = vadd.xlane.f32.xlu0 %v5765_v20  ;;  %v5676_v8 = vmax.f32 %v5644_v28, 0.0 }
 0x7be   :  { %v7330_v35 = vpop.eup %7329  ;;  %v5513_v40 = vadd.f32 1e-05, %v5481_v15  ;;  %v5609_v31 = vmul.f32 %v11658_v2, %v5571_v54  ;;  %v5716_v33 = vmul.f32 %v11673_v21, %v5677_v34 }
 0x7bf   :  { %v5512_v5 = vadd.f32 1e-05, %v5480_v29  ;;  %v7332_v53 = vpop.eup %7331  ;;  %v5573_v47 = vmul.f32 %v7330_v35, %v11540_v23  ;;  %5769 = vadd.xlane.f32.xlu1 %v5768_v63  ;;  %v5646_v25 = vadd.f32 %v11664_v57, %v5608_v3  ;;  %v5715_v56 = vmul.f32 %v11673_v21, %v5676_v8 }
 0x7c0   :  { %7337 = vrsqrt.f32 %v5513_v40  ;;  %v5647_v30 = vadd.f32 %v11664_v57, %v5609_v31  ;;  %v5572_v16 = vmul.f32 %v7332_v53, %v11548_v45  ;;  %v5774_v36 = vsel %vm168_vm7, %v5716_v33, 0.0 }
 0x7c1   :  { %7339 = vrsqrt.f32 %v5512_v5  ;;  %v5611_v46 = vmul.f32 %v11658_v2, %v5573_v47  ;;  %v5678_v22 = vmax.f32 %v5646_v25, 0.0  ;;  %v5771_v23 = vsel %vm168_vm7, %v5715_v56, 0.0  ;;  %5775 = vadd.xlane.f32.xlu0 %v5774_v36 }
 0x7c2   :  { %v5679_v27 = vmax.f32 %v5647_v30, 0.0  ;;  %v5610_v11 = vmul.f32 %v11658_v2, %v5572_v16 }
 0x7c3   :  { %v5649_v43 = vadd.f32 %v11664_v57, %v5611_v46  ;;  %5772 = vadd.xlane.f32.xlu1 %v5771_v23  ;;  %v5717_v7 = vmul.f32 %v11673_v21, %v5678_v22 }
 0x7c4   :  { %v7334_v37 = vpop.eup %7333  ;;  %v5718_v1 = vmul.f32 %v11673_v21, %v5679_v27  ;;  %v5648_v15 = vadd.f32 %v11664_v57, %v5610_v11 }
 0x7c5   :  { %v7336_v41 = vpop.eup %7335  ;;  %v5574_v62 = vmul.f32 %v7334_v37, %v11555_v60  ;;  %v5681_v29 = vmax.f32 %v5649_v43, 0.0  ;;  %v5777_v60 = vsel %vm168_vm7, %v5717_v7, 0.0 }
 0x7c6   :  { %v5575_v32 = vmul.f32 %v7336_v41, %v11558_v19  ;;  %v5780_v39 = vsel %vm168_vm7, %v5718_v1, 0.0  ;;  %v5680_v35 = vmax.f32 %v5648_v15, 0.0  ;;  %5778 = vadd.xlane.f32.xlu0 %v5777_v60 }
 0x7c7   :  { %v5612_v4 = vmul.f32 %v11658_v2, %v5574_v62  ;;  %v5720_v44 = vmul.f32 %v11673_v21, %v5681_v29  ;;  %5781 = vadd.xlane.f32.xlu1 %v5780_v39 }
 0x7c8   :  { %v5435_v45 = vpop.xlane.xlu0 %5434  ;;  %v5613_v54 = vmul.f32 %v11658_v2, %v5575_v32  ;;  %v5719_v20 = vmul.f32 %v11673_v21, %v5680_v35 }
 0x7c9   :  { %v5483_v42 = vmul.f32 0.03125, %v5435_v45  ;;  %v5432_v18 = vpop.xlane.xlu1 %5431  ;;  %v5650_v59 = vadd.f32 %v11664_v57, %v5612_v4  ;;  %v5786_v34 = vsel %vm168_vm7, %v5720_v44, 0.0 }
 0x7ca   :  { %v5482_v55 = vmul.f32 0.03125, %v5432_v18  ;;  %v7338_v19 = vpop.eup %7337  ;;  %v5651_v63 = vadd.f32 %v11664_v57, %v5613_v54  ;;  %v5783_v53 = vsel %vm168_vm7, %v5719_v20, 0.0  ;;  %5787 = vadd.xlane.f32.xlu0 %v5786_v34 }
 0x7cb   :  { %v5515_v40 = vadd.f32 1e-05, %v5483_v42  ;;  %v7340_v28 = vpop.eup %7339  ;;  %v5682_v31 = vmax.f32 %v5650_v59, 0.0  ;;  %v5577_v33 = vmul.f32 %v7338_v19, %v11568_v48  ;;  %5784 = vadd.xlane.f32.xlu1 %v5783_v53 }
 0x7cc   :  { %v5514_v5 = vadd.f32 1e-05, %v5482_v55  ;;  %v5576_v8 = vmul.f32 %v7340_v28, %v11571_v6  ;;  %v5683_v25 = vmax.f32 %v5651_v63, 0.0 }
 0x7cd   :  { %7341 = vrsqrt.f32 %v5515_v40  ;;  %v5441_v3 = vpop.xlane.xlu1 %5440  ;;  %v5721_v16 = vmul.f32 %v11673_v21, %v5682_v31  ;;  %v5615_v46 = vmul.f32 %v11658_v2, %v5577_v33 }
 0x7ce   :  { %7343 = vrsqrt.f32 %v5514_v5  ;;  %v5438_v47 = vpop.xlane.xlu0 %5437  ;;  %v5485_v30 = vmul.f32 0.03125, %v5441_v3  ;;  %v5614_v36 = vmul.f32 %v11658_v2, %v5576_v8  ;;  %v5722_v27 = vmul.f32 %v11673_v21, %v5683_v25 }
 0x7cf   :  { %v5484_v56 = vmul.f32 0.03125, %v5438_v47  ;;  %v5789_v22 = vsel %vm168_vm7, %v5721_v16, 0.0  ;;  %v5653_v11 = vadd.f32 %v11664_v57, %v5615_v46 }
 0x7d0   :  { %v5517_v37 = vadd.f32 1e-05, %v5485_v30  ;;  %v5652_v48 = vadd.f32 %v11664_v57, %v5614_v36  ;;  %v5792_v41 = vsel %vm168_vm7, %v5722_v27, 0.0  ;;  %5790 = vadd.xlane.f32.xlu0 %v5789_v22 }
 0x7d1   :  { %v5516_v6 = vadd.f32 1e-05, %v5484_v56  ;;  %5793 = vadd.xlane.f32.xlu1 %v5792_v41  ;;  %v5685_v43 = vmax.f32 %v5653_v11, 0.0 }
 0x7d2   :  { %7345 = vrsqrt.f32 %v5517_v37  ;;  %v5684_v23 = vmax.f32 %v5652_v48, 0.0 }
 0x7d3   :  { %7347 = vrsqrt.f32 %v5516_v6  ;;  %v5724_v45 = vmul.f32 %v11673_v21, %v5685_v43 }
 0x7d4   :  { %v5723_v62 = vmul.f32 %v11673_v21, %v5684_v23 }
 0x7d5   :  { %v5798_v42 = vsel %vm168_vm7, %v5724_v45, 0.0 }
 0x7d6   :  { %v5795_v32 = vsel %vm168_vm7, %v5723_v62, 0.0  ;;  %5799 = vadd.xlane.f32.xlu0 %v5798_v42 }
 0x7d7   :  { %v7342_v1 = vpop.eup %7341  ;;  %v5447_v15 = vpop.xlane.xlu0 %5446  ;;  %5796 = vadd.xlane.f32.xlu1 %v5795_v32 }
 0x7d8   :  { %v7344_v7 = vpop.eup %7343  ;;  %v5579_v18 = vmul.f32 %v7342_v1, %v11580_v24  ;;  %v5487_v29 = vmul.f32 0.03125, %v5447_v15  ;;  %v5444_v4 = vpop.xlane.xlu1 %5443 }
 0x7d9   :  { %v5578_v55 = vmul.f32 %v7344_v7, %v11583_v12  ;;  %v5486_v39 = vmul.f32 0.03125, %v5444_v4 }
 0x7da   :  { %v5617_v60 = vmul.f32 %v11658_v2, %v5579_v18  ;;  %v5519_v35 = vadd.f32 1e-05, %v5487_v29 }
 0x7db   :  { %v5616_v40 = vmul.f32 %v11658_v2, %v5578_v55  ;;  %v5518_v44 = vadd.f32 1e-05, %v5486_v39 }
 0x7dc   :  { %v5655_v54 = vadd.f32 %v11664_v57, %v5617_v60  ;;  %v7346_v59 = vpop.eup %7345  ;;  %7349 = vrsqrt.f32 %v5519_v35 }
 0x7dd   :  { %v5654_v19 = vadd.f32 %v11664_v57, %v5616_v40  ;;  %v7348_v24 = vpop.eup %7347  ;;  %7351 = vrsqrt.f32 %v5518_v44  ;;  %v5581_v20 = vmul.f32 %v7346_v59, %v11592_v50 }
 0x7de   :  { %v5687_v5 = vmax.f32 %v5655_v54, 0.0  ;;  %v5580_v12 = vmul.f32 %v7348_v24, %v11595_v26 }
 0x7df   :  { %v5686_v28 = vmax.f32 %v5654_v19, 0.0  ;;  %v5619_v63 = vmul.f32 %v11658_v2, %v5581_v20 }
 0x7e0   :  { %v5726_v34 = vmul.f32 %v11673_v21, %v5687_v5  ;;  %v5453_v31 = vpop.xlane.xlu1 %5452  ;;  %v5618_v53 = vmul.f32 %v11658_v2, %v5580_v12 }
 0x7e1   :  { %v5725_v3 = vmul.f32 %v11673_v21, %v5686_v28  ;;  %v5450_v8 = vpop.xlane.xlu0 %5449  ;;  %v5489_v33 = vmul.f32 0.03125, %v5453_v31  ;;  %v5657_v30 = vadd.f32 %v11664_v57, %v5619_v63 }
 0x7e2   :  { %v5804_v47 = vsel %vm168_vm7, %v5726_v34, 0.0  ;;  %v5488_v25 = vmul.f32 0.03125, %v5450_v8  ;;  %v5656_v26 = vadd.f32 %v11664_v57, %v5618_v53 }
 0x7e3   :  { %5805 = vadd.xlane.f32.xlu1 %v5804_v47  ;;  %v5801_v50 = vsel %vm168_vm7, %v5725_v3, 0.0  ;;  %v5521_v16 = vadd.f32 1e-05, %v5489_v33  ;;  %v5689_v56 = vmax.f32 %v5657_v30, 0.0 }
 0x7e4   :  { %5802 = vadd.xlane.f32.xlu0 %v5801_v50  ;;  %v5520_v36 = vadd.f32 1e-05, %v5488_v25  ;;  %v5688_v46 = vmax.f32 %v5656_v26, 0.0 }
 0x7e5   :  { %7353 = vrsqrt.f32 %v5521_v16  ;;  %v5728_v37 = vmul.f32 %v11673_v21, %v5689_v56 }
 0x7e6   :  { %v7350_v27 = vpop.eup %7349  ;;  %7355 = vrsqrt.f32 %v5520_v36  ;;  %v5727_v22 = vmul.f32 %v11673_v21, %v5688_v46 }
 0x7e7   :  { %v7352_v6 = vpop.eup %7351  ;;  %v5810_v48 = vsel %vm168_vm7, %v5728_v37, 0.0  ;;  %v5583_v11 = vmul.f32 %v7350_v27, %v11604_v14 }
 0x7e8   :  { %v5807_v23 = vsel %vm168_vm7, %v5727_v22, 0.0  ;;  %5811 = vadd.xlane.f32.xlu0 %v5810_v48  ;;  %v5582_v43 = vmul.f32 %v7352_v6, %v11607_v10  ;;  %v5907_v22 = vld [vmem:[%s12584_s29 + $0x10] sm:$0xff]  ;;  %v5908_v48 = vld [vmem:[%s12584_s29 + $0x18] sm:$0xff] }
 0x7e9   :  { %v5459_v41 = vpop.xlane.xlu0 %5458  ;;  %5808 = vadd.xlane.f32.xlu1 %v5807_v23  ;;  %v5621_v1 = vmul.f32 %v11658_v2, %v5583_v11  ;;  %v6831_v11 = vpack.c.bf16 %v5908_v48, %v5907_v22 }
 0x7ea   :  { %v5491_v62 = vmul.f32 0.03125, %v5459_v41  ;;  %v5456_v45 = vpop.xlane.xlu1 %5455  ;;  %v5620_v15 = vmul.f32 %v11658_v2, %v5582_v43  ;;  %v12585_v41 = vmov 0.0|0.0  }
 0x7eb   :  { %v5490_v7 = vmul.f32 0.03125, %v5456_v45  ;;  %v5659_v42 = vadd.f32 %v11664_v57, %v5621_v1 }
 0x7ec   :  { %v5523_v32 = vadd.f32 1e-05, %v5491_v62  ;;  %v5658_v14 = vadd.f32 %v11664_v57, %v5620_v15 }
 0x7ed   :  { %v5522_v18 = vadd.f32 1e-05, %v5490_v7  ;;  %v5691_v29 = vmax.f32 %v5659_v42, 0.0 }
 0x7ee   :  { %7357 = vrsqrt.f32 %v5523_v32  ;;  %v5690_v4 = vmax.f32 %v5658_v14, 0.0  ;;  %v6000_v8 = vpop.xlane.xlu1 %5999 }
 0x7ef   :  { %7359 = vrsqrt.f32 %v5522_v18  ;;  %v7354_v55 = vpop.eup %7353  ;;  %v5730_v10 = vmul.f32 %v11673_v21, %v5691_v29 }
 0x7f0   :  { %v7356_v39 = vpop.eup %7355  ;;  %v5729_v60 = vmul.f32 %v11673_v21, %v5690_v4  ;;  %v5585_v35 = vmul.f32 %v7354_v55, %v11616_v38 }
 0x7f1   :  { %v5816_v40 = vsel %vm168_vm7, %v5730_v10, 0.0  ;;  %v5584_v44 = vmul.f32 %v7356_v39, %v11619_v51 }
 0x7f2   :  { %5817 = vadd.xlane.f32.xlu1 %v5816_v40  ;;  %v5813_v54 = vsel %vm168_vm7, %v5729_v60, 0.0  ;;  %v5623_v59 = vmul.f32 %v11658_v2, %v5585_v35 }
 0x7f3   :  { %5814 = vadd.xlane.f32.xlu0 %v5813_v54  ;;  %v5622_v19 = vmul.f32 %v11658_v2, %v5584_v44 }
 0x7f4   :  { %v5661_v24 = vadd.f32 %v11664_v57, %v5623_v59 }
 0x7f5   :  { %v5660_v5 = vadd.f32 %v11664_v57, %v5622_v19 }
 0x7f6   :  { %v5693_v20 = vmax.f32 %v5661_v24, 0.0 }
 0x7f7   :  { %v5692_v12 = vmax.f32 %v5660_v5, 0.0 }
 0x7f8   :  { %v7358_v28 = vpop.eup %7357  ;;  %v5732_v34 = vmul.f32 %v11673_v21, %v5693_v20 }
 0x7f9   :  { %v7360_v38 = vpop.eup %7359  ;;  %v5587_v51 = vmul.f32 %v7358_v28, %v11636_v58  ;;  %v5731_v63 = vmul.f32 %v11673_v21, %v5692_v12  ;;  %v6002_v58 = vmul.f32 0.00390625, %v6000_v8  ;;  %v11862_v8 = vld [vmem:[%s12093_s21] sm:$0x3] }
 0x7fa   :  { %v5586_v31 = vmul.f32 %v7360_v38, %v11639_v0  ;;  %v5822_v3 = vsel %vm168_vm7, %v5732_v34, 0.0  ;;  %v6106_v38 = vand.u32 127, %v4721_v61 }
 0x7fb   :  { %v5625_v53 = vmul.f32 %v11658_v2, %v5587_v51  ;;  %v5819_v33 = vsel %vm168_vm7, %v5731_v63, 0.0  ;;  %5823 = vadd.xlane.f32.xlu0 %v5822_v3  ;;  %v11828_v16 = vsub.f32 %v11642_v49, %v6002_v58  ;;  %v11831_v56 = vsub.f32 %v11645_v52, %v6002_v58  ;;  %v6570_v49 = vld [vmem:[#allocation2] ss:$0 sm:$0xff] }
 0x7fc   :  { %v5624_v47 = vmul.f32 %v11658_v2, %v5586_v31  ;;  %5820 = vadd.xlane.f32.xlu1 %v5819_v33  ;;  %v5905_v52 = vld [vmem:[%s12584_s29] sm:$0xff]  ;;  %v6111_v51 = vadd.s32 4294967288, %v6106_v38  ;;  %v6118_v63 = vadd.s32 4294967280, %v6106_v38  ;;  %v6125_v31 = vadd.s32 4294967272, %v6106_v38 }
 0x7fd   :  { %v5663_v30 = vadd.f32 %v11664_v57, %v5625_v53  ;;  %v6005_v46 = vmul.f32 %v11828_v16, %v11828_v16  ;;  %v11857_v53 = vld [vmem:[%s12092_s20] sm:$0x3] }
 0x7fe   :  { %v5662_v25 = vadd.f32 %v11664_v57, %v5624_v47  ;;  %v6006_v57 = vmul.f32 %v11831_v56, %v11831_v56  ;;  %v11865_v47 = vsub.s32 %v6106_v38, %v11069_v17  ;;  %v11868_v61 = vsub.s32 %v6111_v51, %v11069_v17 }
 0x7ff   :  { %v5695_v26 = vmax.f32 %v5663_v30, 0.0  ;;  %v11871_v30 = vsub.s32 %v6118_v63, %v11069_v17 }
 0x800   :  { %v5694_v50 = vmax.f32 %v5662_v25, 0.0  ;;  %v6007_v27 = vadd.f32 %v6006_v57, %v6005_v46  ;;  %v11874_v25 = vsub.s32 %v6125_v31, %v11069_v17  ;;  %v6032_v46 = vrot.slane %v11862_v8, %v11104_v13 }
 0x801   :  { %v5734_v2 = vmul.f32 %v11673_v21, %v5695_v26  ;;  %v6019_v26 = vrot.slane %v11857_v53, %v11104_v13  ;;  %v6036_v57 = vrot.slane %v11862_v8, %v11624_v9 }
 0x802   :  { %v5733_v0 = vmul.f32 %v11673_v21, %v5694_v50  ;;  %v5906_v21 = vld [vmem:[%s12584_s29 + $0x8] sm:$0xff] }
 0x803   :  { %v5828_v37 = vsel %vm168_vm7, %v5734_v2, 0.0  ;;  %v6828_v6 = vpack.c.bf16 %v5906_v21, %v5905_v52 }
 0x804   :  { %v5825_v36 = vsel %vm168_vm7, %v5733_v0, 0.0  ;;  %v6023_v0 = vrot.slane %v11857_v53, %v11624_v9 }
 0x805   :  { %5826 = vadd.xlane.f32.xlu0 %v5825_v36  ;;  %6829 = vmatpush3.bf16.msra.mxu1 %v6828_v6 }
 0x806   :  { %6830 = vmatprep.subr.bf16.mxu1 %v12585_v41 }
 0x809   :  { %5829 = vadd.xlane.f32.xlu0 %v5828_v37  ;;  %6832 = vmatpush3.bf16.msra.mxu1 %v6831_v11 }
 0x80d   :  { %6008 = vadd.xlane.f32.xlu0 %v6007_v27  ;;  %5838 = vperm.xlu1 %6974, %v6570_v49  }
 0x82b   :  { %v5740_v43 = vpop.xlane.xlu1 %5739 }
 0x82c   :  { %v5737_v23 = vpop.xlane.xlu0 %5736 }
 0x834   :  { %v5746_v45 = vpop.xlane.xlu0 %5745 }
 0x839   :  { %v5752_v62 = vpop.xlane.xlu1 %5751  ;;  %v5743_v7 = vpop.xlane.xlu0 %5742 }
 0x83e   :  { %v5749_v32 = vpop.xlane.xlu0 %5748 }
 0x83f   :  { %v5758_v1 = vpop.xlane.xlu1 %5757 }
 0x844   :  { %v5755_v15 = vpop.xlane.xlu1 %5754 }
 0x846   :  { %v5761_v18 = vpop.xlane.xlu0 %5760 }
 0x848   :  { %v5764_v42 = vpop.xlane.xlu1 %5763 }
 0x84a   :  { %v5767_v29 = vpop.xlane.xlu0 %5766 }
 0x84c   :  { %v5770_v14 = vpop.xlane.xlu1 %5769 }
 0x84e   :  { %v5776_v55 = vpop.xlane.xlu0 %5775 }
 0x850   :  { %v5773_v4 = vpop.xlane.xlu1 %5772 }
 0x853   :  { %v5779_v39 = vpop.xlane.xlu0 %5778 }
 0x854   :  { %v5782_v10 = vpop.xlane.xlu1 %5781 }
 0x857   :  { %v5788_v35 = vpop.xlane.xlu0 %5787 }
 0x858   :  { %v5785_v60 = vpop.xlane.xlu1 %5784 }
 0x85d   :  { %v5791_v44 = vpop.xlane.xlu0 %5790 }
 0x85e   :  { %v5794_v40 = vpop.xlane.xlu1 %5793 }
 0x863   :  { %v5800_v59 = vpop.xlane.xlu0 %5799 }
 0x864   :  { %v5797_v54 = vpop.xlane.xlu1 %5796 }
 0x870   :  { %v5806_v19 = vpop.xlane.xlu1 %5805 }
 0x871   :  { %v5803_v24 = vpop.xlane.xlu0 %5802 }
 0x875   :  { %v5812_v20 = vpop.xlane.xlu0 %5811 }
 0x876   :  { %v5809_v5 = vpop.xlane.xlu1 %5808 }
 0x87f   :  { %v5818_v28 = vpop.xlane.xlu1 %5817 }
 0x880   :  { %v5815_v12 = vpop.xlane.xlu0 %5814 }
 0x888   :  { %v5824_v3 = vpop.xlane.xlu0 %5823 }
 0x889   :  { %v5821_v34 = vpop.xlane.xlu1 %5820 }
 0x88d   :  { %v5839_v33 = vpop.permute.xlu1 %5838 }
 0x88e   :  { %v5869_v58 = vadd.f32 %v5839_v33, %v5821_v34  ;;  %v5870_v50 = vadd.f32 %v5839_v33, %v5824_v3  ;;  %v11880_v36 = vadd.f32 %v5839_v33, %v5737_v23  ;;  %v11882_v2 = vadd.f32 %v5839_v33, %v5740_v43 }
 0x88f   :  { %v11888_v27 = vadd.f32 %v5839_v33, %v5743_v7  ;;  %v11890_v49 = vadd.f32 %v5839_v33, %v5746_v45  ;;  %v11892_v21 = vadd.f32 %v5839_v33, %v5749_v32  ;;  %v11894_v22 = vadd.f32 %v5839_v33, %v5752_v62 }
 0x890   :  { %v5901_v17 = vmax.f32 %v5869_v58, 0.0  ;;  %v5902_v37 = vmax.f32 %v5870_v50, 0.0  ;;  %v11896_v6 = vadd.f32 %v5839_v33, %v5755_v15  ;;  %v11898_v48 = vadd.f32 %v5839_v33, %v5758_v1 }
 0x891   :  { %v11902_v43 = vadd.f32 %v5839_v33, %v5761_v18  ;;  %v11904_v7 = vadd.f32 %v5839_v33, %v5764_v42  ;;  %v11906_v45 = vadd.f32 %v5839_v33, %v5767_v29  ;;  %v11908_v38 = vadd.f32 %v5839_v33, %v5770_v14 }
 0x892   :  { %v5827_v52 = vpop.xlane.xlu0 %5826  ;;  %v6249_v41 = vrot.slane %v5901_v17, %v11865_v47  ;;  %v6253_v23 = vrot.slane %v5902_v37, %v11868_v61  ;;  %v11910_v32 = vadd.f32 %v5839_v33, %v5773_v4  ;;  %v11912_v15 = vadd.f32 %v5839_v33, %v5776_v55 }
 0x893   :  { %v5871_v11 = vadd.f32 %v5839_v33, %v5827_v52  ;;  %v11914_v1 = vadd.f32 %v5839_v33, %v5779_v39  ;;  %v11916_v34 = vadd.f32 %v5839_v33, %v5782_v10  ;;  %v11921_v18 = vadd.f32 %v5839_v33, %v5785_v60 }
 0x894   :  { %v11919_v63 = vsel %vm6116_vm8, %v6253_v23, %v6249_v41  ;;  %v11923_v42 = vadd.f32 %v5839_v33, %v5788_v35  ;;  %v11925_v29 = vadd.f32 %v5839_v33, %v5791_v44  ;;  %v11927_v4 = vadd.f32 %v5839_v33, %v5794_v40 }
 0x895   :  { %v5903_v62 = vmax.f32 %v5871_v11, 0.0  ;;  %v11929_v31 = vadd.f32 %v5839_v33, %v5797_v54  ;;  %v11931_v55 = vadd.f32 %v5839_v33, %v5800_v59  ;;  %v11936_v39 = vadd.f32 %v5839_v33, %v5803_v24 }
 0x896   :  { %v5830_v51 = vpop.xlane.xlu0 %5829  ;;  %v11938_v3 = vadd.f32 %v5839_v33, %v5806_v19  ;;  %v11940_v60 = vadd.f32 %v5839_v33, %v5809_v5  ;;  %v11942_v44 = vadd.f32 %v5839_v33, %v5812_v20  ;;  %v11944_v58 = vadd.f32 %v5839_v33, %v5815_v12 }
 0x897   :  { %v5872_v14 = vadd.f32 %v5839_v33, %v5830_v51  ;;  %v11934_v10 = vrot.slane %v5903_v62, %v11871_v30  ;;  %v11946_v40 = vadd.f32 %v5839_v33, %v5818_v28  ;;  %v5873_v59 = vmax.f32 %v11880_v36, 0.0 }
 0x898   :  { %v5874_v50 = vmax.f32 %v11882_v2, 0.0  ;;  %v5875_v24 = vmax.f32 %v11888_v27, 0.0  ;;  %v5876_v19 = vmax.f32 %v11890_v49, 0.0  ;;  %v5877_v17 = vmax.f32 %v11892_v21, 0.0 }
 0x899   :  { %v5904_v35 = vmax.f32 %v5872_v14, 0.0  ;;  %v5878_v20 = vmax.f32 %v11894_v22, 0.0  ;;  %v5879_v12 = vmax.f32 %v11896_v6, 0.0  ;;  %v5880_v33 = vmax.f32 %v11898_v48, 0.0 }
 0x89a   :  { %v6009_v54 = vpop.xlane.xlu0 %6008  ;;  %v5881_v36 = vmax.f32 %v11902_v43, 0.0  ;;  %v5882_v2 = vmax.f32 %v11904_v7, 0.0  ;;  %v5883_v27 = vmax.f32 %v11906_v45, 0.0  ;;  %v5884_v49 = vmax.f32 %v11908_v38, 0.0 }
 0x89b   :  { %v6010_v5 = vmul.f32 0.00390625, %v6009_v54  ;;  %v11956_v28 = vrot.slane %v5904_v35, %v11874_v25  ;;  %v5885_v52 = vmax.f32 %v11910_v32, 0.0  ;;  %v5886_v21 = vmax.f32 %v11912_v15, 0.0 }
 0x89c   :  { %v5887_v22 = vmax.f32 %v11914_v1, 0.0  ;;  %v5888_v6 = vmax.f32 %v11916_v34, 0.0  ;;  %v5889_v11 = vmax.f32 %v11921_v18, 0.0  ;;  %v5890_v48 = vmax.f32 %v11923_v42, 0.0 }
 0x89d   :  { %v6011_v37 = vadd.f32 1e-05, %v6010_v5  ;;  %v5891_v41 = vmax.f32 %v11925_v29, 0.0  ;;  %v5892_v23 = vmax.f32 %v11927_v4, 0.0  ;;  %v5893_v43 = vmax.f32 %v11929_v31, 0.0 }
 0x89e   :  { %v5894_v7 = vmax.f32 %v11931_v55, 0.0  ;;  %v5895_v45 = vmax.f32 %v11936_v39, 0.0  ;;  %v5896_v38 = vmax.f32 %v11938_v3, 0.0  ;;  %v5897_v32 = vmax.f32 %v11940_v60, 0.0 }
 0x89f   :  { %7361 = vrsqrt.f32 %v6011_v37  ;;  %v5898_v62 = vmax.f32 %v11942_v44, 0.0  ;;  %v6110_v15 = vrot.slane %v5873_v59, %v11865_v47  ;;  %v6115_v1 = vrot.slane %v5874_v50, %v11868_v61 }
 0x8a0   :  { %v5899_v34 = vmax.f32 %v11944_v58, 0.0  ;;  %v6122_v51 = vrot.slane %v5875_v24, %v11871_v30  ;;  %v6135_v18 = vrot.slane %v5877_v17, %v11865_v47  ;;  %v6139_v42 = vrot.slane %v5878_v20, %v11868_v61 }
 0x8a1   :  { %v6117_v29 = vsel %vm6116_vm8, %v6115_v1, %v6110_v15  ;;  %v6129_v14 = vrot.slane %v5876_v19, %v11874_v25  ;;  %v6144_v4 = vrot.slane %v5879_v12, %v11871_v30  ;;  %v6154_v31 = vrot.slane %v5881_v36, %v11865_v47 }
 0x8a2   :  { %v6124_v55 = vsel %vm6123_vm3, %v6122_v51, %v6117_v29  ;;  %v6140_v39 = vsel %vm6116_vm8, %v6139_v42, %v6135_v18  ;;  %v6158_v3 = vrot.slane %v5882_v2, %v11868_v61  ;;  %v6163_v60 = vrot.slane %v5883_v27, %v11871_v30 }
 0x8a3   :  { %v5900_v35 = vmax.f32 %v11946_v40, 0.0  ;;  %v6145_v44 = vsel %vm6123_vm3, %v6144_v4, %v6140_v39  ;;  %v6149_v58 = vrot.slane %v5880_v33, %v11874_v25  ;;  %v6173_v54 = vrot.slane %v5885_v52, %v11865_v47 }
 0x8a4   :  { %v6131_v59 = vsel %vm6130_vm14, %v6129_v14, %v6124_v55  ;;  %v6159_v50 = vsel %vm6116_vm8, %v6158_v3, %v6154_v31  ;;  %v6177_v24 = vrot.slane %v5886_v21, %v11868_v61  ;;  %v6182_v19 = vrot.slane %v5887_v22, %v11871_v30 }
 0x8a5   :  { %v6164_v5 = vsel %vm6123_vm3, %v6163_v60, %v6159_v50  ;;  %v6168_v40 = vrot.slane %v5884_v49, %v11874_v25  ;;  %v6192_v17 = vrot.slane %v5889_v11, %v11865_v47  ;;  %v6196_v20 = vrot.slane %v5890_v48, %v11868_v61 }
 0x8a6   :  { %v6150_v12 = vsel %vm6130_vm14, %v6149_v58, %v6145_v44  ;;  %v6178_v33 = vsel %vm6116_vm8, %v6177_v24, %v6173_v54  ;;  %v6187_v36 = vrot.slane %v5888_v6, %v11874_v25  ;;  %v6201_v2 = vrot.slane %v5891_v41, %v11871_v30  ;;  %v6572_v58 = vld [vmem:[#allocation3] ss:$0 sm:$0xff] }
 0x8a7   :  { %v6183_v27 = vsel %vm6123_vm3, %v6182_v19, %v6178_v33  ;;  %v6197_v52 = vsel %vm6116_vm8, %v6196_v20, %v6192_v17  ;;  %v6211_v21 = vrot.slane %v5893_v43, %v11865_v47  ;;  %v6215_v49 = vrot.slane %v5894_v7, %v11868_v61 }
 0x8a8   :  { %v6169_v22 = vsel %vm6130_vm14, %v6168_v40, %v6164_v5  ;;  %v6202_v11 = vsel %vm6123_vm3, %v6201_v2, %v6197_v52  ;;  %v6206_v48 = vrot.slane %v5892_v23, %v11874_v25  ;;  %v6220_v15 = vrot.slane %v5895_v45, %v11871_v30 }
 0x8a9   :  { %v7362_v37 = vpop.eup %7361  ;;  %v6188_v6 = vsel %vm6130_vm14, %v6187_v36, %v6183_v27  ;;  %v6216_v41 = vsel %vm6116_vm8, %v6215_v49, %v6211_v21  ;;  %v6230_v1 = vrot.slane %v5897_v32, %v11865_v47  ;;  %v6234_v51 = vrot.slane %v5898_v62, %v11868_v61 }
 0x8aa   :  { %v6221_v43 = vsel %vm6123_vm3, %v6220_v15, %v6216_v41  ;;  %v6225_v7 = vrot.slane %v5896_v38, %v11874_v25  ;;  %v6239_v18 = vrot.slane %v5899_v34, %v11871_v30  ;;  %v6266_v42 = vsel %vm6265_vm10, %v6150_v12, %v6131_v59  ;;  %v6043_v30 = vld [vmem:[%s12094_s22] sm:$0x3]  ;;  %s7404_s22 = smov [#allocation4]  }
 0x8ab   :  { %v6207_v23 = vsel %vm6130_vm14, %v6206_v48, %v6202_v11  ;;  %v6235_v45 = vsel %vm6116_vm8, %v6234_v51, %v6230_v1  ;;  %v6268_v29 = vsel %vm6267_vm11, %v6169_v22, %v6266_v42  ;;  %v6013_v14 = vmul.f32 %v7362_v37, %v11828_v16  ;;  %s6358_s1 = sshll.u32 %s7404_s22, 4  ;;  %s6359_s1 = int_to_ptr.vmem [resolvable:$true] %s6358_s1 }
 0x8ac   :  { %v6240_v47 = vsel %vm6123_vm3, %v6239_v18, %v6235_v45  ;;  %v6244_v61 = vrot.slane %v5900_v35, %v11874_v25  ;;  %v6270_v32 = vsel %vm6269_vm13, %v6188_v6, %v6268_v29  ;;  %v6014_v38 = vmul.f32 %v7362_v37, %v11831_v56  ;;  %s7369_s5 = scalar_lea.vmem %s6359_s1, 128  ;;  %p7374_p1 = scmp.lt.s32.totalorder %s6359_s1, %s6359_s1 }
 0x8ad   :  { %v6226_v62 = vsel %vm6130_vm14, %v6225_v7, %v6221_v43  ;;  %v6272_v34 = vsel %vm6271_vm2, %v6207_v23, %v6270_v32  ;;  %v6026_v16 = vmul.f32 %v6019_v26, %v6013_v14  ;;  %v6259_v25 = vsel %vm6123_vm3, %v11934_v10, %v11919_v63  ;;  %p7370_p0 = scmp.ne.s32.totalorder %s6359_s1, %s7369_s5  ;;  %p7375_p2 = scmp.lt.s32.totalorder %s7369_s5, %s7369_s5 }
 0x8ae   :  { %v6245_v4 = vsel %vm6130_vm14, %v6244_v61, %v6240_v47  ;;  %v6274_v56 = vsel %vm6273_vm6, %v6226_v62, %v6272_v34  ;;  %v6027_v31 = vmul.f32 %v6023_v0, %v6014_v38  ;;  %v6264_v55 = vsel %vm6130_vm14, %v11956_v28, %v6259_v25 }
 0x8af   :  { %v6276_v39 = vsel %vm6275_vm1, %v6245_v4, %v6274_v56  ;;  %v6039_v26 = vadd.f32 %v6032_v46, %v6026_v16  ;;  %v6048_v3 = vrot.slane %v6043_v30, %v11104_v13  ;;  %v6052_v60 = vrot.slane %v6043_v30, %v11624_v9  ;;  %p7376_p3 = por %p7375_p2, %p7374_p1 }
 0x8b0   :  { %v6278_v63 = vsel %vm6277_vm5, %v6264_v55, %v6276_v39  ;;  %v6040_v10 = vadd.f32 %v6036_v57, %v6027_v31 }
 0x8b1   :  { %6794 = vmatmul.mubr.msk.f32.vlgmr.msra.gmra.mrb[32].mxu1 %vm168_vm7, %v6278_v63  ;;  %v6041_v53 = vmax.f32 %v6039_v26, 0.0  ;;  %p7377_p4 = pnand %p7376_p3, %p7370_p0 }
 0x8b2   :  { %v6042_v0 = vmax.f32 %v6040_v10, 0.0 }
 0x8b3   :  { %v6055_v28 = vmul.f32 %v6048_v3, %v6041_v53 }
 0x8b4   :  { %v6056_v35 = vmul.f32 %v6052_v60, %v6042_v0 }
 0x8b6   :  { %v6057_v44 = vadd.f32 %v6056_v35, %v6055_v28 }
 0x8b8   :  { %6058 = vadd.xlane.f32.xlu0 %v6057_v44 }
 0x945   :  { %v6059_v54 = vpop.xlane.xlu0 %6058 }
 0x946   :  { %v6067_v46 = vadd.f32 %v6572_v58, %v6059_v54 }
 0x948   :  { %6070 = vperm.xlu0 %6973, %v6067_v46  }
 0x984   :  { %v6347_v13 = vpop.f32.mrb[32].mxu1 }
 0x985   :  { %v6795_v59 = vpop.f32.mrb[33].mxu1 }
 0x9c7   :  { %v6071_v8 = vpop.permute.xlu0 %6070 }
 0x9c8   :  { %v6348_v57 = vadd.f32 %v6347_v13, %v6071_v8 }
 0x9ca   :  { %6351 = vst.msk [vmem:[#allocation4] sm:$0xff] %vm168_vm7, %v6348_v57 }
 0x9cb   :  { %7380 = shalt.err (!%p7377_p4)
}
 0x9cc   :  { %s7381_s26 = scalar_lea.hbm %s12095_s24, 128 }
 0x9cd   :  { %p7382_p5 = scmp.ne.s32.totalorder %s12095_s24, %s7381_s26  ;;  %p7385_p6 = scmp.lt.u32.totalorder %s7381_s26, %s12095_s24 }
 0x9cf   :  { %p7387_p7 = pnand %p7385_p6, %p7382_p5 }
 0x9d1   :  { %7390 = shalt.err (!%p7387_p7)
}
 0x9d2   :  { %6361 = dma.vmem_to_hbm [thread:$0]  %s6359_s1, 128, %s12095_s24, [#allocation5]  }
 0x9d3   :  { %7391 = dma.done.wait [#allocation5], 128  }
 0x9d4   :  { %7392 = vsyncadd [#allocation5], 4294967168 }
 0x9d5   :  { %6365 = vsyncpa [#allocation5], 1 }

</bundles_post_ra>
